<compile_context>
chip_gen: v7x
topology: tpu7x:2x2x1
jax: 0.10.0
libtpu: 0.0.40
codegen_flags: <defaults>
</compile_context>

<pallas_src>
from functools import lru_cache

import numpy as np
import jax
import jax.numpy as jnp
from jax.experimental import pallas as pl
from jax.experimental.pallas import tpu as pltpu

BETA = 0.999          # self.beta
BN_EPS = 1e-5         # nn.BatchNorm1d default eps
NORM_EPS = 1e-12      # F.normalize default eps

P_BUCKET = 256        # point-count bucket (full MXU-height multiple)
NC_BUCKET = 4         # class-count bucket

VMEM_LIMIT_BYTES = 32 * 1024 * 1024   # explicit: > v5e 16MiB default, < v7x 64MiB


# ---------------------------------------------------------------------------
# Pallas kernel: CLS_TILE classes of one level per grid step
# ---------------------------------------------------------------------------
def _project_kernel(x_ref, we_ref, be_ref,
                    w1_ref, g1_ref, bt1_ref,
                    w2_ref, g2_ref, bt2_ref,
                    z_ref, mean_ref):
    ct, p, cin = x_ref.shape             # e.g. (2, 256, 8)
    x = x_ref[...]                       # (ct, p, 8) bf16
    m = x[:, :, 7:8].astype(jnp.float32)   # validity mask (ct, p, 1), exact 0/1

    cnt = jnp.sum(m, axis=1, keepdims=True)          # (ct, 1, 1) valid points
    inv_n = 1.0 / jnp.maximum(cnt, 1.0)              # guard dummy (all-pad) classes

    # ---- encoder stand-in: masked pointwise linear 8->512 + ReLU ----------
    # TODO(synk): PointNet2Encoder is not defined in the source module; this is
    # a deterministic masked per-point MLP stand-in producing 512-d features.
    hf = jnp.dot(x.reshape(ct * p, cin), we_ref[...],
                 preferred_element_type=jnp.float32) + be_ref[...]
    # Keep ONLY the bf16 copy of the 512-wide activation (largest live buffer).
    h = (jnp.maximum(hf, 0.0).reshape(ct, p, 512) * m).astype(jnp.bfloat16)

    # ---- Linear(512,256) + BatchNorm1d(256) (batch stats) + ReLU -----------
    # b1 is omitted: a per-channel constant cancels exactly under batch-stat BN.
    h1 = jnp.dot(h.reshape(ct * p, 512), w1_ref[...],
                 preferred_element_type=jnp.float32).reshape(ct, p, 256)
    # h (and hence h1) is exactly zero on padded rows -> unmasked reductions.
    mu1 = jnp.sum(h1, axis=1, keepdims=True) * inv_n
    # NOTE: E[x^2]-E[x]^2 in f32 with a >=0 clamp; acceptable after bf16 matmuls.
    v1 = jnp.maximum(jnp.sum(h1 * h1, axis=1, keepdims=True) * inv_n - mu1 * mu1, 0.0)
    sc1 = g1_ref[...] * jax.lax.rsqrt(v1 + BN_EPS)   # folded BN affine
    sh1 = bt1_ref[...] - mu1 * sc1
    h1p = jnp.maximum(h1 * sc1 + sh1, 0.0).astype(jnp.bfloat16)   # single bf16 copy

    # ---- Linear(256,128) + BatchNorm1d(128) + ReLU --------------------------
    # (b2 omitted for the same reason as b1.)
    h2 = jnp.dot(h1p.reshape(ct * p, 256), w2_ref[...],
                 preferred_element_type=jnp.float32).reshape(ct, p, 128)
    # padded rows of h1p are relu(sh1) != 0, so layer-2 stats need the mask.
    hm2 = h2 * m
    mu2 = jnp.sum(hm2, axis=1, keepdims=True) * inv_n
    v2 = jnp.maximum(jnp.sum(hm2 * h2, axis=1, keepdims=True) * inv_n - mu2 * mu2, 0.0)
    sc2 = g2_ref[...] * jax.lax.rsqrt(v2 + BN_EPS)
    sh2 = bt2_ref[...] - mu2 * sc2
    h2p = jnp.maximum(h2 * sc2 + sh2, 0.0)

    # ---- F.normalize(dim=1) + mask once + per-class mean --------------------
    ssq = jnp.sum(h2p * h2p, axis=2, keepdims=True)
    z = h2p * jax.lax.rsqrt(jnp.maximum(ssq, NORM_EPS * NORM_EPS))
    z = z * m                                        # zero padded rows (single pass)
    z_ref[...] = z.astype(z_ref.dtype)               # bf16 writeback
    mean_ref[...] = jnp.sum(z, axis=1, keepdims=True) * inv_n

    # TODO(synk): BatchNorm running-stat (momentum) updates are not modeled;
    # the forward normalization matches torch training mode.


# ---------------------------------------------------------------------------
# Pallas wrapper (built & jitted once per bucketed shape)
# ---------------------------------------------------------------------------
def _choose_cls_tile(nc_pad, p):
    # Keep per-step M = cls_tile * p >= 512 MXU rows, but 1 class/step once P is
    # large so the per-step VMEM live set stays flat.
    # TODO(synk): for very large P (>> 4k points) add a P-streaming grid axis
    # (last, "arbitrary") with running sum / sum-of-squares for the BN stats.
    tile = 1 if p >= 512 else min(nc_pad, max(1, 512 // p))
    while nc_pad % tile:
        tile -= 1
    return max(tile, 1)


@lru_cache(maxsize=None)
def _make_projector(nc_pad, p):
    assert nc_pad % NC_BUCKET == 0 and p % 8 == 0
    cls_tile = _choose_cls_tile(nc_pad, p)
    grid = (nc_pad // cls_tile,)

    cls_map = lambda c: (c, 0, 0)
    const2 = lambda c: (0, 0)      # constant -> weight tiles stay VMEM-resident

    in_specs = [
        pl.BlockSpec((cls_tile, p, 8), cls_map),   # points (+mask channel), bf16
        pl.BlockSpec((8, 512), const2),            # we (bf16)
        pl.BlockSpec((1, 512), const2),            # be (f32)
        pl.BlockSpec((512, 256), const2),          # w1 (bf16)
        pl.BlockSpec((1, 256), const2),            # g1
        pl.BlockSpec((1, 256), const2),            # bt1
        pl.BlockSpec((256, 128), const2),          # w2 (bf16)
        pl.BlockSpec((1, 128), const2),            # g2
        pl.BlockSpec((1, 128), const2),            # bt2
    ]
    out_specs = (
        pl.BlockSpec((cls_tile, p, 128), cls_map),   # z (bf16)
        pl.BlockSpec((cls_tile, 1, 128), cls_map),   # per-class mean (f32)
    )
    out_shape = (
        jax.ShapeDtypeStruct((nc_pad, p, 128), jnp.bfloat16),
        jax.ShapeDtypeStruct((nc_pad, 1, 128), jnp.float32),
    )
    call = pl.pallas_call(
        _project_kernel,
        grid=grid,
        in_specs=in_specs,
        out_specs=out_specs,
        out_shape=out_shape,
        compiler_params=pltpu.CompilerParams(
            dimension_semantics=("parallel",),          # classes shard across TCs
            vmem_limit_bytes=VMEM_LIMIT_BYTES),
    )
    return jax.jit(call)


def project_classes(points8, params):
    """points8: [NC_pad, P, 8] bf16 -> (z [NC_pad,P,128] bf16, mean [NC_pad,1,128] f32)."""
    nc_pad, p, _ = points8.shape
    fn = _make_projector(nc_pad, p)
    return fn(points8,
              params["we"], params["be"],
              params["w1"], params["g1"], params["bt1"],
              params["w2"], params["g2"], params["bt2"])


# ---------------------------------------------------------------------------
# Host-side glue (data-dependent split; mirrors aux_branch.split)
# ---------------------------------------------------------------------------
def split_np(label, points, level, rng):
    """label: [B, N, level] int, points: [B, 6, N] f32."""
    labels = np.split(label, level, axis=2)
    level_info = []
    for i in range(level):
        lab = labels[i][..., 0]                                   # [B, N]
        feats, offsets, class_index = [], [], []
        for j in np.unique(lab):
            b_idx, p_idx = np.nonzero(lab == j)
            if b_idx.size == 0:
                continue
            selected = points[b_idx, :, p_idx]                    # [n_sel, 6]
            n_sel = selected.shape[0]
            if 0 < n_sel < 256:
                extra = rng.integers(0, n_sel, size=(256 - n_sel,))
                selected = np.concatenate([selected, selected[extra]], axis=0)
                n_sel = 256
            feats.append(selected.astype(np.float32))
            offsets.append(n_sel)
            class_index.append(int(j))
        nc = len(feats)
        # Bucket P and NC -> stable BlockSpecs, no per-batch recompiles.
        max_pts = max(f.shape[0] for f in feats)
        max_pts = int(np.ceil(max_pts / P_BUCKET) * P_BUCKET)
        nc_pad = int(np.ceil(max(nc, 1) / NC_BUCKET) * NC_BUCKET)
        # Channel-last, 8 channels: 0..5 = coord|feat, 6 = 0, 7 = validity mask.
        pts8 = np.zeros((nc_pad, max_pts, 8), np.float32)
        for k, f in enumerate(feats):
            n = f.shape[0]
            pts8[k, :n, :6] = f
            pts8[k, :n, 7] = 1.0
        offsets = np.cumsum(np.asarray(offsets, np.int32)).astype(np.int32)
        level_info.append((pts8, offsets, class_index, nc))
    return level_info


def aux_branch_forward(params, prior_ema, num_class, label, points, level, rng):
    level_info = split_np(label, points, level, rng)
    new_prior = list(prior_ema)
    cur_feat = []
    for li, (pts8, offsets, class_index, nc_real) in enumerate(level_info):
        # Points shipped in bf16 (mask channel is exact in bf16); the coord/feat
        # channels were cast to bf16 at the matmul before anyway.
        pts8_dev = jnp.asarray(pts8, dtype=jnp.bfloat16)
        z, means = project_classes(pts8_dev, params)   # [NCp,P,128] bf16, [NCp,1,128] f32
        z = z[:nc_real]                                 # drop padded dummy classes
        means = means[:nc_real, 0, :]                   # [NC, 128] f32

        # EMA prototype update.  The reference calls self.ema(..., i) with the
        # sequential loop index (not the class id), so prototype rows 0..NC-1
        # are updated; untouched rows stay bit-exact.
        idx = jnp.arange(nc_real)
        proto = new_prior[li]
        upd = BETA * proto[idx] + (1.0 - BETA) * means
        new_prior[li] = proto.at[idx].set(upd)

        # Append class-index column (the "fill 255 then overwrite" collapses to
        # this); upcast z to f32 here so cur_feat matches the reference dtype.
        cls = jnp.asarray(class_index, jnp.float32)[:, None, None]    # [NC,1,1]
        nc, p, _ = z.shape
        last = jnp.broadcast_to(cls, (nc, p, 1))
        feat = jnp.concatenate([z.astype(jnp.float32), last], axis=2)
        cur_feat.append(feat.reshape(nc * p, 129))
    return cur_feat, new_prior


# ---------------------------------------------------------------------------
def make_params(key):
    ks = jax.random.split(key, 3)
    f32, bf16 = jnp.float32, jnp.bfloat16
    # encoder stand-in weight: rows 6,7 (pad / mask channels) are zero
    we = jnp.zeros((8, 512), f32).at[:6].set(
        jax.random.normal(ks[0], (6, 512), f32) * 0.1)
    return {
        "we": we.astype(bf16),
        "be": jnp.zeros((1, 512), f32),
        "w1": (jax.random.normal(ks[1], (512, 256), f32) / np.sqrt(512.0)).astype(bf16),
        "g1": jnp.ones((1, 256), f32),
        "bt1": jnp.zeros((1, 256), f32),
        "w2": (jax.random.normal(ks[2], (256, 128), f32) / np.sqrt(256.0)).astype(bf16),
        "g2": jnp.ones((1, 128), f32),
        "bt2": jnp.zeros((1, 128), f32),
        # Linear biases b1/b2 cancel exactly under batch-statistics BatchNorm,
        # so they are intentionally not passed to the kernel.
        "b1": jnp.zeros((1, 256), f32),
        "b2": jnp.zeros((1, 128), f32),
    }


def make_prototypes(key, num_class, level):
    protos = []
    keys = jax.random.split(key, len(num_class[2:5]))
    for i, nc in enumerate(num_class[2:5]):
        p = jax.random.uniform(keys[i], (nc, 128), jnp.float32)   # torch.rand analogue
        protos.append(p)
    for i in range(level):                                        # normalize first `level`
        nrm = jnp.sqrt(jnp.sum(protos[i] ** 2, axis=1, keepdims=True))
        protos[i] = protos[i] / jnp.maximum(nrm, NORM_EPS)
    return protos


if __name__ == "__main__":
    key = jax.random.PRNGKey(0)
    k_par, k_proto, k_pts, k_lab0, k_lab1 = jax.random.split(key, 5)

    level = 2
    num_class = [0, 0, 3, 4, 5]           # prototypes built from num_class[2:5]

    params = make_params(k_par)
    prior_ema = make_prototypes(k_proto, num_class, level)

    # small deterministic inputs: points [B, 6, N] (NCHW-like), label [B, N, level]
    B, N = 2, 300
    points = np.asarray(jax.random.normal(k_pts, (B, 6, N), jnp.float32))
    lab0 = np.asarray(jax.random.randint(k_lab0, (B, N, 1), 0, num_class[2]))
    lab1 = np.asarray(jax.random.randint(k_lab1, (B, N, 1), 0, num_class[3]))
    label = np.concatenate([lab0, lab1], axis=2).astype(np.int64)

    rng = np.random.default_rng(0)        # deterministic stand-in for torch.randint in split()
    cur_feat, new_prior = aux_branch_forward(
        params, prior_ema, num_class, label, points, level, rng)

    for f in cur_feat:
        jax.block_until_ready(f)
    for p in new_prior:
        jax.block_until_ready(p)

    print("KERNEL_OK")
</pallas_src>

<mosaic_0001>
module attributes {stable_mosaic.version = 11 : i64} {
  func.func @_project_kernel(%arg0: i32, %arg1: memref<2x256x8xbf16, #tpu.memory_space<vmem>>, %arg2: memref<8x512xbf16, #tpu.memory_space<vmem>>, %arg3: memref<1x512xf32, #tpu.memory_space<vmem>>, %arg4: memref<512x256xbf16, #tpu.memory_space<vmem>>, %arg5: memref<1x256xf32, #tpu.memory_space<vmem>>, %arg6: memref<1x256xf32, #tpu.memory_space<vmem>>, %arg7: memref<256x128xbf16, #tpu.memory_space<vmem>>, %arg8: memref<1x128xf32, #tpu.memory_space<vmem>>, %arg9: memref<1x128xf32, #tpu.memory_space<vmem>>, %arg10: memref<2x256x128xbf16, #tpu.memory_space<vmem>>, %arg11: memref<2x1x128xf32, #tpu.memory_space<vmem>>) attributes {dimension_semantics = [#tpu.dimension_semantics<parallel>], iteration_bounds = array<i64: 2>, scalar_prefetch = 0 : i64, scratch_operands = 0 : i64, tpu.core_type = #tpu.core_type<tc>, window_params = [{transform_indices = @transform_0, window_bounds = array<i64: 2, 256, 8>}, {pipeline_mode = #tpu.pipeline_mode<synchronous>, transform_indices = @transform_1, window_bounds = array<i64: 8, 512>}, {pipeline_mode = #tpu.pipeline_mode<synchronous>, transform_indices = @transform_2, window_bounds = array<i64: 1, 512>}, {pipeline_mode = #tpu.pipeline_mode<synchronous>, transform_indices = @transform_3, window_bounds = array<i64: 512, 256>}, {pipeline_mode = #tpu.pipeline_mode<synchronous>, transform_indices = @transform_4, window_bounds = array<i64: 1, 256>}, {pipeline_mode = #tpu.pipeline_mode<synchronous>, transform_indices = @transform_5, window_bounds = array<i64: 1, 256>}, {pipeline_mode = #tpu.pipeline_mode<synchronous>, transform_indices = @transform_6, window_bounds = array<i64: 256, 128>}, {pipeline_mode = #tpu.pipeline_mode<synchronous>, transform_indices = @transform_7, window_bounds = array<i64: 1, 128>}, {pipeline_mode = #tpu.pipeline_mode<synchronous>, transform_indices = @transform_8, window_bounds = array<i64: 1, 128>}, {transform_indices = @transform_9, window_bounds = array<i64: 2, 256, 128>}, {transform_indices = @transform_10, window_bounds = array<i64: 2, 1, 128>}]} {
    %c0 = arith.constant 0 : index
    %c0_0 = arith.constant 0 : index
    %c0_1 = arith.constant 0 : index
    %0 = vector.load %arg1[%c0, %c0_0, %c0_1] : memref<2x256x8xbf16, #tpu.memory_space<vmem>>, vector<2x256x8xbf16>
    %1 = vector.extract_strided_slice %0 {offsets = [0, 0, 7], sizes = [2, 256, 1], strides = [1, 1, 1]} : vector<2x256x8xbf16> to vector<2x256x1xbf16>
    %2 = arith.extf %1 : vector<2x256x1xbf16> to vector<2x256x1xf32>
    %cst = arith.constant dense<0.000000e+00> : vector<2x1xf32>
    %3 = vector.multi_reduction <add>, %2, %cst [1] : vector<2x256x1xf32> to vector<2x1xf32>
    %4 = vector.shape_cast %3 : vector<2x1xf32> to vector<2x1x1xf32>
    %cst_2 = arith.constant 1.000000e+00 : f32
    %5 = vector.broadcast %cst_2 : f32 to vector<2x1x1xf32>
    %6 = arith.maximumf %4, %5 : vector<2x1x1xf32>
    %cst_3 = arith.constant 1.000000e+00 : f32
    %7 = vector.broadcast %cst_3 : f32 to vector<2x1x1xf32>
    %8 = arith.divf %7, %6 : vector<2x1x1xf32>
    %9 = vector.shape_cast %0 : vector<2x256x8xbf16> to vector<512x8xbf16>
    %c0_4 = arith.constant 0 : index
    %c0_5 = arith.constant 0 : index
    %10 = vector.load %arg2[%c0_4, %c0_5] : memref<8x512xbf16, #tpu.memory_space<vmem>>, vector<8x512xbf16>
    %cst_6 = arith.constant dense<0.000000e+00> : vector<512x512xf32>
    %11 = tpu.matmul %9, %10, %cst_6 {dimension_numbers = #tpu.dot_dimension_numbers<[1], [0], [0], [1], [0, 0, 1, 1], [], []>} : vector<512x8xbf16>, vector<8x512xbf16>, vector<512x512xf32> -> vector<512x512xf32>
    %c0_7 = arith.constant 0 : index
    %c0_8 = arith.constant 0 : index
    %12 = vector.load %arg3[%c0_7, %c0_8] : memref<1x512xf32, #tpu.memory_space<vmem>>, vector<1x512xf32>
    %13 = vector.broadcast %12 : vector<1x512xf32> to vector<512x512xf32>
    %14 = arith.addf %11, %13 : vector<512x512xf32>
    %cst_9 = arith.constant 0.000000e+00 : f32
    %15 = vector.broadcast %cst_9 : f32 to vector<512x512xf32>
    %16 = arith.maximumf %14, %15 : vector<512x512xf32>
    %17 = vector.shape_cast %16 : vector<512x512xf32> to vector<2x256x512xf32>
    %18 = vector.broadcast %2 : vector<2x256x1xf32> to vector<2x256x512xf32>
    %19 = arith.mulf %17, %18 : vector<2x256x512xf32>
    %20 = arith.truncf %19 : vector<2x256x512xf32> to vector<2x256x512xbf16>
    %21 = vector.shape_cast %20 : vector<2x256x512xbf16> to vector<512x512xbf16>
    %c0_10 = arith.constant 0 : index
    %c0_11 = arith.constant 0 : index
    %22 = vector.load %arg4[%c0_10, %c0_11] : memref<512x256xbf16, #tpu.memory_space<vmem>>, vector<512x256xbf16>
    %cst_12 = arith.constant dense<0.000000e+00> : vector<512x256xf32>
    %23 = tpu.matmul %21, %22, %cst_12 {dimension_numbers = #tpu.dot_dimension_numbers<[1], [0], [0], [1], [0, 0, 1, 1], [], []>} : vector<512x512xbf16>, vector<512x256xbf16>, vector<512x256xf32> -> vector<512x256xf32>
    %24 = vector.shape_cast %23 : vector<512x256xf32> to vector<2x256x256xf32>
    %cst_13 = arith.constant dense<0.000000e+00> : vector<2x256xf32>
    %25 = vector.multi_reduction <add>, %24, %cst_13 [1] : vector<2x256x256xf32> to vector<2x256xf32>
    %26 = vector.shape_cast %25 : vector<2x256xf32> to vector<2x1x256xf32>
    %27 = vector.broadcast %8 : vector<2x1x1xf32> to vector<2x1x256xf32>
    %28 = arith.mulf %26, %27 : vector<2x1x256xf32>
    %29 = arith.mulf %24, %24 : vector<2x256x256xf32>
    %cst_14 = arith.constant dense<0.000000e+00> : vector<2x256xf32>
    %30 = vector.multi_reduction <add>, %29, %cst_14 [1] : vector<2x256x256xf32> to vector<2x256xf32>
    %31 = vector.shape_cast %30 : vector<2x256xf32> to vector<2x1x256xf32>
    %32 = vector.broadcast %8 : vector<2x1x1xf32> to vector<2x1x256xf32>
    %33 = arith.mulf %31, %32 : vector<2x1x256xf32>
    %34 = arith.mulf %28, %28 : vector<2x1x256xf32>
    %35 = arith.subf %33, %34 : vector<2x1x256xf32>
    %cst_15 = arith.constant 0.000000e+00 : f32
    %36 = vector.broadcast %cst_15 : f32 to vector<2x1x256xf32>
    %37 = arith.maximumf %35, %36 : vector<2x1x256xf32>
    %c0_16 = arith.constant 0 : index
    %c0_17 = arith.constant 0 : index
    %38 = vector.load %arg5[%c0_16, %c0_17] : memref<1x256xf32, #tpu.memory_space<vmem>>, vector<1x256xf32>
    %cst_18 = arith.constant 9.99999974E-6 : f32
    %39 = vector.broadcast %cst_18 : f32 to vector<2x1x256xf32>
    %40 = arith.addf %37, %39 : vector<2x1x256xf32>
    %41 = math.rsqrt %40 : vector<2x1x256xf32>
    %42 = vector.shape_cast %38 : vector<1x256xf32> to vector<1x1x256xf32>
    %43 = vector.broadcast %42 : vector<1x1x256xf32> to vector<2x1x256xf32>
    %44 = arith.mulf %43, %41 : vector<2x1x256xf32>
    %c0_19 = arith.constant 0 : index
    %c0_20 = arith.constant 0 : index
    %45 = vector.load %arg6[%c0_19, %c0_20] : memref<1x256xf32, #tpu.memory_space<vmem>>, vector<1x256xf32>
    %46 = arith.mulf %28, %44 : vector<2x1x256xf32>
    %47 = vector.shape_cast %45 : vector<1x256xf32> to vector<1x1x256xf32>
    %48 = vector.broadcast %47 : vector<1x1x256xf32> to vector<2x1x256xf32>
    %49 = arith.subf %48, %46 : vector<2x1x256xf32>
    %50 = vector.broadcast %44 : vector<2x1x256xf32> to vector<2x256x256xf32>
    %51 = arith.mulf %24, %50 : vector<2x256x256xf32>
    %52 = vector.broadcast %49 : vector<2x1x256xf32> to vector<2x256x256xf32>
    %53 = arith.addf %51, %52 : vector<2x256x256xf32>
    %cst_21 = arith.constant 0.000000e+00 : f32
    %54 = vector.broadcast %cst_21 : f32 to vector<2x256x256xf32>
    %55 = arith.maximumf %53, %54 : vector<2x256x256xf32>
    %56 = arith.truncf %55 : vector<2x256x256xf32> to vector<2x256x256xbf16>
    %57 = vector.shape_cast %56 : vector<2x256x256xbf16> to vector<512x256xbf16>
    %c0_22 = arith.constant 0 : index
    %c0_23 = arith.constant 0 : index
    %58 = vector.load %arg7[%c0_22, %c0_23] : memref<256x128xbf16, #tpu.memory_space<vmem>>, vector<256x128xbf16>
    %cst_24 = arith.constant dense<0.000000e+00> : vector<512x128xf32>
    %59 = tpu.matmul %57, %58, %cst_24 {dimension_numbers = #tpu.dot_dimension_numbers<[1], [0], [0], [1], [0, 0, 1, 1], [], []>} : vector<512x256xbf16>, vector<256x128xbf16>, vector<512x128xf32> -> vector<512x128xf32>
    %60 = vector.shape_cast %59 : vector<512x128xf32> to vector<2x256x128xf32>
    %61 = vector.broadcast %2 : vector<2x256x1xf32> to vector<2x256x128xf32>
    %62 = arith.mulf %60, %61 : vector<2x256x128xf32>
    %cst_25 = arith.constant dense<0.000000e+00> : vector<2x128xf32>
    %63 = vector.multi_reduction <add>, %62, %cst_25 [1] : vector<2x256x128xf32> to vector<2x128xf32>
    %64 = vector.shape_cast %63 : vector<2x128xf32> to vector<2x1x128xf32>
    %65 = vector.broadcast %8 : vector<2x1x1xf32> to vector<2x1x128xf32>
    %66 = arith.mulf %64, %65 : vector<2x1x128xf32>
    %67 = arith.mulf %62, %60 : vector<2x256x128xf32>
    %cst_26 = arith.constant dense<0.000000e+00> : vector<2x128xf32>
    %68 = vector.multi_reduction <add>, %67, %cst_26 [1] : vector<2x256x128xf32> to vector<2x128xf32>
    %69 = vector.shape_cast %68 : vector<2x128xf32> to vector<2x1x128xf32>
    %70 = vector.broadcast %8 : vector<2x1x1xf32> to vector<2x1x128xf32>
    %71 = arith.mulf %69, %70 : vector<2x1x128xf32>
    %72 = arith.mulf %66, %66 : vector<2x1x128xf32>
    %73 = arith.subf %71, %72 : vector<2x1x128xf32>
    %cst_27 = arith.constant 0.000000e+00 : f32
    %74 = vector.broadcast %cst_27 : f32 to vector<2x1x128xf32>
    %75 = arith.maximumf %73, %74 : vector<2x1x128xf32>
    %c0_28 = arith.constant 0 : index
    %c0_29 = arith.constant 0 : index
    %76 = vector.load %arg8[%c0_28, %c0_29] : memref<1x128xf32, #tpu.memory_space<vmem>>, vector<1x128xf32>
    %cst_30 = arith.constant 9.99999974E-6 : f32
    %77 = vector.broadcast %cst_30 : f32 to vector<2x1x128xf32>
    %78 = arith.addf %75, %77 : vector<2x1x128xf32>
    %79 = math.rsqrt %78 : vector<2x1x128xf32>
    %80 = vector.shape_cast %76 : vector<1x128xf32> to vector<1x1x128xf32>
    %81 = vector.broadcast %80 : vector<1x1x128xf32> to vector<2x1x128xf32>
    %82 = arith.mulf %81, %79 : vector<2x1x128xf32>
    %c0_31 = arith.constant 0 : index
    %c0_32 = arith.constant 0 : index
    %83 = vector.load %arg9[%c0_31, %c0_32] : memref<1x128xf32, #tpu.memory_space<vmem>>, vector<1x128xf32>
    %84 = arith.mulf %66, %82 : vector<2x1x128xf32>
    %85 = vector.shape_cast %83 : vector<1x128xf32> to vector<1x1x128xf32>
    %86 = vector.broadcast %85 : vector<1x1x128xf32> to vector<2x1x128xf32>
    %87 = arith.subf %86, %84 : vector<2x1x128xf32>
    %88 = vector.broadcast %82 : vector<2x1x128xf32> to vector<2x256x128xf32>
    %89 = arith.mulf %60, %88 : vector<2x256x128xf32>
    %90 = vector.broadcast %87 : vector<2x1x128xf32> to vector<2x256x128xf32>
    %91 = arith.addf %89, %90 : vector<2x256x128xf32>
    %cst_33 = arith.constant 0.000000e+00 : f32
    %92 = vector.broadcast %cst_33 : f32 to vector<2x256x128xf32>
    %93 = arith.maximumf %91, %92 : vector<2x256x128xf32>
    %94 = arith.mulf %93, %93 : vector<2x256x128xf32>
    %cst_34 = arith.constant dense<0.000000e+00> : vector<2x256xf32>
    %95 = vector.multi_reduction <add>, %94, %cst_34 [2] : vector<2x256x128xf32> to vector<2x256xf32>
    %96 = vector.shape_cast %95 : vector<2x256xf32> to vector<2x256x1xf32>
    %cst_35 = arith.constant 1.000000e-24 : f32
    %97 = vector.broadcast %cst_35 : f32 to vector<2x256x1xf32>
    %98 = arith.maximumf %96, %97 : vector<2x256x1xf32>
    %99 = math.rsqrt %98 : vector<2x256x1xf32>
    %100 = vector.broadcast %99 : vector<2x256x1xf32> to vector<2x256x128xf32>
    %101 = arith.mulf %93, %100 : vector<2x256x128xf32>
    %102 = vector.broadcast %2 : vector<2x256x1xf32> to vector<2x256x128xf32>
    %103 = arith.mulf %101, %102 : vector<2x256x128xf32>
    %104 = arith.truncf %103 : vector<2x256x128xf32> to vector<2x256x128xbf16>
    %c0_36 = arith.constant 0 : index
    %c0_37 = arith.constant 0 : index
    %c0_38 = arith.constant 0 : index
    %105 = vector.load %arg10[%c0_36, %c0_37, %c0_38] : memref<2x256x128xbf16, #tpu.memory_space<vmem>>, vector<2x256x128xbf16>
    tpu.vector_store %arg10[%c0_36, %c0_37, %c0_38], %104 {strides = array<i32>} : memref<2x256x128xbf16, #tpu.memory_space<vmem>>, vector<2x256x128xbf16>,
    %cst_39 = arith.constant dense<0.000000e+00> : vector<2x128xf32>
    %106 = vector.multi_reduction <add>, %103, %cst_39 [1] : vector<2x256x128xf32> to vector<2x128xf32>
    %107 = vector.shape_cast %106 : vector<2x128xf32> to vector<2x1x128xf32>
    %108 = vector.broadcast %8 : vector<2x1x1xf32> to vector<2x1x128xf32>
    %109 = arith.mulf %107, %108 : vector<2x1x128xf32>
    %c0_40 = arith.constant 0 : index
    %c0_41 = arith.constant 0 : index
    %c0_42 = arith.constant 0 : index
    %110 = vector.load %arg11[%c0_40, %c0_41, %c0_42] : memref<2x1x128xf32, #tpu.memory_space<vmem>>, vector<2x1x128xf32>
    tpu.vector_store %arg11[%c0_40, %c0_41, %c0_42], %109 {strides = array<i32>} : memref<2x1x128xf32, #tpu.memory_space<vmem>>, vector<2x1x128xf32>,
    return
  }
  func.func @transform_0(%arg0: i32) -> (i32, i32, i32) {
    %c0_i32 = arith.constant 0 : i32
    %c0_i32_0 = arith.constant 0 : i32
    %c0_i32_1 = arith.constant 0 : i32
    return %arg0, %c0_i32, %c0_i32_0 : i32, i32, i32
  }
  func.func @transform_1(%arg0: i32) -> (i32, i32) {
    %c0_i32 = arith.constant 0 : i32
    %c0_i32_0 = arith.constant 0 : i32
    %c0_i32_1 = arith.constant 0 : i32
    return %c0_i32, %c0_i32_0 : i32, i32
  }
  func.func @transform_2(%arg0: i32) -> (i32, i32) {
    %c0_i32 = arith.constant 0 : i32
    %c0_i32_0 = arith.constant 0 : i32
    %c0_i32_1 = arith.constant 0 : i32
    return %c0_i32, %c0_i32_0 : i32, i32
  }
  func.func @transform_3(%arg0: i32) -> (i32, i32) {
    %c0_i32 = arith.constant 0 : i32
    %c0_i32_0 = arith.constant 0 : i32
    %c0_i32_1 = arith.constant 0 : i32
    return %c0_i32, %c0_i32_0 : i32, i32
  }
  func.func @transform_4(%arg0: i32) -> (i32, i32) {
    %c0_i32 = arith.constant 0 : i32
    %c0_i32_0 = arith.constant 0 : i32
    %c0_i32_1 = arith.constant 0 : i32
    return %c0_i32, %c0_i32_0 : i32, i32
  }
  func.func @transform_5(%arg0: i32) -> (i32, i32) {
    %c0_i32 = arith.constant 0 : i32
    %c0_i32_0 = arith.constant 0 : i32
    %c0_i32_1 = arith.constant 0 : i32
    return %c0_i32, %c0_i32_0 : i32, i32
  }
  func.func @transform_6(%arg0: i32) -> (i32, i32) {
    %c0_i32 = arith.constant 0 : i32
    %c0_i32_0 = arith.constant 0 : i32
    %c0_i32_1 = arith.constant 0 : i32
    return %c0_i32, %c0_i32_0 : i32, i32
  }
  func.func @transform_7(%arg0: i32) -> (i32, i32) {
    %c0_i32 = arith.constant 0 : i32
    %c0_i32_0 = arith.constant 0 : i32
    %c0_i32_1 = arith.constant 0 : i32
    return %c0_i32, %c0_i32_0 : i32, i32
  }
  func.func @transform_8(%arg0: i32) -> (i32, i32) {
    %c0_i32 = arith.constant 0 : i32
    %c0_i32_0 = arith.constant 0 : i32
    %c0_i32_1 = arith.constant 0 : i32
    return %c0_i32, %c0_i32_0 : i32, i32
  }
  func.func @transform_9(%arg0: i32) -> (i32, i32, i32) {
    %c0_i32 = arith.constant 0 : i32
    %c0_i32_0 = arith.constant 0 : i32
    %c0_i32_1 = arith.constant 0 : i32
    return %arg0, %c0_i32, %c0_i32_0 : i32, i32, i32
  }
  func.func @transform_10(%arg0: i32) -> (i32, i32, i32) {
    %c0_i32 = arith.constant 0 : i32
    %c0_i32_0 = arith.constant 0 : i32
    %c0_i32_1 = arith.constant 0 : i32
    return %arg0, %c0_i32, %c0_i32_0 : i32, i32, i32
  }
}

</mosaic_0001>

<bundles_post_ra>
// kernel: tpu_custom_call.1
= control target key start
LH: loop header
LB: loop body
LE: loop exit
PB: predicated region body
PF: predicated region fallthrough
CT: control target
= control target key end

     0   :  { %s13867_s0 = inlined_call_operand.vmem [shape: bf16[4,256,8], index: 0, kind: input, shape index: {}]   ;;  %s13868_s1 = inlined_call_operand.vmem [shape: bf16[8,512], index: 1, kind: input, shape index: {}]   ;;  %s13869_s2 = inlined_call_operand.vmem [shape: f32[1,512], index: 2, kind: input, shape index: {}]   ;;  %s13870_s3 = inlined_call_operand.vmem [shape: bf16[512,256], index: 3, kind: input, shape index: {}]   ;;  %s13871_s4 = inlined_call_operand.vmem [shape: f32[1,256], index: 4, kind: input, shape index: {}]   ;;  %s13872_s5 = inlined_call_operand.vmem [shape: f32[1,256], index: 5, kind: input, shape index: {}]   ;;  %s13873_s6 = inlined_call_operand.hbm [shape: bf16[256,128], index: 6, kind: input, shape index: {}]   ;;  %s13874_s7 = inlined_call_operand.vmem [shape: f32[1,128], index: 7, kind: input, shape index: {}]   ;;  %s13875_s8 = inlined_call_operand.vmem [shape: f32[1,128], index: 8, kind: input, shape index: {}]   ;;  %s13876_s9 = inlined_call_operand.hbm [shape: bf16[4,256,128], index: 9, kind: output, shape index: {0}]   ;;  %s13877_s10 = inlined_call_operand.hbm [shape: f32[4,1,128], index: 10, kind: output, shape index: {1}]  }
   0x1   :  { %14278 = sst [smem:[#allocation151_spill]] %s13867_s0 }
   0x2   :  { %16 = vsyncpa [#allocation3], 0 }
   0x3   :  { %17 = vsyncpa [#allocation4], 0 }
   0x4   :  { %19 = vsyncpa [#allocation4 + $0x1], 0 }
   0x5   :  { %20 = vsyncpa [#allocation7], 0 }
   0x6   :  { %22 = vsyncpa [#allocation7 + $0x1], 0  ;;  %s8081_s13 = smov 0   ;;  %s8083_s14 = smov 0  }
   0x7   :  { %s8085_s15 = smov 0   ;;  %s8087_s16 = smov 0  }
   0x8 LB: > { %s8102_s17 = sadd.s32 4294967295, %s8012_s16   ;;  %s6680_s18 = sadd.s32 4294967294, %s8012_s16   ;;  %s8012_s16 = sphi %s8087_s16, %s15180_s16   ;;  %s8008_s15 = sphi %s8085_s15, %s15179_s15   ;;  %s8004_s14 = sphi %s8083_s14, %s15178_s14   ;;  %s8000_s13 = sphi %s8081_s13, %s15177_s13  }
   0x9   : > { %s8106_s19 = sadd.s32 1, %s8012_s16   ;;  %s229_s20 = sadd.s32 1, %s8008_s15 }
   0xa   : > { %s226_s21 = ssub.s32 %s8012_s16, %s8106_s19  ;;  %p239_p0 = scmp.ne.s32.totalorder %s8008_s15, %s8004_s14 }
   0xb   : > { %p227_p1 = scmp.eq.s32.totalorder %s226_s21, 0  ;;  %p240_p2 = scmp.eq.s32.totalorder %s8102_s17, 1 }
   0xc   : > { %p245_p3 = scmp.ne.s32.totalorder %s8004_s14, %s8000_s13  ;;  %p246_p4 = scmp.eq.s32.totalorder %s6680_s18, 1 }
   0xd   : > { %s8117_s22 = scalar_select %p227_p1, %s8008_s15, %s229_s20  }
   0xe   : > { %p8119_p5 = por %p240_p2, %p239_p0  ;;  %p8123_p6 = por %p246_p4, %p245_p3 }
   0xf   : > { %p6681_p7 = scmp.ge.s32.totalorder %s8012_s16, 1  ;;  %p279_p8 = scmp.lt.s32.totalorder %s8012_s16, 3 }
  0x10   : > { %s14279_s23 = scalar_select %p8119_p5, 1, 0 }
  0x11   : > { %s14280_s24 = scalar_select %p8123_p6, 1, 0 }
  0x12   : > { %p13878_p9 = scmp.eq.s32.totalorder %s8102_s17, 0  ;;  %p8130_p10 = pnand %p6681_p7, %p279_p8 }
  0x13   : > { %s8014_s26 = smov [#allocation2]   ;;  %s7886_s11 = scalar_lea.hbm %s13873_s6, 2048 }
  0x14   : > { %s14281_s25 = scalar_select %p8130_p10, 1, 0 }
  0x15   : > { %s306_s27 = sshll.u32 %s8014_s26, 4  ;;  %p7343_p11 = pneg %p8130_p10  ;;  %s307_s27 = int_to_ptr.vmem [resolvable:$true] %s306_s27 }
  0x16   : > { %p7887_p13 = scmp.ne.s32.totalorder %s13873_s6, %s7886_s11  ;;  %p7893_p3 = scmp.lt.u32.totalorder %s7886_s11, %s13873_s6 }
  0x17   : > { %p8138_p12 = pnand %p13878_p9, %p7343_p11 }
  0x19   : > { %p7888_p0 = pneg %p8138_p12 }
  0x1b   : > { %p7889_p1 = pnand %p7888_p0, %p7887_p13 }
  0x1d   : > { %p7890_p2 = pneg %p7889_p1 }
  0x1f   : > { %p7895_p4 = pnand %p7893_p3, %p7890_p2 }
  0x21   : > { %7898 = shalt.err (!%p7895_p4)
}
  0x22   : > { %s7899_s26 = scalar_lea.vmem %s307_s27, 2048  ;;  %p7907_p9 = scmp.lt.s32.totalorder %s307_s27, %s307_s27 }
  0x23   : > { %p7900_p7 = scmp.ne.s32.totalorder %s307_s27, %s7899_s26  ;;  %p7908_p6 = scmp.lt.s32.totalorder %s7899_s26, %s7899_s26 }
  0x25   : > { %p7902_p8 = pnand %p7900_p7, %p7888_p0  ;;  %p7909_p5 = por %p7908_p6, %p7907_p9 }
  0x27   : > { %p7903_p11 = pneg %p7902_p8 }
  0x29   : > { %p7910_p10 = pnand %p7909_p5, %p7903_p11 }
  0x2b   : > { %7913 = shalt.err (!%p7910_p10)
}
  0x2c   : > { %s8015_s29 = smov 64   ;;  %s8016_s30 = smov 4  }
  0x2d   : > { %7346 = dma.hbm_to_vmem [thread:$0]  (!%p8138_p12), %s13873_s6, 2048, %s307_s27, [#allocation3], %s8015_s29, %s8015_s29, %s8016_s30  }
  0x2e   : > { %p14283_p13 = scmp.ne.s32.totalorder %s14281_s25, 0 }
  0x30   : > { %338 = sbr.rel (%p14283_p13) target bundleno = 1832 (0x728), region = 56 }
  0x37   : > { %p14284_p1 = scmp.eq.s32.totalorder %s8102_s17, 0 }
  0x39   : > { %7987 = dma.done.wait (%p14284_p1), [#allocation3], 2048   ;;  %p14285_p0 = pmov %p14284_p1 }
  0x3a   : > { %s6688_s11 = sshll.u32 %s8102_s17, 1  ;;  %v13885_v0 = vmov 0   ;;  %v8018_v1 = vmov 7   ;;  %s14286_s0 = sld [smem:[#allocation151_spill]]  ;;  %v665_v2 = vld [vmem:[%s13868_s1] sm:$0xff]  ;;  %vm956_vm0 = vcmask 1043456  }
  0x3b   : > { %7989 = vsyncadd (%p14285_p0), [#allocation3], 4294965248  ;;  %1001 = vmatprep.mubr.bf16.mxu0 %v13885_v0  ;;  %1161 = vmatprep.mubr.bf16.mxu1 %v13885_v0  ;;  %p383_p5 = scmp.lt.s32.totalorder %s6688_s11, 3  ;;  %v6724_v5 = vcombine.high %v665_v2, %v665_v2  ;;  %v6723_v6 = vcombine.low %v665_v2, %v665_v2  ;;  %vm520_vm1 = vcmask 64568   ;;  %vm859_vm2 = vcmask 64512   ;;  %s13334_s12 = sand.u32 1, %s8004_s14  }
  0x3c   : > { %7399 = vset.pattern.permute.xlu0 %v8018_v1  ;;  %7410 = vset.pattern.permute.xlu1 %v8018_v1  ;;  %v7589_v32 = vld [vmem:[%s13870_s3 + $0x4] ss:$8 sps:$4 sm:$0xff]   ;;  %v7587_v43 = vld [vmem:[%s13870_s3] ss:$8 sps:$4 sm:$0xff]   ;;  %v7594_v48 = vld [vmem:[%s13870_s3 + $0x14] ss:$8 sps:$4 sm:$0xff]  }
  0x3d   : > { %s15182_s11 = smov (!%p383_p5, %s6688_s11), 3  ;;  %6727 = vmatprep.subr.msk.bf16.mxu0 %vm956_vm0, %v6724_v5  ;;  %7205 = vmatprep.subr.msk.bf16.mxu1 %vm956_vm0, %v6724_v5  ;;  %v958_v9 = vsel %vm956_vm0, %v6723_v6, 0  ;;  %v7592_v58 = vld [vmem:[%s13870_s3 + $0x10] ss:$8 sps:$4 sm:$0xff]   ;;  %s6686_s18 = sshll.u32 %s13334_s12, 8 }
  0x3e   : > { %s6946_s25 = sshll.u32 %s15182_s11, 7  ;;  %970 = vmatpush1.bf16.msra.mxu0 %v958_v9  ;;  %7206 = vmatpush1.bf16.msra.mxu1 %v958_v9  ;;  %s13357_s11 = scalar_lea.vmem [#allocation5], %s6686_s18 }
  0x3f   : > { %3019 = vmatprep.subr.bf16.mxu0 %v7589_v32  ;;  %s7012_s28 = sshll.u32 %s8102_s17, 12  ;;  %s6558_s21 = sshll.u32 %s13357_s11, 4  ;;  %s13788_s21 = int_to_ptr.vmem [resolvable:$true] %s6558_s21 }
  0x40   : > { %s8170_s20 = scalar_lea.vmem %s14286_s0, %s6946_s25  ;;  %s6687_s25 = sshll.u32 %s13334_s12, 1 }
  0x41   : > { %v8176_v3 = vld [vmem:[%s8170_s20] sm:$0xff]   ;;  %v8182_v7 = vld [vmem:[%s8170_s20 + $0x8] sm:$0xff]   ;;  %v8193_v14 = vld [vmem:[%s8170_s20 + $0x10] sm:$0xff]   ;;  %s13641_s27 = scalar_lea.vmem [#allocation6], %s6687_s25  ;;  %s13786_s29 = scalar_lea.hbm %s13876_s9, %s7012_s28 }
  0x42   : > { %v8179_v4 = vld [vmem:[%s8170_s20 + $0x80] sm:$0xff]   ;;  %v456_v8 = vunpack.c.l.bf16 %v8176_v3  ;;  %v457_v10 = vunpack.c.h.bf16 %v8176_v3  ;;  %v458_v12 = vunpack.c.l.bf16 %v8182_v7  ;;  %v459_v13 = vunpack.c.h.bf16 %v8182_v7  ;;  %6728 = vmatmul.mubr.msk.bf16.vlgmr.msra.gmra.mrb[0].mxu0 %vm859_vm2, %v8176_v3  ;;  %v8201_v17 = vld [vmem:[%s8170_s20 + $0x88] sm:$0xff]   ;;  %v8211_v22 = vld [vmem:[%s8170_s20 + $0x18] sm:$0xff]   ;;  %s7914_s18 = scalar_lea.vmem %s13788_s21, 4096  ;;  %p15173_p9 = scmp.ne.s32.totalorder %s14279_s23, 0 }
  0x43   : > { %6744 = vmatmul.mubr.msk.bf16.vlgmr.msra.gmra.mrb[0].mxu1 %vm859_vm2, %v8179_v4  ;;  %v8205_v20 = vld [vmem:[%s8170_s20 + $0x20] sm:$0xff]   ;;  %1011 = vmatprep.mubr.bf16.mxu0 %v13885_v0  ;;  %v460_v25 = vunpack.c.l.bf16 %v8193_v14  ;;  %v461_v26 = vunpack.c.h.bf16 %v8193_v14  ;;  %v8222_v33 = vld [vmem:[%s8170_s20 + $0x30] sm:$0xff]   ;;  %v462_v35 = vunpack.c.l.bf16 %v8211_v22  ;;  %v463_v36 = vunpack.c.h.bf16 %v8211_v22  ;;  %v8231_v39 = vld [vmem:[%s8170_s20 + $0x28] sm:$0xff]   ;;  %p7915_p6 = scmp.ne.s32.totalorder %s13788_s21, %s7914_s18  ;;  %s8020_s25 = smov [#allocation5]  }
  0x44   : > { %v521_v11 = vsel %vm520_vm1, %v456_v8, 0.0  ;;  %v522_v15 = vsel %vm520_vm1, %v457_v10, 0.0  ;;  %v7400_v16 = vpack.i.bf16 %v457_v10, %v456_v8  ;;  %v524_v19 = vsel %vm520_vm1, %v458_v12, 0.0  ;;  %1171 = vmatprep.mubr.bf16.mxu1 %v13885_v0  ;;  %v8228_v37 = vld [vmem:[%s8170_s20 + $0x90] sm:$0xff]   ;;  %v8234_v41 = vld [vmem:[%s8170_s20 + $0x40] sm:$0xff]   ;;  %v8255_v52 = vld [vmem:[%s8170_s20 + $0x38] sm:$0xff]   ;;  %3020 = vmatpush1.bf16.msra.mxu0 %v7587_v43 }
  0x45   : > { %v523_v18 = vadd.f32 %v522_v15, %v521_v11  ;;  %v526_v21 = vsel %vm520_vm1, %v459_v13, 0.0  ;;  %v7405_v23 = vpack.i.bf16 %v459_v13, %v458_v12  ;;  %v464_v27 = vunpack.c.l.bf16 %v8205_v20  ;;  %v8266_v61 = vld [vmem:[%s8170_s20 + $0x50] sm:$0xff]   ;;  %3021 = vmatprep.subr.bf16.mxu0 %v7594_v48  ;;  %v8272_v2 = vld [vmem:[%s8170_s20 + $0x60] sm:$0xff]   ;;  %v8275_v5 = vld [vmem:[%s8170_s20 + $0x48] sm:$0xff]   ;;  %p7916_p10 = pnand %p7915_p6, %p15173_p9  ;;  %s7918_s0 = sshll.u32 %s8020_s25, 4  ;;  %s7919_s0 = int_to_ptr.vmem [resolvable:$false] %s7918_s0 }
  0x46   : > { %7401 = vperm.xlu0 %7399, %v7400_v16   ;;  %v465_v28 = vunpack.c.h.bf16 %v8205_v20  ;;  %v7411_v29 = vpack.i.bf16 %v461_v26, %v460_v25  ;;  %v528_v31 = vsel %vm520_vm1, %v460_v25, 0.0  ;;  %v530_v34 = vsel %vm520_vm1, %v461_v26, 0.0  ;;  %v7597_v10 = vld [vmem:[%s13870_s3 + $0x20] ss:$8 sps:$4 sm:$0xff]   ;;  %v7599_v11 = vld [vmem:[%s13870_s3 + $0x24] ss:$8 sps:$4 sm:$0xff]   ;;  %p7921_p2 = scmp.lt.s32.totalorder %s13788_s21, %s7919_s0 }
  0x47   : > { %v525_v24 = vadd.f32 %v524_v19, %v523_v18  ;;  %v7416_v42 = vpack.i.bf16 %v463_v36, %v462_v35  ;;  %v468_v44 = vunpack.c.l.bf16 %v8222_v33  ;;  %v469_v45 = vunpack.c.h.bf16 %v8222_v33  ;;  %v8290_v12 = vld [vmem:[%s8170_s20 + $0x98] sm:$0xff]   ;;  %v8340_v48 = vld [vmem:[%s8170_s20 + $0xa0] sm:$0xff]   ;;  %p7917_p12 = pneg %p7916_p10  ;;  %s7920_s28 = scalar_lea.vmem %s7919_s0, 8192 }
  0x48   : > { %v7421_v38 = vpack.i.bf16 %v465_v28, %v464_v27  ;;  %7412 = vperm.xlu1 %7410, %v7411_v29   ;;  %v532_v47 = vsel %vm520_vm1, %v462_v35, 0.0  ;;  %v534_v49 = vsel %vm520_vm1, %v463_v36, 0.0  ;;  %v466_v50 = vunpack.c.l.bf16 %v8231_v39  ;;  %3022 = vmatpush1.bf16.msra.mxu0 %v7592_v58  ;;  %v8309_v25 = vld [vmem:[%s8170_s20 + $0x58] sm:$0xff]   ;;  %v8327_v36 = vld [vmem:[%s8170_s20 + $0x68] sm:$0xff]   ;;  %p7922_p3 = scmp.lt.s32.totalorder %s7920_s28, %s7914_s18 }
  0x49   : > { %v527_v30 = vadd.f32 %v526_v21, %v525_v24  ;;  %v467_v51 = vunpack.c.h.bf16 %v8231_v39  ;;  %v7431_v53 = vpack.i.bf16 %v469_v45, %v468_v44  ;;  %v536_v55 = vsel %vm520_vm1, %v464_v27, 0.0  ;;  %v7604_v26 = vld [vmem:[%s13870_s3 + $0x34] ss:$8 sps:$4 sm:$0xff]   ;;  %3023 = vmatprep.subr.bf16.mxu0 %v7599_v11 }
  0x4a   : > { %7406 = vperm.xlu0 %7399, %v7405_v23   ;;  %6729 = vmatmul.mubr.msk.bf16.gmra.mrb[4].mxu0 %vm859_vm2, %v8182_v7  ;;  %v472_v56 = vunpack.c.l.bf16 %v8234_v41  ;;  %v473_v59 = vunpack.c.h.bf16 %v8234_v41  ;;  %v470_v62 = vunpack.c.l.bf16 %v8255_v52  ;;  %v471_v63 = vunpack.c.h.bf16 %v8255_v52  ;;  %p7923_p4 = por %p7922_p3, %p7921_p2 }
  0x4b   : > { %v529_v40 = vadd.f32 %v528_v31, %v527_v30  ;;  %6745 = vmatmul.mubr.msk.bf16.gmra.mrb[4].mxu1 %vm859_vm2, %v8201_v17  ;;  %1021 = vmatprep.mubr.bf16.mxu0 %v13885_v0  ;;  %v7426_v57 = vpack.i.bf16 %v467_v51, %v466_v50  ;;  %v538_v1 = vsel %vm520_vm1, %v465_v28, 0.0  ;;  %v476_v13 = vunpack.c.l.bf16 %v8266_v61  ;;  %v8317_v30 = vld [vmem:[%s8170_s20 + $0x70] sm:$0xff]  }
  0x4c   : > { %1181 = vmatprep.mubr.bf16.mxu1 %v13885_v0  ;;  %7417 = vperm.xlu1 %7410, %v7416_v42   ;;  %v7441_v6 = vpack.i.bf16 %v473_v59, %v472_v56  ;;  %v7436_v9 = vpack.i.bf16 %v471_v63, %v470_v62  ;;  %v477_v15 = vunpack.c.h.bf16 %v8266_v61  ;;  %v540_v16 = vsel %vm520_vm1, %v466_v50, 0.0  ;;  %p7924_p7 = pnand %p7923_p4, %p7917_p12 }
  0x4d   : > { %v531_v46 = vadd.f32 %v530_v34, %v529_v40  ;;  %v474_v19 = vunpack.c.l.bf16 %v8275_v5  ;;  %v475_v21 = vunpack.c.h.bf16 %v8275_v5  ;;  %v542_v24 = vsel %vm520_vm1, %v467_v51, 0.0  ;;  %3024 = vmatpush1.bf16.msra.mxu0 %v7597_v10  ;;  %v7611_v51 = vld [vmem:[%s13870_s3 + $0x44] ss:$8 sps:$4 sm:$0xff]  }
  0x4e   : > { %7422 = vperm.xlu0 %7399, %v7421_v38   ;;  %v7451_v23 = vpack.i.bf16 %v477_v15, %v476_v13  ;;  %v480_v28 = vunpack.c.l.bf16 %v8272_v2  ;;  %v481_v29 = vunpack.c.h.bf16 %v8272_v2  ;;  %v544_v32 = vsel %vm520_vm1, %v468_v44, 0.0  ;;  %3025 = vmatprep.subr.bf16.mxu0 %v7604_v26 }
  0x4f   : > { %v533_v54 = vadd.f32 %v532_v47, %v531_v46  ;;  %v7446_v31 = vpack.i.bf16 %v475_v21, %v474_v19  ;;  %v488_v34 = vunpack.c.l.bf16 %v8179_v4  ;;  %v489_v35 = vunpack.c.h.bf16 %v8179_v4  ;;  %v7602_v47 = vld [vmem:[%s13870_s3 + $0x30] ss:$8 sps:$4 sm:$0xff]  }
  0x50   : > { %7427 = vperm.xlu1 %7410, %v7426_v57   ;;  %v478_v40 = vunpack.c.l.bf16 %v8309_v25  ;;  %v479_v42 = vunpack.c.h.bf16 %v8309_v25  ;;  %v546_v43 = vsel %vm520_vm1, %v469_v45, 0.0  ;;  %v484_v46 = vunpack.c.l.bf16 %v8317_v30 }
  0x51   : > { %v535_v60 = vadd.f32 %v534_v49, %v533_v54  ;;  %v485_v44 = vunpack.c.h.bf16 %v8317_v30  ;;  %v7461_v50 = vpack.i.bf16 %v481_v29, %v480_v28  ;;  %v591_v54 = vsel %vm520_vm1, %v489_v35, 0.0  ;;  %3026 = vmatpush1.bf16.msra.mxu0 %v7602_v47 }
  0x52   : > { %7432 = vperm.xlu0 %7399, %v7431_v53   ;;  %6730 = vmatmul.mubr.msk.bf16.gmra.mrb[8].mxu0 %vm859_vm2, %v8193_v14  ;;  %v7456_v45 = vpack.i.bf16 %v479_v42, %v478_v40  ;;  %v548_v53 = vsel %vm520_vm1, %v470_v62, 0.0  ;;  %v482_v58 = vunpack.c.l.bf16 %v8327_v36  ;;  %v550_v62 = vsel %vm520_vm1, %v471_v63, 0.0  ;;  %v7609_v63 = vld [vmem:[%s13870_s3 + $0x40] ss:$8 sps:$4 sm:$0xff]  }
  0x53   : > { %v537_v8 = vadd.f32 %v536_v55, %v535_v60  ;;  %6746 = vmatmul.mubr.msk.bf16.gmra.mrb[8].mxu1 %vm859_vm2, %v8228_v37  ;;  %1031 = vmatprep.mubr.bf16.mxu0 %v13885_v0  ;;  %v590_v55 = vsel %vm520_vm1, %v488_v34, 0.0  ;;  %v483_v60 = vunpack.c.h.bf16 %v8327_v36  ;;  %v552_v11 = vsel %vm520_vm1, %v472_v56, 0.0 }
  0x54   : > { %1191 = vmatprep.mubr.bf16.mxu1 %v13885_v0  ;;  %7437 = vperm.xlu1 %7410, %v7436_v9   ;;  %v592_v9 = vadd.f32 %v591_v54, %v590_v55  ;;  %v493_v56 = vunpack.c.h.bf16 %v8228_v37 }
  0x55   : > { %v539_v18 = vadd.f32 %v538_v1, %v537_v8  ;;  %v7471_v1 = vpack.i.bf16 %v485_v44, %v484_v46  ;;  %v7466_v10 = vpack.i.bf16 %v483_v60, %v482_v58  ;;  %3027 = vmatprep.subr.bf16.mxu0 %v7611_v51  ;;  %v494_v51 = vunpack.c.l.bf16 %v8290_v12 }
  0x56   : > { %7442 = vperm.xlu0 %7399, %v7441_v6   ;;  %v8372_v6 = vld [vmem:[%s8170_s20 + $0x78] sm:$0xff]   ;;  %3028 = vmatpush1.bf16.msra.mxu0 %v7609_v63 }
  0x57   : > { %v541_v27 = vadd.f32 %v540_v16, %v539_v18  ;;  %v492_v16 = vunpack.c.l.bf16 %v8228_v37  ;;  %v490_v18 = vunpack.c.l.bf16 %v8201_v17  ;;  %v487_v26 = vunpack.c.h.bf16 %v8372_v6 }
  0x58   : > { %7447 = vperm.xlu1 %7410, %v7446_v31   ;;  %v554_v31 = vsel %vm520_vm1, %v473_v59, 0.0 }
  0x59   : > { %v543_v38 = vadd.f32 %v542_v24, %v541_v27  ;;  %v486_v24 = vunpack.c.l.bf16 %v8372_v6  ;;  %v491_v27 = vunpack.c.h.bf16 %v8201_v17 }
  0x5a   : > { %7452 = vperm.xlu0 %7399, %v7451_v23   ;;  %6731 = vmatmul.mubr.msk.bf16.gmra.mrb[12].mxu0 %vm859_vm2, %v8211_v22 }
  0x5b   : > { %v545_v49 = vadd.f32 %v544_v32, %v543_v38  ;;  %6747 = vmatmul.mubr.msk.bf16.gmra.mrb[12].mxu1 %vm859_vm2, %v8290_v12  ;;  %1041 = vmatprep.mubr.bf16.mxu0 %v13885_v0  ;;  %v7481_v32 = vpack.i.bf16 %v489_v35, %v488_v34  ;;  %v593_v38 = vsel %vm520_vm1, %v490_v18, 0.0  ;;  %v595_v59 = vsel %vm520_vm1, %v491_v27, 0.0  ;;  %v7612_v35 = vld [vmem:[%s13870_s3 + $0x50] ss:$8 sps:$4 sm:$0xff]  }
  0x5c   : > { %1201 = vmatprep.mubr.bf16.mxu1 %v13885_v0  ;;  %7457 = vperm.xlu1 %7410, %v7456_v45   ;;  %v594_v34 = vadd.f32 %v593_v38, %v592_v9  ;;  %v597_v45 = vsel %vm520_vm1, %v492_v16, 0.0  ;;  %v8434_v9 = vld [vmem:[%s8170_s20 + $0xb0] sm:$0xff]  }
  0x5d   : > { %v547_v57 = vadd.f32 %v546_v43, %v545_v49  ;;  %v7614_v43 = vld [vmem:[%s13870_s3 + $0x54] ss:$8 sps:$4 sm:$0xff]   ;;  %v7476_v49 = vpack.i.bf16 %v487_v26, %v486_v24 }
  0x5e   : > { %7462 = vperm.xlu0 %7399, %v7461_v50   ;;  %v556_v50 = vsel %vm520_vm1, %v474_v19, 0.0  ;;  %v560_v19 = vsel %vm520_vm1, %v476_v13, 0.0  ;;  %v596_v55 = vadd.f32 %v595_v59, %v594_v34  ;;  %v7617_v13 = vld [vmem:[%s13870_s3 + $0x64] ss:$8 sps:$4 sm:$0xff]   ;;  %3029 = vmatprep.subr.bf16.mxu0 %v7614_v43  ;;  %v8457_v59 = vld [vmem:[%s8170_s20 + $0xb8] sm:$0xff]  }
  0x5f   : > { %v549_v8 = vadd.f32 %v548_v53, %v547_v57  ;;  %v562_v53 = vsel %vm520_vm1, %v477_v15, 0.0  ;;  %v8423_v57 = vld [vmem:[%s8170_s20 + $0xa8] sm:$0xff]   ;;  %v495_v15 = vunpack.c.h.bf16 %v8290_v12  ;;  %3030 = vmatpush1.bf16.msra.mxu0 %v7612_v35  ;;  %v8460_v34 = vld [vmem:[%s8170_s20 + $0xc0] sm:$0xff]   ;;  %v500_v35 = vunpack.c.l.bf16 %v8434_v9 }
  0x60   : > { %7467 = vperm.xlu1 %7410, %v7466_v10   ;;  %v8439_v10 = vsel %vm520_vm1, %v481_v29, 0.0  ;;  %3031 = vmatprep.subr.bf16.mxu0 %v7617_v13  ;;  %v8487_v13 = vld [vmem:[%s8170_s20 + $0xc8] sm:$0xff]  }
  0x61   : > { %v551_v23 = vadd.f32 %v550_v62, %v549_v8  ;;  %v558_v62 = vsel %vm520_vm1, %v475_v21, 0.0  ;;  %v7491_v8 = vpack.i.bf16 %v493_v56, %v492_v16  ;;  %v7486_v21 = vpack.i.bf16 %v491_v27, %v490_v18 }
  0x62   : > { %7472 = vperm.xlu0 %7399, %v7471_v1   ;;  %6732 = vmatmul.mubr.msk.bf16.gmra.mrb[16].mxu0 %vm859_vm2, %v8205_v20  ;;  %v599_v1 = vsel %vm520_vm1, %v493_v56, 0.0  ;;  %v568_v16 = vsel %vm520_vm1, %v480_v28, 0.0  ;;  %v601_v56 = vsel %vm520_vm1, %v494_v51, 0.0  ;;  %v8450_v18 = vsel %vm520_vm1, %v484_v46, 0.0 }
  0x63   : > { %v553_v47 = vadd.f32 %v552_v11, %v551_v23  ;;  %6748 = vmatmul.mubr.msk.bf16.gmra.mrb[16].mxu1 %vm859_vm2, %v8340_v48  ;;  %1051 = vmatprep.mubr.bf16.mxu0 %v13885_v0  ;;  %v598_v11 = vadd.f32 %v597_v45, %v596_v55  ;;  %v496_v23 = vunpack.c.l.bf16 %v8340_v48  ;;  %v603_v28 = vsel %vm520_vm1, %v495_v15, 0.0  ;;  %v7620_v55 = vld [vmem:[%s13870_s3 + $0x74] ss:$8 sps:$4 sm:$0xff]  }
  0x64   : > { %1211 = vmatprep.mubr.bf16.mxu1 %v13885_v0  ;;  %7477 = vperm.xlu1 %7410, %v7476_v49   ;;  %v7496_v43 = vpack.i.bf16 %v495_v15, %v494_v51  ;;  %v498_v45 = vunpack.c.l.bf16 %v8423_v57 }
  0x65   : > { %v555_v54 = vadd.f32 %v554_v31, %v553_v47  ;;  %v497_v31 = vunpack.c.h.bf16 %v8340_v48  ;;  %v600_v38 = vadd.f32 %v599_v1, %v598_v11  ;;  %v564_v47 = vsel %vm520_vm1, %v478_v40, 0.0  ;;  %v7615_v40 = vld [vmem:[%s13870_s3 + $0x60] ss:$8 sps:$4 sm:$0xff]  }
  0x66   : > { %7482 = vperm.xlu0 %7399, %v7481_v32   ;;  %v605_v46 = vsel %vm520_vm1, %v496_v23, 0.0  ;;  %3032 = vmatpush1.bf16.msra.mxu0 %v7615_v40 }
  0x67   : > { %v557_v63 = vadd.f32 %v556_v50, %v555_v54  ;;  %v7501_v27 = vpack.i.bf16 %v497_v31, %v496_v23  ;;  %v602_v49 = vadd.f32 %v601_v56, %v600_v38  ;;  %v501_v50 = vunpack.c.h.bf16 %v8434_v9  ;;  %3033 = vmatprep.subr.bf16.mxu0 %v7620_v55 }
  0x68   : > { %7487 = vperm.xlu1 %7410, %v7486_v21   ;;  %v499_v54 = vunpack.c.h.bf16 %v8423_v57  ;;  %v607_v1 = vsel %vm520_vm1, %v497_v31, 0.0  ;;  %v8490_v21 = vld [vmem:[%s8170_s20 + $0xd0] sm:$0xff]   ;;  %v504_v23 = vunpack.c.l.bf16 %v8460_v34  ;;  %v505_v31 = vunpack.c.h.bf16 %v8460_v34 }
  0x69   : > { %v559_v29 = vadd.f32 %v558_v62, %v557_v63  ;;  %v566_v62 = vsel %vm520_vm1, %v479_v42, 0.0  ;;  %v572_v42 = vsel %vm520_vm1, %v482_v58, 0.0  ;;  %v609_v56 = vsel %vm520_vm1, %v498_v45, 0.0 }
  0x6a   : > { %7492 = vperm.xlu0 %7399, %v7491_v8   ;;  %6733 = vmatmul.mubr.msk.bf16.gmra.mrb[20].mxu0 %vm859_vm2, %v8231_v39  ;;  %v7511_v8 = vpack.i.bf16 %v501_v50, %v500_v35  ;;  %v7506_v11 = vpack.i.bf16 %v499_v54, %v498_v45  ;;  %v613_v58 = vsel %vm520_vm1, %v500_v35, 0.0  ;;  %v8510_v45 = vld [vmem:[%s8170_s20 + $0xe0] sm:$0xff]   ;;  %v13881_v35 = vunpack.c.h.bf16 %v8490_v21 }
  0x6b   : > { %v561_v32 = vadd.f32 %v560_v19, %v559_v29  ;;  %6749 = vmatmul.mubr.msk.bf16.gmra.mrb[20].mxu1 %vm859_vm2, %v8423_v57  ;;  %v604_v19 = vadd.f32 %v603_v28, %v602_v49  ;;  %1061 = vmatprep.mubr.bf16.mxu0 %v13885_v0  ;;  %v503_v28 = vunpack.c.h.bf16 %v8457_v59  ;;  %14288 = vst [vmem:[#allocation12_spill] sm:$0xff] %v8510_v45  ;;  %v506_v55 = vunpack.c.l.bf16 %v8487_v13 }
  0x6c   : > { %1221 = vmatprep.mubr.bf16.mxu1 %v13885_v0  ;;  %7497 = vperm.xlu1 %7410, %v7496_v43   ;;  %v611_v43 = vsel %vm520_vm1, %v499_v54, 0.0 }
  0x6d   : > { %v563_v51 = vadd.f32 %v562_v53, %v561_v32  ;;  %v7618_v53 = vld [vmem:[%s13870_s3 + $0x70] ss:$8 sps:$4 sm:$0xff]   ;;  %v606_v63 = vadd.f32 %v605_v46, %v604_v19  ;;  %v13882_v19 = vunpack.c.l.bf16 %v8490_v21 }
  0x6e   : > { %7502 = vperm.xlu0 %7399, %v7501_v27   ;;  %v502_v27 = vunpack.c.l.bf16 %v8457_v59  ;;  %v8501_v32 = vld [vmem:[%s8170_s20 + $0xf8] sm:$0xff]   ;;  %3034 = vmatpush1.bf16.msra.mxu0 %v7618_v53  ;;  %v7621_v53 = vld [vmem:[%s13870_s3 + $0x80] ss:$8 sps:$4 sm:$0xff]  }
  0x6f   : > { %v565_v15 = vadd.f32 %v564_v47, %v563_v51  ;;  %v608_v38 = vadd.f32 %v607_v1, %v606_v63  ;;  %14287 = vst [vmem:[#allocation11_spill] sm:$0xff] %v8501_v32  ;;  %v7521_v47 = vpack.i.bf16 %v505_v31, %v504_v23  ;;  %v8513_v51 = vld [vmem:[%s8170_s20 + $0xd8] sm:$0xff]   ;;  %v574_v63 = vsel %vm520_vm1, %v483_v60, 0.0 }
  0x70   : > { %7507 = vperm.xlu1 %7410, %v7506_v11   ;;  %v7516_v40 = vpack.i.bf16 %v503_v28, %v502_v27  ;;  %v615_v11 = vsel %vm520_vm1, %v501_v50, 0.0  ;;  %v7626_v60 = vld [vmem:[%s13870_s3 + $0x94] ss:$8 sps:$4 sm:$0xff]  }
  0x71   : > { %v567_v29 = vadd.f32 %v566_v62, %v565_v15  ;;  %v610_v46 = vadd.f32 %v609_v56, %v608_v38  ;;  %v13883_v62 = vunpack.c.l.bf16 %v8501_v32  ;;  %v13884_v15 = vunpack.c.h.bf16 %v8501_v32 }
  0x72   : > { %7512 = vperm.xlu0 %7399, %v7511_v8   ;;  %6734 = vmatmul.mubr.msk.bf16.gmra.mrb[24].mxu0 %vm859_vm2, %v8222_v33  ;;  %v507_v8 = vunpack.c.h.bf16 %v8487_v13 }
  0x73   : > { %v569_v49 = vadd.f32 %v568_v16, %v567_v29  ;;  %v7623_v16 = vld [vmem:[%s13870_s3 + $0x84] ss:$8 sps:$4 sm:$0xff]   ;;  %6750 = vmatmul.mubr.msk.bf16.gmra.mrb[24].mxu1 %vm859_vm2, %v8434_v9  ;;  %v612_v1 = vadd.f32 %v611_v43, %v610_v46  ;;  %1071 = vmatprep.mubr.bf16.mxu0 %v13885_v0  ;;  %v8545_v56 = vsel %vm520_vm1, %v13883_v62, 0.0  ;;  %v512_v46 = vunpack.c.l.bf16 %v8510_v45 }
  0x74   : > { %1231 = vmatprep.mubr.bf16.mxu1 %v13885_v0  ;;  %v666_v29 = vld [vmem:[%s13868_s1 + $0x8] sm:$0xff]  ;;  %7517 = vperm.xlu1 %7410, %v7516_v40   ;;  %v7526_v43 = vpack.i.bf16 %v507_v8, %v506_v55  ;;  %v8567_v40 = vld [vmem:[%s8170_s20 + $0xf0] sm:$0xff]  }
  0x75   : > { %v571_v54 = vadd.f32 %v8439_v10, %v569_v49  ;;  %v7531_v10 = vpack.i.bf16 %v13881_v35, %v13882_v19  ;;  %v614_v38 = vadd.f32 %v613_v58, %v612_v1  ;;  %v8560_v49 = vsel %vm520_vm1, %v13884_v15, 0.0  ;;  %3035 = vmatprep.subr.bf16.mxu0 %v7623_v16  ;;  %14289 = vst [vmem:[#allocation13_spill] sm:$0xff] %v8567_v40  ;;  %v8571_v1 = vld [vmem:[%s8170_s20 + $0xe8] sm:$0xff]  }
  0x76   : > { %7522 = vperm.xlu0 %7399, %v7521_v47   ;;  %v513_v35 = vunpack.c.h.bf16 %v8510_v45  ;;  %v617_v19 = vsel %vm520_vm1, %v502_v27, 0.0  ;;  %14290 = vst [vmem:[#allocation14_spill] sm:$0xff] %v8571_v1  ;;  %v6726_v62 = vcombine.high %v666_v29, %v666_v29  ;;  %3036 = vmatpush1.bf16.msra.mxu0 %v7621_v53  ;;  %v578_v15 = vsel %vm520_vm1, %v485_v44, 0.0 }
  0x77   : > { %v573_v50 = vadd.f32 %v572_v42, %v571_v54  ;;  %v510_v42 = vunpack.c.l.bf16 %v8513_v51  ;;  %v616_v47 = vadd.f32 %v615_v11, %v614_v38  ;;  %v511_v54 = vunpack.c.h.bf16 %v8513_v51  ;;  %3037 = vmatprep.subr.bf16.mxu0 %v7626_v60 }
  0x78   : > { %v7541_v27 = vpack.i.bf16 %v513_v35, %v512_v46  ;;  %v619_v16 = vsel %vm520_vm1, %v503_v28, 0.0  ;;  %7527 = vperm.xlu1 %7410, %v7526_v43   ;;  %v621_v28 = vsel %vm520_vm1, %v504_v23, 0.0  ;;  %v514_v60 = vunpack.c.l.bf16 %v8571_v1  ;;  %6760 = vmatprep.subr.msk.bf16.mxu1 %vm956_vm0, %v6726_v62  ;;  %v7629_v62 = vld [vmem:[%s13870_s3 + $0xa4] ss:$8 sps:$4 sm:$0xff]  }
  0x79   : > { %v575_v58 = vadd.f32 %v574_v63, %v573_v50  ;;  %v6725_v63 = vcombine.low %v666_v29, %v666_v29  ;;  %v580_v50 = vsel %vm520_vm1, %v486_v24, 0.0  ;;  %v618_v53 = vadd.f32 %v617_v19, %v616_v47  ;;  %v7624_v24 = vld [vmem:[%s13870_s3 + $0x90] ss:$8 sps:$4 sm:$0xff]  }
  0x7a   : > { %7532 = vperm.xlu0 %7399, %v7531_v10   ;;  %v7536_v44 = vpack.i.bf16 %v511_v54, %v510_v42  ;;  %v516_v29 = vunpack.c.l.bf16 %v8567_v40  ;;  %6735 = vmatmul.mubr.msk.bf16.gmra.mrb[28].mxu0 %vm859_vm2, %v8255_v52  ;;  %v515_v10 = vunpack.c.h.bf16 %v8571_v1  ;;  %v582_v43 = vsel %vm520_vm1, %v487_v26, 0.0 }
  0x7b   : > { %v577_v11 = vadd.f32 %v8450_v18, %v575_v58  ;;  %v517_v18 = vunpack.c.h.bf16 %v8567_v40  ;;  %6751 = vmatmul.mubr.msk.bf16.gmra.mrb[28].mxu1 %vm859_vm2, %v8457_v59  ;;  %v620_v23 = vadd.f32 %v619_v16, %v618_v53  ;;  %v964_v38 = vsel %vm956_vm0, %v6725_v63, 0  ;;  %1081 = vmatprep.mubr.bf16.mxu0 %v13885_v0 }
  0x7c   : > { %1241 = vmatprep.mubr.bf16.mxu1 %v13885_v0  ;;  %7537 = vperm.xlu1 %7410, %v7536_v44   ;;  %v7546_v63 = vpack.i.bf16 %v515_v10, %v514_v60  ;;  %v625_v26 = vsel %vm520_vm1, %v506_v55, 0.0  ;;  %v14291_v55 = vunpack.c.l.bf16 %v8501_v32 }
  0x7d   : > { %v579_v19 = vadd.f32 %v578_v15, %v577_v11  ;;  %v623_v15 = vsel %vm520_vm1, %v505_v31, 0.0  ;;  %v7551_v58 = vpack.i.bf16 %v517_v18, %v516_v29  ;;  %v622_v16 = vadd.f32 %v621_v28, %v620_v23  ;;  %1323 = vmatpush1.bf16.msra.mxu1 %v964_v38  ;;  %3038 = vmatpush1.bf16.msra.mxu0 %v7624_v24  ;;  %v7627_v31 = vld [vmem:[%s13870_s3 + $0xa0] ss:$8 sps:$4 sm:$0xff]  }
  0x7e   : > { %7542 = vperm.xlu0 %7399, %v7541_v27   ;;  %3039 = vmatprep.subr.bf16.mxu0 %v7629_v62  ;;  %v627_v27 = vsel %vm520_vm1, %v507_v8, 0.0  ;;  %v14292_v28 = vunpack.c.h.bf16 %v8501_v32  ;;  %v14293_v23 = vunpack.c.l.bf16 %v8490_v21  ;;  %v7630_v8 = vld [vmem:[%s13870_s3 + $0xb0] ss:$8 sps:$4 sm:$0xff]  }
  0x7f   : > { %v581_v47 = vadd.f32 %v580_v50, %v579_v19  ;;  %v624_v50 = vadd.f32 %v623_v15, %v622_v16  ;;  %4889 = vmatprep.subr.bf16.mxu1 %v13885_v0  ;;  %v7632_v19 = vld [vmem:[%s13870_s3 + $0xb4] ss:$8 sps:$4 sm:$0xff]   ;;  %v7635_v15 = vld [vmem:[%s13870_s3 + $0xc4] ss:$8 sps:$4 sm:$0xff]  }
  0x80   : > { %7547 = vperm.xlu1 %7410, %v7546_v63   ;;  %v7556_v24 = vpack.i.bf16 %v14292_v28, %v14291_v55  ;;  %v629_v38 = vsel %vm520_vm1, %v14293_v23, 0.0  ;;  %v7638_v55 = vld [vmem:[%s13870_s3 + $0xd4] ss:$8 sps:$4 sm:$0xff]   ;;  %v7636_v28 = vld [vmem:[%s13870_s3 + $0xd0] ss:$8 sps:$4 sm:$0xff]  }
  0x81   : > { %v583_v11 = vadd.f32 %v582_v43, %v581_v47  ;;  %v626_v44 = vadd.f32 %v625_v26, %v624_v50  ;;  %3040 = vmatpush1.bf16.msra.mxu0 %v7627_v31  ;;  %v633_v26 = vsel %vm520_vm1, %v510_v42, 0.0  ;;  %v7633_v31 = vld [vmem:[%s13870_s3 + $0xc0] ss:$8 sps:$4 sm:$0xff]   ;;  %v637_v42 = vsel %vm520_vm1, %v512_v46, 0.0 }
  0x82   : > { %7552 = vperm.xlu0 %7399, %v7551_v58   ;;  %6736 = vmatmul.mubr.msk.bf16.gmra.mrb[32].mxu0 %vm859_vm2, %v8234_v41  ;;  %v14294_v58 = vunpack.c.h.bf16 %v8490_v21  ;;  %v639_v46 = vsel %vm520_vm1, %v513_v35, 0.0  ;;  %v643_v35 = vsel %vm520_vm1, %v515_v10, 0.0 }
  0x83   : > { %v584_v53 = vrot.slane %v583_v11, 4  ;;  %6752 = vmatmul.mubr.msk.bf16.gmra.mrb[32].mxu1 %vm859_vm2, %v8460_v34  ;;  %v628_v43 = vadd.f32 %v627_v27, %v626_v44  ;;  %1091 = vmatprep.mubr.bf16.mxu0 %v13885_v0  ;;  %v635_v27 = vsel %vm520_vm1, %v511_v54, 0.0 }
  0x84   : > { %1251 = vmatprep.mubr.bf16.mxu1 %v13885_v0  ;;  %v631_v47 = vsel %vm520_vm1, %v14294_v58, 0.0  ;;  %7557 = vperm.xlu1 %7410, %v7556_v24   ;;  %v645_v58 = vsel %vm520_vm1, %v516_v29, 0.0 }
  0x85   : > { %v585_v62 = vadd.f32 %v584_v53, %v583_v11  ;;  %v630_v63 = vadd.f32 %v629_v38, %v628_v43  ;;  %3041 = vmatprep.subr.bf16.mxu0 %v7632_v19  ;;  %v7641_v19 = vld [vmem:[%s13870_s3 + $0xe4] ss:$8 sps:$4 sm:$0xff]  }
  0x86   : > { %3042 = vmatpush1.bf16.msra.mxu0 %v7630_v8  ;;  %v641_v8 = vsel %vm520_vm1, %v514_v60, 0.0 }
  0x87   : > { %v586_v16 = vrot.slane %v585_v62, 2  ;;  %v632_v50 = vadd.f32 %v631_v47, %v630_v63  ;;  %3043 = vmatprep.subr.bf16.mxu0 %v7635_v15  ;;  %v647_v47 = vsel %vm520_vm1, %v517_v18, 0.0 }
  0x89   : > { %v587_v11 = vadd.f32 %v586_v16, %v585_v62  ;;  %v634_v44 = vadd.f32 %v633_v26, %v632_v50  ;;  %v7639_v62 = vld [vmem:[%s13870_s3 + $0xe0] ss:$8 sps:$4 sm:$0xff]  }
  0x8a   : > { %3044 = vmatpush1.bf16.msra.mxu0 %v7633_v31 }
  0x8b   : > { %v588_v53 = vrot.slane %v587_v11, 1  ;;  %6737 = vmatmul.mubr.msk.bf16.gmra.mrb[36].mxu0 %vm859_vm2, %v8275_v5  ;;  %6753 = vmatmul.mubr.msk.bf16.gmra.mrb[36].mxu1 %vm859_vm2, %v8487_v13  ;;  %v636_v54 = vadd.f32 %v635_v27, %v634_v44 }
  0x8c   : > { %1101 = vmatprep.mubr.bf16.mxu0 %v13885_v0  ;;  %1261 = vmatprep.mubr.bf16.mxu1 %v13885_v0 }
  0x8d   : > { %v589_v24 = vadd.f32 %v588_v53, %v587_v11  ;;  %v638_v38 = vadd.f32 %v637_v42, %v636_v54  ;;  %3045 = vmatprep.subr.bf16.mxu0 %v7638_v55  ;;  %v7642_v11 = vld [vmem:[%s13870_s3 + $0xf0] ss:$8 sps:$4 sm:$0xff]   ;;  %v7647_v53 = vld [vmem:[%s13870_s3 + $0x104] ss:$8 sps:$4 sm:$0xff]  }
  0x8e   : > { %3046 = vmatpush1.bf16.msra.mxu0 %v7636_v28 }
  0x8f   : > { %v659_v23 = vmax.f32 %v589_v24, 1.0  ;;  %v640_v43 = vadd.f32 %v639_v46, %v638_v38  ;;  %3047 = vmatprep.subr.bf16.mxu0 %v7641_v19 }
  0x91   : > { %7741 = vrcp.f32 %v659_v23  ;;  %v642_v15 = vadd.f32 %v641_v8, %v640_v43  ;;  %v667_v43 = vld [vmem:[%s13869_s2] sm:$0xf] }
  0x92   : > { %3048 = vmatpush1.bf16.msra.mxu0 %v7639_v62 }
  0x93   : > { %6738 = vmatmul.mubr.msk.bf16.gmra.mrb[40].mxu0 %vm859_vm2, %v8266_v61  ;;  %6754 = vmatmul.mubr.msk.bf16.gmra.mrb[40].mxu1 %vm859_vm2, %v8490_v21  ;;  %v644_v60 = vadd.f32 %v643_v35, %v642_v15 }
  0x94   : > { %1111 = vmatprep.mubr.bf16.mxu0 %v13885_v0  ;;  %1271 = vmatprep.mubr.bf16.mxu1 %v13885_v0 }
  0x95   : > { %v646_v10 = vadd.f32 %v645_v58, %v644_v60 }
  0x97   : > { %v648_v16 = vadd.f32 %v647_v47, %v646_v10 }
  0x99   : > { %v650_v29 = vadd.f32 %v8545_v56, %v648_v16  ;;  %v7644_v56 = vld [vmem:[%s13870_s3 + $0xf4] ss:$8 sps:$4 sm:$0xff]  }
  0x9a   : > { %3049 = vmatprep.subr.bf16.mxu0 %v7644_v56 }
  0x9b   : > { %v7742_v63 = vpop.eup %7741  ;;  %6739 = vmatmul.mubr.msk.bf16.gmra.mrb[44].mxu0 %vm859_vm2, %v8309_v25  ;;  %6755 = vmatmul.mubr.msk.bf16.gmra.mrb[44].mxu1 %vm859_vm2, %v8513_v51  ;;  %v652_v26 = vadd.f32 %v8560_v49, %v650_v29 }
  0x9c   : > { %3875 = vperm.xlu0 %7399, %v7742_v63   ;;  %1121 = vmatprep.mubr.bf16.mxu0 %v13885_v0 }
  0x9d   : > { %1281 = vmatprep.mubr.bf16.mxu1 %v13885_v0  ;;  %v653_v18 = vrot.slane %v652_v26, 4  ;;  %3050 = vmatpush1.bf16.msra.mxu0 %v7642_v11 }
  0x9e   : > { %3372 = vmatprep.subr.bf16.mxu0 %v7647_v53 }
  0x9f   : > { %v654_v31 = vadd.f32 %v653_v18, %v652_v26 }
  0xa1   : > { %v655_v50 = vrot.slane %v654_v31, 2 }
  0xa3   : > { %6740 = vmatmul.mubr.msk.bf16.gmra.mrb[48].mxu0 %vm859_vm2, %v8272_v2  ;;  %6756 = vmatmul.mubr.msk.bf16.gmra.mrb[48].mxu1 %vm859_vm2, %v8510_v45  ;;  %v656_v49 = vadd.f32 %v655_v50, %v654_v31 }
  0xa4   : > { %1131 = vmatprep.mubr.bf16.mxu0 %v13885_v0  ;;  %1291 = vmatprep.mubr.bf16.mxu1 %v13885_v0 }
  0xa5   : > { %v657_v27 = vrot.slane %v656_v49, 1 }
  0xa7   : > { %v658_v44 = vadd.f32 %v657_v27, %v656_v49 }
  0xa9   : > { %v660_v55 = vmax.f32 %v658_v44, 1.0 }
  0xab   : > { %7743 = vrcp.f32 %v660_v55  ;;  %6741 = vmatmul.mubr.msk.bf16.gmra.mrb[52].mxu0 %vm859_vm2, %v8327_v36  ;;  %6757 = vmatmul.mubr.msk.bf16.gmra.mrb[52].mxu1 %vm859_vm2, %v8571_v1 }
  0xac   : > { %1141 = vmatprep.mubr.bf16.mxu0 %v13885_v0  ;;  %1301 = vmatprep.mubr.bf16.mxu1 %v13885_v0 }
  0xb3   : > { %6742 = vmatmul.mubr.msk.bf16.gmra.mrb[56].mxu0 %vm859_vm2, %v8317_v30  ;;  %6758 = vmatmul.mubr.msk.bf16.gmra.mrb[56].mxu1 %vm859_vm2, %v8567_v40 }
  0xb4   : > { %1151 = vmatprep.mubr.bf16.mxu0 %v13885_v0  ;;  %1311 = vmatprep.mubr.bf16.mxu1 %v13885_v0 }
  0xb5   : > { %v7744_v42 = vpop.eup %7743 }
  0xb6   : > { %3880 = vperm.xlu1 %7410, %v7744_v42  }
  0xbb   : > { %6743 = vmatmul.mubr.msk.bf16.gmra.mrb[60].mxu0 %vm859_vm2, %v8372_v6  ;;  %6759 = vmatmul.mubr.msk.bf16.gmra.mrb[60].mxu1 %vm859_vm2, %v8501_v32 }
  0xbc   : > { %1354 = vmatprep.mubr.bf16.mxu1 %v13885_v0 }
  0xc3   : > { %6761 = vmatmul.mubr.msk.bf16.vlgmr.msra.gmra.mrb[64].mxu1 %vm859_vm2, %v8176_v3 }
  0xc4   : > { %1364 = vmatprep.mubr.bf16.mxu1 %v13885_v0 }
  0xc5   : > { %v7402_v3 = vpop.permute.xlu0 %7401 }
  0xc6   : > { %v8828_v47 = vunpack.i.h.bf16 %v7402_v3  ;;  %v8830_v63 = vunpack.i.l.bf16 %v7402_v3 }
  0xc8   : > { %14298 = vst [vmem:[#allocation18_spill] sm:$0xff] %v8828_v47  ;;  %14299 = vst [vmem:[#allocation19_spill] sm:$0xff] %v8830_v63 }
  0xc9   : > { %v7407_v28 = vpop.permute.xlu0 %7406 }
  0xca   : > { %v8832_v29 = vunpack.i.h.bf16 %v7407_v28 }
  0xcb   : > { %6762 = vmatmul.mubr.msk.bf16.gmra.mrb[68].mxu1 %vm859_vm2, %v8182_v7  ;;  %v8765_v7 = vpop.permute.xlu1 %7412 }
  0xcc   : > { %1374 = vmatprep.mubr.bf16.mxu1 %v13885_v0  ;;  %14300 = vst [vmem:[#allocation20_spill] sm:$0xff] %v8832_v29 }
  0xcf   : > { %v8772_v24 = vpop.permute.xlu1 %7417 }
  0xd3   : > { %6763 = vmatmul.mubr.msk.bf16.gmra.mrb[72].mxu1 %vm859_vm2, %v8193_v14  ;;  %v8770_v14 = vpop.permute.xlu0 %7422 }
  0xd4   : > { %1384 = vmatprep.mubr.bf16.mxu1 %v13885_v0 }
  0xdb   : > { %6764 = vmatmul.mubr.msk.bf16.gmra.mrb[76].mxu1 %vm859_vm2, %v8211_v22  ;;  %v8779_v22 = vpop.permute.xlu1 %7427 }
  0xdc   : > { %1394 = vmatprep.mubr.bf16.mxu1 %v13885_v0 }
  0xdf   : > { %v8786_v54 = vpop.permute.xlu1 %7437 }
  0xe3   : > { %6765 = vmatmul.mubr.msk.bf16.gmra.mrb[80].mxu1 %vm859_vm2, %v8205_v20  ;;  %v8777_v20 = vpop.permute.xlu0 %7432  ;;  %v8790_v19 = vpop.permute.xlu1 %7447 }
  0xe4   : > { %1404 = vmatprep.mubr.bf16.mxu1 %v13885_v0 }
  0xe7   : > { %v8797_v38 = vpop.permute.xlu1 %7457 }
  0xeb   : > { %6766 = vmatmul.mubr.msk.bf16.gmra.mrb[84].mxu1 %vm859_vm2, %v8231_v39  ;;  %v8784_v39 = vpop.permute.xlu0 %7442  ;;  %v8806_v62 = vpop.permute.xlu1 %7467 }
  0xec   : > { %1414 = vmatprep.mubr.bf16.mxu1 %v13885_v0 }
  0xef   : > { %v8788_v46 = vpop.permute.xlu0 %7452  ;;  %v8826_v60 = vpop.permute.xlu1 %7477 }
  0xf3   : > { %6767 = vmatmul.mubr.msk.bf16.gmra.mrb[88].mxu1 %vm859_vm2, %v8222_v33  ;;  %v669_v33 = vlaneseq  ;;  %v8795_v23 = vpop.permute.xlu0 %7462 }
  0xf4   : > { %1424 = vmatprep.mubr.bf16.mxu1 %v13885_v0 }
  0xf7   : > { %v8804_v8 = vpop.permute.xlu0 %7472 }
  0xfb   : > { %6768 = vmatmul.mubr.msk.bf16.gmra.mrb[92].mxu1 %vm859_vm2, %v8255_v52  ;;  %v8801_v52 = vshrl.u32 %v669_v33, 7  ;;  %v7483_v58 = vpop.permute.xlu0 %7482 }
  0xfc   : > { %1434 = vmatprep.mubr.bf16.mxu1 %v13885_v0  ;;  %v8836_v11 = vunpack.i.h.bf16 %v7483_v58  ;;  %v8838_v56 = vunpack.i.l.bf16 %v7483_v58 }
  0xfd   : > { %14295 = vst [vmem:[#allocation15_spill] sm:$0xff] %v8801_v52  ;;  %v8815_v35 = vsub.s32 1, %v8801_v52 }
  0xfe   : > { %14301 = vst [vmem:[#allocation21_spill] sm:$0xff] %v8836_v11  ;;  %14302 = vst [vmem:[#allocation22_spill] sm:$0xff] %v8838_v56 }
  0xff   : > { %14297 = vst [vmem:[#allocation17_spill] sm:$0xff] %v8815_v35  ;;  %v8823_v15 = vrot.slane %v667_v43, %v8815_v35  ;;  %v8846_v35 = vunpack.i.l.bf16 %v7407_v28 }
 0x101   : > { %14303 = vst [vmem:[#allocation23_spill] sm:$0xff] %v8846_v35 }
 0x103   : > { %6769 = vmatmul.mubr.msk.bf16.gmra.mrb[96].mxu1 %vm859_vm2, %v8234_v41  ;;  %v8809_v41 = vsub.s32 0, %v8801_v52 }
 0x104   : > { %1444 = vmatprep.mubr.bf16.mxu1 %v13885_v0 }
 0x105   : > { %14296 = vst [vmem:[#allocation16_spill] sm:$0xff] %v8809_v41 }
 0x10b   : > { %6770 = vmatmul.mubr.msk.bf16.gmra.mrb[100].mxu1 %vm859_vm2, %v8275_v5  ;;  %v8820_v5 = vrot.slane %v667_v43, %v8809_v41 }
 0x10c   : > { %1454 = vmatprep.mubr.bf16.mxu1 %v13885_v0 }
 0x113   : > { %6771 = vmatmul.mubr.msk.bf16.gmra.mrb[104].mxu1 %vm859_vm2, %v8266_v61 }
 0x114   : > { %1464 = vmatprep.mubr.bf16.mxu1 %v13885_v0 }
 0x115   : > { %v1003_v10 = vpop.f32.mrb[0].mxu0 }
 0x116   : > { %v1163_v16 = vpop.f32.mrb[0].mxu1  ;;  %v1004_v61 = vadd.f32 %v1003_v10, %v8820_v5  ;;  %v1005_v31 = vpop.f32.mrb[1].mxu0 }
 0x117   : > { %v1164_v26 = vadd.f32 %v1163_v16, %v8820_v5  ;;  %v1165_v18 = vpop.f32.mrb[1].mxu1  ;;  %v1006_v49 = vadd.f32 %v1005_v31, %v8823_v15  ;;  %v1007_v27 = vpop.f32.mrb[2].mxu0 }
 0x118   : > { %v1166_v50 = vadd.f32 %v1165_v18, %v8823_v15  ;;  %v1167_v53 = vpop.f32.mrb[2].mxu1  ;;  %v1675_v44 = vmax.f32 %v1004_v61, 0.0  ;;  %v1008_v42 = vadd.f32 %v1007_v27, %v8820_v5  ;;  %v1009_v33 = vpop.f32.mrb[3].mxu0  ;;  %v8849_v18 = vunpack.i.h.bf16 %v8765_v7 }
 0x119   : > { %v1803_v55 = vmax.f32 %v1164_v26, 0.0  ;;  %v1168_v3 = vadd.f32 %v1167_v53, %v8820_v5  ;;  %v1169_v43 = vpop.f32.mrb[3].mxu1  ;;  %v1676_v16 = vmax.f32 %v1006_v49, 0.0  ;;  %v1010_v0 = vadd.f32 %v1009_v33, %v8823_v15  ;;  %v7488_v31 = vpop.permute.xlu1 %7487 }
 0x11a   : > { %v1804_v10 = vmax.f32 %v1166_v50, 0.0  ;;  %v1170_v58 = vadd.f32 %v1169_v43, %v8823_v15  ;;  %14304 = vst [vmem:[#allocation24_spill] sm:$0xff] %v8849_v18  ;;  %v1679_v61 = vmax.f32 %v1008_v42, 0.0  ;;  %v8853_v27 = vunpack.i.h.bf16 %v7488_v31 }
 0x11b   : > { %v1807_v26 = vmax.f32 %v1168_v3, 0.0  ;;  %6772 = vmatmul.mubr.msk.bf16.gmra.mrb[108].mxu1 %vm859_vm2, %v8309_v25  ;;  %v2251_v50 = vmul.f32 %v8830_v63, %v1675_v44  ;;  %v1680_v49 = vmax.f32 %v1010_v0, 0.0  ;;  %v14306_v33 = vmov 0  }
 0x11c   : > { %14305 = vst [vmem:[#allocation25_spill] sm:$0xff] %v8853_v27  ;;  %v1808_v53 = vmax.f32 %v1170_v58, 0.0  ;;  %1474 = vmatprep.mubr.bf16.mxu1 %v14306_v33  ;;  %v2255_v28 = vmul.f32 %v8828_v47, %v1679_v61  ;;  %v8859_v43 = vmul.f32 %v8838_v56, %v1804_v10  ;;  %v8862_v41 = vmul.f32 %v8838_v56, %v1803_v55 }
 0x11d   : > { %v8865_v42 = vmul.f32 %v8836_v11, %v1807_v26  ;;  %v8867_v25 = vunpack.i.l.bf16 %v7488_v31  ;;  %v2252_v3 = vmul.f32 %v8830_v63, %v1676_v16  ;;  %v2256_v0 = vmul.f32 %v8828_v47, %v1680_v49  ;;  %v1013_v44 = vpop.f32.mrb[4].mxu0  ;;  %v7645_v49 = vld [vmem:[%s13870_s3 + $0x100] ss:$8 sps:$4 sm:$0xff]  }
 0x11e   : > { %14307 = vst [vmem:[#allocation26_spill] sm:$0xff] %v8862_v41  ;;  %v1173_v58 = vpop.f32.mrb[4].mxu1  ;;  %v8872_v32 = vmul.f32 %v8836_v11, %v1808_v53  ;;  %v2507_v61 = vpack.c.bf16 %v2255_v28, %v2251_v50  ;;  %v1014_v10 = vadd.f32 %v1013_v44, %v8820_v5  ;;  %v1015_v40 = vpop.f32.mrb[5].mxu0 }
 0x11f   : > { %14308 = vst [vmem:[#allocation27_spill] sm:$0xff] %v8865_v42  ;;  %14309 = vst [vmem:[#allocation28_spill] sm:$0xff] %v8867_v25  ;;  %v1174_v55 = vadd.f32 %v1173_v58, %v8820_v5  ;;  %v1175_v56 = vpop.f32.mrb[5].mxu1  ;;  %v1016_v26 = vadd.f32 %v1015_v40, %v8823_v15  ;;  %v1017_v16 = vpop.f32.mrb[6].mxu0  ;;  %v2508_v1 = vpack.c.bf16 %v2256_v0, %v2252_v3  ;;  %v7650_v3 = vld [vmem:[%s13870_s3 + $0x114] ss:$8 sps:$4 sm:$0xff]  }
 0x120   : > { %v1176_v53 = vadd.f32 %v1175_v56, %v8823_v15  ;;  %v1177_v50 = vpop.f32.mrb[6].mxu1  ;;  %v1683_v44 = vmax.f32 %v1014_v10, 0.0  ;;  %v1018_v58 = vadd.f32 %v1017_v16, %v8820_v5  ;;  %v1019_v11 = vpop.f32.mrb[7].mxu0  ;;  %v8893_v10 = vunpack.i.l.bf16 %v8765_v7  ;;  %v7648_v7 = vld [vmem:[%s13870_s3 + $0x110] ss:$8 sps:$4 sm:$0xff]  }
 0x121   : > { %v1811_v45 = vmax.f32 %v1174_v55, 0.0  ;;  %v1178_v31 = vadd.f32 %v1177_v50, %v8820_v5  ;;  %v1179_v40 = vpop.f32.mrb[7].mxu1  ;;  %v1684_v0 = vmax.f32 %v1016_v26, 0.0  ;;  %v1020_v41 = vadd.f32 %v1019_v11, %v8823_v15  ;;  %3051 = vmatprep.mubr.bf16.mxu0 %v2508_v1 }
 0x122   : > { %v1812_v56 = vmax.f32 %v1176_v53, 0.0  ;;  %v1180_v42 = vadd.f32 %v1179_v40, %v8823_v15  ;;  %14310 = vst [vmem:[#allocation29_spill] sm:$0xff] %v8893_v10  ;;  %v1687_v16 = vmax.f32 %v1018_v58, 0.0  ;;  %3052 = vmatmul.mubr.bf16.vlgmr.msra.gmra.mrb[64].mxu0 %v2507_v61  ;;  %v8901_v26 = vunpack.i.h.bf16 %v8770_v14 }
 0x123   : > { %6773 = vmatmul.mubr.msk.bf16.gmra.mrb[112].mxu1 %vm859_vm2, %v8272_v2  ;;  %v1815_v55 = vmax.f32 %v1178_v31, 0.0  ;;  %v8898_v50 = vmul.f32 %v8867_v25, %v1811_v45  ;;  %v1688_v11 = vmax.f32 %v1020_v41, 0.0  ;;  %3373 = vmatpush1.bf16.msra.mxu0 %v7645_v49  ;;  %v8911_v2 = vunpack.i.l.bf16 %v8770_v14  ;;  %v7653_v41 = vld [vmem:[%s13870_s3 + $0x124] ss:$8 sps:$4 sm:$0xff]  }
 0x124   : > { %14312 = vst [vmem:[#allocation31_spill] sm:$0xff] %v8901_v26  ;;  %v1816_v1 = vmax.f32 %v1180_v42, 0.0  ;;  %1484 = vmatprep.mubr.bf16.mxu1 %v14306_v33  ;;  %v8908_v53 = vmul.f32 %v8867_v25, %v1812_v56  ;;  %v2259_v45 = vmul.f32 %v8846_v35, %v1683_v44  ;;  %v2263_v61 = vmul.f32 %v8832_v29, %v1687_v16 }
 0x125   : > { %14311 = vst [vmem:[#allocation30_spill] sm:$0xff] %v8898_v50  ;;  %14313 = vst [vmem:[#allocation32_spill] sm:$0xff] %v8911_v2  ;;  %3374 = vmatprep.subr.bf16.mxu0 %v7650_v3  ;;  %v8919_v42 = vmul.f32 %v8853_v27, %v1815_v55  ;;  %v8922_v31 = vunpack.i.h.bf16 %v8772_v24  ;;  %v2260_v49 = vmul.f32 %v8846_v35, %v1684_v0  ;;  %v1023_v58 = vpop.f32.mrb[8].mxu0 }
 0x126   : > { %v2264_v14 = vmul.f32 %v8832_v29, %v1688_v11  ;;  %v1183_v40 = vpop.f32.mrb[8].mxu1  ;;  %v8927_v44 = vmul.f32 %v8853_v27, %v1816_v1  ;;  %v1024_v3 = vadd.f32 %v1023_v58, %v8820_v5  ;;  %v1025_v28 = vpop.f32.mrb[9].mxu0  ;;  %v2511_v55 = vpack.c.bf16 %v2263_v61, %v2259_v45  ;;  %v7651_v1 = vld [vmem:[%s13870_s3 + $0x120] ss:$8 sps:$4 sm:$0xff]  }
 0x127   : > { %14314 = vst [vmem:[#allocation33_spill] sm:$0xff] %v8919_v42  ;;  %14315 = vst [vmem:[#allocation34_spill] sm:$0xff] %v8922_v31  ;;  %v1184_v56 = vadd.f32 %v1183_v40, %v8820_v5  ;;  %v1185_v16 = vpop.f32.mrb[9].mxu1  ;;  %v1026_v0 = vadd.f32 %v1025_v28, %v8823_v15  ;;  %v1027_v11 = vpop.f32.mrb[10].mxu0  ;;  %3375 = vmatpush1.bf16.msra.mxu0 %v7648_v7  ;;  %v7656_v28 = vld [vmem:[%s13870_s3 + $0x134] ss:$8 sps:$4 sm:$0xff]  }
 0x128   : > { %v1186_v47 = vadd.f32 %v1185_v16, %v8823_v15  ;;  %v1187_v29 = vpop.f32.mrb[10].mxu1  ;;  %v2512_v35 = vpack.c.bf16 %v2264_v14, %v2260_v49  ;;  %v1691_v40 = vmax.f32 %v1024_v3, 0.0  ;;  %v1028_v61 = vadd.f32 %v1027_v11, %v8820_v5  ;;  %v1029_v16 = vpop.f32.mrb[11].mxu0  ;;  %3376 = vmatprep.subr.bf16.mxu0 %v7653_v41 }
 0x129   : > { %v1819_v45 = vmax.f32 %v1184_v56, 0.0  ;;  %v1188_v25 = vadd.f32 %v1187_v29, %v8820_v5  ;;  %v1189_v27 = vpop.f32.mrb[11].mxu1  ;;  %v7493_v7 = vpop.permute.xlu0 %7492  ;;  %v1692_v14 = vmax.f32 %v1026_v0, 0.0  ;;  %v1030_v50 = vadd.f32 %v1029_v16, %v8823_v15 }
 0x12a   : > { %v1820_v49 = vmax.f32 %v1186_v47, 0.0  ;;  %v1190_v58 = vadd.f32 %v1189_v27, %v8823_v15  ;;  %3061 = vmatprep.mubr.bf16.mxu0 %v2512_v35  ;;  %v8947_v3 = vunpack.i.h.bf16 %v7493_v7  ;;  %v8949_v56 = vunpack.i.l.bf16 %v7493_v7  ;;  %v7654_v35 = vld [vmem:[%s13870_s3 + $0x130] ss:$8 sps:$4 sm:$0xff]  }
 0x12b   : > { %v1695_v29 = vmax.f32 %v1028_v61, 0.0  ;;  %v1823_v11 = vmax.f32 %v1188_v25, 0.0  ;;  %6774 = vmatmul.mubr.msk.bf16.gmra.mrb[116].mxu1 %vm859_vm2, %v8327_v36  ;;  %3062 = vmatmul.mubr.bf16.gmra.mrb[68].mxu0 %v2511_v55  ;;  %v8954_v41 = vunpack.i.h.bf16 %v8777_v20  ;;  %v8957_v47 = vunpack.i.l.bf16 %v8772_v24  ;;  %v7659_v25 = vld [vmem:[%s13870_s3 + $0x144] ss:$8 sps:$4 sm:$0xff]  }
 0x12c   : > { %14316 = vst [vmem:[#allocation35_spill] sm:$0xff] %v8947_v3  ;;  %14317 = vst [vmem:[#allocation36_spill] sm:$0xff] %v8949_v56  ;;  %v1696_v0 = vmax.f32 %v1030_v50, 0.0  ;;  %v1824_v16 = vmax.f32 %v1190_v58, 0.0  ;;  %1494 = vmatprep.mubr.bf16.mxu1 %v14306_v33  ;;  %3377 = vmatpush1.bf16.msra.mxu0 %v7651_v1  ;;  %v2267_v27 = vmul.f32 %v8893_v10, %v1691_v40 }
 0x12d   : > { %14318 = vst [vmem:[#allocation37_spill] sm:$0xff] %v8954_v41  ;;  %14319 = vst [vmem:[#allocation38_spill] sm:$0xff] %v8957_v47  ;;  %v2271_v36 = vmul.f32 %v8849_v18, %v1695_v29  ;;  %3378 = vmatprep.subr.bf16.mxu0 %v7656_v28  ;;  %v8969_v24 = vmul.f32 %v8949_v56, %v1819_v45  ;;  %v8972_v50 = vmul.f32 %v8947_v3, %v1823_v11  ;;  %v1033_v58 = vpop.f32.mrb[12].mxu0 }
 0x12e   : > { %v2268_v55 = vmul.f32 %v8893_v10, %v1692_v14  ;;  %v2272_v1 = vmul.f32 %v8849_v18, %v1696_v0  ;;  %v1193_v61 = vpop.f32.mrb[12].mxu1  ;;  %v8977_v40 = vmul.f32 %v8949_v56, %v1820_v49  ;;  %v8980_v28 = vmul.f32 %v8947_v3, %v1824_v16  ;;  %v1035_v29 = vpop.f32.mrb[13].mxu0  ;;  %v7657_v16 = vld [vmem:[%s13870_s3 + $0x140] ss:$8 sps:$4 sm:$0xff]  }
 0x12f   : > { %14320 = vst [vmem:[#allocation39_spill] sm:$0xff] %v8969_v24  ;;  %14321 = vst [vmem:[#allocation40_spill] sm:$0xff] %v8972_v50  ;;  %v1034_v7 = vadd.f32 %v1033_v58, %v8820_v5  ;;  %v1194_v45 = vadd.f32 %v1193_v61, %v8820_v5  ;;  %v1195_v42 = vpop.f32.mrb[13].mxu1  ;;  %v2515_v11 = vpack.c.bf16 %v2271_v36, %v2267_v27  ;;  %v1037_v10 = vpop.f32.mrb[14].mxu0 }
 0x130   : > { %v1036_v0 = vadd.f32 %v1035_v29, %v8823_v15  ;;  %v1196_v18 = vadd.f32 %v1195_v42, %v8823_v15  ;;  %v1197_v49 = vpop.f32.mrb[14].mxu1  ;;  %v2516_v56 = vpack.c.bf16 %v2272_v1, %v2268_v55  ;;  %3379 = vmatpush1.bf16.msra.mxu0 %v7654_v35  ;;  %v1038_v36 = vadd.f32 %v1037_v10, %v8820_v5  ;;  %v1039_v29 = vpop.f32.mrb[15].mxu0  ;;  %v7662_v42 = vld [vmem:[%s13870_s3 + $0x154] ss:$8 sps:$4 sm:$0xff]  }
 0x131   : > { %v1699_v61 = vmax.f32 %v1034_v7, 0.0  ;;  %v1827_v27 = vmax.f32 %v1194_v45, 0.0  ;;  %v1198_v14 = vadd.f32 %v1197_v49, %v8820_v5  ;;  %v1199_v3 = vpop.f32.mrb[15].mxu1  ;;  %3380 = vmatprep.subr.bf16.mxu0 %v7659_v25  ;;  %v7498_v35 = vpop.permute.xlu1 %7497  ;;  %v1040_v24 = vadd.f32 %v1039_v29, %v8823_v15 }
 0x132   : > { %v1700_v55 = vmax.f32 %v1036_v0, 0.0  ;;  %v1828_v1 = vmax.f32 %v1196_v18, 0.0  ;;  %v1200_v58 = vadd.f32 %v1199_v3, %v8823_v15  ;;  %3071 = vmatprep.mubr.bf16.mxu0 %v2516_v56  ;;  %v9000_v7 = vunpack.i.h.bf16 %v7498_v35  ;;  %v7660_v3 = vld [vmem:[%s13870_s3 + $0x150] ss:$8 sps:$4 sm:$0xff]  }
 0x133   : > { %v9002_v10 = vunpack.i.l.bf16 %v7498_v35  ;;  %v1703_v45 = vmax.f32 %v1038_v36, 0.0  ;;  %v1831_v49 = vmax.f32 %v1198_v14, 0.0  ;;  %6775 = vmatmul.mubr.msk.bf16.gmra.mrb[120].mxu1 %vm859_vm2, %v8317_v30  ;;  %3072 = vmatmul.mubr.bf16.gmra.mrb[72].mxu0 %v2515_v11  ;;  %v9007_v25 = vunpack.i.l.bf16 %v8777_v20  ;;  %v7665_v20 = vld [vmem:[%s13870_s3 + $0x164] ss:$8 sps:$4 sm:$0xff]  }
 0x134   : > { %14322 = vst [vmem:[#allocation41_spill] sm:$0xff] %v9000_v7  ;;  %v9010_v18 = vunpack.i.h.bf16 %v8779_v22  ;;  %v1704_v0 = vmax.f32 %v1040_v24, 0.0  ;;  %v1832_v29 = vmax.f32 %v1200_v58, 0.0  ;;  %1504 = vmatprep.mubr.bf16.mxu1 %v14306_v33  ;;  %3381 = vmatpush1.bf16.msra.mxu0 %v7657_v16  ;;  %v2275_v56 = vmul.f32 %v8957_v47, %v1699_v61 }
 0x135   : > { %14323 = vst [vmem:[#allocation42_spill] sm:$0xff] %v9002_v10  ;;  %14324 = vst [vmem:[#allocation43_spill] sm:$0xff] %v9007_v25  ;;  %v2279_v30 = vmul.f32 %v8922_v31, %v1703_v45  ;;  %3382 = vmatprep.subr.bf16.mxu0 %v7662_v42  ;;  %v9022_v11 = vmul.f32 %v9002_v10, %v1827_v27  ;;  %v9025_v24 = vmul.f32 %v9000_v7, %v1831_v49  ;;  %v1043_v58 = vpop.f32.mrb[16].mxu0 }
 0x136   : > { %14325 = vst [vmem:[#allocation44_spill] sm:$0xff] %v9010_v18  ;;  %v2276_v14 = vmul.f32 %v8957_v47, %v1700_v55  ;;  %v2280_v16 = vmul.f32 %v8922_v31, %v1704_v0  ;;  %v1203_v36 = vpop.f32.mrb[16].mxu1  ;;  %v9030_v61 = vmul.f32 %v9002_v10, %v1828_v1  ;;  %v9033_v42 = vmul.f32 %v9000_v7, %v1832_v29  ;;  %v1045_v45 = vpop.f32.mrb[17].mxu0  ;;  %v7663_v29 = vld [vmem:[%s13870_s3 + $0x160] ss:$8 sps:$4 sm:$0xff]  }
 0x137   : > { %14326 = vst [vmem:[#allocation45_spill] sm:$0xff] %v9022_v11  ;;  %14327 = vst [vmem:[#allocation46_spill] sm:$0xff] %v9025_v24  ;;  %v1044_v35 = vadd.f32 %v1043_v58, %v8820_v5  ;;  %v1204_v27 = vadd.f32 %v1203_v36, %v8820_v5  ;;  %v1205_v50 = vpop.f32.mrb[17].mxu1  ;;  %v2519_v49 = vpack.c.bf16 %v2279_v30, %v2275_v56  ;;  %v1047_v47 = vpop.f32.mrb[18].mxu0 }
 0x138   : > { %v1046_v0 = vadd.f32 %v1045_v45, %v8823_v15  ;;  %v1206_v31 = vadd.f32 %v1205_v50, %v8823_v15  ;;  %v1207_v1 = vpop.f32.mrb[18].mxu1  ;;  %v2520_v10 = vpack.c.bf16 %v2280_v16, %v2276_v14  ;;  %3383 = vmatpush1.bf16.msra.mxu0 %v7660_v3  ;;  %v1048_v30 = vadd.f32 %v1047_v47, %v8820_v5  ;;  %v1049_v45 = vpop.f32.mrb[19].mxu0  ;;  %v7668_v50 = vld [vmem:[%s13870_s3 + $0x174] ss:$8 sps:$4 sm:$0xff]  }
 0x139   : > { %v1707_v36 = vmax.f32 %v1044_v35, 0.0  ;;  %v1835_v56 = vmax.f32 %v1204_v27, 0.0  ;;  %v1208_v55 = vadd.f32 %v1207_v1, %v8820_v5  ;;  %v1209_v7 = vpop.f32.mrb[19].mxu1  ;;  %3384 = vmatprep.subr.bf16.mxu0 %v7665_v20  ;;  %v7503_v3 = vpop.permute.xlu0 %7502  ;;  %v1050_v11 = vadd.f32 %v1049_v45, %v8823_v15 }
 0x13a   : > { %v1708_v14 = vmax.f32 %v1046_v0, 0.0  ;;  %v1836_v16 = vmax.f32 %v1206_v31, 0.0  ;;  %v1210_v58 = vadd.f32 %v1209_v7, %v8823_v15  ;;  %3081 = vmatprep.mubr.bf16.mxu0 %v2520_v10  ;;  %v9053_v35 = vunpack.i.h.bf16 %v7503_v3  ;;  %v7666_v7 = vld [vmem:[%s13870_s3 + $0x170] ss:$8 sps:$4 sm:$0xff]  }
 0x13b   : > { %v9055_v47 = vunpack.i.l.bf16 %v7503_v3  ;;  %v1711_v27 = vmax.f32 %v1048_v30, 0.0  ;;  %v1839_v1 = vmax.f32 %v1208_v55, 0.0  ;;  %6776 = vmatmul.mubr.msk.bf16.gmra.mrb[124].mxu1 %vm859_vm2, %v8372_v6  ;;  %3082 = vmatmul.mubr.bf16.gmra.mrb[76].mxu0 %v2519_v49  ;;  %v9060_v20 = vunpack.i.h.bf16 %v8784_v39  ;;  %v7671_v49 = vld [vmem:[%s13870_s3 + $0x184] ss:$8 sps:$4 sm:$0xff]  }
 0x13c   : > { %14328 = vst [vmem:[#allocation47_spill] sm:$0xff] %v9053_v35  ;;  %v9063_v31 = vunpack.i.l.bf16 %v8779_v22  ;;  %v1712_v0 = vmax.f32 %v1050_v11, 0.0  ;;  %v1840_v45 = vmax.f32 %v1210_v58, 0.0  ;;  %1514 = vmatprep.mubr.bf16.mxu1 %v14306_v33  ;;  %3385 = vmatpush1.bf16.msra.mxu0 %v7663_v29  ;;  %v2283_v10 = vmul.f32 %v8911_v2, %v1707_v36 }
 0x13d   : > { %14329 = vst [vmem:[#allocation48_spill] sm:$0xff] %v9055_v47  ;;  %14330 = vst [vmem:[#allocation49_spill] sm:$0xff] %v9060_v20  ;;  %v2287_v6 = vmul.f32 %v8901_v26, %v1711_v27  ;;  %3386 = vmatprep.subr.bf16.mxu0 %v7668_v50  ;;  %v9075_v22 = vmul.f32 %v9055_v47, %v1835_v56  ;;  %v9078_v11 = vmul.f32 %v9053_v35, %v1839_v1  ;;  %v1053_v58 = vpop.f32.mrb[20].mxu0 }
 0x13e   : > { %14331 = vst [vmem:[#allocation50_spill] sm:$0xff] %v9063_v31  ;;  %v2284_v55 = vmul.f32 %v8911_v2, %v1708_v14  ;;  %v2288_v29 = vmul.f32 %v8901_v26, %v1712_v0  ;;  %v1213_v30 = vpop.f32.mrb[20].mxu1  ;;  %v9083_v36 = vmul.f32 %v9055_v47, %v1836_v16  ;;  %v9086_v50 = vmul.f32 %v9053_v35, %v1840_v45  ;;  %v1055_v27 = vpop.f32.mrb[21].mxu0  ;;  %v7669_v45 = vld [vmem:[%s13870_s3 + $0x180] ss:$8 sps:$4 sm:$0xff]  }
 0x13f   : > { %14332 = vst [vmem:[#allocation51_spill] sm:$0xff] %v9075_v22  ;;  %14333 = vst [vmem:[#allocation52_spill] sm:$0xff] %v9078_v11  ;;  %v1054_v3 = vadd.f32 %v1053_v58, %v8820_v5  ;;  %v1214_v56 = vadd.f32 %v1213_v30, %v8820_v5  ;;  %v1215_v24 = vpop.f32.mrb[21].mxu1  ;;  %v2523_v1 = vpack.c.bf16 %v2287_v6, %v2283_v10  ;;  %v1057_v2 = vpop.f32.mrb[22].mxu0 }
 0x140   : > { %v1056_v0 = vadd.f32 %v1055_v27, %v8823_v15  ;;  %v1216_v26 = vadd.f32 %v1215_v24, %v8823_v15  ;;  %v1217_v16 = vpop.f32.mrb[22].mxu1  ;;  %v2524_v47 = vpack.c.bf16 %v2288_v29, %v2284_v55  ;;  %3387 = vmatpush1.bf16.msra.mxu0 %v7666_v7  ;;  %v1058_v6 = vadd.f32 %v1057_v2, %v8820_v5  ;;  %v1059_v27 = vpop.f32.mrb[23].mxu0  ;;  %v7674_v24 = vld [vmem:[%s13870_s3 + $0x194] ss:$8 sps:$4 sm:$0xff]  }
 0x141   : > { %v1715_v30 = vmax.f32 %v1054_v3, 0.0  ;;  %v1843_v10 = vmax.f32 %v1214_v56, 0.0  ;;  %v1218_v14 = vadd.f32 %v1217_v16, %v8820_v5  ;;  %v1219_v35 = vpop.f32.mrb[23].mxu1  ;;  %3388 = vmatprep.subr.bf16.mxu0 %v7671_v49  ;;  %v7508_v7 = vpop.permute.xlu1 %7507  ;;  %v1060_v22 = vadd.f32 %v1059_v27, %v8823_v15 }
 0x142   : > { %v1716_v55 = vmax.f32 %v1056_v0, 0.0  ;;  %v1844_v29 = vmax.f32 %v1216_v26, 0.0  ;;  %v1220_v58 = vadd.f32 %v1219_v35, %v8823_v15  ;;  %3091 = vmatprep.mubr.bf16.mxu0 %v2524_v47  ;;  %v9106_v3 = vunpack.i.h.bf16 %v7508_v7  ;;  %v7672_v35 = vld [vmem:[%s13870_s3 + $0x190] ss:$8 sps:$4 sm:$0xff]  }
 0x143   : > { %v9108_v2 = vunpack.i.l.bf16 %v7508_v7  ;;  %v1719_v56 = vmax.f32 %v1058_v6, 0.0  ;;  %v1847_v16 = vmax.f32 %v1218_v14, 0.0  ;;  %6777 = vmatmul.mubr.msk.bf16.gmra.mrb[128].mxu1 %vm859_vm2, %v8179_v4  ;;  %3092 = vmatmul.mubr.bf16.gmra.mrb[80].mxu0 %v2523_v1  ;;  %v9113_v49 = vunpack.i.l.bf16 %v8784_v39  ;;  %v7677_v6 = vld [vmem:[%s13870_s3 + $0x1a4] ss:$8 sps:$4 sm:$0xff]  }
 0x144   : > { %14334 = vst [vmem:[#allocation53_spill] sm:$0xff] %v9106_v3  ;;  %v9116_v26 = vunpack.i.h.bf16 %v8786_v54  ;;  %v1720_v0 = vmax.f32 %v1060_v22, 0.0  ;;  %v1848_v27 = vmax.f32 %v1220_v58, 0.0  ;;  %1524 = vmatprep.mubr.bf16.mxu1 %v14306_v33  ;;  %3389 = vmatpush1.bf16.msra.mxu0 %v7669_v45  ;;  %v2291_v47 = vmul.f32 %v9063_v31, %v1715_v30 }
 0x145   : > { %14335 = vst [vmem:[#allocation54_spill] sm:$0xff] %v9108_v2  ;;  %14336 = vst [vmem:[#allocation55_spill] sm:$0xff] %v9113_v49  ;;  %v2295_v4 = vmul.f32 %v9010_v18, %v1719_v56  ;;  %3390 = vmatprep.subr.bf16.mxu0 %v7674_v24  ;;  %v9125_v39 = vmul.f32 %v9108_v2, %v1843_v10  ;;  %v9128_v1 = vmul.f32 %v9106_v3, %v1847_v16  ;;  %v1063_v45 = vpop.f32.mrb[24].mxu0 }
 0x146   : > { %14337 = vst [vmem:[#allocation56_spill] sm:$0xff] %v9116_v26  ;;  %v2292_v22 = vmul.f32 %v9063_v31, %v1716_v55  ;;  %v2296_v14 = vmul.f32 %v9010_v18, %v1720_v0  ;;  %v1223_v58 = vpop.f32.mrb[24].mxu1  ;;  %v9136_v30 = vmul.f32 %v9108_v2, %v1844_v29  ;;  %v9139_v24 = vmul.f32 %v9106_v3, %v1848_v27  ;;  %v1065_v56 = vpop.f32.mrb[25].mxu0  ;;  %v7675_v27 = vld [vmem:[%s13870_s3 + $0x1a0] ss:$8 sps:$4 sm:$0xff]  }
 0x147   : > { %14338 = vst [vmem:[#allocation57_spill] sm:$0xff] %v9125_v39  ;;  %14339 = vst [vmem:[#allocation58_spill] sm:$0xff] %v9128_v1  ;;  %v1064_v10 = vadd.f32 %v1063_v45, %v8820_v5  ;;  %v1224_v7 = vadd.f32 %v1223_v58, %v8820_v5  ;;  %v1225_v55 = vpop.f32.mrb[25].mxu1  ;;  %v2527_v16 = vpack.c.bf16 %v2295_v4, %v2291_v47  ;;  %v1067_v11 = vpop.f32.mrb[26].mxu0 }
 0x148   : > { %v1066_v18 = vadd.f32 %v1065_v56, %v8823_v15  ;;  %v1226_v31 = vadd.f32 %v1225_v55, %v8823_v15  ;;  %v1227_v29 = vpop.f32.mrb[26].mxu1  ;;  %v2528_v2 = vpack.c.bf16 %v2296_v14, %v2292_v22  ;;  %3391 = vmatpush1.bf16.msra.mxu0 %v7672_v35  ;;  %v1068_v4 = vadd.f32 %v1067_v11, %v8820_v5  ;;  %v1069_v56 = vpop.f32.mrb[27].mxu0 }
 0x149   : > { %v1723_v58 = vmax.f32 %v1064_v10, 0.0  ;;  %v1851_v47 = vmax.f32 %v1224_v7, 0.0  ;;  %v1228_v0 = vadd.f32 %v1227_v29, %v8820_v5  ;;  %v1229_v3 = vpop.f32.mrb[27].mxu1  ;;  %3392 = vmatprep.subr.bf16.mxu0 %v7677_v6  ;;  %v7513_v55 = vpop.permute.xlu0 %7512  ;;  %v1070_v35 = vadd.f32 %v1069_v56, %v8823_v15 }
 0x14a   : > { %v1724_v39 = vmax.f32 %v1066_v18, 0.0  ;;  %v1852_v22 = vmax.f32 %v1226_v31, 0.0  ;;  %v1230_v14 = vadd.f32 %v1229_v3, %v8823_v15  ;;  %3101 = vmatprep.mubr.bf16.mxu0 %v2528_v2  ;;  %v9156_v1 = vunpack.i.h.bf16 %v7513_v55 }
 0x14b   : > { %v9158_v45 = vunpack.i.l.bf16 %v7513_v55  ;;  %v1727_v10 = vmax.f32 %v1068_v4, 0.0  ;;  %v1855_v7 = vmax.f32 %v1228_v0, 0.0  ;;  %6778 = vmatmul.mubr.msk.bf16.gmra.mrb[132].mxu1 %vm859_vm2, %v8201_v17  ;;  %3102 = vmatmul.mubr.bf16.gmra.mrb[84].mxu0 %v2527_v16  ;;  %v9163_v11 = vunpack.i.h.bf16 %v8788_v46 }
 0x14c   : > { %14340 = vst [vmem:[#allocation59_spill] sm:$0xff] %v9156_v1  ;;  %v9166_v18 = vunpack.i.l.bf16 %v8786_v54  ;;  %v1728_v31 = vmax.f32 %v1070_v35, 0.0  ;;  %v1856_v6 = vmax.f32 %v1230_v14, 0.0  ;;  %1534 = vmatprep.mubr.bf16.mxu1 %v14306_v33  ;;  %3393 = vmatpush1.bf16.msra.mxu0 %v7675_v27  ;;  %v2299_v3 = vmul.f32 %v9007_v25, %v1723_v58 }
 0x14d   : > { %14341 = vst [vmem:[#allocation60_spill] sm:$0xff] %v9158_v45  ;;  %14342 = vst [vmem:[#allocation61_spill] sm:$0xff] %v9163_v11  ;;  %v2303_v2 = vmul.f32 %v8954_v41, %v1727_v10  ;;  %v9172_v0 = vmul.f32 %v9158_v45, %v1851_v47  ;;  %v9175_v17 = vmul.f32 %v9156_v1, %v1855_v7  ;;  %v1073_v29 = vpop.f32.mrb[28].mxu0 }
 0x14e   : > { %14343 = vst [vmem:[#allocation62_spill] sm:$0xff] %v9166_v18  ;;  %v2300_v16 = vmul.f32 %v9007_v25, %v1724_v39  ;;  %v2304_v54 = vmul.f32 %v8954_v41, %v1728_v31  ;;  %v1233_v4 = vpop.f32.mrb[28].mxu1  ;;  %v9180_v56 = vmul.f32 %v9158_v45, %v1852_v22  ;;  %v9183_v27 = vmul.f32 %v9156_v1, %v1856_v6  ;;  %v1075_v55 = vpop.f32.mrb[29].mxu0 }
 0x14f   : > { %14344 = vst [vmem:[#allocation63_spill] sm:$0xff] %v9172_v0  ;;  %14345 = vst [vmem:[#allocation64_spill] sm:$0xff] %v9175_v17  ;;  %v1074_v58 = vadd.f32 %v1073_v29, %v8820_v5  ;;  %v1234_v47 = vadd.f32 %v1233_v4, %v8820_v5  ;;  %v1235_v35 = vpop.f32.mrb[29].mxu1  ;;  %v2531_v14 = vpack.c.bf16 %v2303_v2, %v2299_v3  ;;  %v1077_v31 = vpop.f32.mrb[30].mxu0 }
 0x150   : > { %14346 = vst [vmem:[#allocation65_spill] sm:$0xff] %v9180_v56  ;;  %v1076_v10 = vadd.f32 %v1075_v55, %v8823_v15  ;;  %v1236_v7 = vadd.f32 %v1235_v35, %v8823_v15  ;;  %v1237_v22 = vpop.f32.mrb[30].mxu1  ;;  %v2532_v45 = vpack.c.bf16 %v2304_v54, %v2300_v16  ;;  %v1078_v4 = vadd.f32 %v1077_v31, %v8820_v5  ;;  %v1079_v3 = vpop.f32.mrb[31].mxu0 }
 0x151   : > { %v1731_v1 = vmax.f32 %v1074_v58, 0.0  ;;  %v1859_v29 = vmax.f32 %v1234_v47, 0.0  ;;  %v1238_v41 = vadd.f32 %v1237_v22, %v8820_v5  ;;  %v1239_v2 = vpop.f32.mrb[31].mxu1  ;;  %v7518_v25 = vpop.permute.xlu1 %7517  ;;  %v1080_v55 = vadd.f32 %v1079_v3, %v8823_v15 }
 0x152   : > { %v1732_v39 = vmax.f32 %v1076_v10, 0.0  ;;  %v1860_v0 = vmax.f32 %v1236_v7, 0.0  ;;  %v1240_v35 = vadd.f32 %v1239_v2, %v8823_v15  ;;  %3111 = vmatprep.mubr.bf16.mxu0 %v2532_v45  ;;  %v9197_v16 = vunpack.i.h.bf16 %v7518_v25  ;;  %v7678_v2 = vld [vmem:[%s13870_s3 + $0x1b0] ss:$8 sps:$4 sm:$0xff]   ;;  %v7523_v6 = vpop.permute.xlu0 %7522 }
 0x153   : > { %v9199_v54 = vunpack.i.l.bf16 %v7518_v25  ;;  %v1735_v58 = vmax.f32 %v1078_v4, 0.0  ;;  %v1863_v47 = vmax.f32 %v1238_v41, 0.0  ;;  %6779 = vmatmul.mubr.msk.bf16.gmra.mrb[136].mxu1 %vm859_vm2, %v8228_v37  ;;  %3112 = vmatmul.mubr.bf16.gmra.mrb[88].mxu0 %v2531_v14  ;;  %v9204_v31 = vunpack.i.l.bf16 %v8788_v46 }
 0x154   : > { %14347 = vst [vmem:[#allocation66_spill] sm:$0xff] %v9197_v16  ;;  %v9207_v10 = vunpack.i.h.bf16 %v8790_v19  ;;  %v1736_v7 = vmax.f32 %v1080_v55, 0.0  ;;  %v1864_v22 = vmax.f32 %v1240_v35, 0.0  ;;  %1544 = vmatprep.mubr.bf16.mxu1 %v14306_v33  ;;  %v2307_v45 = vmul.f32 %v9166_v18, %v1731_v1  ;;  %v7680_v1 = vld [vmem:[%s13870_s3 + $0x1b4] ss:$8 sps:$4 sm:$0xff]  }
 0x155   : > { %14348 = vst [vmem:[#allocation67_spill] sm:$0xff] %v9199_v54  ;;  %14349 = vst [vmem:[#allocation68_spill] sm:$0xff] %v9204_v31  ;;  %v2311_v25 = vmul.f32 %v9116_v26, %v1735_v58  ;;  %v9213_v41 = vmul.f32 %v9199_v54, %v1859_v29  ;;  %v9216_v37 = vmul.f32 %v9197_v16, %v1863_v47  ;;  %v1083_v4 = vpop.f32.mrb[32].mxu0  ;;  %3394 = vmatprep.subr.bf16.mxu0 %v7680_v1 }
 0x156   : > { %14350 = vst [vmem:[#allocation69_spill] sm:$0xff] %v9207_v10  ;;  %v2308_v46 = vmul.f32 %v9166_v18, %v1732_v39  ;;  %v2312_v14 = vmul.f32 %v9116_v26, %v1736_v7  ;;  %v1243_v3 = vpop.f32.mrb[32].mxu1  ;;  %v9227_v29 = vmul.f32 %v9199_v54, %v1860_v0  ;;  %v9230_v55 = vmul.f32 %v9197_v16, %v1864_v22  ;;  %v1085_v58 = vpop.f32.mrb[33].mxu0 }
 0x157   : > { %14351 = vst [vmem:[#allocation70_spill] sm:$0xff] %v9213_v41  ;;  %v1084_v39 = vadd.f32 %v1083_v4, %v8820_v5  ;;  %v1244_v35 = vadd.f32 %v1243_v3, %v8820_v5  ;;  %v1245_v47 = vpop.f32.mrb[33].mxu1  ;;  %v2535_v7 = vpack.c.bf16 %v2311_v25, %v2307_v45  ;;  %v1086_v26 = vadd.f32 %v1085_v58, %v8823_v15  ;;  %v1087_v17 = vpop.f32.mrb[34].mxu0 }
 0x158   : > { %v1246_v18 = vadd.f32 %v1245_v47, %v8823_v15  ;;  %v1247_v0 = vpop.f32.mrb[34].mxu1  ;;  %v2536_v54 = vpack.c.bf16 %v2312_v14, %v2308_v46  ;;  %v1088_v3 = vadd.f32 %v1087_v17, %v8820_v5  ;;  %v1089_v25 = vpop.f32.mrb[35].mxu0  ;;  %3395 = vmatpush1.bf16.msra.mxu0 %v7678_v2  ;;  %v9244_v14 = vunpack.i.h.bf16 %v7523_v6 }
 0x159   : > { %v1739_v4 = vmax.f32 %v1084_v39, 0.0  ;;  %v1867_v16 = vmax.f32 %v1244_v35, 0.0  ;;  %v1248_v45 = vadd.f32 %v1247_v0, %v8820_v5  ;;  %v1249_v56 = vpop.f32.mrb[35].mxu1  ;;  %v1740_v58 = vmax.f32 %v1086_v26, 0.0 }
 0x15a   : > { %v1868_v41 = vmax.f32 %v1246_v18, 0.0  ;;  %v1090_v47 = vadd.f32 %v1089_v25, %v8823_v15  ;;  %v1250_v46 = vadd.f32 %v1249_v56, %v8823_v15  ;;  %3121 = vmatprep.mubr.bf16.mxu0 %v2536_v54  ;;  %14352 = vst [vmem:[#allocation71_spill] sm:$0xff] %v9244_v14  ;;  %v9246_v1 = vunpack.i.l.bf16 %v7523_v6 }
 0x15b   : > { %v1743_v39 = vmax.f32 %v1088_v3, 0.0  ;;  %v1871_v35 = vmax.f32 %v1248_v45, 0.0  ;;  %6780 = vmatmul.mubr.msk.bf16.gmra.mrb[140].mxu1 %vm859_vm2, %v8290_v12  ;;  %3122 = vmatmul.mubr.bf16.gmra.mrb[92].mxu0 %v2535_v7  ;;  %v9251_v17 = vunpack.i.h.bf16 %v8795_v23  ;;  %v9254_v26 = vunpack.i.l.bf16 %v8790_v19 }
 0x15c   : > { %14353 = vst [vmem:[#allocation72_spill] sm:$0xff] %v9246_v1  ;;  %v1744_v18 = vmax.f32 %v1090_v47, 0.0  ;;  %v1872_v2 = vmax.f32 %v1250_v46, 0.0  ;;  %1554 = vmatprep.mubr.bf16.mxu1 %v14306_v33  ;;  %v2315_v56 = vmul.f32 %v9113_v49, %v1739_v4  ;;  %v9260_v54 = vmul.f32 %v9246_v1, %v1867_v16 }
 0x15d   : > { %14354 = vst [vmem:[#allocation73_spill] sm:$0xff] %v9251_v17  ;;  %14355 = vst [vmem:[#allocation74_spill] sm:$0xff] %v9254_v26  ;;  %v2319_v6 = vmul.f32 %v9060_v20, %v1743_v39  ;;  %v9263_v12 = vmul.f32 %v9244_v14, %v1871_v35  ;;  %v2316_v7 = vmul.f32 %v9113_v49, %v1740_v58  ;;  %v7528_v49 = vpop.permute.xlu1 %7527 }
 0x15e   : > { %14356 = vst [vmem:[#allocation75_spill] sm:$0xff] %v9260_v54  ;;  %v2320_v0 = vmul.f32 %v9060_v20, %v1744_v18  ;;  %v1093_v19 = vpop.f32.mrb[36].mxu0  ;;  %v1253_v3 = vpop.f32.mrb[36].mxu1  ;;  %v9268_v45 = vmul.f32 %v9246_v1, %v1868_v41  ;;  %v9271_v25 = vmul.f32 %v9244_v14, %v1872_v2 }
 0x15f   : > { %14357 = vst [vmem:[#allocation76_spill] sm:$0xff] %v9263_v12  ;;  %v1094_v4 = vadd.f32 %v1093_v19, %v8820_v5  ;;  %v1254_v16 = vadd.f32 %v1253_v3, %v8820_v5  ;;  %v1095_v47 = vpop.f32.mrb[37].mxu0  ;;  %v1255_v46 = vpop.f32.mrb[37].mxu1  ;;  %v2539_v39 = vpack.c.bf16 %v2319_v6, %v2315_v56 }
 0x160   : > { %14358 = vst [vmem:[#allocation77_spill] sm:$0xff] %v9268_v45  ;;  %v1096_v35 = vadd.f32 %v1095_v47, %v8823_v15  ;;  %v1256_v18 = vadd.f32 %v1255_v46, %v8823_v15  ;;  %v1097_v22 = vpop.f32.mrb[38].mxu0  ;;  %v1257_v41 = vpop.f32.mrb[38].mxu1  ;;  %v2540_v1 = vpack.c.bf16 %v2320_v0, %v2316_v7  ;;  %v9285_v7 = vunpack.i.h.bf16 %v7528_v49 }
 0x161   : > { %v1747_v14 = vmax.f32 %v1094_v4, 0.0  ;;  %v1875_v19 = vmax.f32 %v1254_v16, 0.0  ;;  %v1098_v3 = vadd.f32 %v1097_v22, %v8820_v5  ;;  %v1258_v20 = vadd.f32 %v1257_v41, %v8820_v5  ;;  %v1099_v56 = vpop.f32.mrb[39].mxu0  ;;  %v1259_v6 = vpop.f32.mrb[39].mxu1 }
 0x162   : > { %v1748_v58 = vmax.f32 %v1096_v35, 0.0  ;;  %v1876_v54 = vmax.f32 %v1256_v18, 0.0  ;;  %v1100_v47 = vadd.f32 %v1099_v56, %v8823_v15  ;;  %v1260_v46 = vadd.f32 %v1259_v6, %v8823_v15  ;;  %3131 = vmatprep.mubr.bf16.mxu0 %v2540_v1  ;;  %14359 = vst [vmem:[#allocation78_spill] sm:$0xff] %v9285_v7  ;;  %v7681_v6 = vld [vmem:[%s13870_s3 + $0x1c0] ss:$8 sps:$4 sm:$0xff]   ;;  %v7533_v2 = vpop.permute.xlu0 %7532 }
 0x163   : > { %v9287_v0 = vunpack.i.l.bf16 %v7528_v49  ;;  %v1751_v4 = vmax.f32 %v1098_v3, 0.0  ;;  %v1879_v16 = vmax.f32 %v1258_v20, 0.0  ;;  %6781 = vmatmul.mubr.msk.bf16.gmra.mrb[144].mxu1 %vm859_vm2, %v8340_v48  ;;  %3132 = vmatmul.mubr.bf16.gmra.mrb[96].mxu0 %v2539_v39  ;;  %v9292_v22 = vunpack.i.l.bf16 %v8795_v23 }
 0x164   : > { %v9295_v35 = vunpack.i.h.bf16 %v8797_v38  ;;  %v1752_v18 = vmax.f32 %v1100_v47, 0.0  ;;  %v1880_v41 = vmax.f32 %v1260_v46, 0.0  ;;  %1564 = vmatprep.mubr.bf16.mxu1 %v14306_v33  ;;  %v2323_v1 = vmul.f32 %v9254_v26, %v1747_v14  ;;  %v7683_v14 = vld [vmem:[%s13870_s3 + $0x1c4] ss:$8 sps:$4 sm:$0xff]  }
 0x165   : > { %14360 = vst [vmem:[#allocation79_spill] sm:$0xff] %v9287_v0  ;;  %14361 = vst [vmem:[#allocation80_spill] sm:$0xff] %v9292_v22  ;;  %v2327_v49 = vmul.f32 %v9207_v10, %v1751_v4  ;;  %v9301_v20 = vmul.f32 %v9287_v0, %v1875_v19  ;;  %v9304_v48 = vmul.f32 %v9285_v7, %v1879_v16  ;;  %3396 = vmatprep.subr.bf16.mxu0 %v7683_v14 }
 0x166   : > { %14362 = vst [vmem:[#allocation81_spill] sm:$0xff] %v9295_v35  ;;  %v2324_v23 = vmul.f32 %v9254_v26, %v1748_v58  ;;  %v2328_v39 = vmul.f32 %v9207_v10, %v1752_v18  ;;  %v1103_v3 = vpop.f32.mrb[40].mxu0  ;;  %v1263_v56 = vpop.f32.mrb[40].mxu1  ;;  %v9315_v19 = vmul.f32 %v9287_v0, %v1876_v54  ;;  %v9318_v47 = vmul.f32 %v9285_v7, %v1880_v41 }
 0x167   : > { %14363 = vst [vmem:[#allocation82_spill] sm:$0xff] %v9301_v20  ;;  %v1104_v58 = vadd.f32 %v1103_v3, %v8820_v5  ;;  %v1264_v46 = vadd.f32 %v1263_v56, %v8820_v5  ;;  %v1105_v4 = vpop.f32.mrb[41].mxu0  ;;  %v1265_v16 = vpop.f32.mrb[41].mxu1  ;;  %v2543_v18 = vpack.c.bf16 %v2327_v49, %v2323_v1  ;;  %3397 = vmatpush1.bf16.msra.mxu0 %v7681_v6  ;;  %v9334_v14 = vunpack.i.l.bf16 %v7533_v2 }
 0x168   : > { %v1106_v10 = vadd.f32 %v1105_v4, %v8823_v15  ;;  %v1266_v26 = vadd.f32 %v1265_v16, %v8823_v15  ;;  %v1107_v12 = vpop.f32.mrb[42].mxu0  ;;  %v1267_v54 = vpop.f32.mrb[42].mxu1  ;;  %v2544_v0 = vpack.c.bf16 %v2328_v39, %v2324_v23  ;;  %v9332_v39 = vunpack.i.h.bf16 %v7533_v2 }
 0x169   : > { %v1755_v3 = vmax.f32 %v1104_v58, 0.0  ;;  %v1883_v7 = vmax.f32 %v1264_v46, 0.0  ;;  %v1108_v56 = vadd.f32 %v1107_v12, %v8820_v5  ;;  %v1268_v1 = vadd.f32 %v1267_v54, %v8820_v5  ;;  %v1109_v49 = vpop.f32.mrb[43].mxu0  ;;  %v1269_v45 = vpop.f32.mrb[43].mxu1  ;;  %14365 = vst [vmem:[#allocation84_spill] sm:$0xff] %v9334_v14 }
 0x16a   : > { %v1756_v4 = vmax.f32 %v1106_v10, 0.0  ;;  %v1884_v20 = vmax.f32 %v1266_v26, 0.0  ;;  %v1110_v16 = vadd.f32 %v1109_v49, %v8823_v15  ;;  %v1270_v23 = vadd.f32 %v1269_v45, %v8823_v15  ;;  %3141 = vmatprep.mubr.bf16.mxu0 %v2544_v0  ;;  %14364 = vst [vmem:[#allocation83_spill] sm:$0xff] %v9332_v39 }
 0x16b   : > { %v1759_v58 = vmax.f32 %v1108_v56, 0.0  ;;  %v1887_v46 = vmax.f32 %v1268_v1, 0.0  ;;  %6782 = vmatmul.mubr.msk.bf16.gmra.mrb[148].mxu1 %vm859_vm2, %v8423_v57  ;;  %3142 = vmatmul.mubr.bf16.gmra.mrb[100].mxu0 %v2543_v18  ;;  %v9339_v12 = vunpack.i.h.bf16 %v8804_v8  ;;  %v9342_v10 = vunpack.i.l.bf16 %v8797_v38 }
 0x16c   : > { %v1760_v26 = vmax.f32 %v1110_v16, 0.0  ;;  %v1888_v6 = vmax.f32 %v1270_v23, 0.0  ;;  %1574 = vmatprep.mubr.bf16.mxu1 %v14306_v33  ;;  %v2331_v45 = vmul.f32 %v9204_v31, %v1755_v3  ;;  %v9348_v0 = vmul.f32 %v9334_v14, %v1883_v7 }
 0x16d   : > { %14366 = vst [vmem:[#allocation85_spill] sm:$0xff] %v9339_v12  ;;  %14367 = vst [vmem:[#allocation86_spill] sm:$0xff] %v9342_v10  ;;  %v2335_v2 = vmul.f32 %v9163_v11, %v1759_v58  ;;  %v9351_v57 = vmul.f32 %v9332_v39, %v1887_v46  ;;  %v2332_v18 = vmul.f32 %v9204_v31, %v1756_v4  ;;  %v7538_v31 = vpop.permute.xlu1 %7537 }
 0x16e   : > { %14368 = vst [vmem:[#allocation87_spill] sm:$0xff] %v9348_v0  ;;  %v2336_v54 = vmul.f32 %v9163_v11, %v1760_v26  ;;  %v1113_v38 = vpop.f32.mrb[44].mxu0  ;;  %v1273_v56 = vpop.f32.mrb[44].mxu1  ;;  %v9356_v1 = vmul.f32 %v9334_v14, %v1884_v20  ;;  %v9359_v49 = vmul.f32 %v9332_v39, %v1888_v6 }
 0x16f   : > { %14369 = vst [vmem:[#allocation88_spill] sm:$0xff] %v9351_v57  ;;  %v1114_v3 = vadd.f32 %v1113_v38, %v8820_v5  ;;  %v1274_v7 = vadd.f32 %v1273_v56, %v8820_v5  ;;  %v1115_v16 = vpop.f32.mrb[45].mxu0  ;;  %v1275_v23 = vpop.f32.mrb[45].mxu1  ;;  %v2547_v58 = vpack.c.bf16 %v2335_v2, %v2331_v45 }
 0x170   : > { %14370 = vst [vmem:[#allocation89_spill] sm:$0xff] %v9356_v1  ;;  %v1116_v46 = vadd.f32 %v1115_v16, %v8823_v15  ;;  %v1276_v26 = vadd.f32 %v1275_v23, %v8823_v15  ;;  %v1117_v41 = vpop.f32.mrb[46].mxu0  ;;  %v1277_v20 = vpop.f32.mrb[46].mxu1  ;;  %v2548_v14 = vpack.c.bf16 %v2336_v54, %v2332_v18  ;;  %v9373_v18 = vunpack.i.h.bf16 %v7538_v31 }
 0x171   : > { %v1763_v39 = vmax.f32 %v1114_v3, 0.0  ;;  %v1891_v38 = vmax.f32 %v1274_v7, 0.0  ;;  %v1118_v56 = vadd.f32 %v1117_v41, %v8820_v5  ;;  %v1278_v11 = vadd.f32 %v1277_v20, %v8820_v5  ;;  %v1119_v45 = vpop.f32.mrb[47].mxu0  ;;  %v1279_v2 = vpop.f32.mrb[47].mxu1 }
 0x172   : > { %v1764_v4 = vmax.f32 %v1116_v46, 0.0  ;;  %v1892_v0 = vmax.f32 %v1276_v26, 0.0  ;;  %v1120_v16 = vadd.f32 %v1119_v45, %v8823_v15  ;;  %v1280_v23 = vadd.f32 %v1279_v2, %v8823_v15  ;;  %3151 = vmatprep.mubr.bf16.mxu0 %v2548_v14  ;;  %14371 = vst [vmem:[#allocation90_spill] sm:$0xff] %v9373_v18  ;;  %v7684_v2 = vld [vmem:[%s13870_s3 + $0x1d0] ss:$8 sps:$4 sm:$0xff]   ;;  %v7543_v6 = vpop.permute.xlu0 %7542 }
 0x173   : > { %v9375_v54 = vunpack.i.l.bf16 %v7538_v31  ;;  %v1767_v3 = vmax.f32 %v1118_v56, 0.0  ;;  %v1895_v7 = vmax.f32 %v1278_v11, 0.0  ;;  %6783 = vmatmul.mubr.msk.bf16.gmra.mrb[152].mxu1 %vm859_vm2, %v8434_v9  ;;  %3152 = vmatmul.mubr.bf16.gmra.mrb[104].mxu0 %v2547_v58  ;;  %v9380_v41 = vunpack.i.l.bf16 %v8804_v8 }
 0x174   : > { %v9383_v46 = vunpack.i.h.bf16 %v8806_v62  ;;  %v1768_v26 = vmax.f32 %v1120_v16, 0.0  ;;  %v1896_v20 = vmax.f32 %v1280_v23, 0.0  ;;  %1584 = vmatprep.mubr.bf16.mxu1 %v14306_v33  ;;  %v2339_v14 = vmul.f32 %v9342_v10, %v1763_v39  ;;  %v7686_v39 = vld [vmem:[%s13870_s3 + $0x1d4] ss:$8 sps:$4 sm:$0xff]  }
 0x175   : > { %14372 = vst [vmem:[#allocation91_spill] sm:$0xff] %v9375_v54  ;;  %14373 = vst [vmem:[#allocation92_spill] sm:$0xff] %v9380_v41  ;;  %v2343_v31 = vmul.f32 %v9295_v35, %v1767_v3  ;;  %v9389_v11 = vmul.f32 %v9375_v54, %v1891_v38  ;;  %v9392_v9 = vmul.f32 %v9373_v18, %v1895_v7  ;;  %3398 = vmatprep.subr.bf16.mxu0 %v7686_v39 }
 0x176   : > { %14374 = vst [vmem:[#allocation93_spill] sm:$0xff] %v9383_v46  ;;  %v2340_v8 = vmul.f32 %v9342_v10, %v1764_v4  ;;  %v2344_v58 = vmul.f32 %v9295_v35, %v1768_v26  ;;  %v1123_v56 = vpop.f32.mrb[48].mxu0  ;;  %v1283_v45 = vpop.f32.mrb[48].mxu1  ;;  %v9403_v38 = vmul.f32 %v9375_v54, %v1892_v0  ;;  %v9406_v16 = vmul.f32 %v9373_v18, %v1896_v20 }
 0x177   : > { %14375 = vst [vmem:[#allocation94_spill] sm:$0xff] %v9389_v11  ;;  %v1124_v4 = vadd.f32 %v1123_v56, %v8820_v5  ;;  %v1284_v23 = vadd.f32 %v1283_v45, %v8820_v5  ;;  %v1125_v3 = vpop.f32.mrb[49].mxu0  ;;  %v1285_v7 = vpop.f32.mrb[49].mxu1  ;;  %v2551_v26 = vpack.c.bf16 %v2343_v31, %v2339_v14  ;;  %3399 = vmatpush1.bf16.msra.mxu0 %v7684_v2  ;;  %v9422_v39 = vunpack.i.l.bf16 %v7543_v6 }
 0x178   : > { %v1126_v35 = vadd.f32 %v1125_v3, %v8823_v15  ;;  %v1286_v10 = vadd.f32 %v1285_v7, %v8823_v15  ;;  %v1127_v57 = vpop.f32.mrb[50].mxu0  ;;  %v1287_v0 = vpop.f32.mrb[50].mxu1  ;;  %v2552_v54 = vpack.c.bf16 %v2344_v58, %v2340_v8  ;;  %v9420_v58 = vunpack.i.h.bf16 %v7543_v6 }
 0x179   : > { %v1771_v56 = vmax.f32 %v1124_v4, 0.0  ;;  %v1899_v18 = vmax.f32 %v1284_v23, 0.0  ;;  %v1128_v45 = vadd.f32 %v1127_v57, %v8820_v5  ;;  %v1288_v14 = vadd.f32 %v1287_v0, %v8820_v5  ;;  %v1129_v31 = vpop.f32.mrb[51].mxu0  ;;  %v1289_v1 = vpop.f32.mrb[51].mxu1  ;;  %14377 = vst [vmem:[#allocation96_spill] sm:$0xff] %v9422_v39 }
 0x17a   : > { %v1772_v3 = vmax.f32 %v1126_v35, 0.0  ;;  %v1900_v11 = vmax.f32 %v1286_v10, 0.0  ;;  %v1130_v7 = vadd.f32 %v1129_v31, %v8823_v15  ;;  %v1290_v8 = vadd.f32 %v1289_v1, %v8823_v15  ;;  %3161 = vmatprep.mubr.bf16.mxu0 %v2552_v54  ;;  %14376 = vst [vmem:[#allocation95_spill] sm:$0xff] %v9420_v58 }
 0x17b   : > { %v1775_v4 = vmax.f32 %v1128_v45, 0.0  ;;  %v1903_v23 = vmax.f32 %v1288_v14, 0.0  ;;  %6784 = vmatmul.mubr.msk.bf16.gmra.mrb[156].mxu1 %vm859_vm2, %v8457_v59  ;;  %3162 = vmatmul.mubr.bf16.gmra.mrb[108].mxu0 %v2551_v26  ;;  %v9427_v57 = vunpack.i.l.bf16 %v8806_v62  ;;  %v9430_v35 = vunpack.i.h.bf16 %v8826_v60 }
 0x17c   : > { %v1776_v10 = vmax.f32 %v1130_v7, 0.0  ;;  %v1904_v2 = vmax.f32 %v1290_v8, 0.0  ;;  %1594 = vmatprep.mubr.bf16.mxu1 %v14306_v33  ;;  %v2347_v1 = vmul.f32 %v9292_v22, %v1771_v56  ;;  %v9436_v54 = vmul.f32 %v9422_v39, %v1899_v18 }
 0x17d   : > { %14378 = vst [vmem:[#allocation97_spill] sm:$0xff] %v9427_v57  ;;  %14379 = vst [vmem:[#allocation98_spill] sm:$0xff] %v9430_v35  ;;  %v2351_v6 = vmul.f32 %v9251_v17, %v1775_v4  ;;  %v9439_v59 = vmul.f32 %v9420_v58, %v1903_v23  ;;  %v2348_v62 = vmul.f32 %v9292_v22, %v1772_v3  ;;  %v7548_v22 = vpop.permute.xlu1 %7547 }
 0x17e   : > { %14380 = vst [vmem:[#allocation99_spill] sm:$0xff] %v9436_v54  ;;  %v2352_v26 = vmul.f32 %v9251_v17, %v1776_v10  ;;  %v1133_v0 = vpop.f32.mrb[52].mxu0  ;;  %v1293_v45 = vpop.f32.mrb[52].mxu1  ;;  %v9444_v14 = vmul.f32 %v9422_v39, %v1900_v11  ;;  %v9447_v31 = vmul.f32 %v9420_v58, %v1904_v2  ;;  %v9463_v2 = vunpack.i.l.bf16 %v7548_v22 }
 0x17f   : > { %14381 = vst [vmem:[#allocation100_spill] sm:$0xff] %v9439_v59  ;;  %v1134_v56 = vadd.f32 %v1133_v0, %v8820_v5  ;;  %v1294_v18 = vadd.f32 %v1293_v45, %v8820_v5  ;;  %v1135_v7 = vpop.f32.mrb[53].mxu0  ;;  %v1295_v8 = vpop.f32.mrb[53].mxu1  ;;  %v2555_v4 = vpack.c.bf16 %v2351_v6, %v2347_v1 }
 0x180   : > { %14382 = vst [vmem:[#allocation101_spill] sm:$0xff] %v9444_v14  ;;  %14383 = vst [vmem:[#allocation102_spill] sm:$0xff] %v9447_v31  ;;  %v1136_v23 = vadd.f32 %v1135_v7, %v8823_v15  ;;  %v1296_v10 = vadd.f32 %v1295_v8, %v8823_v15  ;;  %v1137_v20 = vpop.f32.mrb[54].mxu0  ;;  %v1297_v11 = vpop.f32.mrb[54].mxu1  ;;  %v2556_v39 = vpack.c.bf16 %v2352_v26, %v2348_v62  ;;  %v9461_v26 = vunpack.i.h.bf16 %v7548_v22 }
 0x181   : > { %v1779_v58 = vmax.f32 %v1134_v56, 0.0  ;;  %v1907_v0 = vmax.f32 %v1294_v18, 0.0  ;;  %v1138_v45 = vadd.f32 %v1137_v20, %v8820_v5  ;;  %v1298_v17 = vadd.f32 %v1297_v11, %v8820_v5  ;;  %v1139_v1 = vpop.f32.mrb[55].mxu0  ;;  %v1299_v6 = vpop.f32.mrb[55].mxu1  ;;  %14385 = vst [vmem:[#allocation104_spill] sm:$0xff] %v9463_v2 }
 0x182   : > { %v1780_v3 = vmax.f32 %v1136_v23, 0.0  ;;  %v1908_v54 = vmax.f32 %v1296_v10, 0.0  ;;  %v1140_v7 = vadd.f32 %v1139_v1, %v8823_v15  ;;  %v1300_v8 = vadd.f32 %v1299_v6, %v8823_v15  ;;  %3171 = vmatprep.mubr.bf16.mxu0 %v2556_v39  ;;  %v7553_v62 = vpop.permute.xlu0 %7552  ;;  %14384 = vst [vmem:[#allocation103_spill] sm:$0xff] %v9461_v26  ;;  %v7687_v6 = vld [vmem:[%s13870_s3 + $0x1e0] ss:$8 sps:$4 sm:$0xff]  }
 0x183   : > { %v1783_v56 = vmax.f32 %v1138_v45, 0.0  ;;  %v1911_v18 = vmax.f32 %v1298_v17, 0.0  ;;  %6785 = vmatmul.mubr.msk.bf16.gmra.mrb[160].mxu1 %vm859_vm2, %v8460_v34  ;;  %3172 = vmatmul.mubr.bf16.gmra.mrb[112].mxu0 %v2555_v4  ;;  %v9468_v20 = vunpack.i.l.bf16 %v8826_v60  ;;  %v9470_v23 = vunpack.i.h.bf16 %v7553_v62 }
 0x184   : > { %v1784_v10 = vmax.f32 %v1140_v7, 0.0  ;;  %v1912_v11 = vmax.f32 %v1300_v8, 0.0  ;;  %1604 = vmatprep.mubr.bf16.mxu1 %v14306_v33  ;;  %v2355_v39 = vmul.f32 %v9427_v57, %v1779_v58  ;;  %v9476_v45 = vmul.f32 %v9463_v2, %v1907_v0  ;;  %v7689_v58 = vld [vmem:[%s13870_s3 + $0x1e4] ss:$8 sps:$4 sm:$0xff]  }
 0x185   : > { %14386 = vst [vmem:[#allocation105_spill] sm:$0xff] %v9468_v20  ;;  %14387 = vst [vmem:[#allocation106_spill] sm:$0xff] %v9470_v23  ;;  %v2359_v22 = vmul.f32 %v9383_v46, %v1783_v56  ;;  %v9479_v17 = vmul.f32 %v9461_v26, %v1911_v18  ;;  %v2356_v34 = vmul.f32 %v9427_v57, %v1780_v3  ;;  %3400 = vmatprep.subr.bf16.mxu0 %v7689_v58 }
 0x186   : > { %14388 = vst [vmem:[#allocation107_spill] sm:$0xff] %v9476_v45  ;;  %v2360_v60 = vmul.f32 %v9383_v46, %v1784_v10  ;;  %v1143_v4 = vpop.f32.mrb[56].mxu0  ;;  %v1303_v1 = vpop.f32.mrb[56].mxu1  ;;  %v9490_v0 = vmul.f32 %v9463_v2, %v1908_v54  ;;  %v9493_v7 = vmul.f32 %v9461_v26, %v1912_v11  ;;  %3401 = vmatpush1.bf16.msra.mxu0 %v7687_v6 }
 0x187   : > { %v1144_v3 = vadd.f32 %v1143_v4, %v8820_v5  ;;  %v1304_v8 = vadd.f32 %v1303_v1, %v8820_v5  ;;  %v1145_v56 = vpop.f32.mrb[57].mxu0  ;;  %v1305_v18 = vpop.f32.mrb[57].mxu1  ;;  %v2559_v10 = vpack.c.bf16 %v2359_v22, %v2355_v39 }
 0x188   : > { %v1146_v57 = vadd.f32 %v1145_v56, %v8823_v15  ;;  %v1306_v59 = vadd.f32 %v1305_v18, %v8823_v15  ;;  %v1147_v14 = vpop.f32.mrb[58].mxu0  ;;  %v1307_v54 = vpop.f32.mrb[58].mxu1  ;;  %v2560_v2 = vpack.c.bf16 %v2360_v60, %v2356_v34  ;;  %v9507_v60 = vunpack.i.l.bf16 %v7553_v62 }
 0x189   : > { %v1787_v4 = vmax.f32 %v1144_v3, 0.0  ;;  %v1915_v26 = vmax.f32 %v1304_v8, 0.0  ;;  %v1148_v1 = vadd.f32 %v1147_v14, %v8820_v5  ;;  %v1308_v39 = vadd.f32 %v1307_v54, %v8820_v5  ;;  %v1149_v22 = vpop.f32.mrb[59].mxu0  ;;  %v1309_v31 = vpop.f32.mrb[59].mxu1 }
 0x18a   : > { %v7558_v46 = vpop.permute.xlu1 %7557  ;;  %v1788_v56 = vmax.f32 %v1146_v57, 0.0  ;;  %v1916_v45 = vmax.f32 %v1306_v59, 0.0  ;;  %v1150_v18 = vadd.f32 %v1149_v22, %v8823_v15  ;;  %v1310_v34 = vadd.f32 %v1309_v31, %v8823_v15  ;;  %3181 = vmatprep.mubr.bf16.mxu0 %v2560_v2  ;;  %14389 = vst [vmem:[#allocation108_spill] sm:$0xff] %v9507_v60 }
 0x18b   : > { %v9509_v58 = vunpack.i.h.bf16 %v7558_v46  ;;  %v1791_v3 = vmax.f32 %v1148_v1, 0.0  ;;  %v1919_v8 = vmax.f32 %v1308_v39, 0.0  ;;  %6786 = vmatmul.mubr.msk.bf16.gmra.mrb[164].mxu1 %vm859_vm2, %v8487_v13  ;;  %3182 = vmatmul.mubr.bf16.gmra.mrb[116].mxu0 %v2559_v10  ;;  %v679_v57 = vsub.s32 2, %v8801_v52 }
 0x18c   : > { %v1792_v14 = vmax.f32 %v1150_v18, 0.0  ;;  %v1920_v6 = vmax.f32 %v1310_v34, 0.0  ;;  %1614 = vmatprep.mubr.bf16.mxu1 %v14306_v33  ;;  %v683_v59 = vsub.s32 3, %v8801_v52  ;;  %v2363_v31 = vmul.f32 %v9380_v41, %v1787_v4 }
 0x18d   : > { %14390 = vst [vmem:[#allocation109_spill] sm:$0xff] %v9509_v58  ;;  %v2367_v2 = vmul.f32 %v9339_v12, %v1791_v3  ;;  %v9519_v62 = vmul.f32 %v9507_v60, %v1915_v26  ;;  %v9522_v54 = vmul.f32 %v9470_v23, %v1919_v8  ;;  %v2364_v13 = vmul.f32 %v9380_v41, %v1788_v56 }
 0x18e   : > { %v2368_v10 = vmul.f32 %v9339_v12, %v1792_v14  ;;  %v1153_v1 = vpop.f32.mrb[60].mxu0  ;;  %v1313_v39 = vpop.f32.mrb[60].mxu1  ;;  %v9527_v22 = vmul.f32 %v9507_v60, %v1916_v45  ;;  %v9530_v18 = vmul.f32 %v9470_v23, %v1920_v6  ;;  %v14404_v6 = vld [vmem:[#allocation30_spill] sm:$0xff] }
 0x18f   : > { %14391 = vst [vmem:[#allocation110_spill] sm:$0xff] %v9519_v62  ;;  %v1154_v4 = vadd.f32 %v1153_v1, %v8820_v5  ;;  %v1314_v26 = vadd.f32 %v1313_v39, %v8820_v5  ;;  %v1155_v34 = vpop.f32.mrb[61].mxu0  ;;  %v1315_v3 = vpop.f32.mrb[61].mxu1  ;;  %v2563_v8 = vpack.c.bf16 %v2367_v2, %v2363_v31  ;;  %v9544_v62 = vunpack.i.l.bf16 %v7558_v46 }
 0x190   : > { %v1156_v14 = vadd.f32 %v1155_v34, %v8823_v15  ;;  %v1316_v11 = vadd.f32 %v1315_v3, %v8823_v15  ;;  %v1157_v52 = vpop.f32.mrb[62].mxu0  ;;  %v1317_v45 = vpop.f32.mrb[62].mxu1  ;;  %v2564_v60 = vpack.c.bf16 %v2368_v10, %v2364_v13 }
 0x191   : > { %v1795_v23 = vmax.f32 %v1154_v4, 0.0  ;;  %v1923_v1 = vmax.f32 %v1314_v26, 0.0  ;;  %v1158_v39 = vadd.f32 %v1157_v52, %v8820_v5  ;;  %v1318_v12 = vadd.f32 %v1317_v45, %v8820_v5  ;;  %v1159_v31 = vpop.f32.mrb[63].mxu0  ;;  %v1319_v2 = vpop.f32.mrb[63].mxu1  ;;  %14392 = vst [vmem:[#allocation111_spill] sm:$0xff] %v9544_v62 }
 0x192   : > { %v1796_v41 = vmax.f32 %v1156_v14, 0.0  ;;  %v1924_v56 = vmax.f32 %v1316_v11, 0.0  ;;  %v1160_v34 = vadd.f32 %v1159_v31, %v8823_v15  ;;  %v1320_v3 = vadd.f32 %v1319_v2, %v8823_v15  ;;  %3191 = vmatprep.mubr.bf16.mxu0 %v2564_v60  ;;  %v7885_v52 = vld [vmem:[%s13869_s2] sm:$0xf] }
 0x193   : > { %v1799_v13 = vmax.f32 %v1158_v39, 0.0  ;;  %v1927_v10 = vmax.f32 %v1318_v12, 0.0  ;;  %6787 = vmatmul.mubr.msk.bf16.gmra.mrb[168].mxu1 %vm859_vm2, %v8490_v21  ;;  %3192 = vmatmul.mubr.bf16.gmra.mrb[120].mxu0 %v2563_v8  ;;  %v9551_v5 = vrot.slane %v7885_v52, %v679_v57  ;;  %v9553_v26 = vrot.slane %v7885_v52, %v683_v59  ;;  %v7690_v59 = vld [vmem:[%s13870_s3 + $0x1f0] ss:$8 sps:$4 sm:$0xff]  }
 0x194   : > { %v1800_v11 = vmax.f32 %v1160_v34, 0.0  ;;  %v1928_v4 = vmax.f32 %v1320_v3, 0.0  ;;  %1624 = vmatprep.mubr.bf16.mxu1 %v14306_v33  ;;  %v2371_v15 = vmul.f32 %v9468_v20, %v1795_v23  ;;  %v9559_v46 = vmul.f32 %v9544_v62, %v1923_v1  ;;  %v7692_v23 = vld [vmem:[%s13870_s3 + $0x1f4] ss:$8 sps:$4 sm:$0xff]  }
 0x195   : > { %v2375_v12 = vmul.f32 %v9430_v35, %v1799_v13  ;;  %v9562_v21 = vmul.f32 %v9509_v58, %v1927_v10  ;;  %v2372_v60 = vmul.f32 %v9468_v20, %v1796_v41  ;;  %v9573_v14 = vmul.f32 %v9544_v62, %v1924_v56  ;;  %3402 = vmatprep.subr.bf16.mxu0 %v7692_v23  ;;  %v14402_v13 = vld [vmem:[#allocation14_spill] sm:$0xff] }
 0x196   : > { %v2376_v57 = vmul.f32 %v9430_v35, %v1800_v11  ;;  %v1356_v8 = vpop.f32.mrb[64].mxu1  ;;  %v9576_v45 = vmul.f32 %v9509_v58, %v1928_v4  ;;  %3403 = vmatpush1.bf16.msra.mxu0 %v7690_v59  ;;  %v14421_v58 = vpack.c.bf16 %v9086_v50, %v9083_v36  ;;  %v14430_v36 = vld [vmem:[#allocation50_spill] sm:$0xff] }
 0x197   : > { %v1357_v1 = vadd.f32 %v1356_v8, %v9551_v5  ;;  %v1358_v41 = vpop.f32.mrb[65].mxu1  ;;  %v2567_v39 = vpack.c.bf16 %v2375_v12, %v2371_v15  ;;  %v14394_v8 = vld [vmem:[#allocation18_spill] sm:$0xff] }
 0x198   : > { %v1359_v2 = vadd.f32 %v1358_v41, %v9553_v26  ;;  %v1360_v34 = vpop.f32.mrb[66].mxu1  ;;  %v2568_v3 = vpack.c.bf16 %v2376_v57, %v2372_v60  ;;  %v14393_v60 = vpack.c.bf16 %v8872_v32, %v8859_v43  ;;  %v14399_v41 = vpack.c.bf16 %v8927_v44, %v8908_v53 }
 0x199   : > { %v1677_v56 = vmax.f32 %v1357_v1, 0.0  ;;  %v1361_v10 = vadd.f32 %v1360_v34, %v9551_v5  ;;  %v1362_v52 = vpop.f32.mrb[67].mxu1 }
 0x19a   : > { %v1678_v11 = vmax.f32 %v1359_v2, 0.0  ;;  %v1363_v4 = vadd.f32 %v1362_v52, %v9553_v26  ;;  %3201 = vmatprep.mubr.bf16.mxu0 %v2568_v3 }
 0x19b   : > { %v1681_v15 = vmax.f32 %v1361_v10, 0.0  ;;  %6788 = vmatmul.mubr.msk.bf16.gmra.mrb[172].mxu1 %vm859_vm2, %v8513_v51  ;;  %3202 = vmatmul.mubr.bf16.gmra.mrb[124].mxu0 %v2567_v39  ;;  %v9593_v57 = vmul.f32 %v8830_v63, %v1677_v56 }
 0x19c   : > { %v1682_v12 = vmax.f32 %v1363_v4, 0.0  ;;  %3211 = vmatprep.mubr.bf16.mxu0 %v14393_v60  ;;  %1634 = vmatprep.mubr.bf16.mxu1 %v14306_v33  ;;  %v9599_v23 = vmul.f32 %v8830_v63, %v1678_v11  ;;  %v14397_v60 = vld [vmem:[#allocation26_spill] sm:$0xff]  ;;  %v14419_v63 = vld [vmem:[#allocation45_spill] sm:$0xff] }
 0x19d   : > { %v9596_v59 = vmul.f32 %v14394_v8, %v1681_v15  ;;  %v14395_v15 = vld [vmem:[#allocation12_spill] sm:$0xff] }
 0x19e   : > { %v9602_v1 = vmul.f32 %v14394_v8, %v1682_v12  ;;  %v1366_v51 = vpop.f32.mrb[68].mxu1  ;;  %v14396_v12 = vld [vmem:[#allocation27_spill] sm:$0xff]  ;;  %v14413_v8 = vpack.c.bf16 %v9033_v42, %v9030_v61 }
 0x19f   : > { %v1367_v32 = vadd.f32 %v1366_v51, %v9551_v5  ;;  %v1368_v43 = vpop.f32.mrb[69].mxu1  ;;  %v14398_v51 = vpack.c.bf16 %v14396_v12, %v14397_v60 }
 0x1a0   : > { %v1369_v39 = vadd.f32 %v1368_v43, %v9553_v26  ;;  %v1370_v2 = vpop.f32.mrb[70].mxu1 }
 0x1a1   : > { %v1685_v3 = vmax.f32 %v1367_v32, 0.0  ;;  %v1371_v56 = vadd.f32 %v1370_v2, %v9551_v5  ;;  %v1372_v10 = vpop.f32.mrb[71].mxu1  ;;  %v14400_v32 = vld [vmem:[#allocation23_spill] sm:$0xff] }
 0x1a2   : > { %v1686_v52 = vmax.f32 %v1369_v39, 0.0  ;;  %v1373_v11 = vadd.f32 %v1372_v10, %v9553_v26  ;;  %v14401_v39 = vld [vmem:[#allocation20_spill] sm:$0xff] }
 0x1a3   : > { %v1689_v4 = vmax.f32 %v1371_v56, 0.0  ;;  %6789 = vmatmul.mubr.msk.bf16.gmra.mrb[176].mxu1 %vm859_vm2, %v14395_v15  ;;  %3212 = vmatmul.mubr.bf16.gmra.mrb[128].mxu0 %v14398_v51  ;;  %v9622_v2 = vmul.f32 %v14400_v32, %v1685_v3 }
 0x1a4   : > { %v1690_v43 = vmax.f32 %v1373_v11, 0.0  ;;  %3221 = vmatprep.mubr.bf16.mxu0 %v14399_v41  ;;  %1644 = vmatprep.mubr.bf16.mxu1 %v14306_v33  ;;  %v9628_v56 = vmul.f32 %v14400_v32, %v1686_v52  ;;  %v14411_v32 = vld [vmem:[#allocation39_spill] sm:$0xff] }
 0x1a5   : > { %v9625_v10 = vmul.f32 %v14401_v39, %v1689_v4 }
 0x1a6   : > { %v9631_v15 = vmul.f32 %v14401_v39, %v1690_v43  ;;  %v1376_v12 = vpop.f32.mrb[72].mxu1  ;;  %v14406_v39 = vpack.c.bf16 %v8980_v28, %v8977_v40 }
 0x1a7   : > { %v1377_v11 = vadd.f32 %v1376_v12, %v9551_v5  ;;  %v1378_v60 = vpop.f32.mrb[73].mxu1  ;;  %v14403_v12 = vld [vmem:[#allocation33_spill] sm:$0xff] }
 0x1a8   : > { %v1379_v44 = vadd.f32 %v1378_v60, %v9553_v26  ;;  %v1380_v41 = vpop.f32.mrb[74].mxu1  ;;  %v14405_v53 = vpack.c.bf16 %v14403_v12, %v14404_v6 }
 0x1a9   : > { %v1693_v4 = vmax.f32 %v1377_v11, 0.0  ;;  %v1381_v52 = vadd.f32 %v1380_v41, %v9551_v5  ;;  %v1382_v51 = vpop.f32.mrb[75].mxu1  ;;  %v14407_v11 = vld [vmem:[#allocation29_spill] sm:$0xff] }
 0x1aa   : > { %v1694_v34 = vmax.f32 %v1379_v44, 0.0  ;;  %v1383_v43 = vadd.f32 %v1382_v51, %v9553_v26  ;;  %v14408_v44 = vld [vmem:[#allocation24_spill] sm:$0xff] }
 0x1ab   : > { %v1697_v31 = vmax.f32 %v1381_v52, 0.0  ;;  %6790 = vmatmul.mubr.msk.bf16.gmra.mrb[180].mxu1 %vm859_vm2, %v14402_v13  ;;  %3222 = vmatmul.mubr.bf16.gmra.mrb[132].mxu0 %v14405_v53  ;;  %v9651_v41 = vmul.f32 %v14407_v11, %v1693_v4 }
 0x1ac   : > { %v1698_v60 = vmax.f32 %v1383_v43, 0.0  ;;  %3231 = vmatprep.mubr.bf16.mxu0 %v14406_v39  ;;  %1654 = vmatprep.mubr.bf16.mxu1 %v14306_v33  ;;  %v9657_v52 = vmul.f32 %v14407_v11, %v1694_v34  ;;  %v14409_v11 = vld [vmem:[#allocation13_spill] sm:$0xff] }
 0x1ad   : > { %v9654_v51 = vmul.f32 %v14408_v44, %v1697_v31 }
 0x1ae   : > { %v9660_v13 = vmul.f32 %v14408_v44, %v1698_v60  ;;  %v1386_v6 = vpop.f32.mrb[76].mxu1 }
 0x1af   : > { %v1387_v53 = vadd.f32 %v1386_v6, %v9551_v5  ;;  %v1388_v43 = vpop.f32.mrb[77].mxu1  ;;  %v14410_v6 = vld [vmem:[#allocation40_spill] sm:$0xff] }
 0x1b0   : > { %v1389_v28 = vadd.f32 %v1388_v43, %v9553_v26  ;;  %v1390_v39 = vpop.f32.mrb[78].mxu1  ;;  %v14412_v40 = vpack.c.bf16 %v14410_v6, %v14411_v32 }
 0x1b1   : > { %v1701_v4 = vmax.f32 %v1387_v53, 0.0  ;;  %v1391_v34 = vadd.f32 %v1390_v39, %v9551_v5  ;;  %v1392_v12 = vpop.f32.mrb[79].mxu1  ;;  %v14414_v53 = vld [vmem:[#allocation38_spill] sm:$0xff] }
 0x1b2   : > { %v1702_v3 = vmax.f32 %v1389_v28, 0.0  ;;  %v1393_v60 = vadd.f32 %v1392_v12, %v9553_v26  ;;  %v14416_v28 = vld [vmem:[#allocation34_spill] sm:$0xff] }
 0x1b3   : > { %v1705_v44 = vmax.f32 %v1391_v34, 0.0  ;;  %6791 = vmatmul.mubr.msk.bf16.gmra.mrb[184].mxu1 %vm859_vm2, %v14409_v11  ;;  %3232 = vmatmul.mubr.bf16.gmra.mrb[136].mxu0 %v14412_v40  ;;  %v9680_v39 = vmul.f32 %v14414_v53, %v1701_v4 }
 0x1b4   : > { %v1706_v43 = vmax.f32 %v1393_v60, 0.0  ;;  %3241 = vmatprep.mubr.bf16.mxu0 %v14413_v8  ;;  %1664 = vmatprep.mubr.bf16.mxu1 %v14306_v33  ;;  %v9686_v34 = vmul.f32 %v14414_v53, %v1702_v3  ;;  %v14417_v53 = vld [vmem:[#allocation11_spill] sm:$0xff] }
 0x1b5   : > { %14415 = vst [vmem:[#allocation12_spill] sm:$0xff] %v9680_v39  ;;  %v9683_v12 = vmul.f32 %v14416_v28, %v1705_v44 }
 0x1b6   : > { %v9689_v11 = vmul.f32 %v14416_v28, %v1706_v43  ;;  %v1396_v32 = vpop.f32.mrb[80].mxu1 }
 0x1b7   : > { %v1397_v40 = vadd.f32 %v1396_v32, %v9551_v5  ;;  %v1398_v60 = vpop.f32.mrb[81].mxu1  ;;  %v14418_v32 = vld [vmem:[#allocation46_spill] sm:$0xff] }
 0x1b8   : > { %v1399_v42 = vadd.f32 %v1398_v60, %v9553_v26  ;;  %v1400_v8 = vpop.f32.mrb[82].mxu1  ;;  %v14420_v61 = vpack.c.bf16 %v14418_v32, %v14419_v63 }
 0x1b9   : > { %v1709_v4 = vmax.f32 %v1397_v40, 0.0  ;;  %v1401_v3 = vadd.f32 %v1400_v8, %v9551_v5  ;;  %v1402_v6 = vpop.f32.mrb[83].mxu1  ;;  %v14422_v40 = vld [vmem:[#allocation32_spill] sm:$0xff]  ;;  %v14424_v8 = vld [vmem:[#allocation31_spill] sm:$0xff] }
 0x1ba   : > { %v1710_v31 = vmax.f32 %v1399_v42, 0.0  ;;  %v1403_v43 = vadd.f32 %v1402_v6, %v9553_v26 }
 0x1bb   : > { %v1713_v28 = vmax.f32 %v1401_v3, 0.0  ;;  %6792 = vmatmul.mubr.msk.bf16.gmra.mrb[188].mxu1 %vm859_vm2, %v14417_v53  ;;  %3242 = vmatmul.mubr.bf16.gmra.mrb[140].mxu0 %v14420_v61  ;;  %v9708_v44 = vmul.f32 %v14422_v40, %v1709_v4 }
 0x1bc   : > { %v1714_v60 = vmax.f32 %v1403_v43, 0.0  ;;  %3251 = vmatprep.mubr.bf16.mxu0 %v14421_v58  ;;  %v9714_v3 = vmul.f32 %v14422_v40, %v1710_v31  ;;  %v14426_v40 = vld [vmem:[#allocation52_spill] sm:$0xff] }
 0x1bd   : > { %14423 = vst [vmem:[#allocation27_spill] sm:$0xff] %v9708_v44  ;;  %v9711_v42 = vmul.f32 %v14424_v8, %v1713_v28 }
 0x1be   : > { %v9717_v53 = vmul.f32 %v14424_v8, %v1714_v60  ;;  %v1406_v6 = vpop.f32.mrb[84].mxu1 }
 0x1bf   : > { %14425 = vst [vmem:[#allocation26_spill] sm:$0xff] %v9711_v42  ;;  %v1407_v63 = vadd.f32 %v1406_v6, %v9551_v5  ;;  %v1408_v61 = vpop.f32.mrb[85].mxu1  ;;  %v14427_v6 = vld [vmem:[#allocation51_spill] sm:$0xff] }
 0x1c0   : > { %v1409_v50 = vadd.f32 %v1408_v61, %v9553_v26  ;;  %v1410_v58 = vpop.f32.mrb[86].mxu1  ;;  %v14428_v62 = vpack.c.bf16 %v14426_v40, %v14427_v6  ;;  %v14429_v61 = vpack.c.bf16 %v9139_v24, %v9136_v30  ;;  %v14438_v30 = vld [vmem:[#allocation65_spill] sm:$0xff] }
 0x1c1   : > { %v1717_v4 = vmax.f32 %v1407_v63, 0.0  ;;  %v1411_v31 = vadd.f32 %v1410_v58, %v9551_v5  ;;  %v1412_v43 = vpop.f32.mrb[87].mxu1  ;;  %v14432_v63 = vld [vmem:[#allocation44_spill] sm:$0xff] }
 0x1c2   : > { %v1718_v32 = vmax.f32 %v1409_v50, 0.0  ;;  %v1413_v60 = vadd.f32 %v1412_v43, %v9553_v26 }
 0x1c3   : > { %v1721_v8 = vmax.f32 %v1411_v31, 0.0  ;;  %3252 = vmatmul.mubr.bf16.gmra.mrb[144].mxu0 %v14428_v62  ;;  %v9734_v44 = vmul.f32 %v14430_v36, %v1717_v4 }
 0x1c4   : > { %v1722_v39 = vmax.f32 %v1413_v60, 0.0  ;;  %3261 = vmatprep.mubr.bf16.mxu0 %v14429_v61  ;;  %v9740_v50 = vmul.f32 %v14430_v36, %v1718_v32 }
 0x1c5   : > { %14431 = vst [vmem:[#allocation14_spill] sm:$0xff] %v9734_v44  ;;  %v9737_v28 = vmul.f32 %v14432_v63, %v1721_v8  ;;  %v14440_v44 = vld [vmem:[#allocation43_spill] sm:$0xff] }
 0x1c6   : > { %14434 = vst [vmem:[#allocation30_spill] sm:$0xff] %v9740_v50  ;;  %v9743_v58 = vmul.f32 %v14432_v63, %v1722_v39  ;;  %v1416_v31 = vpop.f32.mrb[88].mxu1  ;;  %v14435_v63 = vld [vmem:[#allocation58_spill] sm:$0xff] }
 0x1c7   : > { %14433 = vst [vmem:[#allocation33_spill] sm:$0xff] %v9737_v28  ;;  %v1417_v62 = vadd.f32 %v1416_v31, %v9551_v5  ;;  %v1418_v40 = vpop.f32.mrb[89].mxu1  ;;  %v14436_v31 = vld [vmem:[#allocation57_spill] sm:$0xff] }
 0x1c8   : > { %v1419_v24 = vadd.f32 %v1418_v40, %v9553_v26  ;;  %v1420_v4 = vpop.f32.mrb[90].mxu1  ;;  %v14437_v36 = vpack.c.bf16 %v14435_v63, %v14436_v31  ;;  %v14439_v40 = vpack.c.bf16 %v9183_v27, %v14438_v30  ;;  %v14447_v27 = vld [vmem:[#allocation62_spill] sm:$0xff] }
 0x1c9   : > { %v1725_v43 = vmax.f32 %v1417_v62, 0.0  ;;  %v1421_v32 = vadd.f32 %v1420_v4, %v9551_v5  ;;  %v1422_v60 = vpop.f32.mrb[91].mxu1  ;;  %v14442_v62 = vld [vmem:[#allocation37_spill] sm:$0xff] }
 0x1ca   : > { %v1726_v6 = vmax.f32 %v1419_v24, 0.0  ;;  %v1423_v39 = vadd.f32 %v1422_v60, %v9553_v26 }
 0x1cb   : > { %v1729_v61 = vmax.f32 %v1421_v32, 0.0  ;;  %3262 = vmatmul.mubr.bf16.gmra.mrb[148].mxu0 %v14437_v36  ;;  %v9760_v28 = vmul.f32 %v14440_v44, %v1725_v43 }
 0x1cc   : > { %v1730_v42 = vmax.f32 %v1423_v39, 0.0  ;;  %3271 = vmatprep.mubr.bf16.mxu0 %v14439_v40  ;;  %v9766_v24 = vmul.f32 %v14440_v44, %v1726_v6 }
 0x1cd   : > { %14441 = vst [vmem:[#allocation13_spill] sm:$0xff] %v9760_v28  ;;  %v9763_v8 = vmul.f32 %v14442_v62, %v1729_v61 }
 0x1ce   : > { %v9769_v4 = vmul.f32 %v14442_v62, %v1730_v42  ;;  %v1426_v32 = vpop.f32.mrb[92].mxu1  ;;  %v14443_v62 = vld [vmem:[#allocation64_spill] sm:$0xff] }
 0x1cf   : > { %v1427_v36 = vadd.f32 %v1426_v32, %v9551_v5  ;;  %v1428_v63 = vpop.f32.mrb[93].mxu1  ;;  %v14444_v32 = vld [vmem:[#allocation63_spill] sm:$0xff] }
 0x1d0   : > { %v1429_v30 = vadd.f32 %v1428_v63, %v9553_v26  ;;  %v1430_v43 = vpop.f32.mrb[94].mxu1  ;;  %v14445_v44 = vpack.c.bf16 %v14443_v62, %v14444_v32  ;;  %v14446_v63 = vpack.c.bf16 %v9230_v55, %v9227_v29  ;;  %v14454_v29 = vld [vmem:[#allocation77_spill] sm:$0xff] }
 0x1d1   : > { %v1733_v39 = vmax.f32 %v1427_v36, 0.0  ;;  %v1431_v6 = vadd.f32 %v1430_v43, %v9551_v5  ;;  %v1432_v61 = vpop.f32.mrb[95].mxu1  ;;  %v14449_v36 = vld [vmem:[#allocation56_spill] sm:$0xff] }
 0x1d2   : > { %v1734_v31 = vmax.f32 %v1429_v30, 0.0  ;;  %v1433_v42 = vadd.f32 %v1432_v61, %v9553_v26 }
 0x1d3   : > { %v1737_v40 = vmax.f32 %v1431_v6, 0.0  ;;  %3272 = vmatmul.mubr.bf16.gmra.mrb[152].mxu0 %v14445_v44  ;;  %v9786_v28 = vmul.f32 %v14447_v27, %v1733_v39 }
 0x1d4   : > { %v1738_v50 = vmax.f32 %v1433_v42, 0.0  ;;  %3281 = vmatprep.mubr.bf16.mxu0 %v14446_v63  ;;  %v9792_v30 = vmul.f32 %v14447_v27, %v1734_v31 }
 0x1d5   : > { %14448 = vst [vmem:[#allocation40_spill] sm:$0xff] %v9786_v28  ;;  %v9789_v60 = vmul.f32 %v14449_v36, %v1737_v40  ;;  %v14456_v28 = vld [vmem:[#allocation55_spill] sm:$0xff] }
 0x1d6   : > { %14451 = vst [vmem:[#allocation11_spill] sm:$0xff] %v9792_v30  ;;  %v9795_v43 = vmul.f32 %v14449_v36, %v1738_v50  ;;  %v1436_v6 = vpop.f32.mrb[96].mxu1 }
 0x1d7   : > { %14450 = vst [vmem:[#allocation39_spill] sm:$0xff] %v9789_v60  ;;  %v1437_v44 = vadd.f32 %v1436_v6, %v9551_v5  ;;  %v1438_v62 = vpop.f32.mrb[97].mxu1  ;;  %v14452_v6 = vld [vmem:[#allocation70_spill] sm:$0xff] }
 0x1d8   : > { %v1439_v55 = vadd.f32 %v1438_v62, %v9553_v26  ;;  %v1440_v39 = vpop.f32.mrb[98].mxu1  ;;  %v14453_v36 = vpack.c.bf16 %v9216_v37, %v14452_v6  ;;  %v14455_v62 = vpack.c.bf16 %v9271_v25, %v14454_v29  ;;  %v14463_v25 = vld [vmem:[#allocation74_spill] sm:$0xff] }
 0x1d9   : > { %v1741_v42 = vmax.f32 %v1437_v44, 0.0  ;;  %v1441_v31 = vadd.f32 %v1440_v39, %v9551_v5  ;;  %v1442_v40 = vpop.f32.mrb[99].mxu1  ;;  %v14458_v44 = vld [vmem:[#allocation49_spill] sm:$0xff] }
 0x1da   : > { %v1742_v32 = vmax.f32 %v1439_v55, 0.0  ;;  %v1443_v50 = vadd.f32 %v1442_v40, %v9553_v26 }
 0x1db   : > { %v1745_v63 = vmax.f32 %v1441_v31, 0.0  ;;  %3282 = vmatmul.mubr.bf16.gmra.mrb[156].mxu0 %v14453_v36  ;;  %v9812_v60 = vmul.f32 %v14456_v28, %v1741_v42 }
 0x1dc   : > { %v1746_v27 = vmax.f32 %v1443_v50, 0.0  ;;  %3291 = vmatprep.mubr.bf16.mxu0 %v14455_v62  ;;  %v9818_v55 = vmul.f32 %v14456_v28, %v1742_v32 }
 0x1dd   : > { %14457 = vst [vmem:[#allocation46_spill] sm:$0xff] %v9812_v60  ;;  %v9815_v61 = vmul.f32 %v14458_v44, %v1745_v63 }
 0x1de   : > { %v9821_v39 = vmul.f32 %v14458_v44, %v1746_v27  ;;  %v1446_v31 = vpop.f32.mrb[100].mxu1  ;;  %v14459_v44 = vld [vmem:[#allocation76_spill] sm:$0xff] }
 0x1df   : > { %v1447_v37 = vadd.f32 %v1446_v31, %v9551_v5  ;;  %v1448_v36 = vpop.f32.mrb[101].mxu1  ;;  %v14460_v31 = vld [vmem:[#allocation75_spill] sm:$0xff] }
 0x1e0   : > { %v1449_v29 = vadd.f32 %v1448_v36, %v9553_v26  ;;  %v1450_v42 = vpop.f32.mrb[102].mxu1  ;;  %v14461_v28 = vpack.c.bf16 %v14459_v44, %v14460_v31  ;;  %v14462_v36 = vpack.c.bf16 %v9318_v47, %v9315_v19  ;;  %v14470_v19 = vld [vmem:[#allocation89_spill] sm:$0xff] }
 0x1e1   : > { %v1749_v50 = vmax.f32 %v1447_v37, 0.0  ;;  %v1451_v32 = vadd.f32 %v1450_v42, %v9551_v5  ;;  %v1452_v63 = vpop.f32.mrb[103].mxu1  ;;  %v14465_v37 = vld [vmem:[#allocation69_spill] sm:$0xff] }
 0x1e2   : > { %v1750_v6 = vmax.f32 %v1449_v29, 0.0  ;;  %v1453_v27 = vadd.f32 %v1452_v63, %v9553_v26 }
 0x1e3   : > { %v1753_v62 = vmax.f32 %v1451_v32, 0.0  ;;  %3292 = vmatmul.mubr.bf16.gmra.mrb[160].mxu0 %v14461_v28  ;;  %v9838_v60 = vmul.f32 %v14463_v25, %v1749_v50 }
 0x1e4   : > { %v1754_v30 = vmax.f32 %v1453_v27, 0.0  ;;  %3301 = vmatprep.mubr.bf16.mxu0 %v14462_v36  ;;  %v9844_v29 = vmul.f32 %v14463_v25, %v1750_v6 }
 0x1e5   : > { %14464 = vst [vmem:[#allocation45_spill] sm:$0xff] %v9838_v60  ;;  %v9841_v40 = vmul.f32 %v14465_v37, %v1753_v62  ;;  %v14472_v60 = vld [vmem:[#allocation68_spill] sm:$0xff] }
 0x1e6   : > { %14467 = vst [vmem:[#allocation51_spill] sm:$0xff] %v9844_v29  ;;  %v9847_v42 = vmul.f32 %v14465_v37, %v1754_v30  ;;  %v1456_v32 = vpop.f32.mrb[104].mxu1 }
 0x1e7   : > { %14466 = vst [vmem:[#allocation52_spill] sm:$0xff] %v9841_v40  ;;  %v1457_v28 = vadd.f32 %v1456_v32, %v9551_v5  ;;  %v1458_v44 = vpop.f32.mrb[105].mxu1  ;;  %v14468_v32 = vld [vmem:[#allocation82_spill] sm:$0xff] }
 0x1e8   : > { %v1459_v47 = vadd.f32 %v1458_v44, %v9553_v26  ;;  %v1460_v50 = vpop.f32.mrb[106].mxu1  ;;  %v14469_v37 = vpack.c.bf16 %v9304_v48, %v14468_v32  ;;  %v14471_v44 = vpack.c.bf16 %v9359_v49, %v14470_v19  ;;  %v14480_v49 = vld [vmem:[#allocation86_spill] sm:$0xff] }
 0x1e9   : > { %v1757_v27 = vmax.f32 %v1457_v28, 0.0  ;;  %v1461_v6 = vadd.f32 %v1460_v50, %v9551_v5  ;;  %v1462_v62 = vpop.f32.mrb[107].mxu1  ;;  %v14474_v28 = vld [vmem:[#allocation61_spill] sm:$0xff] }
 0x1ea   : > { %v1758_v31 = vmax.f32 %v1459_v47, 0.0  ;;  %v1463_v30 = vadd.f32 %v1462_v62, %v9553_v26 }
 0x1eb   : > { %v1761_v36 = vmax.f32 %v1461_v6, 0.0  ;;  %3302 = vmatmul.mubr.bf16.gmra.mrb[164].mxu0 %v14469_v37  ;;  %v9864_v40 = vmul.f32 %v14472_v60, %v1757_v27 }
 0x1ec   : > { %v1762_v25 = vmax.f32 %v1463_v30, 0.0  ;;  %3311 = vmatprep.mubr.bf16.mxu0 %v14471_v44  ;;  %v9870_v47 = vmul.f32 %v14472_v60, %v1758_v31 }
 0x1ed   : > { %14473 = vst [vmem:[#allocation58_spill] sm:$0xff] %v9864_v40  ;;  %v9867_v63 = vmul.f32 %v14474_v28, %v1761_v36 }
 0x1ee   : > { %v9873_v50 = vmul.f32 %v14474_v28, %v1762_v25  ;;  %v1466_v6 = vpop.f32.mrb[108].mxu1  ;;  %v14476_v28 = vld [vmem:[#allocation88_spill] sm:$0xff] }
 0x1ef   : > { %14475 = vst [vmem:[#allocation57_spill] sm:$0xff] %v9867_v63  ;;  %v1467_v48 = vadd.f32 %v1466_v6, %v9551_v5  ;;  %v1468_v37 = vpop.f32.mrb[109].mxu1  ;;  %v14477_v6 = vld [vmem:[#allocation87_spill] sm:$0xff] }
 0x1f0   : > { %v1469_v19 = vadd.f32 %v1468_v37, %v9553_v26  ;;  %v1470_v27 = vpop.f32.mrb[110].mxu1  ;;  %v14478_v60 = vpack.c.bf16 %v14476_v28, %v14477_v6  ;;  %v14479_v37 = vpack.c.bf16 %v9406_v16, %v9403_v38  ;;  %v14487_v38 = vld [vmem:[#allocation102_spill] sm:$0xff] }
 0x1f1   : > { %v1765_v30 = vmax.f32 %v1467_v48, 0.0  ;;  %v1471_v31 = vadd.f32 %v1470_v27, %v9551_v5  ;;  %v1472_v36 = vpop.f32.mrb[111].mxu1  ;;  %v14482_v48 = vld [vmem:[#allocation81_spill] sm:$0xff] }
 0x1f2   : > { %v1766_v32 = vmax.f32 %v1469_v19, 0.0  ;;  %v1473_v25 = vadd.f32 %v1472_v36, %v9553_v26 }
 0x1f3   : > { %v1769_v44 = vmax.f32 %v1471_v31, 0.0  ;;  %3312 = vmatmul.mubr.bf16.gmra.mrb[168].mxu0 %v14478_v60  ;;  %v9890_v40 = vmul.f32 %v14480_v49, %v1765_v30 }
 0x1f4   : > { %v1770_v29 = vmax.f32 %v1473_v25, 0.0  ;;  %3321 = vmatprep.mubr.bf16.mxu0 %v14479_v37  ;;  %v9896_v19 = vmul.f32 %v14480_v49, %v1766_v32 }
 0x1f5   : > { %14481 = vst [vmem:[#allocation65_spill] sm:$0xff] %v9890_v40  ;;  %v9893_v62 = vmul.f32 %v14482_v48, %v1769_v44  ;;  %v14488_v40 = vld [vmem:[#allocation101_spill] sm:$0xff] }
 0x1f6   : > { %14484 = vst [vmem:[#allocation63_spill] sm:$0xff] %v9896_v19  ;;  %v9899_v27 = vmul.f32 %v14482_v48, %v1770_v29  ;;  %v1476_v31 = vpop.f32.mrb[112].mxu1 }
 0x1f7   : > { %14483 = vst [vmem:[#allocation64_spill] sm:$0xff] %v9893_v62  ;;  %v1477_v60 = vadd.f32 %v1476_v31, %v9551_v5  ;;  %v1478_v28 = vpop.f32.mrb[113].mxu1  ;;  %v14485_v31 = vld [vmem:[#allocation94_spill] sm:$0xff]  ;;  %v14490_v62 = vld [vmem:[#allocation80_spill] sm:$0xff] }
 0x1f8   : > { %v1479_v16 = vadd.f32 %v1478_v28, %v9553_v26  ;;  %v1480_v30 = vpop.f32.mrb[114].mxu1  ;;  %v14486_v48 = vpack.c.bf16 %v9392_v9, %v14485_v31  ;;  %v14489_v28 = vpack.c.bf16 %v14487_v38, %v14488_v40  ;;  %v14497_v40 = vld [vmem:[#allocation97_spill] sm:$0xff] }
 0x1f9   : > { %v1773_v25 = vmax.f32 %v1477_v60, 0.0  ;;  %v1481_v32 = vadd.f32 %v1480_v30, %v9551_v5  ;;  %v1482_v44 = vpop.f32.mrb[115].mxu1  ;;  %v14492_v60 = vld [vmem:[#allocation73_spill] sm:$0xff] }
 0x1fa   : > { %v1774_v6 = vmax.f32 %v1479_v16, 0.0  ;;  %v1483_v29 = vadd.f32 %v1482_v44, %v9553_v26 }
 0x1fb   : > { %v1777_v37 = vmax.f32 %v1481_v32, 0.0  ;;  %3322 = vmatmul.mubr.bf16.gmra.mrb[172].mxu0 %v14486_v48  ;;  %v9916_v63 = vmul.f32 %v14490_v62, %v1773_v25 }
 0x1fc   : > { %v1778_v49 = vmax.f32 %v1483_v29, 0.0  ;;  %3331 = vmatprep.mubr.bf16.mxu0 %v14489_v28  ;;  %v9922_v16 = vmul.f32 %v14490_v62, %v1774_v6 }
 0x1fd   : > { %14491 = vst [vmem:[#allocation70_spill] sm:$0xff] %v9916_v63  ;;  %v9919_v36 = vmul.f32 %v14492_v60, %v1777_v37 }
 0x1fe   : > { %v9925_v30 = vmul.f32 %v14492_v60, %v1778_v49  ;;  %v1486_v32 = vpop.f32.mrb[116].mxu1  ;;  %v14493_v60 = vld [vmem:[#allocation100_spill] sm:$0xff] }
 0x1ff   : > { %v1487_v9 = vadd.f32 %v1486_v32, %v9551_v5  ;;  %v1488_v48 = vpop.f32.mrb[117].mxu1  ;;  %v14494_v32 = vld [vmem:[#allocation99_spill] sm:$0xff] }
 0x200   : > { %v1489_v38 = vadd.f32 %v1488_v48, %v9553_v26  ;;  %v1490_v25 = vpop.f32.mrb[118].mxu1  ;;  %v14495_v62 = vpack.c.bf16 %v14493_v60, %v14494_v32  ;;  %v14496_v48 = vpack.c.bf16 %v9493_v7, %v9490_v0  ;;  %v14503_v0 = vld [vmem:[#allocation92_spill] sm:$0xff] }
 0x201   : > { %v1781_v29 = vmax.f32 %v1487_v9, 0.0  ;;  %v1491_v6 = vadd.f32 %v1490_v25, %v9551_v5  ;;  %v1492_v37 = vpop.f32.mrb[119].mxu1  ;;  %v14499_v9 = vld [vmem:[#allocation93_spill] sm:$0xff] }
 0x202   : > { %v1782_v31 = vmax.f32 %v1489_v38, 0.0  ;;  %v1493_v49 = vadd.f32 %v1492_v37, %v9553_v26 }
 0x203   : > { %v1785_v28 = vmax.f32 %v1491_v6, 0.0  ;;  %3332 = vmatmul.mubr.bf16.gmra.mrb[176].mxu0 %v14495_v62  ;;  %v9942_v63 = vmul.f32 %v14497_v40, %v1781_v29 }
 0x204   : > { %v1786_v19 = vmax.f32 %v1493_v49, 0.0  ;;  %3341 = vmatprep.mubr.bf16.mxu0 %v14496_v48  ;;  %v9948_v38 = vmul.f32 %v14497_v40, %v1782_v31 }
 0x205   : > { %14498 = vst [vmem:[#allocation77_spill] sm:$0xff] %v9942_v63  ;;  %v9945_v44 = vmul.f32 %v14499_v9, %v1785_v28 }
 0x206   : > { %v9951_v25 = vmul.f32 %v14499_v9, %v1786_v19  ;;  %v1496_v6 = vpop.f32.mrb[120].mxu1 }
 0x207   : > { %v1497_v62 = vadd.f32 %v1496_v6, %v9551_v5  ;;  %v1498_v60 = vpop.f32.mrb[121].mxu1  ;;  %v14500_v6 = vld [vmem:[#allocation107_spill] sm:$0xff] }
 0x208   : > { %v1499_v7 = vadd.f32 %v1498_v60, %v9553_v26  ;;  %v1500_v29 = vpop.f32.mrb[122].mxu1  ;;  %v14501_v9 = vpack.c.bf16 %v9479_v17, %v14500_v6  ;;  %v14502_v60 = vpack.c.bf16 %v9530_v18, %v9527_v22 }
 0x209   : > { %v1789_v49 = vmax.f32 %v1497_v62, 0.0  ;;  %v1501_v31 = vadd.f32 %v1500_v29, %v9551_v5  ;;  %v1502_v28 = vpop.f32.mrb[123].mxu1  ;;  %v14504_v62 = vld [vmem:[#allocation85_spill] sm:$0xff] }
 0x20a   : > { %v1790_v32 = vmax.f32 %v1499_v7, 0.0  ;;  %v1503_v19 = vadd.f32 %v1502_v28, %v9553_v26 }
 0x20b   : > { %v1793_v48 = vmax.f32 %v1501_v31, 0.0  ;;  %3342 = vmatmul.mubr.bf16.gmra.mrb[180].mxu0 %v14501_v9  ;;  %v9968_v63 = vmul.f32 %v14503_v0, %v1789_v49 }
 0x20c   : > { %v1794_v40 = vmax.f32 %v1503_v19, 0.0  ;;  %3351 = vmatprep.mubr.bf16.mxu0 %v14502_v60  ;;  %v9974_v7 = vmul.f32 %v14503_v0, %v1790_v32 }
 0x20d   : > { %v9971_v37 = vmul.f32 %v14504_v62, %v1793_v48 }
 0x20e   : > { %v9977_v29 = vmul.f32 %v14504_v62, %v1794_v40  ;;  %v1506_v31 = vpop.f32.mrb[124].mxu1 }
 0x20f   : > { %v1507_v17 = vadd.f32 %v1506_v31, %v9551_v5  ;;  %v1508_v9 = vpop.f32.mrb[125].mxu1  ;;  %v14505_v31 = vld [vmem:[#allocation110_spill] sm:$0xff] }
 0x210   : > { %v1509_v18 = vadd.f32 %v1508_v9, %v9553_v26  ;;  %v1510_v49 = vpop.f32.mrb[126].mxu1  ;;  %v14506_v62 = vpack.c.bf16 %v9522_v54, %v14505_v31  ;;  %v14507_v9 = vpack.c.bf16 %v9576_v45, %v9573_v14  ;;  %v14510_v14 = vld [vmem:[#allocation22_spill] sm:$0xff] }
 0x211   : > { %v1797_v19 = vmax.f32 %v1507_v17, 0.0  ;;  %v1511_v32 = vadd.f32 %v1510_v49, %v9551_v5  ;;  %v1512_v48 = vpop.f32.mrb[127].mxu1 }
 0x212   : > { %v1798_v6 = vmax.f32 %v1509_v18, 0.0  ;;  %v1513_v40 = vadd.f32 %v1512_v48, %v9553_v26 }
 0x213   : > { %v1801_v60 = vmax.f32 %v1511_v32, 0.0  ;;  %3352 = vmatmul.mubr.bf16.gmra.mrb[184].mxu0 %v14506_v62  ;;  %v9994_v22 = vmul.f32 %v9468_v20, %v1797_v19 }
 0x214   : > { %v1802_v0 = vmax.f32 %v1513_v40, 0.0  ;;  %3361 = vmatprep.mubr.bf16.mxu0 %v14507_v9  ;;  %v10000_v18 = vmul.f32 %v9468_v20, %v1798_v6  ;;  %v14528_v20 = vld [vmem:[#allocation48_spill] sm:$0xff] }
 0x215   : > { %v9997_v17 = vmul.f32 %v9430_v35, %v1801_v60 }
 0x216   : > { %v10003_v49 = vmul.f32 %v9430_v35, %v1802_v0  ;;  %v1516_v32 = vpop.f32.mrb[128].mxu1 }
 0x217   : > { %v1517_v54 = vadd.f32 %v1516_v32, %v9551_v5  ;;  %v1518_v62 = vpop.f32.mrb[129].mxu1  ;;  %v14508_v32 = vpack.c.bf16 %v9562_v21, %v9559_v46 }
 0x218   : > { %v1519_v45 = vadd.f32 %v1518_v62, %v9553_v26  ;;  %v1520_v19 = vpop.f32.mrb[130].mxu1  ;;  %v14509_v62 = vpack.c.bf16 %v9602_v1, %v9599_v23  ;;  %v14514_v23 = vld [vmem:[#allocation28_spill] sm:$0xff] }
 0x219   : > { %v1805_v40 = vmax.f32 %v1517_v54, 0.0  ;;  %v1521_v6 = vadd.f32 %v1520_v19, %v9551_v5  ;;  %v1522_v60 = vpop.f32.mrb[131].mxu1  ;;  %v14511_v54 = vld [vmem:[#allocation21_spill] sm:$0xff] }
 0x21a   : > { %v1806_v31 = vmax.f32 %v1519_v45, 0.0  ;;  %v1523_v0 = vadd.f32 %v1522_v60, %v9553_v26 }
 0x21b   : > { %v1809_v9 = vmax.f32 %v1521_v6, 0.0  ;;  %3362 = vmatmul.mubr.bf16.gmra.mrb[188].mxu0 %v14508_v32  ;;  %v10020_v35 = vmul.f32 %v14510_v14, %v1805_v40 }
 0x21c   : > { %v1810_v28 = vmax.f32 %v1523_v0, 0.0  ;;  %3404 = vmatprep.mubr.bf16.mxu0 %v14509_v62  ;;  %v10026_v45 = vmul.f32 %v14510_v14, %v1806_v31 }
 0x21d   : > { %v10023_v48 = vmul.f32 %v14511_v54, %v1809_v9 }
 0x21e   : > { %v10029_v19 = vmul.f32 %v14511_v54, %v1810_v28  ;;  %v1526_v6 = vpop.f32.mrb[132].mxu1 }
 0x21f   : > { %v1527_v46 = vadd.f32 %v1526_v6, %v9551_v5  ;;  %v1528_v21 = vpop.f32.mrb[133].mxu1  ;;  %v14512_v6 = vpack.c.bf16 %v9596_v59, %v9593_v57 }
 0x220   : > { %v1529_v1 = vadd.f32 %v1528_v21, %v9553_v26  ;;  %v1530_v40 = vpop.f32.mrb[134].mxu1  ;;  %v14513_v21 = vpack.c.bf16 %v9631_v15, %v9628_v56  ;;  %v7693_v56 = vld [vmem:[#allocation2] sm:$0xff]  }
 0x221   : > { %v1813_v0 = vmax.f32 %v1527_v46, 0.0  ;;  %v1531_v31 = vadd.f32 %v1530_v40, %v9551_v5  ;;  %v1532_v9 = vpop.f32.mrb[135].mxu1  ;;  %v14515_v46 = vld [vmem:[#allocation25_spill] sm:$0xff]  ;;  %4890 = vmatpush1.bf16.msra.mxu1 %v7693_v56 }
 0x222   : > { %v1814_v32 = vmax.f32 %v1529_v1, 0.0  ;;  %v1533_v28 = vadd.f32 %v1532_v9, %v9553_v26  ;;  %4891 = vmatprep.subr.bf16.mxu1 %v14306_v33 }
 0x223   : > { %v1817_v62 = vmax.f32 %v1531_v31, 0.0  ;;  %3405 = vmatmul.mubr.bf16.vlgmr.msra.gmra.mrb[64].mxu0 %v14512_v6  ;;  %v10046_v14 = vmul.f32 %v14514_v23, %v1813_v0 }
 0x224   : > { %v1818_v54 = vmax.f32 %v1533_v28, 0.0  ;;  %3414 = vmatprep.mubr.bf16.mxu0 %v14513_v21  ;;  %v10052_v1 = vmul.f32 %v14514_v23, %v1814_v32  ;;  %v14518_v23 = vld [vmem:[#allocation36_spill] sm:$0xff] }
 0x225   : > { %v10049_v60 = vmul.f32 %v14515_v46, %v1817_v62 }
 0x226   : > { %v10055_v40 = vmul.f32 %v14515_v46, %v1818_v54  ;;  %v1536_v31 = vpop.f32.mrb[136].mxu1 }
 0x227   : > { %v1537_v57 = vadd.f32 %v1536_v31, %v9551_v5  ;;  %v1538_v59 = vpop.f32.mrb[137].mxu1  ;;  %v14516_v31 = vpack.c.bf16 %v9625_v10, %v9622_v2 }
 0x228   : > { %v1539_v15 = vadd.f32 %v1538_v59, %v9553_v26  ;;  %v1540_v0 = vpop.f32.mrb[138].mxu1  ;;  %v14517_v59 = vpack.c.bf16 %v9660_v13, %v9657_v52 }
 0x229   : > { %v1821_v28 = vmax.f32 %v1537_v57, 0.0  ;;  %v1541_v32 = vadd.f32 %v1540_v0, %v9551_v5  ;;  %v1542_v62 = vpop.f32.mrb[139].mxu1  ;;  %v14519_v57 = vld [vmem:[#allocation35_spill] sm:$0xff] }
 0x22a   : > { %v1822_v6 = vmax.f32 %v1539_v15, 0.0  ;;  %v1543_v54 = vadd.f32 %v1542_v62, %v9553_v26 }
 0x22b   : > { %v1825_v21 = vmax.f32 %v1541_v32, 0.0  ;;  %3415 = vmatmul.mubr.bf16.gmra.mrb[68].mxu0 %v14516_v31  ;;  %v10072_v9 = vmul.f32 %v14518_v23, %v1821_v28 }
 0x22c   : > { %v1826_v46 = vmax.f32 %v1543_v54, 0.0  ;;  %3424 = vmatprep.mubr.bf16.mxu0 %v14517_v59  ;;  %v10078_v15 = vmul.f32 %v14518_v23, %v1822_v6 }
 0x22d   : > { %v10075_v0 = vmul.f32 %v14519_v57, %v1825_v21 }
 0x22e   : > { %v10081_v32 = vmul.f32 %v14519_v57, %v1826_v46  ;;  %v1546_v2 = vpop.f32.mrb[140].mxu1  ;;  %v14522_v57 = vld [vmem:[#allocation42_spill] sm:$0xff] }
 0x22f   : > { %v1547_v10 = vadd.f32 %v1546_v2, %v9551_v5  ;;  %v1548_v62 = vpop.f32.mrb[141].mxu1  ;;  %v14520_v2 = vpack.c.bf16 %v9654_v51, %v9651_v41 }
 0x230   : > { %v1549_v13 = vadd.f32 %v1548_v62, %v9553_v26  ;;  %v1550_v28 = vpop.f32.mrb[142].mxu1  ;;  %v14521_v62 = vpack.c.bf16 %v9689_v11, %v9686_v34  ;;  %v7694_v34 = vld [vmem:[#allocation2 + $0x8] sm:$0xff]  }
 0x231   : > { %v1829_v54 = vmax.f32 %v1547_v10, 0.0  ;;  %v1551_v46 = vadd.f32 %v1550_v28, %v9551_v5  ;;  %v1552_v21 = vpop.f32.mrb[143].mxu1  ;;  %v14524_v10 = vld [vmem:[#allocation41_spill] sm:$0xff]  ;;  %4892 = vmatpush1.bf16.msra.mxu1 %v7694_v34 }
 0x232   : > { %v1830_v31 = vmax.f32 %v1549_v13, 0.0  ;;  %v1553_v56 = vadd.f32 %v1552_v21, %v9553_v26  ;;  %4893 = vmatprep.subr.bf16.mxu1 %v14306_v33 }
 0x233   : > { %v1833_v59 = vmax.f32 %v1551_v46, 0.0  ;;  %3425 = vmatmul.mubr.bf16.gmra.mrb[72].mxu0 %v14520_v2  ;;  %v10099_v23 = vmul.f32 %v14522_v57, %v1829_v54 }
 0x234   : > { %v1834_v52 = vmax.f32 %v1553_v56, 0.0  ;;  %3434 = vmatprep.mubr.bf16.mxu0 %v14521_v62  ;;  %v10105_v13 = vmul.f32 %v14522_v57, %v1830_v31 }
 0x235   : > { %14523 = vst [vmem:[#allocation76_spill] sm:$0xff] %v10099_v23  ;;  %v10102_v6 = vmul.f32 %v14524_v10, %v1833_v59 }
 0x236   : > { %v10108_v28 = vmul.f32 %v14524_v10, %v1834_v52  ;;  %v1556_v46 = vpop.f32.mrb[144].mxu1 }
 0x237   : > { %v1557_v41 = vadd.f32 %v1556_v46, %v9551_v5  ;;  %v1558_v51 = vpop.f32.mrb[145].mxu1  ;;  %v14525_v46 = vld [vmem:[#allocation12_spill] sm:$0xff] }
 0x238   : > { %v1559_v11 = vadd.f32 %v1558_v51, %v9553_v26  ;;  %v1560_v54 = vpop.f32.mrb[146].mxu1  ;;  %v14526_v10 = vpack.c.bf16 %v9683_v12, %v14525_v46  ;;  %v14527_v51 = vpack.c.bf16 %v9717_v53, %v9714_v3 }
 0x239   : > { %v1837_v56 = vmax.f32 %v1557_v41, 0.0  ;;  %v1561_v31 = vadd.f32 %v1560_v54, %v9551_v5  ;;  %v1562_v59 = vpop.f32.mrb[147].mxu1  ;;  %v14530_v41 = vld [vmem:[#allocation47_spill] sm:$0xff] }
 0x23a   : > { %v1838_v2 = vmax.f32 %v1559_v11, 0.0  ;;  %v1563_v52 = vadd.f32 %v1562_v59, %v9553_v26 }
 0x23b   : > { %v1841_v62 = vmax.f32 %v1561_v31, 0.0  ;;  %3435 = vmatmul.mubr.bf16.gmra.mrb[76].mxu0 %v14526_v10  ;;  %v10125_v21 = vmul.f32 %v14528_v20, %v1837_v56 }
 0x23c   : > { %v1842_v57 = vmax.f32 %v1563_v52, 0.0  ;;  %3444 = vmatprep.mubr.bf16.mxu0 %v14527_v51  ;;  %v10131_v11 = vmul.f32 %v14528_v20, %v1838_v2 }
 0x23d   : > { %14529 = vst [vmem:[#allocation75_spill] sm:$0xff] %v10125_v21  ;;  %v10128_v54 = vmul.f32 %v14530_v41, %v1841_v62  ;;  %v14536_v21 = vld [vmem:[#allocation30_spill] sm:$0xff] }
 0x23e   : > { %14532 = vst [vmem:[#allocation89_spill] sm:$0xff] %v10131_v11  ;;  %v10134_v31 = vmul.f32 %v14530_v41, %v1842_v57  ;;  %v1566_v12 = vpop.f32.mrb[148].mxu1  ;;  %v14534_v41 = vld [vmem:[#allocation27_spill] sm:$0xff] }
 0x23f   : > { %14531 = vst [vmem:[#allocation82_spill] sm:$0xff] %v10128_v54  ;;  %v1567_v10 = vadd.f32 %v1566_v12, %v9551_v5  ;;  %v1568_v59 = vpop.f32.mrb[149].mxu1  ;;  %v14533_v12 = vld [vmem:[#allocation26_spill] sm:$0xff] }
 0x240   : > { %v1569_v53 = vadd.f32 %v1568_v59, %v9553_v26  ;;  %v1570_v56 = vpop.f32.mrb[150].mxu1  ;;  %v14535_v20 = vpack.c.bf16 %v14533_v12, %v14534_v41  ;;  %v14537_v59 = vpack.c.bf16 %v9743_v58, %v14536_v21  ;;  %v14538_v54 = vld [vmem:[#allocation54_spill] sm:$0xff]  ;;  %v7695_v58 = vld [vmem:[#allocation2 + $0x10] sm:$0xff]  }
 0x241   : > { %v1845_v52 = vmax.f32 %v1567_v10, 0.0  ;;  %v1571_v57 = vadd.f32 %v1570_v56, %v9551_v5  ;;  %v1572_v62 = vpop.f32.mrb[151].mxu1  ;;  %v14540_v10 = vld [vmem:[#allocation53_spill] sm:$0xff]  ;;  %4894 = vmatpush1.bf16.msra.mxu1 %v7695_v58 }
 0x242   : > { %v1846_v46 = vmax.f32 %v1569_v53, 0.0  ;;  %v1573_v34 = vadd.f32 %v1572_v62, %v9553_v26  ;;  %4895 = vmatprep.subr.bf16.mxu1 %v14306_v33 }
 0x243   : > { %v1849_v51 = vmax.f32 %v1571_v57, 0.0  ;;  %3445 = vmatmul.mubr.bf16.gmra.mrb[80].mxu0 %v14535_v20  ;;  %v10152_v23 = vmul.f32 %v14538_v54, %v1845_v52 }
 0x244   : > { %v1850_v3 = vmax.f32 %v1573_v34, 0.0  ;;  %3454 = vmatprep.mubr.bf16.mxu0 %v14537_v59  ;;  %v10158_v53 = vmul.f32 %v14538_v54, %v1846_v46 }
 0x245   : > { %14539 = vst [vmem:[#allocation88_spill] sm:$0xff] %v10152_v23  ;;  %v10155_v2 = vmul.f32 %v14540_v10, %v1849_v51  ;;  %v14545_v23 = vld [vmem:[#allocation60_spill] sm:$0xff] }
 0x246   : > { %v10161_v56 = vmul.f32 %v14540_v10, %v1850_v3  ;;  %v1576_v57 = vpop.f32.mrb[152].mxu1  ;;  %v14541_v10 = vld [vmem:[#allocation33_spill] sm:$0xff] }
 0x247   : > { %v1577_v20 = vadd.f32 %v1576_v57, %v9551_v5  ;;  %v1578_v41 = vpop.f32.mrb[153].mxu1  ;;  %v14542_v57 = vld [vmem:[#allocation14_spill] sm:$0xff] }
 0x248   : > { %v1579_v21 = vadd.f32 %v1578_v41, %v9553_v26  ;;  %v1580_v52 = vpop.f32.mrb[154].mxu1  ;;  %v14543_v54 = vpack.c.bf16 %v14541_v10, %v14542_v57  ;;  %v14544_v41 = vpack.c.bf16 %v9769_v4, %v9766_v24 }
 0x249   : > { %v1853_v34 = vmax.f32 %v1577_v20, 0.0  ;;  %v1581_v46 = vadd.f32 %v1580_v52, %v9551_v5  ;;  %v1582_v51 = vpop.f32.mrb[155].mxu1  ;;  %v14547_v20 = vld [vmem:[#allocation59_spill] sm:$0xff] }
 0x24a   : > { %v1854_v12 = vmax.f32 %v1579_v21, 0.0  ;;  %v1583_v3 = vadd.f32 %v1582_v51, %v9553_v26 }
 0x24b   : > { %v1857_v59 = vmax.f32 %v1581_v46, 0.0  ;;  %3455 = vmatmul.mubr.bf16.gmra.mrb[84].mxu0 %v14543_v54  ;;  %v10178_v62 = vmul.f32 %v14545_v23, %v1853_v34 }
 0x24c   : > { %v1858_v11 = vmax.f32 %v1583_v3, 0.0  ;;  %3464 = vmatprep.mubr.bf16.mxu0 %v14544_v41  ;;  %v10184_v21 = vmul.f32 %v14545_v23, %v1854_v12  ;;  %v14552_v23 = vld [vmem:[#allocation11_spill] sm:$0xff] }
 0x24d   : > { %14546 = vst [vmem:[#allocation87_spill] sm:$0xff] %v10178_v62  ;;  %v10181_v52 = vmul.f32 %v14547_v20, %v1857_v59  ;;  %v14554_v62 = vld [vmem:[#allocation67_spill] sm:$0xff] }
 0x24e   : > { %14549 = vst [vmem:[#allocation102_spill] sm:$0xff] %v10184_v21  ;;  %v10187_v46 = vmul.f32 %v14547_v20, %v1858_v11  ;;  %v1586_v10 = vpop.f32.mrb[156].mxu1 }
 0x24f   : > { %14548 = vst [vmem:[#allocation94_spill] sm:$0xff] %v10181_v52  ;;  %v1587_v54 = vadd.f32 %v1586_v10, %v9551_v5  ;;  %v1588_v51 = vpop.f32.mrb[157].mxu1  ;;  %v14550_v10 = vld [vmem:[#allocation13_spill] sm:$0xff] }
 0x250   : > { %v1589_v4 = vadd.f32 %v1588_v51, %v9553_v26  ;;  %v1590_v34 = vpop.f32.mrb[158].mxu1  ;;  %v14551_v20 = vpack.c.bf16 %v9763_v8, %v14550_v10  ;;  %v14553_v51 = vpack.c.bf16 %v9795_v43, %v14552_v23  ;;  %v7696_v43 = vld [vmem:[#allocation2 + $0x18] sm:$0xff]  }
 0x251   : > { %v1861_v3 = vmax.f32 %v1587_v54, 0.0  ;;  %v1591_v11 = vadd.f32 %v1590_v34, %v9551_v5  ;;  %v1592_v59 = vpop.f32.mrb[159].mxu1  ;;  %v14556_v54 = vld [vmem:[#allocation66_spill] sm:$0xff]  ;;  %4896 = vmatpush1.bf16.msra.mxu1 %v7696_v43 }
 0x252   : > { %v1862_v57 = vmax.f32 %v1589_v4, 0.0  ;;  %v1593_v58 = vadd.f32 %v1592_v59, %v9553_v26  ;;  %4897 = vmatprep.subr.bf16.mxu1 %v14306_v33 }
 0x253   : > { %v1865_v41 = vmax.f32 %v1591_v11, 0.0  ;;  %3465 = vmatmul.mubr.bf16.gmra.mrb[88].mxu0 %v14551_v20  ;;  %v10205_v52 = vmul.f32 %v14554_v62, %v1861_v3 }
 0x254   : > { %v1866_v24 = vmax.f32 %v1593_v58, 0.0  ;;  %3474 = vmatprep.mubr.bf16.mxu0 %v14553_v51  ;;  %v10211_v4 = vmul.f32 %v14554_v62, %v1862_v57 }
 0x255   : > { %14555 = vst [vmem:[#allocation101_spill] sm:$0xff] %v10205_v52  ;;  %v10208_v12 = vmul.f32 %v14556_v54, %v1865_v41  ;;  %v14561_v52 = vld [vmem:[#allocation72_spill] sm:$0xff] }
 0x256   : > { %v10214_v34 = vmul.f32 %v14556_v54, %v1866_v24  ;;  %v1596_v11 = vpop.f32.mrb[160].mxu1  ;;  %v14557_v54 = vld [vmem:[#allocation39_spill] sm:$0xff] }
 0x257   : > { %v1597_v8 = vadd.f32 %v1596_v11, %v9551_v5  ;;  %v1598_v20 = vpop.f32.mrb[161].mxu1  ;;  %v14558_v11 = vld [vmem:[#allocation40_spill] sm:$0xff] }
 0x258   : > { %v1599_v23 = vadd.f32 %v1598_v20, %v9553_v26  ;;  %v1600_v3 = vpop.f32.mrb[162].mxu1  ;;  %v14559_v62 = vpack.c.bf16 %v14557_v54, %v14558_v11  ;;  %v14560_v20 = vpack.c.bf16 %v9821_v39, %v9818_v55 }
 0x259   : > { %v1869_v58 = vmax.f32 %v1597_v8, 0.0  ;;  %v1601_v57 = vadd.f32 %v1600_v3, %v9551_v5  ;;  %v1602_v41 = vpop.f32.mrb[163].mxu1  ;;  %v14563_v8 = vld [vmem:[#allocation71_spill] sm:$0xff] }
 0x25a   : > { %v1870_v10 = vmax.f32 %v1599_v23, 0.0  ;;  %v1603_v24 = vadd.f32 %v1602_v41, %v9553_v26 }
 0x25b   : > { %v1873_v51 = vmax.f32 %v1601_v57, 0.0  ;;  %3475 = vmatmul.mubr.bf16.gmra.mrb[92].mxu0 %v14559_v62  ;;  %v10231_v59 = vmul.f32 %v14561_v52, %v1869_v58 }
 0x25c   : > { %v1874_v21 = vmax.f32 %v1603_v24, 0.0  ;;  %3484 = vmatprep.mubr.bf16.mxu0 %v14560_v20  ;;  %v10237_v23 = vmul.f32 %v14561_v52, %v1870_v10  ;;  %v14568_v52 = vld [vmem:[#allocation51_spill] sm:$0xff] }
 0x25d   : > { %14562 = vst [vmem:[#allocation100_spill] sm:$0xff] %v10231_v59  ;;  %v10234_v3 = vmul.f32 %v14563_v8, %v1873_v51  ;;  %v14570_v59 = vld [vmem:[#allocation79_spill] sm:$0xff] }
 0x25e   : > { %14565 = vst [vmem:[#allocation107_spill] sm:$0xff] %v10237_v23  ;;  %v10240_v57 = vmul.f32 %v14563_v8, %v1874_v21  ;;  %v1606_v54 = vpop.f32.mrb[164].mxu1 }
 0x25f   : > { %14564 = vst [vmem:[#allocation99_spill] sm:$0xff] %v10234_v3  ;;  %v1607_v62 = vadd.f32 %v1606_v54, %v9551_v5  ;;  %v1608_v41 = vpop.f32.mrb[165].mxu1  ;;  %v14566_v54 = vld [vmem:[#allocation46_spill] sm:$0xff] }
 0x260   : > { %v1609_v39 = vadd.f32 %v1608_v41, %v9553_v26  ;;  %v1610_v58 = vpop.f32.mrb[166].mxu1  ;;  %v14567_v8 = vpack.c.bf16 %v9815_v61, %v14566_v54  ;;  %v14569_v41 = vpack.c.bf16 %v9847_v42, %v14568_v52  ;;  %v7697_v42 = vld [vmem:[#allocation2 + $0x20] sm:$0xff]  }
 0x261   : > { %v1877_v24 = vmax.f32 %v1607_v62, 0.0  ;;  %v1611_v21 = vadd.f32 %v1610_v58, %v9551_v5  ;;  %v1612_v51 = vpop.f32.mrb[167].mxu1  ;;  %v14572_v62 = vld [vmem:[#allocation78_spill] sm:$0xff]  ;;  %4898 = vmatpush1.bf16.msra.mxu1 %v7697_v42 }
 0x262   : > { %v1878_v11 = vmax.f32 %v1609_v39, 0.0  ;;  %v1613_v43 = vadd.f32 %v1612_v51, %v9553_v26  ;;  %4899 = vmatprep.subr.bf16.mxu1 %v14306_v33 }
 0x263   : > { %v1881_v20 = vmax.f32 %v1611_v21, 0.0  ;;  %3485 = vmatmul.mubr.bf16.gmra.mrb[96].mxu0 %v14567_v8  ;;  %v10258_v3 = vmul.f32 %v14570_v59, %v1877_v24 }
 0x264   : > { %v1882_v55 = vmax.f32 %v1613_v43, 0.0  ;;  %3494 = vmatprep.mubr.bf16.mxu0 %v14569_v41  ;;  %v10264_v39 = vmul.f32 %v14570_v59, %v1878_v11 }
 0x265   : > { %14571 = vst [vmem:[#allocation110_spill] sm:$0xff] %v10258_v3  ;;  %v10261_v10 = vmul.f32 %v14572_v62, %v1881_v20  ;;  %v14578_v3 = vld [vmem:[#allocation84_spill] sm:$0xff] }
 0x266   : > { %v10267_v58 = vmul.f32 %v14572_v62, %v1882_v55  ;;  %v1616_v21 = vpop.f32.mrb[168].mxu1  ;;  %v14574_v62 = vld [vmem:[#allocation52_spill] sm:$0xff] }
 0x267   : > { %14573 = vst [vmem:[#allocation12_spill] sm:$0xff] %v10261_v10  ;;  %v1617_v61 = vadd.f32 %v1616_v21, %v9551_v5  ;;  %v1618_v8 = vpop.f32.mrb[169].mxu1  ;;  %v14575_v21 = vld [vmem:[#allocation45_spill] sm:$0xff] }
 0x268   : > { %v1619_v52 = vadd.f32 %v1618_v8, %v9553_v26  ;;  %v1620_v24 = vpop.f32.mrb[170].mxu1  ;;  %v14576_v59 = vpack.c.bf16 %v14574_v62, %v14575_v21  ;;  %v14577_v8 = vpack.c.bf16 %v9873_v50, %v9870_v47 }
 0x269   : > { %v1885_v43 = vmax.f32 %v1617_v61, 0.0  ;;  %v1621_v11 = vadd.f32 %v1620_v24, %v9551_v5  ;;  %v1622_v20 = vpop.f32.mrb[171].mxu1  ;;  %v14580_v61 = vld [vmem:[#allocation83_spill] sm:$0xff] }
 0x26a   : > { %v1886_v54 = vmax.f32 %v1619_v52, 0.0  ;;  %v1623_v55 = vadd.f32 %v1622_v20, %v9553_v26 }
 0x26b   : > { %v1889_v41 = vmax.f32 %v1621_v11, 0.0  ;;  %3495 = vmatmul.mubr.bf16.gmra.mrb[100].mxu0 %v14576_v59  ;;  %v10284_v51 = vmul.f32 %v14578_v3, %v1885_v43 }
 0x26c   : > { %v1890_v23 = vmax.f32 %v1623_v55, 0.0  ;;  %3504 = vmatprep.mubr.bf16.mxu0 %v14577_v8  ;;  %v10290_v52 = vmul.f32 %v14578_v3, %v1886_v54 }
 0x26d   : > { %14579 = vst [vmem:[#allocation26_spill] sm:$0xff] %v10284_v51  ;;  %v10287_v24 = vmul.f32 %v14580_v61, %v1889_v41  ;;  %v14586_v51 = vld [vmem:[#allocation63_spill] sm:$0xff] }
 0x26e   : > { %14582 = vst [vmem:[#allocation30_spill] sm:$0xff] %v10290_v52  ;;  %v10293_v11 = vmul.f32 %v14580_v61, %v1890_v23  ;;  %v1626_v62 = vpop.f32.mrb[172].mxu1  ;;  %v14584_v61 = vld [vmem:[#allocation58_spill] sm:$0xff] }
 0x26f   : > { %14581 = vst [vmem:[#allocation27_spill] sm:$0xff] %v10287_v24  ;;  %v1627_v59 = vadd.f32 %v1626_v62, %v9551_v5  ;;  %v1628_v20 = vpop.f32.mrb[173].mxu1  ;;  %v14583_v62 = vld [vmem:[#allocation57_spill] sm:$0xff]  ;;  %v14588_v24 = vld [vmem:[#allocation91_spill] sm:$0xff] }
 0x270   : > { %v1629_v50 = vadd.f32 %v1628_v20, %v9553_v26  ;;  %v1630_v43 = vpop.f32.mrb[174].mxu1  ;;  %v14585_v3 = vpack.c.bf16 %v14583_v62, %v14584_v61  ;;  %v14587_v20 = vpack.c.bf16 %v9899_v27, %v14586_v51  ;;  %v14595_v27 = vld [vmem:[#allocation96_spill] sm:$0xff] }
 0x271   : > { %v1893_v55 = vmax.f32 %v1627_v59, 0.0  ;;  %v1631_v23 = vadd.f32 %v1630_v43, %v9551_v5  ;;  %v1632_v41 = vpop.f32.mrb[175].mxu1  ;;  %v14590_v59 = vld [vmem:[#allocation90_spill] sm:$0xff] }
 0x272   : > { %v1894_v21 = vmax.f32 %v1629_v50, 0.0  ;;  %v1633_v42 = vadd.f32 %v1632_v41, %v9553_v26 }
 0x273   : > { %v1897_v8 = vmax.f32 %v1631_v23, 0.0  ;;  %3505 = vmatmul.mubr.bf16.gmra.mrb[104].mxu0 %v14585_v3  ;;  %v10311_v10 = vmul.f32 %v14588_v24, %v1893_v55 }
 0x274   : > { %v1898_v47 = vmax.f32 %v1633_v42, 0.0  ;;  %3514 = vmatprep.mubr.bf16.mxu0 %v14587_v20  ;;  %v10317_v50 = vmul.f32 %v14588_v24, %v1894_v21 }
 0x275   : > { %14589 = vst [vmem:[#allocation33_spill] sm:$0xff] %v10311_v10  ;;  %v10314_v54 = vmul.f32 %v14590_v59, %v1897_v8 }
 0x276   : > { %v10320_v43 = vmul.f32 %v14590_v59, %v1898_v47  ;;  %v1636_v23 = vpop.f32.mrb[176].mxu1  ;;  %v14591_v59 = vld [vmem:[#allocation64_spill] sm:$0xff] }
 0x277   : > { %v1637_v3 = vadd.f32 %v1636_v23, %v9551_v5  ;;  %v1638_v61 = vpop.f32.mrb[177].mxu1  ;;  %v14592_v23 = vld [vmem:[#allocation65_spill] sm:$0xff] }
 0x278   : > { %v1639_v51 = vadd.f32 %v1638_v61, %v9553_v26  ;;  %v1640_v55 = vpop.f32.mrb[178].mxu1  ;;  %v14593_v24 = vpack.c.bf16 %v14591_v59, %v14592_v23  ;;  %v14594_v61 = vpack.c.bf16 %v9925_v30, %v9922_v16  ;;  %v7698_v16 = vld [vmem:[#allocation2 + $0x28] sm:$0xff]  }
 0x279   : > { %v1901_v42 = vmax.f32 %v1637_v3, 0.0  ;;  %v1641_v21 = vadd.f32 %v1640_v55, %v9551_v5  ;;  %v1642_v8 = vpop.f32.mrb[179].mxu1  ;;  %v14597_v3 = vld [vmem:[#allocation95_spill] sm:$0xff]  ;;  %4900 = vmatpush1.bf16.msra.mxu1 %v7698_v16 }
 0x27a   : > { %v1902_v62 = vmax.f32 %v1639_v51, 0.0  ;;  %v1643_v47 = vadd.f32 %v1642_v8, %v9553_v26  ;;  %4901 = vmatprep.subr.bf16.mxu1 %v14306_v33 }
 0x27b   : > { %v1905_v20 = vmax.f32 %v1641_v21, 0.0  ;;  %3515 = vmatmul.mubr.bf16.gmra.mrb[108].mxu0 %v14593_v24  ;;  %v10337_v10 = vmul.f32 %v14595_v27, %v1901_v42 }
 0x27c   : > { %v1906_v52 = vmax.f32 %v1643_v47, 0.0  ;;  %3524 = vmatprep.mubr.bf16.mxu0 %v14594_v61  ;;  %v10343_v51 = vmul.f32 %v14595_v27, %v1902_v62 }
 0x27d   : > { %14596 = vst [vmem:[#allocation14_spill] sm:$0xff] %v10337_v10  ;;  %v10340_v41 = vmul.f32 %v14597_v3, %v1905_v20  ;;  %v14601_v10 = vld [vmem:[#allocation104_spill] sm:$0xff] }
 0x27e   : > { %v10346_v55 = vmul.f32 %v14597_v3, %v1906_v52  ;;  %v1646_v21 = vpop.f32.mrb[180].mxu1 }
 0x27f   : > { %v1647_v24 = vadd.f32 %v1646_v21, %v9551_v5  ;;  %v1648_v59 = vpop.f32.mrb[181].mxu1  ;;  %v14598_v21 = vld [vmem:[#allocation70_spill] sm:$0xff] }
 0x280   : > { %v1649_v30 = vadd.f32 %v1648_v59, %v9553_v26  ;;  %v1650_v42 = vpop.f32.mrb[182].mxu1  ;;  %v14599_v3 = vpack.c.bf16 %v9919_v36, %v14598_v21  ;;  %v14600_v59 = vpack.c.bf16 %v9951_v25, %v9948_v38 }
 0x281   : > { %v1909_v47 = vmax.f32 %v1647_v24, 0.0  ;;  %v1651_v62 = vadd.f32 %v1650_v42, %v9551_v5  ;;  %v1652_v20 = vpop.f32.mrb[183].mxu1  ;;  %v14603_v24 = vld [vmem:[#allocation103_spill] sm:$0xff] }
 0x282   : > { %v1910_v23 = vmax.f32 %v1649_v30, 0.0  ;;  %v1653_v52 = vadd.f32 %v1652_v20, %v9553_v26 }
 0x283   : > { %v1913_v61 = vmax.f32 %v1651_v62, 0.0  ;;  %3525 = vmatmul.mubr.bf16.gmra.mrb[112].mxu0 %v14599_v3  ;;  %v10363_v8 = vmul.f32 %v14601_v10, %v1909_v47 }
 0x284   : > { %v1914_v27 = vmax.f32 %v1653_v52, 0.0  ;;  %3534 = vmatprep.mubr.bf16.mxu0 %v14600_v59  ;;  %v10369_v30 = vmul.f32 %v14601_v10, %v1910_v23  ;;  %v14607_v10 = vld [vmem:[#allocation108_spill] sm:$0xff] }
 0x285   : > { %14602 = vst [vmem:[#allocation13_spill] sm:$0xff] %v10363_v8  ;;  %v10366_v42 = vmul.f32 %v14603_v24, %v1913_v61 }
 0x286   : > { %v10372_v62 = vmul.f32 %v14603_v24, %v1914_v27  ;;  %v1656_v36 = vpop.f32.mrb[184].mxu1 }
 0x287   : > { %v1657_v3 = vadd.f32 %v1656_v36, %v9551_v5  ;;  %v1658_v20 = vpop.f32.mrb[185].mxu1  ;;  %v14604_v36 = vld [vmem:[#allocation77_spill] sm:$0xff] }
 0x288   : > { %v1659_v25 = vadd.f32 %v1658_v20, %v9553_v26  ;;  %v1660_v47 = vpop.f32.mrb[186].mxu1  ;;  %v14605_v24 = vpack.c.bf16 %v9945_v44, %v14604_v36  ;;  %v14606_v20 = vpack.c.bf16 %v9977_v29, %v9974_v7  ;;  %v7699_v7 = vld [vmem:[#allocation2 + $0x30] sm:$0xff]  }
 0x289   : > { %v1917_v52 = vmax.f32 %v1657_v3, 0.0  ;;  %v1661_v27 = vadd.f32 %v1660_v47, %v9551_v5  ;;  %v1662_v61 = vpop.f32.mrb[187].mxu1  ;;  %v14608_v3 = vld [vmem:[#allocation106_spill] sm:$0xff]  ;;  %4902 = vmatpush1.bf16.msra.mxu1 %v7699_v7  ;;  %v14616_v7 = vpack.c.bf16 %v10055_v40, %v10052_v1 }
 0x28a   : > { %v1918_v21 = vmax.f32 %v1659_v25, 0.0  ;;  %v1663_v16 = vadd.f32 %v1662_v61, %v9553_v26  ;;  %4903 = vmatprep.subr.bf16.mxu1 %v14306_v33  ;;  %v14625_v40 = vld [vmem:[#allocation82_spill] sm:$0xff] }
 0x28b   : > { %v1921_v59 = vmax.f32 %v1661_v27, 0.0  ;;  %3535 = vmatmul.mubr.bf16.gmra.mrb[116].mxu0 %v14605_v24  ;;  %v10390_v8 = vmul.f32 %v14607_v10, %v1917_v52 }
 0x28c   : > { %v1922_v38 = vmax.f32 %v1663_v16, 0.0  ;;  %3544 = vmatprep.mubr.bf16.mxu0 %v14606_v20  ;;  %v10396_v25 = vmul.f32 %v14607_v10, %v1918_v21  ;;  %v14611_v10 = vld [vmem:[#allocation111_spill] sm:$0xff] }
 0x28d   : > { %v10393_v23 = vmul.f32 %v14608_v3, %v1921_v59 }
 0x28e   : > { %v10399_v47 = vmul.f32 %v14608_v3, %v1922_v38  ;;  %v1666_v27 = vpop.f32.mrb[188].mxu1 }
 0x28f   : > { %v1667_v44 = vadd.f32 %v1666_v27, %v9551_v5  ;;  %v1668_v24 = vpop.f32.mrb[189].mxu1  ;;  %v14609_v27 = vpack.c.bf16 %v9971_v37, %v9968_v63 }
 0x290   : > { %v1669_v29 = vadd.f32 %v1668_v24, %v9553_v26  ;;  %v1670_v52 = vpop.f32.mrb[190].mxu1  ;;  %v14610_v24 = vpack.c.bf16 %v10003_v49, %v10000_v18  ;;  %v14613_v18 = vpack.c.bf16 %v9997_v17, %v9994_v22  ;;  %v14614_v49 = vpack.c.bf16 %v10029_v19, %v10026_v45  ;;  %v7701_v45 = vld [vmem:[#allocation2 + $0x40] sm:$0xff]   ;;  %v14621_v19 = vld [vmem:[#allocation76_spill] sm:$0xff] }
 0x291   : > { %v1925_v16 = vmax.f32 %v1667_v44, 0.0  ;;  %v1671_v21 = vadd.f32 %v1670_v52, %v9551_v5  ;;  %v1672_v59 = vpop.f32.mrb[191].mxu1  ;;  %v14612_v44 = vld [vmem:[#allocation109_spill] sm:$0xff]  ;;  %v14617_v22 = vpack.c.bf16 %v10049_v60, %v10046_v14  ;;  %v14618_v17 = vpack.c.bf16 %v10081_v32, %v10078_v15  ;;  %v14626_v15 = vld [vmem:[#allocation75_spill] sm:$0xff] }
 0x292   : > { %v1926_v36 = vmax.f32 %v1669_v29, 0.0  ;;  %v1673_v38 = vadd.f32 %v1672_v59, %v9553_v26  ;;  %v7700_v52 = vld [vmem:[#allocation2 + $0x38] sm:$0xff]   ;;  %v14622_v14 = vpack.c.bf16 %v10102_v6, %v14621_v19  ;;  %v7702_v32 = vld [vmem:[#allocation2 + $0x48] sm:$0xff]  }
 0x293   : > { %v1929_v20 = vmax.f32 %v1671_v21, 0.0  ;;  %3545 = vmatmul.mubr.bf16.gmra.mrb[120].mxu0 %v14609_v27  ;;  %v10416_v61 = vmul.f32 %v14611_v10, %v1925_v16  ;;  %4904 = vmatpush1.bf16.msra.mxu1 %v7700_v52  ;;  %v14623_v60 = vld [vmem:[#allocation89_spill] sm:$0xff]  ;;  %v14633_v16 = vld [vmem:[#allocation94_spill] sm:$0xff]  ;;  %v14634_v21 = vld [vmem:[#allocation87_spill] sm:$0xff] }
 0x294   : > { %v1930_v3 = vmax.f32 %v1673_v38, 0.0  ;;  %3554 = vmatprep.mubr.bf16.mxu0 %v14610_v24  ;;  %v10422_v29 = vmul.f32 %v14611_v10, %v1926_v36  ;;  %4905 = vmatprep.subr.bf16.mxu1 %v14306_v33  ;;  %v14624_v1 = vpack.c.bf16 %v10134_v31, %v14623_v60  ;;  %v14635_v59 = vpack.c.bf16 %v14633_v16, %v14634_v21  ;;  %v14637_v36 = vld [vmem:[#allocation101_spill] sm:$0xff]  ;;  %v14639_v38 = vld [vmem:[#allocation107_spill] sm:$0xff]  ;;  %v14642_v27 = vld [vmem:[#allocation100_spill] sm:$0xff] }
 0x295   : > { %v10419_v5 = vmul.f32 %v14612_v44, %v1929_v20  ;;  %v14641_v20 = vld [vmem:[#allocation99_spill] sm:$0xff]  ;;  %v14651_v52 = vld [vmem:[#allocation26_spill] sm:$0xff] }
 0x296   : > { %v10425_v26 = vmul.f32 %v14612_v44, %v1930_v3  ;;  %v14615_v3 = vpack.c.bf16 %v10023_v48, %v10020_v35  ;;  %v14619_v35 = vpack.c.bf16 %v10075_v0, %v10072_v9  ;;  %v14620_v48 = vpack.c.bf16 %v10108_v28, %v10105_v13  ;;  %v14629_v13 = vld [vmem:[#allocation88_spill] sm:$0xff]  ;;  %v14631_v28 = vld [vmem:[#allocation102_spill] sm:$0xff] }
 0x297   : > { %v2633_v63 = vpack.c.bf16 %v10419_v5, %v10416_v61  ;;  %4906 = vmatpush1.bf16.msra.mxu1 %v7701_v45  ;;  %v14627_v9 = vpack.c.bf16 %v14625_v40, %v14626_v15  ;;  %v14628_v0 = vpack.c.bf16 %v10161_v56, %v10158_v53  ;;  %v14630_v6 = vpack.c.bf16 %v10155_v2, %v14629_v13  ;;  %v7703_v56 = vld [vmem:[#allocation2 + $0x50] sm:$0xff]  }
 0x298   : > { %v2634_v37 = vpack.c.bf16 %v10425_v26, %v10422_v29  ;;  %4907 = vmatprep.subr.bf16.mxu1 %v14306_v33  ;;  %v14632_v31 = vpack.c.bf16 %v10187_v46, %v14631_v28  ;;  %v14636_v53 = vpack.c.bf16 %v10214_v34, %v10211_v4  ;;  %v14638_v2 = vpack.c.bf16 %v10208_v12, %v14637_v36  ;;  %v7704_v34 = vld [vmem:[#allocation2 + $0x58] sm:$0xff]  }
 0x299   : > { %v14640_v46 = vpack.c.bf16 %v10240_v57, %v14639_v38  ;;  %v14643_v24 = vpack.c.bf16 %v14641_v20, %v14642_v27  ;;  %v14644_v4 = vpack.c.bf16 %v10267_v58, %v10264_v39  ;;  %v14653_v39 = vpack.c.bf16 %v10320_v43, %v10317_v50 }
 0x29a   : > { %v14659_v20 = vpack.c.bf16 %v10372_v62, %v10369_v30 }
 0x29b   : > { %3555 = vmatmul.mubr.bf16.gmra.mrb[124].mxu0 %v14613_v18  ;;  %4908 = vmatpush1.bf16.msra.mxu1 %v7702_v32  ;;  %v14645_v18 = vld [vmem:[#allocation12_spill] sm:$0xff] }
 0x29c   : > { %3564 = vmatprep.mubr.bf16.mxu0 %v14614_v49  ;;  %4909 = vmatprep.subr.bf16.mxu1 %v14306_v33  ;;  %v14646_v49 = vld [vmem:[#allocation110_spill] sm:$0xff] }
 0x29d   : > { %v14647_v12 = vpack.c.bf16 %v14645_v18, %v14646_v49 }
 0x29f   : > { %4910 = vmatpush1.bf16.msra.mxu1 %v7703_v56 }
 0x2a0   : > { %4911 = vmatprep.subr.bf16.mxu1 %v14306_v33 }
 0x2a3   : > { %3565 = vmatmul.mubr.bf16.gmra.mrb[128].mxu0 %v14615_v3  ;;  %4912 = vmatpush1.bf16.msra.mxu1 %v7704_v34  ;;  %v14648_v3 = vld [vmem:[#allocation30_spill] sm:$0xff] }
 0x2a4   : > { %3574 = vmatprep.mubr.bf16.mxu0 %v14616_v7  ;;  %4913 = vmatprep.subr.bf16.mxu1 %v14306_v33  ;;  %v14649_v57 = vpack.c.bf16 %v10293_v11, %v14648_v3  ;;  %v14650_v7 = vld [vmem:[#allocation27_spill] sm:$0xff] }
 0x2ab   : > { %3575 = vmatmul.mubr.bf16.gmra.mrb[132].mxu0 %v14617_v22  ;;  %v14652_v22 = vpack.c.bf16 %v14650_v7, %v14651_v52 }
 0x2ac   : > { %3584 = vmatprep.mubr.bf16.mxu0 %v14618_v17 }
 0x2b3   : > { %3585 = vmatmul.mubr.bf16.gmra.mrb[136].mxu0 %v14619_v35 }
 0x2b4   : > { %3594 = vmatprep.mubr.bf16.mxu0 %v14620_v48 }
 0x2bb   : > { %3595 = vmatmul.mubr.bf16.gmra.mrb[140].mxu0 %v14622_v14 }
 0x2bc   : > { %3604 = vmatprep.mubr.bf16.mxu0 %v14624_v1  ;;  %v14654_v1 = vld [vmem:[#allocation33_spill] sm:$0xff] }
 0x2bd   : > { %v14655_v40 = vpack.c.bf16 %v10314_v54, %v14654_v1 }
 0x2c3   : > { %3605 = vmatmul.mubr.bf16.gmra.mrb[144].mxu0 %v14627_v9  ;;  %v14656_v9 = vpack.c.bf16 %v10346_v55, %v10343_v51 }
 0x2c4   : > { %3614 = vmatprep.mubr.bf16.mxu0 %v14628_v0 }
 0x2cb   : > { %3615 = vmatmul.mubr.bf16.gmra.mrb[148].mxu0 %v14630_v6 }
 0x2cc   : > { %3624 = vmatprep.mubr.bf16.mxu0 %v14632_v31 }
 0x2d3   : > { %3625 = vmatmul.mubr.bf16.gmra.mrb[152].mxu0 %v14635_v59 }
 0x2d4   : > { %3634 = vmatprep.mubr.bf16.mxu0 %v14636_v53 }
 0x2db   : > { %3635 = vmatmul.mubr.bf16.gmra.mrb[156].mxu0 %v14638_v2  ;;  %v14657_v2 = vld [vmem:[#allocation14_spill] sm:$0xff] }
 0x2dc   : > { %3644 = vmatprep.mubr.bf16.mxu0 %v14640_v46  ;;  %v14658_v38 = vpack.c.bf16 %v10340_v41, %v14657_v2 }
 0x2e3   : > { %3645 = vmatmul.mubr.bf16.gmra.mrb[160].mxu0 %v14643_v24 }
 0x2e4   : > { %3654 = vmatprep.mubr.bf16.mxu0 %v14644_v4 }
 0x2eb   : > { %3655 = vmatmul.mubr.bf16.gmra.mrb[164].mxu0 %v14647_v12 }
 0x2ec   : > { %3664 = vmatprep.mubr.bf16.mxu0 %v14649_v57 }
 0x2f3   : > { %3665 = vmatmul.mubr.bf16.gmra.mrb[168].mxu0 %v14652_v22 }
 0x2f4   : > { %3674 = vmatprep.mubr.bf16.mxu0 %v14653_v39  ;;  %v14660_v39 = vld [vmem:[#allocation13_spill] sm:$0xff] }
 0x2f6   : > { %v10509_v58 = vpop.f32.mrb[64].mxu0 }
 0x2f7   : > { %v10511_v17 = vpop.f32.mrb[65].mxu0  ;;  %v3887_v48 = vmul.f32 %v10509_v58, %v10509_v58 }
 0x2f8   : > { %v10513_v35 = vpop.f32.mrb[66].mxu0  ;;  %v3888_v50 = vmul.f32 %v10511_v17, %v10511_v17 }
 0x2f9   : > { %v3725_v11 = vadd.f32 %v10513_v35, %v10509_v58  ;;  %v3889_v45 = vmul.f32 %v10513_v35, %v10513_v35  ;;  %v10521_v19 = vpop.f32.mrb[67].mxu0 }
 0x2fa   : > { %v3762_v43 = vadd.f32 %v10521_v19, %v10511_v17  ;;  %v3890_v14 = vmul.f32 %v10521_v19, %v10521_v19 }
 0x2fb   : > { %v4015_v60 = vadd.f32 %v3889_v45, %v3887_v48  ;;  %3675 = vmatmul.mubr.bf16.gmra.mrb[172].mxu0 %v14655_v40  ;;  %v14661_v48 = vpack.c.bf16 %v10366_v42, %v14660_v39  ;;  %v14662_v45 = vpack.c.bf16 %v10399_v47, %v10396_v25 }
 0x2fc   : > { %v4052_v15 = vadd.f32 %v3890_v14, %v3888_v50  ;;  %3684 = vmatprep.mubr.bf16.mxu0 %v14656_v9 }
 0x2fe   : > { %v10535_v0 = vpop.f32.mrb[68].mxu0 }
 0x2ff   : > { %v3726_v32 = vadd.f32 %v3725_v11, %v10535_v0  ;;  %v3891_v13 = vmul.f32 %v10535_v0, %v10535_v0  ;;  %v10540_v6 = vpop.f32.mrb[69].mxu0 }
 0x300   : > { %v3763_v28 = vadd.f32 %v3762_v43, %v10540_v6  ;;  %v3892_v54 = vmul.f32 %v10540_v6, %v10540_v6  ;;  %v10545_v31 = vpop.f32.mrb[70].mxu0 }
 0x301   : > { %v4016_v16 = vadd.f32 %v4015_v60, %v3891_v13  ;;  %v3727_v51 = vadd.f32 %v3726_v32, %v10545_v31  ;;  %v3893_v55 = vmul.f32 %v10545_v31, %v10545_v31  ;;  %v10550_v21 = vpop.f32.mrb[71].mxu0 }
 0x302   : > { %v4053_v59 = vadd.f32 %v4052_v15, %v3892_v54  ;;  %v3764_v53 = vadd.f32 %v3763_v28, %v10550_v21  ;;  %v3894_v56 = vmul.f32 %v10550_v21, %v10550_v21 }
 0x303   : > { %v4017_v36 = vadd.f32 %v4016_v16, %v3893_v55  ;;  %3685 = vmatmul.mubr.bf16.gmra.mrb[176].mxu0 %v14658_v38  ;;  %v14663_v16 = vpack.c.bf16 %v10393_v23, %v10390_v8 }
 0x304   : > { %v4054_v46 = vadd.f32 %v4053_v59, %v3894_v56  ;;  %3694 = vmatprep.mubr.bf16.mxu0 %v14659_v20 }
 0x306   : > { %v10561_v27 = vpop.f32.mrb[72].mxu0 }
 0x307   : > { %v3728_v24 = vadd.f32 %v3727_v51, %v10561_v27  ;;  %v3895_v4 = vmul.f32 %v10561_v27, %v10561_v27  ;;  %v10566_v34 = vpop.f32.mrb[73].mxu0 }
 0x308   : > { %v3765_v18 = vadd.f32 %v3764_v53, %v10566_v34  ;;  %v3896_v41 = vmul.f32 %v10566_v34, %v10566_v34  ;;  %v10571_v49 = vpop.f32.mrb[74].mxu0 }
 0x309   : > { %v4018_v12 = vadd.f32 %v4017_v36, %v3895_v4  ;;  %v3729_v30 = vadd.f32 %v3728_v24, %v10571_v49  ;;  %v3897_v62 = vmul.f32 %v10571_v49, %v10571_v49  ;;  %v10576_v3 = vpop.f32.mrb[75].mxu0 }
 0x30a   : > { %v4055_v57 = vadd.f32 %v4054_v46, %v3896_v41  ;;  %v3766_v7 = vadd.f32 %v3765_v18, %v10576_v3  ;;  %v3898_v52 = vmul.f32 %v10576_v3, %v10576_v3 }
 0x30b   : > { %v4019_v22 = vadd.f32 %v4018_v12, %v3897_v62  ;;  %3695 = vmatmul.mubr.bf16.gmra.mrb[180].mxu0 %v14661_v48 }
 0x30c   : > { %v4056_v11 = vadd.f32 %v4055_v57, %v3898_v52  ;;  %3704 = vmatprep.mubr.bf16.mxu0 %v14662_v45 }
 0x30e   : > { %v10587_v50 = vpop.f32.mrb[76].mxu0 }
 0x30f   : > { %v3730_v43 = vadd.f32 %v3729_v30, %v10587_v50  ;;  %v3899_v14 = vmul.f32 %v10587_v50, %v10587_v50  ;;  %v10592_v60 = vpop.f32.mrb[77].mxu0 }
 0x310   : > { %v3767_v1 = vadd.f32 %v3766_v7, %v10592_v60  ;;  %v3900_v42 = vmul.f32 %v10592_v60, %v10592_v60  ;;  %v10597_v40 = vpop.f32.mrb[78].mxu0 }
 0x311   : > { %v4020_v15 = vadd.f32 %v4019_v22, %v3899_v14  ;;  %v3731_v25 = vadd.f32 %v3730_v43, %v10597_v40  ;;  %v3901_v47 = vmul.f32 %v10597_v40, %v10597_v40  ;;  %v10602_v9 = vpop.f32.mrb[79].mxu0 }
 0x312   : > { %v4057_v32 = vadd.f32 %v4056_v11, %v3900_v42  ;;  %v3768_v13 = vadd.f32 %v3767_v1, %v10602_v9  ;;  %v3902_v28 = vmul.f32 %v10602_v9, %v10602_v9 }
 0x313   : > { %v4021_v54 = vadd.f32 %v4020_v15, %v3901_v47  ;;  %3705 = vmatmul.mubr.bf16.gmra.mrb[184].mxu0 %v14663_v16 }
 0x314   : > { %v4058_v51 = vadd.f32 %v4057_v32, %v3902_v28  ;;  %3714 = vmatprep.mubr.bf16.mxu0 %v2634_v37 }
 0x316   : > { %v10613_v55 = vpop.f32.mrb[80].mxu0 }
 0x317   : > { %v3732_v59 = vadd.f32 %v3731_v25, %v10613_v55  ;;  %v3903_v53 = vmul.f32 %v10613_v55, %v10613_v55  ;;  %v10618_v56 = vpop.f32.mrb[81].mxu0 }
 0x318   : > { %v3769_v36 = vadd.f32 %v3768_v13, %v10618_v56  ;;  %v3904_v8 = vmul.f32 %v10618_v56, %v10618_v56  ;;  %v10623_v23 = vpop.f32.mrb[82].mxu0 }
 0x319   : > { %v4022_v2 = vadd.f32 %v4021_v54, %v3903_v53  ;;  %v3733_v29 = vadd.f32 %v3732_v59, %v10623_v23  ;;  %v3905_v26 = vmul.f32 %v10623_v23, %v10623_v23  ;;  %v10628_v37 = vpop.f32.mrb[83].mxu0 }
 0x31a   : > { %v4059_v38 = vadd.f32 %v4058_v51, %v3904_v8  ;;  %v3770_v46 = vadd.f32 %v3769_v36, %v10628_v37  ;;  %v3906_v20 = vmul.f32 %v10628_v37, %v10628_v37 }
 0x31b   : > { %v4023_v24 = vadd.f32 %v4022_v2, %v3905_v26  ;;  %3715 = vmatmul.mubr.bf16.gmra.mrb[188].mxu0 %v2633_v63 }
 0x31c   : > { %v4060_v4 = vadd.f32 %v4059_v38, %v3906_v20 }
 0x31e   : > { %v10636_v18 = vpop.f32.mrb[84].mxu0 }
 0x31f   : > { %v3734_v41 = vadd.f32 %v3733_v29, %v10636_v18  ;;  %v3907_v12 = vmul.f32 %v10636_v18, %v10636_v18  ;;  %v10641_v30 = vpop.f32.mrb[85].mxu0 }
 0x320   : > { %v3771_v62 = vadd.f32 %v3770_v46, %v10641_v30  ;;  %v3908_v57 = vmul.f32 %v10641_v30, %v10641_v30  ;;  %v10646_v7 = vpop.f32.mrb[86].mxu0 }
 0x321   : > { %v4024_v52 = vadd.f32 %v4023_v24, %v3907_v12  ;;  %v3735_v61 = vadd.f32 %v3734_v41, %v10646_v7  ;;  %v3909_v5 = vmul.f32 %v10646_v7, %v10646_v7  ;;  %v10651_v63 = vpop.f32.mrb[87].mxu0 }
 0x322   : > { %v4061_v22 = vadd.f32 %v4060_v4, %v3908_v57  ;;  %v3772_v39 = vadd.f32 %v3771_v62, %v10651_v63  ;;  %v3910_v48 = vmul.f32 %v10651_v63, %v10651_v63 }
 0x323   : > { %v4025_v11 = vadd.f32 %v4024_v52, %v3909_v5 }
 0x324   : > { %v4062_v45 = vadd.f32 %v4061_v22, %v3910_v48 }
 0x326   : > { %v10656_v43 = vpop.f32.mrb[88].mxu0 }
 0x327   : > { %v3736_v14 = vadd.f32 %v3735_v61, %v10656_v43  ;;  %v3911_v1 = vmul.f32 %v10656_v43, %v10656_v43  ;;  %v10661_v42 = vpop.f32.mrb[89].mxu0 }
 0x328   : > { %v3773_v15 = vadd.f32 %v3772_v39, %v10661_v42  ;;  %v3912_v25 = vmul.f32 %v10661_v42, %v10661_v42  ;;  %v10666_v47 = vpop.f32.mrb[90].mxu0  ;;  %v7705_v39 = vld [vmem:[#allocation2 + $0x60] sm:$0xff]  }
 0x329   : > { %v4026_v32 = vadd.f32 %v4025_v11, %v3911_v1  ;;  %v3737_v13 = vadd.f32 %v3736_v14, %v10666_v47  ;;  %v3913_v28 = vmul.f32 %v10666_v47, %v10666_v47  ;;  %v10671_v54 = vpop.f32.mrb[91].mxu0  ;;  %4914 = vmatpush1.bf16.msra.mxu1 %v7705_v39 }
 0x32a   : > { %v4063_v16 = vadd.f32 %v4062_v45, %v3912_v25  ;;  %v3774_v51 = vadd.f32 %v3773_v15, %v10671_v54  ;;  %v3914_v59 = vmul.f32 %v10671_v54, %v10671_v54  ;;  %4915 = vmatprep.subr.bf16.mxu1 %v14306_v33 }
 0x32b   : > { %v4027_v53 = vadd.f32 %v4026_v32, %v3913_v28 }
 0x32c   : > { %v4064_v36 = vadd.f32 %v4063_v16, %v3914_v59 }
 0x32e   : > { %v10676_v8 = vpop.f32.mrb[92].mxu0 }
 0x32f   : > { %v3738_v2 = vadd.f32 %v3737_v13, %v10676_v8  ;;  %v3915_v29 = vmul.f32 %v10676_v8, %v10676_v8  ;;  %v10681_v26 = vpop.f32.mrb[93].mxu0 }
 0x330   : > { %v3775_v38 = vadd.f32 %v3774_v51, %v10681_v26  ;;  %v3916_v46 = vmul.f32 %v10681_v26, %v10681_v26  ;;  %v10686_v20 = vpop.f32.mrb[94].mxu0 }
 0x331   : > { %v4028_v24 = vadd.f32 %v4027_v53, %v3915_v29  ;;  %v3739_v4 = vadd.f32 %v3738_v2, %v10686_v20  ;;  %v3917_v41 = vmul.f32 %v10686_v20, %v10686_v20  ;;  %v10691_v12 = vpop.f32.mrb[95].mxu0  ;;  %v7706_v53 = vld [vmem:[#allocation2 + $0x68] sm:$0xff]  }
 0x332   : > { %v4065_v62 = vadd.f32 %v4064_v36, %v3916_v46  ;;  %v3776_v57 = vadd.f32 %v3775_v38, %v10691_v12  ;;  %v3918_v52 = vmul.f32 %v10691_v12, %v10691_v12  ;;  %4916 = vmatpush1.bf16.msra.mxu1 %v7706_v53  ;;  %v7707_v38 = vld [vmem:[#allocation2 + $0x70] sm:$0xff]  }
 0x333   : > { %v4029_v61 = vadd.f32 %v4028_v24, %v3917_v41  ;;  %4917 = vmatprep.subr.bf16.mxu1 %v14306_v33 }
 0x334   : > { %v4066_v5 = vadd.f32 %v4065_v62, %v3918_v52 }
 0x336   : > { %v10696_v22 = vpop.f32.mrb[96].mxu0  ;;  %4918 = vmatpush1.bf16.msra.mxu1 %v7707_v38 }
 0x337   : > { %v3740_v48 = vadd.f32 %v3739_v4, %v10696_v22  ;;  %v3919_v11 = vmul.f32 %v10696_v22, %v10696_v22  ;;  %v10701_v45 = vpop.f32.mrb[97].mxu0  ;;  %4919 = vmatprep.subr.bf16.mxu1 %v14306_v33 }
 0x338   : > { %v3777_v14 = vadd.f32 %v3776_v57, %v10701_v45  ;;  %v3920_v1 = vmul.f32 %v10701_v45, %v10701_v45  ;;  %v10706_v15 = vpop.f32.mrb[98].mxu0 }
 0x339   : > { %v4030_v25 = vadd.f32 %v4029_v61, %v3919_v11  ;;  %v3741_v32 = vadd.f32 %v3740_v48, %v10706_v15  ;;  %v3921_v13 = vmul.f32 %v10706_v15, %v10706_v15  ;;  %v10711_v28 = vpop.f32.mrb[99].mxu0 }
 0x33a   : > { %v4067_v16 = vadd.f32 %v4066_v5, %v3920_v1  ;;  %v3778_v51 = vadd.f32 %v3777_v14, %v10711_v28  ;;  %v3922_v59 = vmul.f32 %v10711_v28, %v10711_v28 }
 0x33b   : > { %v4031_v36 = vadd.f32 %v4030_v25, %v3921_v13  ;;  %v7708_v13 = vld [vmem:[#allocation2 + $0x78] sm:$0xff]  }
 0x33c   : > { %v4068_v2 = vadd.f32 %v4067_v16, %v3922_v59  ;;  %4920 = vmatpush1.bf16.msra.mxu1 %v7708_v13 }
 0x33e   : > { %v10718_v29 = vpop.f32.mrb[100].mxu0 }
 0x33f   : > { %14664 = vst [vmem:[#allocation11_spill] sm:$0xff] %v10718_v29  ;;  %v3742_v46 = vadd.f32 %v3741_v32, %v10718_v29  ;;  %v3923_v24 = vmul.f32 %v10718_v29, %v10718_v29  ;;  %v10723_v4 = vpop.f32.mrb[101].mxu0 }
 0x340   : > { %14665 = vst [vmem:[#allocation39_spill] sm:$0xff] %v10723_v4  ;;  %v3779_v41 = vadd.f32 %v3778_v51, %v10723_v4  ;;  %v3924_v62 = vmul.f32 %v10723_v4, %v10723_v4  ;;  %v10728_v57 = vpop.f32.mrb[102].mxu0  ;;  %v10879_v4 = vpop.permute.xlu0 %3875 }
 0x341   : > { %14666 = vst [vmem:[#allocation40_spill] sm:$0xff] %v10728_v57  ;;  %v4032_v52 = vadd.f32 %v4031_v36, %v3923_v24  ;;  %v3743_v61 = vadd.f32 %v3742_v46, %v10728_v57  ;;  %v3925_v5 = vmul.f32 %v10728_v57, %v10728_v57  ;;  %v10733_v39 = vpop.f32.mrb[103].mxu0  ;;  %14695 = vst [vmem:[#allocation33_spill] sm:$0xff] %v10879_v4 }
 0x342   : > { %14667 = vst [vmem:[#allocation46_spill] sm:$0xff] %v10733_v39  ;;  %v4069_v48 = vadd.f32 %v4068_v2, %v3924_v62  ;;  %v3780_v11 = vadd.f32 %v3779_v41, %v10733_v39  ;;  %v3926_v14 = vmul.f32 %v10733_v39, %v10733_v39 }
 0x343   : > { %v4033_v1 = vadd.f32 %v4032_v52, %v3925_v5 }
 0x344   : > { %v4070_v25 = vadd.f32 %v4069_v48, %v3926_v14 }
 0x346   : > { %v10739_v32 = vpop.f32.mrb[104].mxu0 }
 0x347   : > { %14668 = vst [vmem:[#allocation51_spill] sm:$0xff] %v10739_v32  ;;  %v3744_v16 = vadd.f32 %v3743_v61, %v10739_v32  ;;  %v3927_v51 = vmul.f32 %v10739_v32, %v10739_v32  ;;  %v10744_v59 = vpop.f32.mrb[105].mxu0 }
 0x348   : > { %14669 = vst [vmem:[#allocation52_spill] sm:$0xff] %v10744_v59  ;;  %v3781_v33 = vadd.f32 %v3780_v11, %v10744_v59  ;;  %v3928_v53 = vmul.f32 %v10744_v59, %v10744_v59  ;;  %v10749_v36 = vpop.f32.mrb[106].mxu0 }
 0x349   : > { %14670 = vst [vmem:[#allocation45_spill] sm:$0xff] %v10749_v36  ;;  %v4034_v2 = vadd.f32 %v4033_v1, %v3927_v51  ;;  %v3745_v38 = vadd.f32 %v3744_v16, %v10749_v36  ;;  %v3929_v46 = vmul.f32 %v10749_v36, %v10749_v36  ;;  %v10754_v24 = vpop.f32.mrb[107].mxu0 }
 0x34a   : > { %14671 = vst [vmem:[#allocation57_spill] sm:$0xff] %v10754_v24  ;;  %v4071_v41 = vadd.f32 %v4070_v25, %v3928_v53  ;;  %v3782_v62 = vadd.f32 %v3781_v33, %v10754_v24  ;;  %v3930_v52 = vmul.f32 %v10754_v24, %v10754_v24 }
 0x34b   : > { %v4035_v61 = vadd.f32 %v4034_v2, %v3929_v46 }
 0x34c   : > { %v4072_v5 = vadd.f32 %v4071_v41, %v3930_v52 }
 0x34e   : > { %v10759_v48 = vpop.f32.mrb[108].mxu0 }
 0x34f   : > { %14672 = vst [vmem:[#allocation58_spill] sm:$0xff] %v10759_v48  ;;  %v3746_v11 = vadd.f32 %v3745_v38, %v10759_v48  ;;  %v3931_v14 = vmul.f32 %v10759_v48, %v10759_v48  ;;  %v10764_v1 = vpop.f32.mrb[109].mxu0 }
 0x350   : > { %14673 = vst [vmem:[#allocation63_spill] sm:$0xff] %v10764_v1  ;;  %v3783_v13 = vadd.f32 %v3782_v62, %v10764_v1  ;;  %v3932_v25 = vmul.f32 %v10764_v1, %v10764_v1  ;;  %v10769_v16 = vpop.f32.mrb[110].mxu0 }
 0x351   : > { %14674 = vst [vmem:[#allocation64_spill] sm:$0xff] %v10769_v16  ;;  %v4036_v51 = vadd.f32 %v4035_v61, %v3931_v14  ;;  %v3747_v33 = vadd.f32 %v3746_v11, %v10769_v16  ;;  %v3933_v53 = vmul.f32 %v10769_v16, %v10769_v16  ;;  %v10774_v2 = vpop.f32.mrb[111].mxu0 }
 0x352   : > { %14675 = vst [vmem:[#allocation65_spill] sm:$0xff] %v10774_v2  ;;  %v4073_v38 = vadd.f32 %v4072_v5, %v3932_v25  ;;  %v3784_v46 = vadd.f32 %v3783_v13, %v10774_v2  ;;  %v3934_v41 = vmul.f32 %v10774_v2, %v10774_v2 }
 0x353   : > { %v4037_v62 = vadd.f32 %v4036_v51, %v3933_v53 }
 0x354   : > { %v4074_v52 = vadd.f32 %v4073_v38, %v3934_v41 }
 0x356   : > { %v10779_v44 = vpop.f32.mrb[112].mxu0 }
 0x357   : > { %14676 = vst [vmem:[#allocation70_spill] sm:$0xff] %v10779_v44  ;;  %v3748_v10 = vadd.f32 %v3747_v33, %v10779_v44  ;;  %v3935_v61 = vmul.f32 %v10779_v44, %v10779_v44  ;;  %v10784_v11 = vpop.f32.mrb[113].mxu0 }
 0x358   : > { %14677 = vst [vmem:[#allocation77_spill] sm:$0xff] %v10784_v11  ;;  %v3785_v14 = vadd.f32 %v3784_v46, %v10784_v11  ;;  %v3936_v5 = vmul.f32 %v10784_v11, %v10784_v11  ;;  %v10789_v13 = vpop.f32.mrb[114].mxu0 }
 0x359   : > { %14678 = vst [vmem:[#allocation76_spill] sm:$0xff] %v10789_v13  ;;  %v4038_v25 = vadd.f32 %v4037_v62, %v3935_v61  ;;  %v3749_v51 = vadd.f32 %v3748_v10, %v10789_v13  ;;  %v3937_v53 = vmul.f32 %v10789_v13, %v10789_v13  ;;  %v10794_v38 = vpop.f32.mrb[115].mxu0 }
 0x35a   : > { %14679 = vst [vmem:[#allocation89_spill] sm:$0xff] %v10794_v38  ;;  %v4075_v33 = vadd.f32 %v4074_v52, %v3936_v5  ;;  %v3786_v41 = vadd.f32 %v3785_v14, %v10794_v38  ;;  %v3938_v44 = vmul.f32 %v10794_v38, %v10794_v38 }
 0x35b   : > { %v4039_v46 = vadd.f32 %v4038_v25, %v3937_v53 }
 0x35c   : > { %v4076_v2 = vadd.f32 %v4075_v33, %v3938_v44 }
 0x35e   : > { %v10799_v16 = vpop.f32.mrb[116].mxu0 }
 0x35f   : > { %14680 = vst [vmem:[#allocation82_spill] sm:$0xff] %v10799_v16  ;;  %v3750_v11 = vadd.f32 %v3749_v51, %v10799_v16  ;;  %v3939_v10 = vmul.f32 %v10799_v16, %v10799_v16  ;;  %v10804_v62 = vpop.f32.mrb[117].mxu0 }
 0x360   : > { %14681 = vst [vmem:[#allocation75_spill] sm:$0xff] %v10804_v62  ;;  %v3787_v61 = vadd.f32 %v3786_v41, %v10804_v62  ;;  %v3940_v52 = vmul.f32 %v10804_v62, %v10804_v62  ;;  %v10809_v14 = vpop.f32.mrb[118].mxu0 }
 0x361   : > { %14682 = vst [vmem:[#allocation88_spill] sm:$0xff] %v10809_v14  ;;  %v4040_v5 = vadd.f32 %v4039_v46, %v3939_v10  ;;  %v3751_v25 = vadd.f32 %v3750_v11, %v10809_v14  ;;  %v3941_v44 = vmul.f32 %v10809_v14, %v10809_v14  ;;  %v10814_v53 = vpop.f32.mrb[119].mxu0 }
 0x362   : > { %14683 = vst [vmem:[#allocation102_spill] sm:$0xff] %v10814_v53  ;;  %v4077_v51 = vadd.f32 %v4076_v2, %v3940_v52  ;;  %v3788_v33 = vadd.f32 %v3787_v61, %v10814_v53  ;;  %v3942_v16 = vmul.f32 %v10814_v53, %v10814_v53 }
 0x363   : > { %v4041_v41 = vadd.f32 %v4040_v5, %v3941_v44 }
 0x364   : > { %v4078_v38 = vadd.f32 %v4077_v51, %v3942_v16 }
 0x366   : > { %v10819_v13 = vpop.f32.mrb[120].mxu0 }
 0x367   : > { %14684 = vst [vmem:[#allocation94_spill] sm:$0xff] %v10819_v13  ;;  %v3752_v62 = vadd.f32 %v3751_v25, %v10819_v13  ;;  %v3943_v11 = vmul.f32 %v10819_v13, %v10819_v13  ;;  %v10824_v46 = vpop.f32.mrb[121].mxu0 }
 0x368   : > { %14685 = vst [vmem:[#allocation87_spill] sm:$0xff] %v10824_v46  ;;  %v3789_v10 = vadd.f32 %v3788_v33, %v10824_v46  ;;  %v3944_v2 = vmul.f32 %v10824_v46, %v10824_v46  ;;  %v10829_v61 = vpop.f32.mrb[122].mxu0 }
 0x369   : > { %14686 = vst [vmem:[#allocation101_spill] sm:$0xff] %v10829_v61  ;;  %v4042_v52 = vadd.f32 %v4041_v41, %v3943_v11  ;;  %v3753_v5 = vadd.f32 %v3752_v62, %v10829_v61  ;;  %v3945_v16 = vmul.f32 %v10829_v61, %v10829_v61  ;;  %v10834_v44 = vpop.f32.mrb[123].mxu0 }
 0x36a   : > { %14687 = vst [vmem:[#allocation107_spill] sm:$0xff] %v10834_v44  ;;  %v4079_v25 = vadd.f32 %v4078_v38, %v3944_v2  ;;  %v3790_v51 = vadd.f32 %v3789_v10, %v10834_v44  ;;  %v3946_v13 = vmul.f32 %v10834_v44, %v10834_v44 }
 0x36b   : > { %v4043_v33 = vadd.f32 %v4042_v52, %v3945_v16 }
 0x36c   : > { %v4080_v53 = vadd.f32 %v4079_v25, %v3946_v13 }
 0x36e   : > { %v10839_v14 = vpop.f32.mrb[124].mxu0 }
 0x36f   : > { %14688 = vst [vmem:[#allocation99_spill] sm:$0xff] %v10839_v14  ;;  %v3754_v46 = vadd.f32 %v3753_v5, %v10839_v14  ;;  %v3947_v62 = vmul.f32 %v10839_v14, %v10839_v14  ;;  %v10844_v41 = vpop.f32.mrb[125].mxu0 }
 0x370   : > { %14689 = vst [vmem:[#allocation100_spill] sm:$0xff] %v10844_v41  ;;  %v3791_v11 = vadd.f32 %v3790_v51, %v10844_v41  ;;  %v3948_v38 = vmul.f32 %v10844_v41, %v10844_v41  ;;  %v10849_v10 = vpop.f32.mrb[126].mxu0 }
 0x371   : > { %14690 = vst [vmem:[#allocation12_spill] sm:$0xff] %v10849_v10  ;;  %v4044_v2 = vadd.f32 %v4043_v33, %v3947_v62  ;;  %v3755_v52 = vadd.f32 %v3754_v46, %v10849_v10  ;;  %v3949_v13 = vmul.f32 %v10849_v10, %v10849_v10  ;;  %v10854_v16 = vpop.f32.mrb[127].mxu0 }
 0x372   : > { %v4081_v5 = vadd.f32 %v4080_v53, %v3948_v38  ;;  %v3792_v25 = vadd.f32 %v3791_v11, %v10854_v16  ;;  %v3950_v14 = vmul.f32 %v10854_v16, %v10854_v16 }
 0x373   : > { %v3756_v51 = vrot.slane %v3755_v52, 4  ;;  %v4045_v44 = vadd.f32 %v4044_v2, %v3949_v13 }
 0x374   : > { %v3793_v61 = vrot.slane %v3792_v25, 4  ;;  %v4082_v41 = vadd.f32 %v4081_v5, %v3950_v14 }
 0x375   : > { %v3757_v1 = vadd.f32 %v3756_v51, %v3755_v52  ;;  %v4046_v48 = vrot.slane %v4045_v44, 4 }
 0x376   : > { %v3794_v33 = vadd.f32 %v3793_v61, %v3792_v25  ;;  %v4083_v62 = vrot.slane %v4082_v41, 4  ;;  %v10859_v46 = vpop.f32.mrb[128].mxu0 }
 0x377   : > { %14691 = vst [vmem:[#allocation110_spill] sm:$0xff] %v10859_v46  ;;  %v3758_v24 = vrot.slane %v3757_v1, 2  ;;  %v4047_v10 = vadd.f32 %v4046_v48, %v4045_v44  ;;  %v10861_v36 = vpop.f32.mrb[129].mxu0  ;;  %v3951_v11 = vmul.f32 %v10859_v46, %v10859_v46 }
 0x378   : > { %14692 = vst [vmem:[#allocation30_spill] sm:$0xff] %v10861_v36  ;;  %v3795_v53 = vrot.slane %v3794_v33, 2  ;;  %v4084_v38 = vadd.f32 %v4083_v62, %v4082_v41  ;;  %v3952_v2 = vmul.f32 %v10861_v36, %v10861_v36  ;;  %v10867_v13 = vpop.f32.mrb[130].mxu0 }
 0x379   : > { %14693 = vst [vmem:[#allocation27_spill] sm:$0xff] %v10867_v13  ;;  %v3759_v14 = vadd.f32 %v3758_v24, %v3757_v1  ;;  %v4048_v52 = vrot.slane %v4047_v10, 2  ;;  %v3799_v61 = vadd.f32 %v10867_v13, %v10859_v46  ;;  %v3953_v48 = vmul.f32 %v10867_v13, %v10867_v13  ;;  %v10873_v44 = vpop.f32.mrb[131].mxu0 }
 0x37a   : > { %14694 = vst [vmem:[#allocation26_spill] sm:$0xff] %v10873_v44  ;;  %v3796_v5 = vadd.f32 %v3795_v53, %v3794_v33  ;;  %v4085_v41 = vrot.slane %v4084_v38, 2  ;;  %v3836_v25 = vadd.f32 %v10873_v44, %v10861_v36  ;;  %v3954_v51 = vmul.f32 %v10873_v44, %v10873_v44 }
 0x37b   : > { %v3760_v62 = vrot.slane %v3759_v14, 1  ;;  %v4049_v59 = vadd.f32 %v4048_v52, %v4047_v10  ;;  %v4089_v24 = vadd.f32 %v3953_v48, %v3951_v11 }
 0x37c   : > { %v3797_v1 = vrot.slane %v3796_v5, 1  ;;  %v4086_v32 = vadd.f32 %v4085_v41, %v4084_v38  ;;  %v4126_v39 = vadd.f32 %v3954_v51, %v3952_v2 }
 0x37d   : > { %v3761_v46 = vadd.f32 %v3760_v62, %v3759_v14  ;;  %v4050_v57 = vrot.slane %v4049_v59, 1 }
 0x37e   : > { %v3798_v13 = vadd.f32 %v3797_v1, %v3796_v5  ;;  %v4087_v29 = vrot.slane %v4086_v32, 1  ;;  %v10881_v33 = vpop.f32.mrb[132].mxu0 }
 0x37f   : > { %14696 = vst [vmem:[#allocation14_spill] sm:$0xff] %v10881_v33  ;;  %v10884_v53 = vmul.f32 %v10879_v4, %v3761_v46  ;;  %v4051_v36 = vadd.f32 %v4050_v57, %v4049_v59  ;;  %v3800_v44 = vadd.f32 %v3799_v61, %v10881_v33  ;;  %v3955_v10 = vmul.f32 %v10881_v33, %v10881_v33  ;;  %v10889_v11 = vpop.f32.mrb[133].mxu0 }
 0x380   : > { %14697 = vst [vmem:[#allocation13_spill] sm:$0xff] %v10889_v11  ;;  %v10892_v38 = vmul.f32 %v10879_v4, %v3798_v13  ;;  %v4088_v2 = vadd.f32 %v4087_v29, %v4086_v32  ;;  %v3837_v14 = vadd.f32 %v3836_v25, %v10889_v11  ;;  %v3956_v52 = vmul.f32 %v10889_v11, %v10889_v11  ;;  %v10897_v48 = vpop.f32.mrb[134].mxu0 }
 0x381   : > { %14698 = vst [vmem:[#allocation112_spill] sm:$0xff] %v10897_v48  ;;  %v4163_v57 = vmul.f32 %v4051_v36, %v10879_v4  ;;  %v4167_v59 = vmul.f32 %v10884_v53, %v10884_v53  ;;  %v4090_v46 = vadd.f32 %v4089_v24, %v3955_v10  ;;  %v3801_v61 = vadd.f32 %v3800_v44, %v10897_v48  ;;  %v10903_v5 = vpop.f32.mrb[135].mxu0 }
 0x382   : > { %14699 = vst [vmem:[#allocation113_spill] sm:$0xff] %v10903_v5  ;;  %v4164_v13 = vmul.f32 %v4088_v2, %v10879_v4  ;;  %v4168_v29 = vmul.f32 %v10892_v38, %v10892_v38  ;;  %v4127_v32 = vadd.f32 %v4126_v39, %v3956_v52  ;;  %v3957_v41 = vmul.f32 %v10897_v48, %v10897_v48 }
 0x383   : > { %v4171_v25 = vsub.f32 %v4163_v57, %v4167_v59  ;;  %v3838_v36 = vadd.f32 %v3837_v14, %v10903_v5  ;;  %v3958_v51 = vmul.f32 %v10903_v5, %v10903_v5  ;;  %v14730_v5 = vld [vmem:[#allocation11_spill] sm:$0xff] }
 0x384   : > { %v4172_v62 = vsub.f32 %v4164_v13, %v4168_v29  ;;  %v4091_v24 = vadd.f32 %v4090_v46, %v3957_v41 }
 0x385   : > { %v4175_v44 = vmax.f32 %v4171_v25, 0.0  ;;  %v4128_v1 = vadd.f32 %v4127_v32, %v3958_v51  ;;  %v8019_v51 = vmov 1966171168  }
 0x386   : > { %v4176_v10 = vmax.f32 %v4172_v62, 0.0  ;;  %v10913_v11 = vpop.f32.mrb[136].mxu0  ;;  %v4194_v62 = vunpack.c.l.s4 %v8019_v51 }
 0x387   : > { %14700 = vst [vmem:[#allocation114_spill] sm:$0xff] %v10913_v11  ;;  %v4180_v2 = vadd.f32 1e-05, %v4175_v44  ;;  %v3802_v4 = vadd.f32 %v3801_v61, %v10913_v11  ;;  %v3959_v39 = vmul.f32 %v10913_v11, %v10913_v11  ;;  %v10918_v52 = vpop.f32.mrb[137].mxu0 }
 0x388   : > { %14701 = vst [vmem:[#allocation115_spill] sm:$0xff] %v10918_v52  ;;  %v4181_v57 = vadd.f32 1e-05, %v4176_v10  ;;  %v3839_v14 = vadd.f32 %v3838_v36, %v10918_v52  ;;  %v3960_v59 = vmul.f32 %v10918_v52, %v10918_v52  ;;  %v10923_v46 = vpop.f32.mrb[138].mxu0 }
 0x389   : > { %14702 = vst [vmem:[#allocation116_spill] sm:$0xff] %v10923_v46  ;;  %7745 = vrsqrt.f32 %v4180_v2  ;;  %v4092_v13 = vadd.f32 %v4091_v24, %v3959_v39  ;;  %v3803_v29 = vadd.f32 %v3802_v4, %v10923_v46  ;;  %v3961_v61 = vmul.f32 %v10923_v46, %v10923_v46  ;;  %v10928_v32 = vpop.f32.mrb[139].mxu0 }
 0x38a   : > { %14703 = vst [vmem:[#allocation117_spill] sm:$0xff] %v10928_v32  ;;  %7747 = vrsqrt.f32 %v4181_v57  ;;  %v4129_v41 = vadd.f32 %v4128_v1, %v3960_v59  ;;  %v3840_v25 = vadd.f32 %v3839_v14, %v10928_v32  ;;  %v3962_v36 = vmul.f32 %v10928_v32, %v10928_v32 }
 0x38b   : > { %v4093_v44 = vadd.f32 %v4092_v13, %v3961_v61  ;;  %v4195_v24 = vunpack.c.0.s8 %v4194_v62  ;;  %v14708_v62 = vld [vmem:[#allocation15_spill] sm:$0xff] }
 0x38c   : > { %v4130_v10 = vadd.f32 %v4129_v41, %v3962_v36 }
 0x38e   : > { %v10933_v2 = vpop.f32.mrb[140].mxu0 }
 0x38f   : > { %14704 = vst [vmem:[#allocation118_spill] sm:$0xff] %v10933_v2  ;;  %v3804_v4 = vadd.f32 %v3803_v29, %v10933_v2  ;;  %v3963_v39 = vmul.f32 %v10933_v2, %v10933_v2  ;;  %v10938_v46 = vpop.f32.mrb[141].mxu0  ;;  %v10954_v2 = vsub.s32 %v4195_v24, %v14708_v62  ;;  %v10967_v24 = vld [vmem:[%s13871_s4] sm:$0x3] }
 0x390   : > { %14705 = vst [vmem:[#allocation119_spill] sm:$0xff] %v10938_v46  ;;  %v3841_v1 = vadd.f32 %v3840_v25, %v10938_v46  ;;  %v3964_v57 = vmul.f32 %v10938_v46, %v10938_v46  ;;  %v10943_v14 = vpop.f32.mrb[142].mxu0  ;;  %14712 = vst [vmem:[#allocation124_spill] sm:$0xff] %v10967_v24 }
 0x391   : > { %14706 = vst [vmem:[#allocation120_spill] sm:$0xff] %v10943_v14  ;;  %v4094_v59 = vadd.f32 %v4093_v44, %v3963_v39  ;;  %v3805_v13 = vadd.f32 %v3804_v4, %v10943_v14  ;;  %v3965_v61 = vmul.f32 %v10943_v14, %v10943_v14  ;;  %v10948_v41 = vpop.f32.mrb[143].mxu0  ;;  %14709 = vst [vmem:[#allocation15_spill] sm:$0xff] %v10954_v2 }
 0x392   : > { %14707 = vst [vmem:[#allocation121_spill] sm:$0xff] %v10948_v41  ;;  %v4131_v29 = vadd.f32 %v4130_v10, %v3964_v57  ;;  %v3842_v36 = vadd.f32 %v3841_v1, %v10948_v41  ;;  %v3966_v51 = vmul.f32 %v10948_v41, %v10948_v41 }
 0x393   : > { %v7746_v25 = vpop.eup %7745  ;;  %v4095_v46 = vadd.f32 %v4094_v59, %v3965_v61 }
 0x394   : > { %v7748_v32 = vpop.eup %7747  ;;  %v4132_v44 = vadd.f32 %v4131_v29, %v3966_v51 }
 0x395   : > { %v4192_v39 = vcombine.low %v7746_v25, %v7748_v32 }
 0x396   : > { %v10956_v4 = vpop.f32.mrb[144].mxu0 }
 0x397   : > { %14710 = vst [vmem:[#allocation122_spill] sm:$0xff] %v10956_v4  ;;  %v4199_v14 = vrot.slane %v4192_v39, %v10954_v2  ;;  %v3806_v52 = vadd.f32 %v3805_v13, %v10956_v4  ;;  %v3967_v10 = vmul.f32 %v10956_v4, %v10956_v4  ;;  %v10962_v1 = vpop.f32.mrb[145].mxu0 }
 0x398   : > { %14711 = vst [vmem:[#allocation123_spill] sm:$0xff] %v10962_v1  ;;  %v3843_v57 = vadd.f32 %v3842_v36, %v10962_v1  ;;  %v3968_v32 = vmul.f32 %v10962_v1, %v10962_v1  ;;  %v10972_v59 = vpop.f32.mrb[146].mxu0 }
 0x399   : > { %14713 = vst [vmem:[#allocation125_spill] sm:$0xff] %v10972_v59  ;;  %v4206_v61 = vrot.slane %v4199_v14, %v10954_v2  ;;  %v4096_v13 = vadd.f32 %v4095_v46, %v3967_v10  ;;  %v10976_v29 = vadd.f32 %v3806_v52, %v10972_v59  ;;  %v3969_v51 = vmul.f32 %v10972_v59, %v10972_v59  ;;  %v10980_v25 = vpop.f32.mrb[147].mxu0  ;;  %v14719_v52 = vld [vmem:[#allocation16_spill] sm:$0xff]  ;;  %v14720_v10 = vld [vmem:[#allocation17_spill] sm:$0xff] }
 0x39a   : > { %14715 = vst [vmem:[#allocation127_spill] sm:$0xff] %v10980_v25  ;;  %v4133_v62 = vadd.f32 %v4132_v44, %v3968_v32  ;;  %v10983_v39 = vadd.f32 %v3843_v57, %v10980_v25  ;;  %v3970_v36 = vmul.f32 %v10980_v25, %v10980_v25 }
 0x39b   : > { %14714 = vst [vmem:[#allocation126_spill] sm:$0xff] %v10976_v29  ;;  %v4224_v1 = vmul.f32 %v4206_v61, %v10967_v24  ;;  %v10988_v4 = vadd.f32 %v4096_v13, %v3969_v51  ;;  %v14752_v29 = vld [vmem:[#allocation75_spill] sm:$0xff] }
 0x39c   : > { %14716 = vst [vmem:[#allocation128_spill] sm:$0xff] %v10983_v39  ;;  %v10990_v46 = vadd.f32 %v4133_v62, %v3970_v36  ;;  %v14748_v39 = vld [vmem:[#allocation89_spill] sm:$0xff] }
 0x39d   : > { %14717 = vst [vmem:[#allocation129_spill] sm:$0xff] %v10988_v4  ;;  %v10993_v14 = vrot.slane %v4224_v1, %v14719_v52  ;;  %v10996_v59 = vrot.slane %v4224_v1, %v14720_v10  ;;  %v14743_v4 = vld [vmem:[#allocation70_spill] sm:$0xff] }
 0x39e   : > { %14718 = vst [vmem:[#allocation130_spill] sm:$0xff] %v10990_v46  ;;  %v10998_v41 = vpop.f32.mrb[148].mxu0  ;;  %v14741_v46 = vld [vmem:[#allocation64_spill] sm:$0xff] }
 0x39f   : > { %14721 = vst [vmem:[#allocation131_spill] sm:$0xff] %v10998_v41  ;;  %v4249_v44 = vmul.f32 %v10993_v14, %v10884_v53  ;;  %v4250_v57 = vmul.f32 %v10996_v59, %v10892_v38  ;;  %v4354_v32 = vmul.f32 %v10996_v59, %v10854_v16  ;;  %v11008_v61 = vmul.f32 %v10993_v14, %v10509_v58  ;;  %v11010_v13 = vpop.f32.mrb[149].mxu0 }
 0x3a0   : > { %14722 = vst [vmem:[#allocation132_spill] sm:$0xff] %v11010_v13  ;;  %v11014_v1 = vmul.f32 %v10996_v59, %v10511_v17  ;;  %v11018_v51 = vmul.f32 %v10993_v14, %v10513_v35  ;;  %v11022_v53 = vmul.f32 %v10996_v59, %v10521_v19  ;;  %v11026_v16 = vmul.f32 %v10993_v14, %v10535_v0  ;;  %v11028_v58 = vpop.f32.mrb[150].mxu0  ;;  %v14750_v13 = vld [vmem:[#allocation82_spill] sm:$0xff] }
 0x3a1   : > { %14723 = vst [vmem:[#allocation133_spill] sm:$0xff] %v11028_v58  ;;  %v4257_v38 = vcombine.low %v4249_v44, %v4250_v57  ;;  %v11032_v62 = vmul.f32 %v10996_v59, %v10540_v6  ;;  %v11036_v17 = vmul.f32 %v10993_v14, %v10545_v31  ;;  %v11040_v35 = vmul.f32 %v10996_v59, %v10550_v21  ;;  %v11042_v19 = vpop.f32.mrb[151].mxu0  ;;  %v14746_v58 = vld [vmem:[#allocation76_spill] sm:$0xff] }
 0x3a2   : > { %14724 = vst [vmem:[#allocation134_spill] sm:$0xff] %v11042_v19  ;;  %v11046_v0 = vmul.f32 %v10993_v14, %v10561_v27  ;;  %v11050_v36 = vmul.f32 %v10996_v59, %v10566_v34  ;;  %v11054_v6 = vmul.f32 %v10993_v14, %v10571_v49  ;;  %v11058_v31 = vmul.f32 %v10996_v59, %v10576_v3  ;;  %v11076_v49 = vld [vmem:[%s13872_s5] sm:$0x3]  ;;  %v14744_v19 = vld [vmem:[#allocation77_spill] sm:$0xff] }
 0x3a3   : > { %v4264_v21 = vrot.slane %v4257_v38, %v10954_v2  ;;  %v11063_v44 = vmul.f32 %v10993_v14, %v10587_v50  ;;  %v11067_v27 = vmul.f32 %v10996_v59, %v10592_v60  ;;  %v11071_v34 = vmul.f32 %v10993_v14, %v10597_v40  ;;  %14725 = vst [vmem:[#allocation135_spill] sm:$0xff] %v11076_v49 }
 0x3a4   : > { %v11080_v3 = vmul.f32 %v10996_v59, %v10602_v9  ;;  %v11084_v50 = vmul.f32 %v10993_v14, %v10613_v55  ;;  %v11088_v60 = vmul.f32 %v10996_v59, %v10618_v56  ;;  %v11092_v40 = vmul.f32 %v10993_v14, %v10623_v23 }
 0x3a5   : > { %v4271_v57 = vrot.slane %v4264_v21, %v10954_v2  ;;  %v11097_v38 = vmul.f32 %v10996_v59, %v10628_v37  ;;  %v11101_v9 = vmul.f32 %v10993_v14, %v10636_v18  ;;  %v11105_v55 = vmul.f32 %v10996_v59, %v10641_v30 }
 0x3a6   : > { %v11109_v56 = vmul.f32 %v10993_v14, %v10646_v7  ;;  %v11113_v23 = vmul.f32 %v10996_v59, %v10651_v63  ;;  %v11117_v37 = vmul.f32 %v10993_v14, %v10656_v43  ;;  %v11121_v18 = vmul.f32 %v10996_v59, %v10661_v42  ;;  %v11123_v21 = vpop.f32.mrb[152].mxu0 }
 0x3a7   : > { %14726 = vst [vmem:[#allocation136_spill] sm:$0xff] %v11123_v21  ;;  %v4289_v30 = vsub.f32 %v11076_v49, %v4271_v57  ;;  %v11128_v7 = vmul.f32 %v10993_v14, %v10666_v47  ;;  %v11132_v63 = vmul.f32 %v10996_v59, %v10671_v54  ;;  %v11136_v43 = vmul.f32 %v10993_v14, %v10676_v8  ;;  %v11138_v25 = vpop.f32.mrb[153].mxu0  ;;  %v14742_v21 = vld [vmem:[#allocation65_spill] sm:$0xff] }
 0x3a8   : > { %14727 = vst [vmem:[#allocation137_spill] sm:$0xff] %v11138_v25  ;;  %v11142_v42 = vmul.f32 %v10996_v59, %v10681_v26  ;;  %v11146_v57 = vmul.f32 %v10993_v14, %v10686_v20  ;;  %v11150_v47 = vmul.f32 %v10996_v59, %v10691_v12  ;;  %v11154_v54 = vmul.f32 %v10993_v14, %v10696_v22  ;;  %v11156_v8 = vpop.f32.mrb[154].mxu0  ;;  %v14740_v25 = vld [vmem:[#allocation63_spill] sm:$0xff] }
 0x3a9   : > { %14728 = vst [vmem:[#allocation138_spill] sm:$0xff] %v11156_v8  ;;  %v11159_v49 = vrot.slane %v4289_v30, %v14719_v52  ;;  %v11162_v26 = vrot.slane %v4289_v30, %v14720_v10  ;;  %v11166_v20 = vmul.f32 %v10996_v59, %v10701_v45  ;;  %v11170_v12 = vmul.f32 %v10993_v14, %v10706_v15  ;;  %v11172_v11 = vpop.f32.mrb[155].mxu0  ;;  %v14731_v30 = vld [vmem:[#allocation39_spill] sm:$0xff]  ;;  %v14732_v45 = vld [vmem:[#allocation40_spill] sm:$0xff]  ;;  %v14734_v52 = vld [vmem:[#allocation46_spill] sm:$0xff] }
 0x3aa   : > { %14729 = vst [vmem:[#allocation139_spill] sm:$0xff] %v11172_v11  ;;  %v11176_v22 = vmul.f32 %v10996_v59, %v10711_v28  ;;  %v11180_v48 = vmul.f32 %v10993_v14, %v14730_v5  ;;  %v11184_v33 = vmul.f32 %v10996_v59, %v14731_v30  ;;  %v11188_v10 = vmul.f32 %v10993_v14, %v14732_v45  ;;  %v14735_v28 = vld [vmem:[#allocation51_spill] sm:$0xff]  ;;  %v14736_v5 = vld [vmem:[#allocation52_spill] sm:$0xff]  ;;  %v14737_v30 = vld [vmem:[#allocation45_spill] sm:$0xff] }
 0x3ab   : > { %v11191_v15 = vadd.f32 %v11162_v26, %v4354_v32  ;;  %v11195_v24 = vmul.f32 %v10996_v59, %v14734_v52  ;;  %v11199_v2 = vmul.f32 %v10993_v14, %v14735_v28  ;;  %v11203_v11 = vmul.f32 %v10996_v59, %v14736_v5  ;;  %v14738_v45 = vld [vmem:[#allocation57_spill] sm:$0xff] }
 0x3ac   : > { %v11207_v8 = vmul.f32 %v10993_v14, %v14737_v30  ;;  %v11211_v32 = vmul.f32 %v10996_v59, %v14738_v45  ;;  %v11219_v28 = vmul.f32 %v10996_v59, %v14740_v25  ;;  %v11223_v5 = vmul.f32 %v10993_v14, %v14741_v46 }
 0x3ad   : > { %14733 = vst [vmem:[#allocation11_spill] sm:$0xff] %v11191_v15  ;;  %v14739_v15 = vld [vmem:[#allocation58_spill] sm:$0xff]  ;;  %v11227_v30 = vmul.f32 %v10996_v59, %v14742_v21  ;;  %v11231_v45 = vmul.f32 %v10993_v14, %v14743_v4  ;;  %v11239_v25 = vmul.f32 %v10993_v14, %v14746_v58  ;;  %v11243_v46 = vmul.f32 %v10996_v59, %v14748_v39 }
 0x3ae   : > { %v11215_v52 = vmul.f32 %v10993_v14, %v14739_v15  ;;  %v11235_v15 = vmul.f32 %v10996_v59, %v14744_v19  ;;  %v11247_v21 = vmul.f32 %v10993_v14, %v14750_v13  ;;  %v11251_v4 = vmul.f32 %v10996_v59, %v14752_v29  ;;  %v11253_v41 = vpop.f32.mrb[156].mxu0  ;;  %v14755_v19 = vld [vmem:[#allocation88_spill] sm:$0xff]  ;;  %v14757_v58 = vld [vmem:[#allocation102_spill] sm:$0xff]  ;;  %v14761_v13 = vld [vmem:[#allocation87_spill] sm:$0xff] }
 0x3af   : > { %14747 = vst [vmem:[#allocation40_spill] sm:$0xff] %v11239_v25  ;;  %14749 = vst [vmem:[#allocation46_spill] sm:$0xff] %v11243_v46  ;;  %v11261_v25 = vmul.f32 %v10996_v59, %v14757_v58  ;;  %v14759_v39 = vld [vmem:[#allocation94_spill] sm:$0xff]  ;;  %v11271_v29 = vpop.f32.mrb[157].mxu0  ;;  %v14766_v58 = vld [vmem:[#allocation99_spill] sm:$0xff] }
 0x3b0   : > { %14745 = vst [vmem:[#allocation39_spill] sm:$0xff] %v11235_v15  ;;  %14751 = vst [vmem:[#allocation51_spill] sm:$0xff] %v11247_v21  ;;  %v11257_v15 = vmul.f32 %v10993_v14, %v14755_v19  ;;  %v11265_v46 = vmul.f32 %v10993_v14, %v14759_v39  ;;  %v11269_v21 = vmul.f32 %v10996_v59, %v14761_v13  ;;  %v14765_v19 = vld [vmem:[#allocation107_spill] sm:$0xff]  ;;  %v14767_v39 = vld [vmem:[#allocation100_spill] sm:$0xff]  ;;  %v11289_v13 = vpop.f32.mrb[158].mxu0 }
 0x3b1   : > { %14753 = vst [vmem:[#allocation52_spill] sm:$0xff] %v11251_v4  ;;  %14754 = vst [vmem:[#allocation45_spill] sm:$0xff] %v11253_v41  ;;  %v14764_v4 = vld [vmem:[#allocation101_spill] sm:$0xff] }
 0x3b2   : > { %14756 = vst [vmem:[#allocation57_spill] sm:$0xff] %v11257_v15  ;;  %14758 = vst [vmem:[#allocation58_spill] sm:$0xff] %v11261_v25  ;;  %v11275_v41 = vmul.f32 %v10993_v14, %v14764_v4  ;;  %v11279_v15 = vmul.f32 %v10996_v59, %v14765_v19  ;;  %v11283_v25 = vmul.f32 %v10993_v14, %v14766_v58 }
 0x3b3   : > { %14760 = vst [vmem:[#allocation63_spill] sm:$0xff] %v11265_v46  ;;  %14762 = vst [vmem:[#allocation64_spill] sm:$0xff] %v11269_v21  ;;  %v11287_v46 = vmul.f32 %v10996_v59, %v14767_v39  ;;  %v14768_v21 = vld [vmem:[#allocation12_spill] sm:$0xff]  ;;  %v11297_v4 = vadd.f32 %v11159_v49, %v11008_v61  ;;  %v11301_v19 = vadd.f32 %v11162_v26, %v11014_v1  ;;  %v11307_v59 = vpop.f32.mrb[159].mxu0 }
 0x3b4   : > { %14763 = vst [vmem:[#allocation65_spill] sm:$0xff] %v11271_v29  ;;  %v11293_v29 = vmul.f32 %v10993_v14, %v14768_v21  ;;  %v11305_v58 = vadd.f32 %v11159_v49, %v11018_v51  ;;  %v11311_v39 = vadd.f32 %v11162_v26, %v11022_v53  ;;  %v11315_v14 = vadd.f32 %v11159_v49, %v11026_v16 }
 0x3b5   : > { %v11319_v61 = vadd.f32 %v11162_v26, %v11032_v62  ;;  %v11323_v1 = vadd.f32 %v11159_v49, %v11036_v17  ;;  %v11327_v51 = vadd.f32 %v11162_v26, %v11040_v35  ;;  %v11331_v53 = vadd.f32 %v11159_v49, %v11046_v0 }
 0x3b6   : > { %v11335_v16 = vadd.f32 %v11162_v26, %v11050_v36  ;;  %v11339_v62 = vadd.f32 %v11159_v49, %v11054_v6  ;;  %v11343_v17 = vadd.f32 %v11162_v26, %v11058_v31  ;;  %v11347_v35 = vadd.f32 %v11159_v49, %v11063_v44  ;;  %v11389_v21 = vpop.f32.mrb[160].mxu0 }
 0x3b7   : > { %v11351_v0 = vadd.f32 %v11162_v26, %v11067_v27  ;;  %v11355_v36 = vadd.f32 %v11159_v49, %v11071_v34  ;;  %v11359_v6 = vadd.f32 %v11162_v26, %v11080_v3  ;;  %v11363_v31 = vadd.f32 %v11159_v49, %v11084_v50 }
 0x3b8   : > { %v11367_v44 = vadd.f32 %v11162_v26, %v11088_v60  ;;  %v11371_v27 = vadd.f32 %v11159_v49, %v11092_v40  ;;  %v11375_v34 = vadd.f32 %v11162_v26, %v11097_v38  ;;  %v11379_v3 = vadd.f32 %v11159_v49, %v11101_v9 }
 0x3b9   : > { %v11383_v50 = vadd.f32 %v11162_v26, %v11105_v55  ;;  %v11387_v60 = vadd.f32 %v11159_v49, %v11109_v56  ;;  %v11393_v40 = vadd.f32 %v11162_v26, %v11113_v23  ;;  %v11397_v38 = vadd.f32 %v11159_v49, %v11117_v37  ;;  %v11407_v56 = vpop.f32.mrb[161].mxu0 }
 0x3ba   : > { %v11401_v9 = vadd.f32 %v11162_v26, %v11121_v18  ;;  %v11405_v55 = vadd.f32 %v11159_v49, %v11128_v7  ;;  %v11415_v23 = vadd.f32 %v11159_v49, %v11136_v43  ;;  %v11419_v37 = vadd.f32 %v11162_v26, %v11142_v42  ;;  %v11425_v7 = vpop.f32.mrb[162].mxu0 }
 0x3bb   : > { %14769 = vst [vmem:[#allocation70_spill] sm:$0xff] %v11387_v60  ;;  %v11411_v60 = vadd.f32 %v11162_v26, %v11132_v63  ;;  %v11423_v18 = vadd.f32 %v11159_v49, %v11146_v57  ;;  %v11433_v63 = vadd.f32 %v11159_v49, %v11154_v54  ;;  %v11437_v43 = vadd.f32 %v11162_v26, %v11166_v20  ;;  %v11443_v57 = vpop.f32.mrb[163].mxu0 }
 0x3bc   : > { %14770 = vst [vmem:[#allocation77_spill] sm:$0xff] %v11405_v55  ;;  %14771 = vst [vmem:[#allocation76_spill] sm:$0xff] %v11415_v23  ;;  %v11429_v55 = vadd.f32 %v11162_v26, %v11150_v47  ;;  %v11441_v42 = vadd.f32 %v11159_v49, %v11170_v12  ;;  %v11451_v47 = vadd.f32 %v11159_v49, %v11180_v48 }
 0x3bd   : > { %14772 = vst [vmem:[#allocation89_spill] sm:$0xff] %v11423_v18  ;;  %14773 = vst [vmem:[#allocation82_spill] sm:$0xff] %v11433_v63  ;;  %v11447_v18 = vadd.f32 %v11162_v26, %v11176_v22  ;;  %v11455_v54 = vadd.f32 %v11162_v26, %v11184_v33  ;;  %v11459_v20 = vadd.f32 %v11159_v49, %v11188_v10 }
 0x3be   : > { %14774 = vst [vmem:[#allocation75_spill] sm:$0xff] %v11437_v43  ;;  %14775 = vst [vmem:[#allocation88_spill] sm:$0xff] %v11441_v42  ;;  %v11463_v12 = vadd.f32 %v11162_v26, %v11195_v24  ;;  %v11467_v22 = vadd.f32 %v11159_v49, %v11199_v2  ;;  %v11471_v48 = vadd.f32 %v11162_v26, %v11203_v11 }
 0x3bf   : > { %14776 = vst [vmem:[#allocation102_spill] sm:$0xff] %v11447_v18  ;;  %14777 = vst [vmem:[#allocation94_spill] sm:$0xff] %v11451_v47  ;;  %v11475_v33 = vadd.f32 %v11159_v49, %v11207_v8  ;;  %v11479_v10 = vadd.f32 %v11162_v26, %v11211_v32  ;;  %v11483_v24 = vadd.f32 %v11159_v49, %v11215_v52  ;;  %v14822_v47 = vld [vmem:[#allocation137_spill] sm:$0xff] }
 0x3c0   : > { %14778 = vst [vmem:[#allocation87_spill] sm:$0xff] %v11455_v54  ;;  %14779 = vst [vmem:[#allocation101_spill] sm:$0xff] %v11459_v20  ;;  %v11487_v2 = vadd.f32 %v11162_v26, %v11219_v28  ;;  %v11491_v11 = vadd.f32 %v11159_v49, %v11223_v5  ;;  %v11495_v8 = vadd.f32 %v11162_v26, %v11227_v30 }
 0x3c1   : > { %14780 = vst [vmem:[#allocation107_spill] sm:$0xff] %v11463_v12  ;;  %14781 = vst [vmem:[#allocation99_spill] sm:$0xff] %v11467_v22  ;;  %v11499_v32 = vadd.f32 %v11159_v49, %v11231_v45  ;;  %v14823_v12 = vld [vmem:[#allocation138_spill] sm:$0xff] }
 0x3c2   : > { %14782 = vst [vmem:[#allocation100_spill] sm:$0xff] %v11471_v48  ;;  %14783 = vst [vmem:[#allocation12_spill] sm:$0xff] %v11475_v33  ;;  %v14790_v33 = vld [vmem:[#allocation39_spill] sm:$0xff]  ;;  %v14821_v48 = vld [vmem:[#allocation130_spill] sm:$0xff]  ;;  %v3977_v54 = vmul.f32 %v14823_v12, %v14823_v12 }
 0x3c3   : > { %14784 = vst [vmem:[#allocation140_spill] sm:$0xff] %v11479_v10  ;;  %14785 = vst [vmem:[#allocation141_spill] sm:$0xff] %v11483_v24  ;;  %v11503_v52 = vadd.f32 %v11162_v26, %v14790_v33  ;;  %v14792_v24 = vld [vmem:[#allocation40_spill] sm:$0xff] }
 0x3c4   : > { %14786 = vst [vmem:[#allocation142_spill] sm:$0xff] %v11487_v2  ;;  %14787 = vst [vmem:[#allocation143_spill] sm:$0xff] %v11491_v11  ;;  %v11507_v28 = vadd.f32 %v11159_v49, %v14792_v24  ;;  %v14794_v2 = vld [vmem:[#allocation46_spill] sm:$0xff]  ;;  %v14796_v11 = vld [vmem:[#allocation51_spill] sm:$0xff] }
 0x3c5   : > { %14788 = vst [vmem:[#allocation144_spill] sm:$0xff] %v11495_v8  ;;  %14789 = vst [vmem:[#allocation145_spill] sm:$0xff] %v11499_v32  ;;  %v11511_v5 = vadd.f32 %v11162_v26, %v14794_v2  ;;  %v11515_v30 = vadd.f32 %v11159_v49, %v14796_v11  ;;  %v14798_v8 = vld [vmem:[#allocation52_spill] sm:$0xff]  ;;  %v14800_v32 = vld [vmem:[#allocation57_spill] sm:$0xff] }
 0x3c6   : > { %14791 = vst [vmem:[#allocation39_spill] sm:$0xff] %v11503_v52  ;;  %14793 = vst [vmem:[#allocation40_spill] sm:$0xff] %v11507_v28  ;;  %v11519_v45 = vadd.f32 %v11162_v26, %v14798_v8  ;;  %v11523_v33 = vadd.f32 %v11159_v49, %v14800_v32  ;;  %v11525_v52 = vpop.f32.mrb[164].mxu0  ;;  %v14802_v24 = vld [vmem:[#allocation58_spill] sm:$0xff]  ;;  %v14804_v2 = vld [vmem:[#allocation63_spill] sm:$0xff]  ;;  %v11541_v8 = vadd.f32 %v11159_v49, %v11275_v41 }
 0x3c7   : > { %14795 = vst [vmem:[#allocation46_spill] sm:$0xff] %v11511_v5  ;;  %14797 = vst [vmem:[#allocation51_spill] sm:$0xff] %v11515_v30  ;;  %v11529_v28 = vadd.f32 %v11162_v26, %v14802_v24  ;;  %v11533_v5 = vadd.f32 %v11159_v49, %v14804_v2  ;;  %v14806_v11 = vld [vmem:[#allocation64_spill] sm:$0xff]  ;;  %v11543_v32 = vpop.f32.mrb[165].mxu0  ;;  %v11551_v24 = vadd.f32 %v11159_v49, %v11283_v25 }
 0x3c8   : > { %14799 = vst [vmem:[#allocation52_spill] sm:$0xff] %v11519_v45  ;;  %14801 = vst [vmem:[#allocation57_spill] sm:$0xff] %v11523_v33  ;;  %v11537_v30 = vadd.f32 %v11162_v26, %v14806_v11  ;;  %v11547_v33 = vadd.f32 %v11162_v26, %v11279_v15  ;;  %v11555_v2 = vadd.f32 %v11162_v26, %v11287_v46  ;;  %v11561_v41 = vpop.f32.mrb[166].mxu0  ;;  %v14813_v15 = vld [vmem:[#allocation131_spill] sm:$0xff]  ;;  %v14815_v26 = vld [vmem:[#allocation132_spill] sm:$0xff] }
 0x3c9   : > { %14803 = vst [vmem:[#allocation58_spill] sm:$0xff] %v11529_v28  ;;  %14805 = vst [vmem:[#allocation63_spill] sm:$0xff] %v11533_v5  ;;  %v11559_v11 = vadd.f32 %v11159_v49, %v11293_v29  ;;  %v4571_v5 = vmax.f32 %v11305_v58, 0.0  ;;  %v3971_v25 = vmul.f32 %v14813_v15, %v14813_v15  ;;  %v14816_v46 = vld [vmem:[#allocation128_spill] sm:$0xff]  ;;  %v3972_v49 = vmul.f32 %v14815_v26, %v14815_v26  ;;  %v14817_v29 = vld [vmem:[#allocation133_spill] sm:$0xff] }
 0x3ca   : > { %14807 = vst [vmem:[#allocation64_spill] sm:$0xff] %v11537_v30  ;;  %14808 = vst [vmem:[#allocation146_spill] sm:$0xff] %v11541_v8  ;;  %v4569_v8 = vmax.f32 %v11297_v4, 0.0  ;;  %v14818_v4 = vld [vmem:[#allocation134_spill] sm:$0xff]  ;;  %v14819_v45 = vld [vmem:[#allocation129_spill] sm:$0xff] }
 0x3cb   : > { %14809 = vst [vmem:[#allocation147_spill] sm:$0xff] %v11547_v33  ;;  %14810 = vst [vmem:[#allocation148_spill] sm:$0xff] %v11551_v24  ;;  %v14814_v33 = vld [vmem:[#allocation126_spill] sm:$0xff]  ;;  %v11569_v24 = vpop.f32.mrb[167].mxu0  ;;  %v3974_v58 = vmul.f32 %v14818_v4, %v14818_v4  ;;  %v4135_v20 = vadd.f32 %v14821_v48, %v3972_v49  ;;  %v14826_v49 = vld [vmem:[#allocation65_spill] sm:$0xff] }
 0x3cc   : > { %14811 = vst [vmem:[#allocation149_spill] sm:$0xff] %v11555_v2  ;;  %14812 = vst [vmem:[#allocation150_spill] sm:$0xff] %v11559_v11  ;;  %v3808_v30 = vadd.f32 %v14814_v33, %v14813_v15  ;;  %v3845_v2 = vadd.f32 %v14816_v46, %v14815_v26  ;;  %v3973_v11 = vmul.f32 %v14817_v29, %v14817_v29  ;;  %v14820_v15 = vld [vmem:[#allocation136_spill] sm:$0xff]  ;;  %v11599_v63 = vpop.f32.mrb[168].mxu0 }
 0x3cd   : > { %v4697_v28 = vpack.c.bf16 %v4571_v5, %v4569_v8  ;;  %v4098_v33 = vadd.f32 %v14819_v45, %v3971_v25  ;;  %v3975_v10 = vmul.f32 %v14820_v15, %v14820_v15  ;;  %v3976_v26 = vmul.f32 %v14822_v47, %v14822_v47  ;;  %v14824_v8 = vld [vmem:[#allocation139_spill] sm:$0xff]  ;;  %v11605_v18 = vpop.f32.mrb[169].mxu0 }
 0x3ce   : > { %v3809_v22 = vadd.f32 %v3808_v30, %v14817_v29  ;;  %v3846_v46 = vadd.f32 %v3845_v2, %v14818_v4  ;;  %v3978_v45 = vmul.f32 %v14824_v8, %v14824_v8  ;;  %v14825_v30 = vld [vmem:[#allocation45_spill] sm:$0xff]  ;;  %v4136_v29 = vadd.f32 %v4135_v20, %v3974_v58  ;;  %v11610_v43 = vpop.f32.mrb[170].mxu0 }
 0x3cf   : > { %v4099_v42 = vadd.f32 %v4098_v33, %v3973_v11  ;;  %v3979_v25 = vmul.f32 %v14825_v30, %v14825_v30  ;;  %v3980_v2 = vmul.f32 %v14826_v49, %v14826_v49  ;;  %v3981_v4 = vmul.f32 %v11289_v13, %v11289_v13 }
 0x3d0   : > { %v3810_v5 = vadd.f32 %v3809_v22, %v14820_v15  ;;  %v3847_v48 = vadd.f32 %v3846_v46, %v14822_v47  ;;  %v3982_v33 = vmul.f32 %v11307_v59, %v11307_v59  ;;  %v4570_v15 = vmax.f32 %v11301_v19, 0.0  ;;  %v11616_v19 = vpop.f32.mrb[171].mxu0 }
 0x3d1   : > { %v4100_v11 = vadd.f32 %v4099_v42, %v3975_v10  ;;  %v4137_v20 = vadd.f32 %v4136_v29, %v3976_v26  ;;  %v4572_v46 = vmax.f32 %v11311_v39, 0.0  ;;  %v4574_v47 = vmax.f32 %v11319_v61, 0.0 }
 0x3d2   : > { %v3811_v22 = vadd.f32 %v3810_v5, %v14823_v12  ;;  %v3848_v58 = vadd.f32 %v3847_v48, %v14824_v8  ;;  %v4576_v10 = vmax.f32 %v11327_v51, 0.0  ;;  %v3983_v5 = vmul.f32 %v11389_v21, %v11389_v21 }
 0x3d3   : > { %v4101_v23 = vadd.f32 %v4100_v11, %v3977_v54  ;;  %v4138_v12 = vadd.f32 %v4137_v20, %v3978_v45  ;;  %v4698_v29 = vpack.c.bf16 %v4572_v46, %v4570_v15  ;;  %v3984_v39 = vmul.f32 %v11407_v56, %v11407_v56 }
 0x3d4   : > { %v3812_v42 = vadd.f32 %v3811_v22, %v14825_v30  ;;  %v3849_v26 = vadd.f32 %v3848_v58, %v14826_v49  ;;  %v4700_v54 = vpack.c.bf16 %v4576_v10, %v4574_v47  ;;  %v3985_v11 = vmul.f32 %v11425_v7, %v11425_v7 }
 0x3d5   : > { %v4102_v61 = vadd.f32 %v4101_v23, %v3979_v25  ;;  %v4139_v51 = vadd.f32 %v4138_v12, %v3980_v2  ;;  %4921 = vmatprep.mubr.bf16.mxu1 %v4698_v29  ;;  %v3986_v45 = vmul.f32 %v11443_v57, %v11443_v57  ;;  %v4573_v20 = vmax.f32 %v11315_v14, 0.0 }
 0x3d6   : > { %v3813_v48 = vadd.f32 %v3812_v42, %v11289_v13  ;;  %v3850_v22 = vadd.f32 %v3849_v26, %v11307_v59  ;;  %4922 = vmatmul.mubr.bf16.vlgmr.msra.gmra.mrb[192].mxu1 %v4697_v28  ;;  %v4575_v23 = vmax.f32 %v11323_v1, 0.0  ;;  %v4578_v47 = vmax.f32 %v11335_v16, 0.0  ;;  %v11635_v42 = vpop.f32.mrb[172].mxu0 }
 0x3d7   : > { %v4103_v15 = vadd.f32 %v4102_v61, %v3981_v4  ;;  %v4140_v25 = vadd.f32 %v4139_v51, %v3982_v33  ;;  %4929 = vmatprep.mubr.bf16.mxu1 %v4700_v54  ;;  %v4580_v2 = vmax.f32 %v11343_v17, 0.0  ;;  %v3987_v46 = vmul.f32 %v11525_v52, %v11525_v52  ;;  %v11640_v10 = vpop.f32.mrb[173].mxu0 }
 0x3d8   : > { %v3814_v58 = vadd.f32 %v3813_v48, %v11389_v21  ;;  %v3851_v12 = vadd.f32 %v3850_v22, %v11407_v56  ;;  %v4699_v4 = vpack.c.bf16 %v4575_v23, %v4573_v20  ;;  %v3988_v1 = vmul.f32 %v11543_v32, %v11543_v32  ;;  %v11645_v29 = vpop.f32.mrb[174].mxu0 }
 0x3d9   : > { %v4104_v14 = vadd.f32 %v4103_v15, %v3983_v5  ;;  %v4141_v16 = vadd.f32 %v4140_v25, %v3984_v39  ;;  %v4702_v26 = vpack.c.bf16 %v4580_v2, %v4578_v47  ;;  %v3989_v17 = vmul.f32 %v11561_v41, %v11561_v41  ;;  %v11651_v51 = vpop.f32.mrb[175].mxu0 }
 0x3da   : > { %v3815_v28 = vadd.f32 %v3814_v58, %v11425_v7  ;;  %v3852_v33 = vadd.f32 %v3851_v12, %v11443_v57  ;;  %v3990_v48 = vmul.f32 %v11569_v24, %v11569_v24  ;;  %v4577_v54 = vmax.f32 %v11331_v53, 0.0 }
 0x3db   : > { %v4105_v61 = vadd.f32 %v4104_v14, %v3985_v11  ;;  %v4142_v22 = vadd.f32 %v4141_v16, %v3986_v45  ;;  %v4579_v20 = vmax.f32 %v11339_v62, 0.0  ;;  %v4582_v15 = vmax.f32 %v11351_v0, 0.0  ;;  %v11670_v16 = vpop.f32.mrb[176].mxu0 }
 0x3dc   : > { %v3816_v5 = vadd.f32 %v3815_v28, %v11525_v52  ;;  %v3853_v39 = vadd.f32 %v3852_v33, %v11543_v32  ;;  %v4584_v11 = vmax.f32 %v11359_v6, 0.0  ;;  %v3991_v47 = vmul.f32 %v11599_v63, %v11599_v63 }
 0x3dd   : > { %v4106_v58 = vadd.f32 %v4105_v61, %v3987_v46  ;;  %v4143_v25 = vadd.f32 %v4142_v22, %v3988_v1  ;;  %v4701_v12 = vpack.c.bf16 %v4579_v20, %v4577_v54  ;;  %v3992_v45 = vmul.f32 %v11605_v18, %v11605_v18 }
 0x3de   : > { %v3817_v23 = vadd.f32 %v3816_v5, %v11561_v41  ;;  %v3854_v53 = vadd.f32 %v3853_v39, %v11569_v24  ;;  %4930 = vmatmul.mubr.bf16.gmra.mrb[196].mxu1 %v4699_v4  ;;  %v4704_v62 = vpack.c.bf16 %v4584_v11, %v4582_v15  ;;  %v3993_v46 = vmul.f32 %v11610_v43, %v11610_v43  ;;  %v11675_v5 = vpop.f32.mrb[177].mxu0 }
 0x3df   : > { %v4107_v2 = vadd.f32 %v4106_v58, %v3989_v17  ;;  %4937 = vmatprep.mubr.bf16.mxu1 %v4702_v26  ;;  %v4144_v6 = vadd.f32 %v4143_v25, %v3990_v48  ;;  %v3994_v28 = vmul.f32 %v11616_v19, %v11616_v19  ;;  %v4581_v1 = vmax.f32 %v11347_v35, 0.0  ;;  %14827 = vst [vmem:[#allocation126_spill] sm:$0xff] %v11675_v5  ;;  %v11681_v35 = vpop.f32.mrb[178].mxu0 }
 0x3e0   : > { %v3818_v0 = vadd.f32 %v3817_v23, %v11599_v63  ;;  %v3855_v14 = vadd.f32 %v3854_v53, %v11605_v18  ;;  %v4583_v17 = vmax.f32 %v11355_v36, 0.0  ;;  %v4586_v61 = vmax.f32 %v11367_v44, 0.0  ;;  %14828 = vst [vmem:[#allocation128_spill] sm:$0xff] %v11681_v35  ;;  %v11686_v44 = vpop.f32.mrb[179].mxu0 }
 0x3e1   : > { %v4108_v33 = vadd.f32 %v4107_v2, %v3991_v47  ;;  %v4145_v26 = vadd.f32 %v4144_v6, %v3992_v45  ;;  %v4588_v54 = vmax.f32 %v11375_v34, 0.0  ;;  %v3995_v22 = vmul.f32 %v11635_v42, %v11635_v42  ;;  %14829 = vst [vmem:[#allocation129_spill] sm:$0xff] %v11686_v44 }
 0x3e2   : > { %v3819_v4 = vadd.f32 %v3818_v0, %v11610_v43  ;;  %v3856_v48 = vadd.f32 %v3855_v14, %v11616_v19  ;;  %v4703_v20 = vpack.c.bf16 %v4583_v17, %v4581_v1  ;;  %v3996_v36 = vmul.f32 %v11640_v10, %v11640_v10 }
 0x3e3   : > { %v4109_v39 = vadd.f32 %v4108_v33, %v3993_v46  ;;  %v4146_v58 = vadd.f32 %v4145_v26, %v3994_v28  ;;  %v4706_v23 = vpack.c.bf16 %v4588_v54, %v4586_v61  ;;  %v3997_v34 = vmul.f32 %v11645_v29, %v11645_v29  ;;  %v11707_v61 = vpop.f32.mrb[180].mxu0 }
 0x3e4   : > { %v3820_v15 = vadd.f32 %v3819_v4, %v11635_v42  ;;  %v3857_v11 = vadd.f32 %v3856_v48, %v11640_v10  ;;  %v3998_v53 = vmul.f32 %v11651_v51, %v11651_v51  ;;  %v4585_v45 = vmax.f32 %v11363_v31, 0.0  ;;  %14830 = vst [vmem:[#allocation130_spill] sm:$0xff] %v11707_v61  ;;  %v11714_v48 = vpop.f32.mrb[181].mxu0 }
 0x3e5   : > { %v4110_v47 = vadd.f32 %v4109_v39, %v3995_v22  ;;  %v4147_v2 = vadd.f32 %v4146_v58, %v3996_v36  ;;  %v4587_v46 = vmax.f32 %v11371_v27, 0.0  ;;  %v4590_v6 = vmax.f32 %v11383_v50, 0.0  ;;  %14831 = vst [vmem:[#allocation139_spill] sm:$0xff] %v11714_v48  ;;  %v14833_v58 = vld [vmem:[#allocation70_spill] sm:$0xff] }
 0x3e6   : > { %v3821_v25 = vadd.f32 %v3820_v15, %v11645_v29  ;;  %v3858_v0 = vadd.f32 %v3857_v11, %v11651_v51  ;;  %4938 = vmatmul.mubr.bf16.gmra.mrb[200].mxu1 %v4701_v12  ;;  %v4592_v28 = vmax.f32 %v11393_v40, 0.0  ;;  %v3999_v33 = vmul.f32 %v11670_v16, %v11670_v16  ;;  %v11720_v15 = vpop.f32.mrb[182].mxu0 }
 0x3e7   : > { %v4111_v14 = vadd.f32 %v4110_v47, %v3997_v34  ;;  %4945 = vmatprep.mubr.bf16.mxu1 %v4704_v62  ;;  %v4148_v4 = vadd.f32 %v4147_v2, %v3998_v53  ;;  %v11702_v17 = vpack.c.bf16 %v4587_v46, %v4585_v45  ;;  %v4000_v27 = vmul.f32 %v11675_v5, %v11675_v5 }
 0x3e8   : > { %v3822_v1 = vadd.f32 %v3821_v25, %v11670_v16  ;;  %v3859_v31 = vadd.f32 %v3858_v0, %v11675_v5  ;;  %v11709_v50 = vpack.c.bf16 %v4592_v28, %v4590_v6  ;;  %v4001_v26 = vmul.f32 %v11681_v35, %v11681_v35  ;;  %14832 = vst [vmem:[#allocation45_spill] sm:$0xff] %v11720_v15  ;;  %v11725_v25 = vpop.f32.mrb[183].mxu0 }
 0x3e9   : > { %v4112_v12 = vadd.f32 %v4111_v14, %v3999_v33  ;;  %v4149_v62 = vadd.f32 %v4148_v4, %v4000_v27  ;;  %v4002_v22 = vmul.f32 %v11686_v44, %v11686_v44  ;;  %v4589_v39 = vmax.f32 %v11379_v3, 0.0  ;;  %14834 = vst [vmem:[#allocation65_spill] sm:$0xff] %v11725_v25 }
 0x3ea   : > { %v3823_v40 = vadd.f32 %v3822_v1, %v11681_v35  ;;  %v3860_v54 = vadd.f32 %v3859_v31, %v11686_v44  ;;  %v4591_v11 = vmax.f32 %v14833_v58, 0.0  ;;  %v4594_v34 = vmax.f32 %v11401_v9, 0.0  ;;  %v14835_v31 = vld [vmem:[#allocation77_spill] sm:$0xff] }
 0x3eb   : > { %v4113_v36 = vadd.f32 %v4112_v12, %v4001_v26  ;;  %v4596_v47 = vmax.f32 %v11411_v60, 0.0  ;;  %v4150_v53 = vadd.f32 %v4149_v62, %v4002_v22  ;;  %v4003_v2 = vmul.f32 %v11707_v61, %v11707_v61  ;;  %v11747_v62 = vpop.f32.mrb[184].mxu0 }
 0x3ec   : > { %v3824_v45 = vadd.f32 %v3823_v40, %v11707_v61  ;;  %v3861_v0 = vadd.f32 %v3860_v54, %v11714_v48  ;;  %v11731_v3 = vpack.c.bf16 %v4591_v11, %v4589_v39  ;;  %v4004_v6 = vmul.f32 %v11714_v48, %v11714_v48  ;;  %14836 = vst [vmem:[#allocation70_spill] sm:$0xff] %v11747_v62  ;;  %v14837_v54 = vld [vmem:[#allocation76_spill] sm:$0xff]  ;;  %v14838_v39 = vld [vmem:[#allocation89_spill] sm:$0xff] }
 0x3ed   : > { %v11733_v46 = vpack.c.bf16 %v4596_v47, %v4594_v34  ;;  %v4005_v60 = vmul.f32 %v11720_v15, %v11720_v15  ;;  %v4114_v9 = vadd.f32 %v4113_v36, %v4003_v2  ;;  %v4006_v1 = vmul.f32 %v11725_v25, %v11725_v25  ;;  %v11756_v34 = vpop.f32.mrb[185].mxu0  ;;  %v14868_v61 = vld [vmem:[#allocation57_spill] sm:$0xff] }
 0x3ee   : > { %v3825_v14 = vadd.f32 %v3824_v45, %v11720_v15  ;;  %v3862_v28 = vadd.f32 %v3861_v0, %v11725_v25  ;;  %4946 = vmatmul.mubr.bf16.gmra.mrb[204].mxu1 %v4703_v20  ;;  %v4151_v33 = vadd.f32 %v4150_v53, %v4004_v6  ;;  %v4593_v4 = vmax.f32 %v11397_v38, 0.0  ;;  %14839 = vst [vmem:[#allocation77_spill] sm:$0xff] %v11756_v34  ;;  %v11763_v47 = vpop.f32.mrb[186].mxu0  ;;  %v14863_v15 = vld [vmem:[#allocation145_spill] sm:$0xff] }
 0x3ef   : > { %v4595_v27 = vmax.f32 %v14835_v31, 0.0  ;;  %v4598_v12 = vmax.f32 %v11419_v37, 0.0  ;;  %4953 = vmatprep.mubr.bf16.mxu1 %v4706_v23  ;;  %v4115_v40 = vadd.f32 %v4114_v9, %v4005_v60  ;;  %v4600_v26 = vmax.f32 %v11429_v55, 0.0  ;;  %14840 = vst [vmem:[#allocation76_spill] sm:$0xff] %v11763_v47  ;;  %v11770_v6 = vpop.f32.mrb[187].mxu0  ;;  %v14842_v60 = vld [vmem:[#allocation75_spill] sm:$0xff] }
 0x3f0   : > { %v4597_v22 = vmax.f32 %v14837_v54, 0.0  ;;  %v4599_v36 = vmax.f32 %v14838_v39, 0.0  ;;  %v4152_v58 = vadd.f32 %v4151_v33, %v4006_v1  ;;  %v3826_v20 = vadd.f32 %v3825_v14, %v11747_v62  ;;  %14841 = vst [vmem:[#allocation89_spill] sm:$0xff] %v11770_v6  ;;  %v14843_v33 = vld [vmem:[#allocation102_spill] sm:$0xff]  ;;  %v14846_v54 = vld [vmem:[#allocation87_spill] sm:$0xff] }
 0x3f1   : > { %v11751_v11 = vpack.c.bf16 %v4595_v27, %v4593_v4  ;;  %v4007_v38 = vmul.f32 %v11747_v62, %v11747_v62  ;;  %v11758_v37 = vpack.c.bf16 %v4600_v26, %v4598_v12  ;;  %v3863_v55 = vadd.f32 %v3862_v28, %v11756_v34  ;;  %v14844_v27 = vld [vmem:[#allocation82_spill] sm:$0xff] }
 0x3f2   : > { %v4008_v23 = vmul.f32 %v11756_v34, %v11756_v34  ;;  %v11765_v53 = vpack.c.bf16 %v4599_v36, %v4597_v22  ;;  %v3827_v2 = vadd.f32 %v3826_v20, %v11763_v47  ;;  %v4009_v0 = vmul.f32 %v11763_v47, %v11763_v47  ;;  %v14847_v20 = vld [vmem:[#allocation107_spill] sm:$0xff]  ;;  %v14862_v62 = vld [vmem:[#allocation46_spill] sm:$0xff] }
 0x3f3   : > { %v4116_v45 = vadd.f32 %v4115_v40, %v4007_v38  ;;  %v4602_v9 = vmax.f32 %v14842_v60, 0.0  ;;  %v3864_v28 = vadd.f32 %v3863_v55, %v11770_v6  ;;  %v4010_v1 = vmul.f32 %v11770_v6, %v11770_v6  ;;  %v14845_v40 = vld [vmem:[#allocation88_spill] sm:$0xff]  ;;  %v14849_v60 = vld [vmem:[#allocation101_spill] sm:$0xff] }
 0x3f4   : > { %v4153_v14 = vadd.f32 %v4152_v58, %v4008_v23  ;;  %v4604_v4 = vmax.f32 %v14843_v33, 0.0  ;;  %v4601_v12 = vmax.f32 %v14844_v27, 0.0  ;;  %v4603_v26 = vmax.f32 %v14845_v40, 0.0  ;;  %v14848_v58 = vld [vmem:[#allocation94_spill] sm:$0xff]  ;;  %v14851_v27 = vld [vmem:[#allocation140_spill] sm:$0xff]  ;;  %v11791_v40 = vpop.f32.mrb[188].mxu0 }
 0x3f5   : > { %v4117_v31 = vadd.f32 %v4116_v45, %v4009_v0  ;;  %v4606_v22 = vmax.f32 %v14846_v54, 0.0  ;;  %v4608_v38 = vmax.f32 %v14847_v20, 0.0  ;;  %v4605_v23 = vmax.f32 %v14848_v58, 0.0  ;;  %v14850_v45 = vld [vmem:[#allocation100_spill] sm:$0xff]  ;;  %14852 = vst [vmem:[#allocation75_spill] sm:$0xff] %v11791_v40  ;;  %v14855_v20 = vld [vmem:[#allocation142_spill] sm:$0xff] }
 0x3f6   : > { %v4154_v39 = vadd.f32 %v4153_v14, %v4010_v1  ;;  %v11780_v36 = vpack.c.bf16 %v4604_v4, %v4602_v9  ;;  %4954 = vmatmul.mubr.bf16.gmra.mrb[208].mxu1 %v11702_v17  ;;  %v11785_v55 = vpack.c.bf16 %v4603_v26, %v4601_v12  ;;  %v4607_v33 = vmax.f32 %v14849_v60, 0.0  ;;  %v14853_v14 = vld [vmem:[#allocation99_spill] sm:$0xff]  ;;  %v14854_v4 = vld [vmem:[#allocation12_spill] sm:$0xff]  ;;  %v11801_v58 = vpop.f32.mrb[189].mxu0 }
 0x3f7   : > { %v4610_v0 = vmax.f32 %v14850_v45, 0.0  ;;  %v4612_v6 = vmax.f32 %v14851_v27, 0.0  ;;  %4961 = vmatprep.mubr.bf16.mxu1 %v11709_v50  ;;  %v11793_v9 = vpack.c.bf16 %v4608_v38, %v4606_v22  ;;  %v4609_v1 = vmax.f32 %v14853_v14, 0.0  ;;  %14856 = vst [vmem:[#allocation102_spill] sm:$0xff] %v11801_v58  ;;  %v11810_v45 = vpop.f32.mrb[190].mxu0  ;;  %v14858_v14 = vld [vmem:[#allocation144_spill] sm:$0xff] }
 0x3f8   : > { %v4611_v54 = vmax.f32 %v14854_v4, 0.0  ;;  %v4614_v17 = vmax.f32 %v14855_v20, 0.0  ;;  %v3828_v12 = vadd.f32 %v3827_v2, %v11791_v40  ;;  %v4011_v26 = vmul.f32 %v11791_v40, %v11791_v40  ;;  %14857 = vst [vmem:[#allocation82_spill] sm:$0xff] %v11810_v45 }
 0x3f9   : > { %v11803_v60 = vpack.c.bf16 %v4607_v33, %v4605_v23  ;;  %v11805_v50 = vpack.c.bf16 %v4612_v6, %v4610_v0  ;;  %v3865_v22 = vadd.f32 %v3864_v28, %v11801_v58  ;;  %v4012_v38 = vmul.f32 %v11801_v58, %v11801_v58  ;;  %v11818_v33 = vpop.f32.mrb[191].mxu0  ;;  %v14859_v6 = vld [vmem:[#allocation141_spill] sm:$0xff] }
 0x3fa   : > { %v11812_v27 = vpack.c.bf16 %v4611_v54, %v4609_v1  ;;  %v4616_v2 = vmax.f32 %v14858_v14, 0.0  ;;  %v4118_v4 = vadd.f32 %v4117_v31, %v4011_v26  ;;  %v3829_v20 = vadd.f32 %v3828_v12, %v11810_v45  ;;  %v14860_v31 = vld [vmem:[#allocation143_spill] sm:$0xff] }
 0x3fb   : > { %v4013_v23 = vmul.f32 %v11810_v45, %v11810_v45  ;;  %v4613_v0 = vmax.f32 %v14859_v6, 0.0  ;;  %v4155_v28 = vadd.f32 %v4154_v39, %v4012_v38  ;;  %v3866_v40 = vadd.f32 %v3865_v22, %v11818_v33  ;;  %v14861_v12 = vld [vmem:[#allocation39_spill] sm:$0xff] }
 0x3fc   : > { %v4014_v58 = vmul.f32 %v11818_v33, %v11818_v33  ;;  %v11824_v1 = vpack.c.bf16 %v4616_v2, %v4614_v17  ;;  %v3830_v54 = vrot.slane %v3829_v20, 4  ;;  %v4615_v26 = vmax.f32 %v14860_v31, 0.0  ;;  %v14864_v17 = vld [vmem:[#allocation40_spill] sm:$0xff] }
 0x3fd   : > { %v4119_v14 = vadd.f32 %v4118_v4, %v4013_v23  ;;  %v4618_v47 = vmax.f32 %v14861_v12, 0.0  ;;  %v3867_v34 = vrot.slane %v3866_v40, 4  ;;  %v4620_v25 = vmax.f32 %v14862_v62, 0.0  ;;  %v14865_v12 = vld [vmem:[#allocation52_spill] sm:$0xff] }
 0x3fe   : > { %v4156_v45 = vadd.f32 %v4155_v28, %v4014_v58  ;;  %v4617_v6 = vmax.f32 %v14863_v15, 0.0  ;;  %4962 = vmatmul.mubr.bf16.gmra.mrb[212].mxu1 %v11731_v3  ;;  %v3831_v39 = vadd.f32 %v3830_v54, %v3829_v20  ;;  %v11831_v38 = vpack.c.bf16 %v4615_v26, %v4613_v0  ;;  %v14866_v15 = vld [vmem:[#allocation58_spill] sm:$0xff]  ;;  %v14867_v0 = vld [vmem:[#allocation51_spill] sm:$0xff] }
 0x3ff   : > { %v4120_v22 = vrot.slane %v4119_v14, 4  ;;  %v4619_v2 = vmax.f32 %v14864_v17, 0.0  ;;  %4969 = vmatprep.mubr.bf16.mxu1 %v11733_v46  ;;  %v3868_v4 = vadd.f32 %v3867_v34, %v3866_v40  ;;  %v11835_v31 = vpack.c.bf16 %v4620_v25, %v4618_v47  ;;  %v14869_v25 = vld [vmem:[#allocation64_spill] sm:$0xff] }
 0x400   : > { %v4157_v23 = vrot.slane %v4156_v45, 4  ;;  %v4622_v58 = vmax.f32 %v14865_v12, 0.0  ;;  %v3832_v28 = vrot.slane %v3831_v39, 2  ;;  %v4624_v3 = vmax.f32 %v14866_v15, 0.0  ;;  %v14871_v15 = vld [vmem:[#allocation63_spill] sm:$0xff] }
 0x401   : > { %v4121_v62 = vadd.f32 %v4120_v22, %v4119_v14  ;;  %v11838_v48 = vpack.c.bf16 %v4619_v2, %v4617_v6  ;;  %v3869_v20 = vrot.slane %v3868_v4, 2  ;;  %v4621_v26 = vmax.f32 %v14867_v0, 0.0  ;;  %v14870_v14 = vld [vmem:[#allocation147_spill] sm:$0xff] }
 0x402   : > { %v4158_v54 = vadd.f32 %v4157_v23, %v4156_v45  ;;  %v4623_v17 = vmax.f32 %v14868_v61, 0.0  ;;  %v3833_v44 = vadd.f32 %v3832_v28, %v3831_v39  ;;  %v11843_v34 = vpack.c.bf16 %v4624_v3, %v4622_v58  ;;  %v14872_v23 = vld [vmem:[#allocation146_spill] sm:$0xff]  ;;  %v14874_v58 = vld [vmem:[#allocation149_spill] sm:$0xff] }
 0x403   : > { %v4122_v46 = vrot.slane %v4121_v62, 2  ;;  %v4626_v47 = vmax.f32 %v14869_v25, 0.0  ;;  %v3870_v40 = vadd.f32 %v3869_v20, %v3868_v4  ;;  %v4628_v6 = vmax.f32 %v14870_v14, 0.0  ;;  %v11858_v25 = vpop.permute.xlu1 %3880  ;;  %v14878_v14 = vld [vmem:[#allocation148_spill] sm:$0xff] }
 0x404   : > { %v4159_v12 = vrot.slane %v4158_v54, 2  ;;  %v11846_v35 = vpack.c.bf16 %v4623_v17, %v4621_v26  ;;  %v3834_v22 = vrot.slane %v3833_v44, 1  ;;  %v4625_v45 = vmax.f32 %v14871_v15, 0.0  ;;  %v14876_v26 = vld [vmem:[#allocation11_spill] sm:$0xff]  ;;  %14877 = vst [vmem:[#allocation107_spill] sm:$0xff] %v11858_v25 }
 0x405   : > { %v4123_v2 = vadd.f32 %v4122_v46, %v4121_v62  ;;  %v4627_v0 = vmax.f32 %v14872_v23, 0.0  ;;  %v3871_v5 = vrot.slane %v3870_v40, 1  ;;  %v11851_v39 = vpack.c.bf16 %v4628_v6, %v4626_v47  ;;  %v14879_v47 = vld [vmem:[#allocation150_spill] sm:$0xff] }
 0x406   : > { %v4160_v61 = vadd.f32 %v4159_v12, %v4158_v54  ;;  %v4630_v28 = vmax.f32 %v14874_v58, 0.0  ;;  %4970 = vmatmul.mubr.bf16.gmra.mrb[216].mxu1 %v11751_v11  ;;  %v3835_v4 = vadd.f32 %v3834_v22, %v3833_v44  ;;  %v4632_v17 = vmax.f32 %v14876_v26, 0.0 }
 0x407   : > { %14873 = vst [vmem:[#allocation88_spill] sm:$0xff] %v11851_v39  ;;  %v4124_v3 = vrot.slane %v4123_v2, 1  ;;  %v11855_v20 = vpack.c.bf16 %v4627_v0, %v4625_v45  ;;  %4977 = vmatprep.mubr.bf16.mxu1 %v11758_v37  ;;  %v3872_v62 = vadd.f32 %v3871_v5, %v3870_v40  ;;  %v4629_v54 = vmax.f32 %v14878_v14, 0.0 }
 0x408   : > { %v4161_v46 = vrot.slane %v4160_v61, 1  ;;  %v4631_v12 = vmax.f32 %v14879_v47, 0.0  ;;  %v3885_v6 = vmul.f32 %v11858_v25, %v3835_v4  ;;  %v11864_v11 = vpack.c.bf16 %v4632_v17, %v4630_v28 }
 0x409   : > { %14875 = vst [vmem:[#allocation87_spill] sm:$0xff] %v11855_v20  ;;  %v4125_v15 = vadd.f32 %v4124_v3, %v4123_v2  ;;  %v3886_v44 = vmul.f32 %v11858_v25, %v3872_v62  ;;  %v14910_v20 = vld [vmem:[#allocation134_spill] sm:$0xff] }
 0x40a   : > { %14880 = vst [vmem:[#allocation94_spill] sm:$0xff] %v11864_v11  ;;  %v4162_v22 = vadd.f32 %v4161_v46, %v4160_v61  ;;  %v11867_v45 = vpack.c.bf16 %v4631_v12, %v4629_v54  ;;  %v4169_v0 = vmul.f32 %v3885_v6, %v3885_v6  ;;  %v14883_v46 = vld [vmem:[#allocation124_spill] sm:$0xff]  ;;  %v14885_v12 = vld [vmem:[#allocation17_spill] sm:$0xff] }
 0x40b   : > { %v4165_v23 = vmul.f32 %v4125_v15, %v11858_v25  ;;  %v4170_v37 = vmul.f32 %v3886_v44, %v3886_v44  ;;  %v14884_v54 = vld [vmem:[#allocation16_spill] sm:$0xff]  ;;  %v14886_v15 = vld [vmem:[#allocation110_spill] sm:$0xff] }
 0x40c   : > { %14881 = vst [vmem:[#allocation101_spill] sm:$0xff] %v11867_v45  ;;  %v4166_v5 = vmul.f32 %v4162_v22, %v11858_v25 }
 0x40d   : > { %v4173_v40 = vsub.f32 %v4165_v23, %v4169_v0  ;;  %v14887_v23 = vld [vmem:[#allocation30_spill] sm:$0xff] }
 0x40e   : > { %v4174_v58 = vsub.f32 %v4166_v5, %v4170_v37  ;;  %4978 = vmatmul.mubr.bf16.gmra.mrb[220].mxu1 %v11765_v53  ;;  %v14882_v53 = vld [vmem:[#allocation15_spill] sm:$0xff] }
 0x40f   : > { %v4177_v26 = vmax.f32 %v4173_v40, 0.0  ;;  %4985 = vmatprep.mubr.bf16.mxu1 %v11780_v36  ;;  %v14888_v5 = vld [vmem:[#allocation27_spill] sm:$0xff]  ;;  %v14891_v40 = vld [vmem:[#allocation13_spill] sm:$0xff] }
 0x410   : > { %v4178_v2 = vmax.f32 %v4174_v58, 0.0 }
 0x411   : > { %v4182_v28 = vadd.f32 1e-05, %v4177_v26  ;;  %v14892_v26 = vld [vmem:[#allocation112_spill] sm:$0xff] }
 0x412   : > { %v4183_v4 = vadd.f32 1e-05, %v4178_v2 }
 0x413   : > { %7749 = vrsqrt.f32 %v4182_v28  ;;  %v14893_v28 = vld [vmem:[#allocation113_spill] sm:$0xff] }
 0x414   : > { %7751 = vrsqrt.f32 %v4183_v4 }
 0x416   : > { %4986 = vmatmul.mubr.bf16.gmra.mrb[224].mxu1 %v11785_v55 }
 0x417   : > { %4993 = vmatprep.mubr.bf16.mxu1 %v11793_v9 }
 0x41d   : > { %v7750_v61 = vpop.eup %7749 }
 0x41e   : > { %v7752_v3 = vpop.eup %7751  ;;  %4994 = vmatmul.mubr.bf16.gmra.mrb[228].mxu1 %v11803_v60 }
 0x41f   : > { %v4207_v17 = vcombine.low %v7750_v61, %v7752_v3  ;;  %5001 = vmatprep.mubr.bf16.mxu1 %v11805_v50  ;;  %v14894_v61 = vld [vmem:[#allocation114_spill] sm:$0xff] }
 0x421   : > { %v4214_v62 = vrot.slane %v4207_v17, %v14882_v53  ;;  %v14895_v17 = vld [vmem:[#allocation115_spill] sm:$0xff] }
 0x423   : > { %v4221_v36 = vrot.slane %v4214_v62, %v14882_v53 }
 0x425   : > { %v4225_v14 = vmul.f32 %v4221_v36, %v14883_v46  ;;  %v14896_v36 = vld [vmem:[#allocation116_spill] sm:$0xff] }
 0x426   : > { %5002 = vmatmul.mubr.bf16.gmra.mrb[232].mxu1 %v11812_v27 }
 0x427   : > { %v11881_v47 = vrot.slane %v4225_v14, %v14884_v54  ;;  %v11884_v55 = vrot.slane %v4225_v14, %v14885_v12  ;;  %5009 = vmatprep.mubr.bf16.mxu1 %v11824_v1  ;;  %v14889_v1 = vld [vmem:[#allocation26_spill] sm:$0xff]  ;;  %v14897_v14 = vld [vmem:[#allocation117_spill] sm:$0xff] }
 0x429   : > { %v4251_v9 = vmul.f32 %v11881_v47, %v3885_v6  ;;  %v4252_v60 = vmul.f32 %v11884_v55, %v3886_v44  ;;  %v4418_v50 = vmul.f32 %v11884_v55, %v11818_v33  ;;  %v11894_v22 = vmul.f32 %v11881_v47, %v14886_v15  ;;  %v14890_v44 = vld [vmem:[#allocation14_spill] sm:$0xff] }
 0x42a   : > { %v11898_v0 = vmul.f32 %v11884_v55, %v14887_v23  ;;  %v11902_v27 = vmul.f32 %v11881_v47, %v14888_v5  ;;  %v11906_v6 = vmul.f32 %v11884_v55, %v14889_v1  ;;  %v11910_v37 = vmul.f32 %v11881_v47, %v14890_v44  ;;  %v14898_v15 = vld [vmem:[#allocation118_spill] sm:$0xff]  ;;  %v14899_v5 = vld [vmem:[#allocation119_spill] sm:$0xff]  ;;  %v14900_v44 = vld [vmem:[#allocation120_spill] sm:$0xff] }
 0x42b   : > { %v4272_v33 = vcombine.low %v4251_v9, %v4252_v60  ;;  %v11914_v58 = vmul.f32 %v11884_v55, %v14891_v40  ;;  %v11918_v2 = vmul.f32 %v11881_v47, %v14892_v26  ;;  %v11922_v4 = vmul.f32 %v11884_v55, %v14893_v28  ;;  %v14901_v26 = vld [vmem:[#allocation121_spill] sm:$0xff] }
 0x42c   : > { %v11926_v3 = vmul.f32 %v11881_v47, %v14894_v61  ;;  %v11930_v62 = vmul.f32 %v11884_v55, %v14895_v17  ;;  %v11934_v46 = vmul.f32 %v11881_v47, %v14896_v36  ;;  %v11938_v9 = vmul.f32 %v11884_v55, %v14897_v14  ;;  %v14902_v61 = vld [vmem:[#allocation122_spill] sm:$0xff]  ;;  %v14904_v14 = vld [vmem:[#allocation125_spill] sm:$0xff] }
 0x42d   : > { %v4279_v60 = vrot.slane %v4272_v33, %v14882_v53  ;;  %v11943_v23 = vmul.f32 %v11881_v47, %v14898_v15  ;;  %v11947_v1 = vmul.f32 %v11884_v55, %v14899_v5  ;;  %v11951_v40 = vmul.f32 %v11881_v47, %v14900_v44  ;;  %v14903_v33 = vld [vmem:[#allocation123_spill] sm:$0xff] }
 0x42e   : > { %v11955_v28 = vmul.f32 %v11884_v55, %v14901_v26  ;;  %v11959_v17 = vmul.f32 %v11881_v47, %v14902_v61  ;;  %v11963_v36 = vmul.f32 %v11884_v55, %v14903_v33  ;;  %v11967_v15 = vmul.f32 %v11881_v47, %v14904_v14  ;;  %v14905_v44 = vld [vmem:[#allocation127_spill] sm:$0xff]  ;;  %v14907_v61 = vld [vmem:[#allocation132_spill] sm:$0xff]  ;;  %5010 = vmatmul.mubr.bf16.gmra.mrb[236].mxu1 %v11831_v38  ;;  %v14909_v33 = vld [vmem:[#allocation133_spill] sm:$0xff] }
 0x42f   : > { %v4286_v5 = vrot.slane %v4279_v60, %v14882_v53  ;;  %v11972_v25 = vmul.f32 %v11884_v55, %v14905_v44  ;;  %v14906_v26 = vld [vmem:[#allocation131_spill] sm:$0xff]  ;;  %v11980_v11 = vmul.f32 %v11884_v55, %v14907_v61  ;;  %v11985_v14 = vmul.f32 %v11881_v47, %v14909_v33  ;;  %v14911_v60 = vld [vmem:[#allocation136_spill] sm:$0xff]  ;;  %5017 = vmatprep.mubr.bf16.mxu1 %v11835_v31 }
 0x430   : > { %v11976_v45 = vmul.f32 %v11881_v47, %v14906_v26  ;;  %v11989_v53 = vmul.f32 %v11884_v55, %v14910_v20  ;;  %v11993_v44 = vmul.f32 %v11881_v47, %v14911_v60  ;;  %v14912_v26 = vld [vmem:[#allocation137_spill] sm:$0xff]  ;;  %v14913_v61 = vld [vmem:[#allocation135_spill] sm:$0xff]  ;;  %v12007_v20 = vmul.f32 %v11884_v55, %v14824_v8 }
 0x431   : > { %14908 = vst [vmem:[#allocation100_spill] sm:$0xff] %v11980_v11  ;;  %v11997_v39 = vmul.f32 %v11884_v55, %v14912_v26  ;;  %v4290_v38 = vsub.f32 %v14913_v61, %v4286_v5  ;;  %v14914_v11 = vld [vmem:[#allocation138_spill] sm:$0xff]  ;;  %v12011_v60 = vmul.f32 %v11881_v47, %v14825_v30  ;;  %v12015_v26 = vmul.f32 %v11884_v55, %v14826_v49 }
 0x432   : > { %v12003_v33 = vmul.f32 %v11881_v47, %v14914_v11  ;;  %v12019_v31 = vmul.f32 %v11881_v47, %v11289_v13  ;;  %v12023_v11 = vmul.f32 %v11884_v55, %v11307_v59  ;;  %v12027_v8 = vmul.f32 %v11881_v47, %v11389_v21 }
 0x433   : > { %v12030_v5 = vrot.slane %v4290_v38, %v14884_v54  ;;  %v12033_v30 = vrot.slane %v4290_v38, %v14885_v12  ;;  %v12037_v49 = vmul.f32 %v11884_v55, %v11407_v56  ;;  %v12041_v13 = vmul.f32 %v11881_v47, %v11425_v7  ;;  %v14918_v38 = vld [vmem:[#allocation128_spill] sm:$0xff] }
 0x434   : > { %v12045_v59 = vmul.f32 %v11884_v55, %v11443_v57  ;;  %v12049_v21 = vmul.f32 %v11881_v47, %v11525_v52  ;;  %v12053_v12 = vmul.f32 %v11884_v55, %v11543_v32  ;;  %v12057_v56 = vmul.f32 %v11881_v47, %v11561_v41 }
 0x435   : > { %v12060_v61 = vadd.f32 %v12033_v30, %v4418_v50  ;;  %v12064_v7 = vmul.f32 %v11884_v55, %v11569_v24  ;;  %v12068_v57 = vmul.f32 %v11881_v47, %v11599_v63  ;;  %v12072_v52 = vmul.f32 %v11884_v55, %v11605_v18 }
 0x436   : > { %v12076_v32 = vmul.f32 %v11881_v47, %v11610_v43  ;;  %v12080_v41 = vmul.f32 %v11884_v55, %v11616_v19  ;;  %v12084_v24 = vmul.f32 %v11881_v47, %v11635_v42  ;;  %v12088_v63 = vmul.f32 %v11884_v55, %v11640_v10  ;;  %5018 = vmatmul.mubr.bf16.gmra.mrb[240].mxu1 %v11838_v48  ;;  %v14916_v42 = vld [vmem:[#allocation126_spill] sm:$0xff] }
 0x437   : > { %14915 = vst [vmem:[#allocation140_spill] sm:$0xff] %v12060_v61  ;;  %v12093_v18 = vmul.f32 %v11881_v47, %v11645_v29  ;;  %v12097_v43 = vmul.f32 %v11884_v55, %v11651_v51  ;;  %v12101_v19 = vmul.f32 %v11881_v47, %v11670_v16  ;;  %v12106_v10 = vmul.f32 %v11884_v55, %v14916_v42  ;;  %v14920_v29 = vld [vmem:[#allocation129_spill] sm:$0xff]  ;;  %v14922_v51 = vld [vmem:[#allocation130_spill] sm:$0xff]  ;;  %v14924_v16 = vld [vmem:[#allocation139_spill] sm:$0xff] }
 0x438   : > { %v12110_v50 = vmul.f32 %v11881_v47, %v14918_v38  ;;  %v12114_v54 = vmul.f32 %v11884_v55, %v14920_v29  ;;  %v12118_v61 = vmul.f32 %v11881_v47, %v14922_v51  ;;  %5025 = vmatprep.mubr.bf16.mxu1 %v11843_v34  ;;  %v12123_v48 = vmul.f32 %v11884_v55, %v14924_v16  ;;  %v14926_v42 = vld [vmem:[#allocation45_spill] sm:$0xff]  ;;  %v14930_v29 = vld [vmem:[#allocation70_spill] sm:$0xff]  ;;  %v14933_v34 = vld [vmem:[#allocation76_spill] sm:$0xff] }
 0x439   : > { %14917 = vst [vmem:[#allocation99_spill] sm:$0xff] %v12106_v10  ;;  %v12127_v10 = vmul.f32 %v11881_v47, %v14926_v42  ;;  %v14928_v38 = vld [vmem:[#allocation65_spill] sm:$0xff]  ;;  %v12143_v16 = vmul.f32 %v11881_v47, %v14933_v34  ;;  %v12163_v34 = vadd.f32 %v12030_v5, %v11894_v22  ;;  %v12187_v22 = vadd.f32 %v12030_v5, %v11918_v2 }
 0x43a   : > { %14919 = vst [vmem:[#allocation12_spill] sm:$0xff] %v12110_v50  ;;  %14921 = vst [vmem:[#allocation142_spill] sm:$0xff] %v12114_v54  ;;  %v12131_v50 = vmul.f32 %v11884_v55, %v14928_v38  ;;  %v12135_v54 = vmul.f32 %v11881_v47, %v14930_v29  ;;  %v14932_v51 = vld [vmem:[#allocation77_spill] sm:$0xff]  ;;  %v12211_v2 = vadd.f32 %v12030_v5, %v11943_v23 }
 0x43b   : > { %14923 = vst [vmem:[#allocation144_spill] sm:$0xff] %v12118_v61  ;;  %14925 = vst [vmem:[#allocation141_spill] sm:$0xff] %v12123_v48  ;;  %v12139_v61 = vmul.f32 %v11884_v55, %v14932_v51  ;;  %v14934_v48 = vld [vmem:[#allocation89_spill] sm:$0xff]  ;;  %v12236_v23 = vadd.f32 %v12030_v5, %v11967_v15  ;;  %v12257_v15 = vadd.f32 %v12033_v30, %v11989_v53 }
 0x43c   : > { %14927 = vst [vmem:[#allocation143_spill] sm:$0xff] %v12127_v10  ;;  %14929 = vst [vmem:[#allocation39_spill] sm:$0xff] %v12131_v50  ;;  %v12147_v42 = vmul.f32 %v11884_v55, %v14934_v48  ;;  %v14935_v10 = vld [vmem:[#allocation75_spill] sm:$0xff]  ;;  %v14936_v50 = vld [vmem:[#allocation102_spill] sm:$0xff]  ;;  %v12167_v48 = vadd.f32 %v12033_v30, %v11898_v0  ;;  %v12191_v0 = vadd.f32 %v12033_v30, %v11922_v4 }
 0x43d   : > { %14931 = vst [vmem:[#allocation46_spill] sm:$0xff] %v12135_v54  ;;  %v12151_v38 = vmul.f32 %v11881_v47, %v14935_v10  ;;  %v12155_v29 = vmul.f32 %v11884_v55, %v14936_v50  ;;  %v14937_v54 = vld [vmem:[#allocation82_spill] sm:$0xff]  ;;  %v12171_v10 = vadd.f32 %v12030_v5, %v11902_v27  ;;  %v12175_v55 = vadd.f32 %v12033_v30, %v11906_v6 }
 0x43e   : > { %v12159_v51 = vmul.f32 %v11881_v47, %v14937_v54  ;;  %v12179_v54 = vadd.f32 %v12030_v5, %v11910_v37  ;;  %v12183_v47 = vadd.f32 %v12033_v30, %v11914_v58  ;;  %v12195_v27 = vadd.f32 %v12030_v5, %v11926_v3  ;;  %5026 = vmatmul.mubr.bf16.gmra.mrb[244].mxu1 %v11846_v35 }
 0x43f   : > { %v12199_v6 = vadd.f32 %v12033_v30, %v11930_v62  ;;  %v12203_v37 = vadd.f32 %v12030_v5, %v11934_v46  ;;  %v12207_v58 = vadd.f32 %v12033_v30, %v11938_v9  ;;  %v12215_v4 = vadd.f32 %v12033_v30, %v11947_v1 }
 0x440   : > { %v12219_v3 = vadd.f32 %v12030_v5, %v11951_v40  ;;  %v12223_v62 = vadd.f32 %v12033_v30, %v11955_v28  ;;  %v12227_v46 = vadd.f32 %v12030_v5, %v11959_v17  ;;  %v12231_v9 = vadd.f32 %v12033_v30, %v11963_v36  ;;  %v14938_v28 = vld [vmem:[#allocation100_spill] sm:$0xff] }
 0x441   : > { %v12240_v1 = vadd.f32 %v12033_v30, %v11972_v25  ;;  %v12244_v40 = vadd.f32 %v12030_v5, %v11976_v45  ;;  %v12248_v17 = vadd.f32 %v12033_v30, %v14938_v28  ;;  %v14939_v36 = vld [vmem:[#allocation88_spill] sm:$0xff]  ;;  %v12253_v35 = vadd.f32 %v12030_v5, %v11985_v14  ;;  %v14947_v28 = vld [vmem:[#allocation99_spill] sm:$0xff] }
 0x442   : > { %5033 = vmatprep.mubr.bf16.mxu1 %v14939_v36  ;;  %v12261_v25 = vadd.f32 %v12030_v5, %v11993_v44  ;;  %v12265_v45 = vadd.f32 %v12033_v30, %v11997_v39  ;;  %v12269_v50 = vadd.f32 %v12030_v5, %v12003_v33  ;;  %v12273_v14 = vadd.f32 %v12033_v30, %v12007_v20  ;;  %v14949_v36 = vld [vmem:[#allocation87_spill] sm:$0xff] }
 0x443   : > { %v12277_v53 = vadd.f32 %v12030_v5, %v12011_v60  ;;  %v12281_v44 = vadd.f32 %v12033_v30, %v12015_v26  ;;  %v12285_v39 = vadd.f32 %v12030_v5, %v12019_v31  ;;  %v12289_v33 = vadd.f32 %v12033_v30, %v12023_v11 }
 0x444   : > { %v12293_v20 = vadd.f32 %v12030_v5, %v12027_v8  ;;  %v12297_v60 = vadd.f32 %v12033_v30, %v12037_v49  ;;  %v12301_v26 = vadd.f32 %v12030_v5, %v12041_v13  ;;  %v12305_v31 = vadd.f32 %v12033_v30, %v12045_v59 }
 0x445   : > { %v12309_v11 = vadd.f32 %v12030_v5, %v12049_v21  ;;  %v12313_v8 = vadd.f32 %v12033_v30, %v12053_v12  ;;  %v12317_v49 = vadd.f32 %v12030_v5, %v12057_v56  ;;  %v12321_v13 = vadd.f32 %v12033_v30, %v12064_v7 }
 0x446   : > { %14940 = vst [vmem:[#allocation145_spill] sm:$0xff] %v12305_v31  ;;  %v12325_v59 = vadd.f32 %v12030_v5, %v12068_v57  ;;  %v12329_v21 = vadd.f32 %v12033_v30, %v12072_v52  ;;  %v12333_v12 = vadd.f32 %v12030_v5, %v12076_v32  ;;  %v12337_v56 = vadd.f32 %v12033_v30, %v12080_v41 }
 0x447   : > { %14941 = vst [vmem:[#allocation40_spill] sm:$0xff] %v12313_v8  ;;  %14942 = vst [vmem:[#allocation52_spill] sm:$0xff] %v12321_v13  ;;  %v12341_v7 = vadd.f32 %v12030_v5, %v12084_v24  ;;  %v12345_v57 = vadd.f32 %v12033_v30, %v12088_v63  ;;  %v12349_v52 = vadd.f32 %v12030_v5, %v12093_v18  ;;  %5034 = vmatmul.mubr.bf16.gmra.mrb[248].mxu1 %v14949_v36  ;;  %v14950_v63 = vld [vmem:[#allocation12_spill] sm:$0xff]  ;;  %v14956_v13 = vld [vmem:[#allocation94_spill] sm:$0xff] }
 0x448   : > { %14943 = vst [vmem:[#allocation58_spill] sm:$0xff] %v12329_v21  ;;  %14944 = vst [vmem:[#allocation51_spill] sm:$0xff] %v12337_v56  ;;  %v12353_v32 = vadd.f32 %v12033_v30, %v12097_v43  ;;  %v12357_v41 = vadd.f32 %v12030_v5, %v12101_v19  ;;  %v12361_v24 = vadd.f32 %v12033_v30, %v14947_v28  ;;  %v14951_v56 = vld [vmem:[#allocation142_spill] sm:$0xff]  ;;  %v14953_v21 = vld [vmem:[#allocation144_spill] sm:$0xff]  ;;  %5041 = vmatprep.mubr.bf16.mxu1 %v14956_v13 }
 0x449   : > { %14945 = vst [vmem:[#allocation57_spill] sm:$0xff] %v12345_v57  ;;  %v4555_v57 = vadd.f32 %v12030_v5, %v14950_v63  ;;  %v12368_v18 = vadd.f32 %v12033_v30, %v14951_v56  ;;  %v4557_v43 = vadd.f32 %v12030_v5, %v14953_v21  ;;  %v14957_v28 = vld [vmem:[#allocation143_spill] sm:$0xff]  ;;  %v14960_v63 = vld [vmem:[#allocation46_spill] sm:$0xff]  ;;  %v4563_v21 = vadd.f32 %v12030_v5, %v12143_v16 }
 0x44a   : > { %14946 = vst [vmem:[#allocation64_spill] sm:$0xff] %v12353_v32  ;;  %14948 = vst [vmem:[#allocation147_spill] sm:$0xff] %v12361_v24  ;;  %v14954_v32 = vld [vmem:[#allocation141_spill] sm:$0xff]  ;;  %v4559_v24 = vadd.f32 %v12030_v5, %v14957_v28  ;;  %v14958_v36 = vld [vmem:[#allocation39_spill] sm:$0xff]  ;;  %v4561_v56 = vadd.f32 %v12030_v5, %v14960_v63  ;;  %v12393_v13 = vadd.f32 %v12033_v30, %v12147_v42  ;;  %v4635_v63 = vmax.f32 %v12171_v10, 0.0 }
 0x44b   : > { %14952 = vst [vmem:[#allocation63_spill] sm:$0xff] %v12368_v18  ;;  %v12374_v19 = vadd.f32 %v12033_v30, %v14954_v32  ;;  %v12381_v8 = vadd.f32 %v12033_v30, %v14958_v36  ;;  %v12387_v18 = vadd.f32 %v12033_v30, %v12139_v61  ;;  %v4565_v32 = vadd.f32 %v12030_v5, %v12151_v38 }
 0x44c   : > { %14962 = vst [vmem:[#allocation148_spill] sm:$0xff] %v12393_v13  ;;  %v12399_v28 = vadd.f32 %v12033_v30, %v12155_v29  ;;  %v4567_v36 = vadd.f32 %v12030_v5, %v12159_v51  ;;  %v4633_v61 = vmax.f32 %v12163_v34, 0.0  ;;  %v4637_v16 = vmax.f32 %v12179_v54, 0.0 }
 0x44d   : > { %14955 = vst [vmem:[#allocation146_spill] sm:$0xff] %v12374_v19  ;;  %14959 = vst [vmem:[#allocation149_spill] sm:$0xff] %v12381_v8  ;;  %v4641_v42 = vmax.f32 %v12195_v27, 0.0  ;;  %v4643_v13 = vmax.f32 %v12203_v37, 0.0  ;;  %v4645_v38 = vmax.f32 %v12211_v2, 0.0  ;;  %v4647_v30 = vmax.f32 %v12219_v3, 0.0 }
 0x44e   : > { %14961 = vst [vmem:[#allocation11_spill] sm:$0xff] %v12387_v18  ;;  %14963 = vst [vmem:[#allocation150_spill] sm:$0xff] %v12399_v28  ;;  %v4639_v18 = vmax.f32 %v12187_v22, 0.0  ;;  %v4649_v29 = vmax.f32 %v12227_v46, 0.0  ;;  %v4651_v5 = vmax.f32 %v12236_v23, 0.0  ;;  %v4653_v51 = vmax.f32 %v12244_v40, 0.0 }
 0x44f   : > { %v4655_v34 = vmax.f32 %v12253_v35, 0.0  ;;  %v4657_v10 = vmax.f32 %v12261_v25, 0.0  ;;  %v4659_v54 = vmax.f32 %v12269_v50, 0.0  ;;  %v4661_v22 = vmax.f32 %v12277_v53, 0.0  ;;  %v14964_v46 = vld [vmem:[#allocation101_spill] sm:$0xff] }
 0x450   : > { %v4663_v27 = vmax.f32 %v12285_v39, 0.0  ;;  %v4665_v37 = vmax.f32 %v12293_v20, 0.0  ;;  %v4667_v2 = vmax.f32 %v12301_v26, 0.0  ;;  %v4669_v3 = vmax.f32 %v12309_v11, 0.0  ;;  %5042 = vmatmul.mubr.bf16.gmra.mrb[252].mxu1 %v14964_v46 }
 0x451   : > { %v4671_v23 = vmax.f32 %v12317_v49, 0.0  ;;  %v4673_v40 = vmax.f32 %v12325_v59, 0.0  ;;  %v4675_v35 = vmax.f32 %v12333_v12, 0.0  ;;  %v4677_v25 = vmax.f32 %v12341_v7, 0.0 }
 0x452   : > { %v4679_v50 = vmax.f32 %v12349_v52, 0.0  ;;  %v4681_v53 = vmax.f32 %v12357_v41, 0.0  ;;  %v4683_v39 = vmax.f32 %v4555_v57, 0.0  ;;  %v4685_v20 = vmax.f32 %v4557_v43, 0.0 }
 0x453   : > { %v4687_v28 = vmax.f32 %v4559_v24, 0.0  ;;  %v4689_v26 = vmax.f32 %v4561_v56, 0.0  ;;  %v4691_v8 = vmax.f32 %v4563_v21, 0.0  ;;  %v4693_v11 = vmax.f32 %v4565_v32, 0.0 }
 0x454   : > { %v4695_v19 = vmax.f32 %v4567_v36, 0.0  ;;  %v4729_v46 = vpack.c.bf16 %v4635_v63, %v4633_v61  ;;  %v12429_v31 = vpack.c.bf16 %v4639_v18, %v4637_v16  ;;  %v12431_v49 = vpack.c.bf16 %v4643_v13, %v4641_v42 }
 0x455   : > { %v12433_v59 = vpack.c.bf16 %v4647_v30, %v4645_v38  ;;  %v12435_v12 = vpack.c.bf16 %v4651_v5, %v4649_v29  ;;  %v12437_v7 = vpack.c.bf16 %v4655_v34, %v4653_v51  ;;  %v12439_v52 = vpack.c.bf16 %v4659_v54, %v4657_v10 }
 0x456   : > { %v12441_v57 = vpack.c.bf16 %v4663_v27, %v4661_v22  ;;  %v12443_v41 = vpack.c.bf16 %v4667_v2, %v4665_v37  ;;  %v12445_v24 = vpack.c.bf16 %v4671_v23, %v4669_v3  ;;  %v12447_v43 = vpack.c.bf16 %v4675_v35, %v4673_v40  ;;  %v14967_v22 = vld [vmem:[#allocation52_spill] sm:$0xff]  ;;  %v14970_v23 = vld [vmem:[#allocation57_spill] sm:$0xff] }
 0x457   : > { %v12449_v18 = vpack.c.bf16 %v4679_v50, %v4677_v25  ;;  %v12451_v56 = vpack.c.bf16 %v4683_v39, %v4681_v53  ;;  %v12453_v21 = vpack.c.bf16 %v4687_v28, %v4685_v20  ;;  %v12455_v13 = vpack.c.bf16 %v4691_v8, %v4689_v26  ;;  %v14973_v39 = vld [vmem:[#allocation63_spill] sm:$0xff]  ;;  %v14974_v26 = vld [vmem:[#allocation146_spill] sm:$0xff] }
 0x458   : > { %v12457_v32 = vpack.c.bf16 %v4695_v19, %v4693_v11  ;;  %v4634_v36 = vmax.f32 %v12167_v48, 0.0  ;;  %v4636_v61 = vmax.f32 %v12175_v55, 0.0  ;;  %v4638_v63 = vmax.f32 %v12183_v47, 0.0 }
 0x459   : > { %v4640_v16 = vmax.f32 %v12191_v0, 0.0  ;;  %v4642_v42 = vmax.f32 %v12199_v6, 0.0  ;;  %v4644_v38 = vmax.f32 %v12207_v58, 0.0  ;;  %v4646_v30 = vmax.f32 %v12215_v4, 0.0 }
 0x45a   : > { %v4730_v28 = vpack.c.bf16 %v4636_v61, %v4634_v36  ;;  %v4648_v8 = vmax.f32 %v12223_v62, 0.0  ;;  %v4650_v19 = vmax.f32 %v12231_v9, 0.0  ;;  %v4652_v29 = vmax.f32 %v12240_v1, 0.0 }
 0x45b   : > { %v4732_v48 = vpack.c.bf16 %v4640_v16, %v4638_v63  ;;  %v4734_v5 = vpack.c.bf16 %v4644_v38, %v4642_v42  ;;  %v4654_v55 = vmax.f32 %v12248_v17, 0.0  ;;  %v4656_v47 = vmax.f32 %v12257_v15, 0.0  ;;  %v14965_v17 = vld [vmem:[#allocation145_spill] sm:$0xff]  ;;  %v14966_v15 = vld [vmem:[#allocation40_spill] sm:$0xff]  ;;  %v14976_v63 = vld [vmem:[#allocation11_spill] sm:$0xff] }
 0x45c   : > { %5049 = vmatprep.mubr.bf16.mxu1 %v4730_v28  ;;  %v4736_v0 = vpack.c.bf16 %v4648_v8, %v4646_v30  ;;  %v4738_v6 = vpack.c.bf16 %v4652_v29, %v4650_v19  ;;  %v4658_v58 = vmax.f32 %v12265_v45, 0.0  ;;  %v4660_v4 = vmax.f32 %v12273_v14, 0.0  ;;  %v14968_v45 = vld [vmem:[#allocation58_spill] sm:$0xff]  ;;  %v14969_v14 = vld [vmem:[#allocation51_spill] sm:$0xff]  ;;  %v14977_v42 = vld [vmem:[#allocation148_spill] sm:$0xff] }
 0x45d   : > { %5050 = vmatmul.mubr.bf16.gmra.mrb[0].mxu1 %v4729_v46  ;;  %v4740_v51 = vpack.c.bf16 %v4656_v47, %v4654_v55  ;;  %v4662_v62 = vmax.f32 %v12281_v44, 0.0  ;;  %v4664_v9 = vmax.f32 %v12289_v33, 0.0  ;;  %v4666_v1 = vmax.f32 %v12297_v60, 0.0  ;;  %v14971_v33 = vld [vmem:[#allocation64_spill] sm:$0xff]  ;;  %v14972_v60 = vld [vmem:[#allocation147_spill] sm:$0xff]  ;;  %v14975_v46 = vld [vmem:[#allocation149_spill] sm:$0xff] }
 0x45e   : > { %5057 = vmatprep.mubr.bf16.mxu1 %v4732_v48  ;;  %v4742_v34 = vpack.c.bf16 %v4660_v4, %v4658_v58  ;;  %v4668_v10 = vmax.f32 %v14965_v17, 0.0  ;;  %v4670_v54 = vmax.f32 %v14966_v15, 0.0  ;;  %v4672_v27 = vmax.f32 %v14967_v22, 0.0  ;;  %v14978_v30 = vld [vmem:[#allocation150_spill] sm:$0xff]  ;;  %v14979_v48 = vld [vmem:[#allocation140_spill] sm:$0xff]  ;;  %v14983_v4 = vld [vmem:[#allocation23_spill] sm:$0xff] }
 0x45f   : > { %v4744_v37 = vpack.c.bf16 %v4664_v9, %v4662_v62  ;;  %v4674_v2 = vmax.f32 %v14968_v45, 0.0  ;;  %v4676_v3 = vmax.f32 %v14969_v14, 0.0  ;;  %v4678_v40 = vmax.f32 %v14970_v23, 0.0  ;;  %v14985_v45 = vld [vmem:[#allocation29_spill] sm:$0xff] }
 0x460   : > { %v4746_v44 = vpack.c.bf16 %v4668_v10, %v4666_v1  ;;  %v4748_v35 = vpack.c.bf16 %v4672_v27, %v4670_v54  ;;  %v4680_v25 = vmax.f32 %v14971_v33, 0.0  ;;  %v4682_v50 = vmax.f32 %v14972_v60, 0.0 }
 0x461   : > { %v4750_v53 = vpack.c.bf16 %v4676_v3, %v4674_v2  ;;  %v4684_v20 = vmax.f32 %v14973_v39, 0.0  ;;  %v4686_v11 = vmax.f32 %v14974_v26, 0.0  ;;  %v4688_v36 = vmax.f32 %v14975_v46, 0.0  ;;  %v14987_v39 = vld [vmem:[#allocation38_spill] sm:$0xff] }
 0x462   : > { %v4752_v61 = vpack.c.bf16 %v4680_v25, %v4678_v40  ;;  %v4690_v16 = vmax.f32 %v14976_v63, 0.0  ;;  %v4692_v38 = vmax.f32 %v14977_v42, 0.0  ;;  %v4694_v28 = vmax.f32 %v14978_v30, 0.0  ;;  %v14986_v40 = vld [vmem:[#allocation24_spill] sm:$0xff] }
 0x463   : > { %v4754_v8 = vpack.c.bf16 %v4684_v20, %v4682_v50  ;;  %v4756_v19 = vpack.c.bf16 %v4688_v36, %v4686_v11  ;;  %v14980_v55 = vmax.f32 %v14979_v48, 0.0  ;;  %v14988_v36 = vld [vmem:[#allocation34_spill] sm:$0xff] }
 0x464   : > { %v12490_v29 = vpack.c.bf16 %v4692_v38, %v4690_v16 }
 0x465   : > { %v12494_v47 = vpack.c.bf16 %v14980_v55, %v4694_v28  ;;  %5058 = vmatmul.mubr.bf16.gmra.mrb[4].mxu1 %v12429_v31 }
 0x466   : > { %5065 = vmatprep.mubr.bf16.mxu1 %v4734_v5 }
 0x46d   : > { %5066 = vmatmul.mubr.bf16.gmra.mrb[8].mxu1 %v12431_v49  ;;  %v14981_v49 = vld [vmem:[#allocation19_spill] sm:$0xff] }
 0x46e   : > { %5073 = vmatprep.mubr.bf16.mxu1 %v4736_v0 }
 0x475   : > { %5074 = vmatmul.mubr.bf16.gmra.mrb[12].mxu1 %v12433_v59 }
 0x476   : > { %5081 = vmatprep.mubr.bf16.mxu1 %v4738_v6 }
 0x47d   : > { %5082 = vmatmul.mubr.bf16.gmra.mrb[16].mxu1 %v12435_v12 }
 0x47e   : > { %5089 = vmatprep.mubr.bf16.mxu1 %v4740_v51 }
 0x485   : > { %5090 = vmatmul.mubr.bf16.gmra.mrb[20].mxu1 %v12437_v7 }
 0x486   : > { %5097 = vmatprep.mubr.bf16.mxu1 %v4742_v34  ;;  %v14984_v34 = vld [vmem:[#allocation20_spill] sm:$0xff] }
 0x48d   : > { %5098 = vmatmul.mubr.bf16.gmra.mrb[24].mxu1 %v12439_v52  ;;  %v14982_v52 = vld [vmem:[#allocation18_spill] sm:$0xff] }
 0x48e   : > { %5105 = vmatprep.mubr.bf16.mxu1 %v4744_v37 }
 0x495   : > { %5106 = vmatmul.mubr.bf16.gmra.mrb[28].mxu1 %v12441_v57 }
 0x496   : > { %5113 = vmatprep.mubr.bf16.mxu1 %v4746_v44 }
 0x49d   : > { %5114 = vmatmul.mubr.bf16.gmra.mrb[32].mxu1 %v12443_v41 }
 0x49e   : > { %5121 = vmatprep.mubr.bf16.mxu1 %v4748_v35 }
 0x4a5   : > { %5122 = vmatmul.mubr.bf16.gmra.mrb[36].mxu1 %v12445_v24 }
 0x4a6   : > { %5129 = vmatprep.mubr.bf16.mxu1 %v4750_v53 }
 0x4a9   : > { %v12505_v31 = vpop.f32.mrb[192].mxu1 }
 0x4aa   : > { %v5178_v59 = vmul.f32 %v14981_v49, %v12505_v31  ;;  %v4925_v12 = vpop.f32.mrb[193].mxu1 }
 0x4ab   : > { %v12510_v7 = vpop.f32.mrb[194].mxu1 }
 0x4ac   : > { %v5179_v57 = vmul.f32 %v14982_v52, %v12510_v7  ;;  %v4928_v5 = vpop.f32.mrb[195].mxu1  ;;  %v5318_v41 = vmul.f32 %v5178_v59, %v12505_v31 }
 0x4ad   : > { %5130 = vmatmul.mubr.bf16.gmra.mrb[40].mxu1 %v12447_v43 }
 0x4ae   : > { %5137 = vmatprep.mubr.bf16.mxu1 %v4752_v61  ;;  %v5242_v0 = vadd.f32 %v5179_v57, %v5178_v59  ;;  %v5319_v24 = vmul.f32 %v5179_v57, %v12510_v7  ;;  %v14990_v59 = vld [vmem:[#allocation31_spill] sm:$0xff] }
 0x4b0   : > { %v5382_v6 = vadd.f32 %v5319_v24, %v5318_v41 }
 0x4b1   : > { %v12516_v58 = vpop.f32.mrb[196].mxu1 }
 0x4b2   : > { %v5180_v51 = vmul.f32 %v14983_v4, %v12516_v58  ;;  %v4933_v62 = vpop.f32.mrb[197].mxu1 }
 0x4b3   : > { %v12521_v43 = vpop.f32.mrb[198].mxu1 }
 0x4b4   : > { %v5243_v9 = vadd.f32 %v5242_v0, %v5180_v51  ;;  %v5320_v1 = vmul.f32 %v5180_v51, %v12516_v58  ;;  %v5181_v17 = vmul.f32 %v14984_v34, %v12521_v43  ;;  %v4936_v10 = vpop.f32.mrb[199].mxu1 }
 0x4b5   : > { %5138 = vmatmul.mubr.bf16.gmra.mrb[44].mxu1 %v12449_v18 }
 0x4b6   : > { %5145 = vmatprep.mubr.bf16.mxu1 %v4754_v8  ;;  %v5383_v15 = vadd.f32 %v5382_v6, %v5320_v1  ;;  %v5244_v54 = vadd.f32 %v5243_v9, %v5181_v17  ;;  %v5321_v22 = vmul.f32 %v5181_v17, %v12521_v43  ;;  %v14992_v17 = vld [vmem:[#allocation44_spill] sm:$0xff] }
 0x4b8   : > { %v5384_v27 = vadd.f32 %v5383_v15, %v5321_v22 }
 0x4b9   : > { %v12527_v37 = vpop.f32.mrb[200].mxu1 }
 0x4ba   : > { %v5182_v18 = vmul.f32 %v14985_v45, %v12527_v37  ;;  %v4941_v2 = vpop.f32.mrb[201].mxu1 }
 0x4bb   : > { %v12532_v14 = vpop.f32.mrb[202].mxu1 }
 0x4bc   : > { %v5245_v3 = vadd.f32 %v5244_v54, %v5182_v18  ;;  %v5322_v23 = vmul.f32 %v5182_v18, %v12527_v37  ;;  %v5183_v44 = vmul.f32 %v14986_v40, %v12532_v14  ;;  %v4944_v35 = vpop.f32.mrb[203].mxu1 }
 0x4bd   : > { %5146 = vmatmul.mubr.bf16.gmra.mrb[48].mxu1 %v12451_v56 }
 0x4be   : > { %5153 = vmatprep.mubr.bf16.mxu1 %v4756_v19  ;;  %v5385_v33 = vadd.f32 %v5384_v27, %v5322_v23  ;;  %v5246_v25 = vadd.f32 %v5245_v3, %v5183_v44  ;;  %v5323_v60 = vmul.f32 %v5183_v44, %v12532_v14  ;;  %v14993_v3 = vld [vmem:[#allocation43_spill] sm:$0xff] }
 0x4c0   : > { %v5386_v50 = vadd.f32 %v5385_v33, %v5323_v60 }
 0x4c1   : > { %v12538_v53 = vpop.f32.mrb[204].mxu1 }
 0x4c2   : > { %v5184_v56 = vmul.f32 %v14987_v39, %v12538_v53  ;;  %v4949_v20 = vpop.f32.mrb[205].mxu1 }
 0x4c3   : > { %v12543_v26 = vpop.f32.mrb[206].mxu1 }
 0x4c4   : > { %v5247_v11 = vadd.f32 %v5246_v25, %v5184_v56  ;;  %v5324_v46 = vmul.f32 %v5184_v56, %v12538_v53  ;;  %v5185_v61 = vmul.f32 %v14988_v36, %v12543_v26  ;;  %v4952_v63 = vpop.f32.mrb[207].mxu1  ;;  %v14994_v25 = vld [vmem:[#allocation37_spill] sm:$0xff] }
 0x4c5   : > { %5154 = vmatmul.mubr.bf16.gmra.mrb[52].mxu1 %v12453_v21  ;;  %v14989_v21 = vld [vmem:[#allocation32_spill] sm:$0xff]  ;;  %v14995_v63 = vld [vmem:[#allocation62_spill] sm:$0xff] }
 0x4c6   : > { %5161 = vmatprep.mubr.bf16.mxu1 %v12490_v29  ;;  %v5387_v16 = vadd.f32 %v5386_v50, %v5324_v46  ;;  %v5248_v42 = vadd.f32 %v5247_v11, %v5185_v61  ;;  %v5325_v38 = vmul.f32 %v5185_v61, %v12543_v26 }
 0x4c8   : > { %v5388_v30 = vadd.f32 %v5387_v16, %v5325_v38 }
 0x4c9   : > { %v12550_v28 = vpop.f32.mrb[208].mxu1 }
 0x4ca   : > { %v5186_v8 = vmul.f32 %v14989_v21, %v12550_v28  ;;  %v4957_v19 = vpop.f32.mrb[209].mxu1 }
 0x4cb   : > { %v12555_v29 = vpop.f32.mrb[210].mxu1  ;;  %v14996_v19 = vld [vmem:[#allocation56_spill] sm:$0xff] }
 0x4cc   : > { %v5249_v48 = vadd.f32 %v5248_v42, %v5186_v8  ;;  %v5326_v55 = vmul.f32 %v5186_v8, %v12550_v28  ;;  %v5187_v12 = vmul.f32 %v14990_v59, %v12555_v29  ;;  %v4960_v57 = vpop.f32.mrb[211].mxu1 }
 0x4cd   : > { %5162 = vmatmul.mubr.bf16.gmra.mrb[56].mxu1 %v12455_v13  ;;  %v14991_v13 = vld [vmem:[#allocation50_spill] sm:$0xff] }
 0x4ce   : > { %5169 = vmatprep.mubr.bf16.mxu1 %v12494_v47  ;;  %v5389_v5 = vadd.f32 %v5388_v30, %v5326_v55  ;;  %v5250_v41 = vadd.f32 %v5249_v48, %v5187_v12  ;;  %v5327_v0 = vmul.f32 %v5187_v12, %v12555_v29 }
 0x4d0   : > { %v5390_v24 = vadd.f32 %v5389_v5, %v5327_v0 }
 0x4d1   : > { %v12562_v6 = vpop.f32.mrb[212].mxu1 }
 0x4d2   : > { %v5188_v51 = vmul.f32 %v14991_v13, %v12562_v6  ;;  %v4965_v62 = vpop.f32.mrb[213].mxu1  ;;  %v15016_v13 = vld [vmem:[#allocation28_spill] sm:$0xff] }
 0x4d3   : > { %v12567_v47 = vpop.f32.mrb[214].mxu1 }
 0x4d4   : > { %v5251_v9 = vadd.f32 %v5250_v41, %v5188_v51  ;;  %v5328_v1 = vmul.f32 %v5188_v51, %v12562_v6  ;;  %v5189_v10 = vmul.f32 %v14992_v17, %v12567_v47  ;;  %v4968_v15 = vpop.f32.mrb[215].mxu1 }
 0x4d5   : > { %5170 = vmatmul.mubr.bf16.gmra.mrb[60].mxu1 %v12457_v32  ;;  %v14998_v15 = vld [vmem:[#allocation49_spill] sm:$0xff] }
 0x4d6   : > { %v5391_v54 = vadd.f32 %v5390_v24, %v5328_v1  ;;  %v5252_v22 = vadd.f32 %v5251_v9, %v5189_v10  ;;  %v5329_v27 = vmul.f32 %v5189_v10, %v12567_v47  ;;  %v14997_v24 = vld [vmem:[#allocation55_spill] sm:$0xff] }
 0x4d8   : > { %v5392_v18 = vadd.f32 %v5391_v54, %v5329_v27 }
 0x4d9   : > { %v12573_v2 = vpop.f32.mrb[216].mxu1 }
 0x4da   : > { %v5190_v23 = vmul.f32 %v14993_v3, %v12573_v2  ;;  %v4973_v32 = vpop.f32.mrb[217].mxu1 }
 0x4db   : > { %v12577_v44 = vpop.f32.mrb[218].mxu1 }
 0x4dc   : > { %v5253_v35 = vadd.f32 %v5252_v22, %v5190_v23  ;;  %v5330_v33 = vmul.f32 %v5190_v23, %v12573_v2  ;;  %v5191_v60 = vmul.f32 %v14994_v25, %v12577_v44  ;;  %v4976_v50 = vpop.f32.mrb[219].mxu1 }
 0x4de   : > { %v5393_v56 = vadd.f32 %v5392_v18, %v5330_v33  ;;  %v5254_v20 = vadd.f32 %v5253_v35, %v5191_v60  ;;  %v5331_v11 = vmul.f32 %v5191_v60, %v12577_v44  ;;  %v14999_v33 = vld [vmem:[#allocation74_spill] sm:$0xff] }
 0x4e0   : > { %v5394_v46 = vadd.f32 %v5393_v56, %v5331_v11 }
 0x4e1   : > { %v12583_v61 = vpop.f32.mrb[220].mxu1 }
 0x4e2   : > { %v5192_v16 = vmul.f32 %v14995_v63, %v12583_v61  ;;  %v4981_v42 = vpop.f32.mrb[221].mxu1 }
 0x4e3   : > { %v12587_v38 = vpop.f32.mrb[222].mxu1 }
 0x4e4   : > { %v5255_v30 = vadd.f32 %v5254_v20, %v5192_v16  ;;  %v5332_v8 = vmul.f32 %v5192_v16, %v12583_v61  ;;  %v5193_v48 = vmul.f32 %v14996_v19, %v12587_v38  ;;  %v4984_v55 = vpop.f32.mrb[223].mxu1 }
 0x4e6   : > { %v5395_v12 = vadd.f32 %v5394_v46, %v5332_v8  ;;  %v5256_v57 = vadd.f32 %v5255_v30, %v5193_v48  ;;  %v5333_v5 = vmul.f32 %v5193_v48, %v12587_v38  ;;  %v15000_v46 = vld [vmem:[#allocation69_spill] sm:$0xff] }
 0x4e8   : > { %v5396_v41 = vadd.f32 %v5395_v12, %v5333_v5 }
 0x4e9   : > { %v12593_v0 = vpop.f32.mrb[224].mxu1 }
 0x4ea   : > { %v5194_v51 = vmul.f32 %v14997_v24, %v12593_v0  ;;  %v4989_v62 = vpop.f32.mrb[225].mxu1  ;;  %v15012_v24 = vld [vmem:[#allocation98_spill] sm:$0xff] }
 0x4eb   : > { %v12597_v9 = vpop.f32.mrb[226].mxu1 }
 0x4ec   : > { %v5257_v1 = vadd.f32 %v5256_v57, %v5194_v51  ;;  %v5334_v10 = vmul.f32 %v5194_v51, %v12593_v0  ;;  %v5195_v54 = vmul.f32 %v14998_v15, %v12597_v9  ;;  %v4992_v22 = vpop.f32.mrb[227].mxu1  ;;  %v15001_v57 = vld [vmem:[#allocation68_spill] sm:$0xff] }
 0x4ee   : > { %v5397_v27 = vadd.f32 %v5396_v41, %v5334_v10  ;;  %v5258_v18 = vadd.f32 %v5257_v1, %v5195_v54  ;;  %v5335_v23 = vmul.f32 %v5195_v54, %v12597_v9  ;;  %v15002_v10 = vld [vmem:[#allocation61_spill] sm:$0xff] }
 0x4f0   : > { %v5398_v32 = vadd.f32 %v5397_v27, %v5335_v23 }
 0x4f1   : > { %v12603_v35 = vpop.f32.mrb[228].mxu1 }
 0x4f2   : > { %v5196_v60 = vmul.f32 %v14999_v33, %v12603_v35  ;;  %v4997_v50 = vpop.f32.mrb[229].mxu1  ;;  %v15010_v33 = vld [vmem:[#allocation85_spill] sm:$0xff] }
 0x4f3   : > { %v12607_v56 = vpop.f32.mrb[230].mxu1  ;;  %v15003_v50 = vld [vmem:[#allocation86_spill] sm:$0xff] }
 0x4f4   : > { %v5259_v20 = vadd.f32 %v5258_v18, %v5196_v60  ;;  %v5336_v11 = vmul.f32 %v5196_v60, %v12603_v35  ;;  %v5197_v16 = vmul.f32 %v15000_v46, %v12607_v56  ;;  %v5000_v42 = vpop.f32.mrb[231].mxu1 }
 0x4f6   : > { %v5399_v30 = vadd.f32 %v5398_v32, %v5336_v11  ;;  %v5260_v8 = vadd.f32 %v5259_v20, %v5197_v16  ;;  %v5337_v48 = vmul.f32 %v5197_v16, %v12607_v56 }
 0x4f8   : > { %v5400_v55 = vadd.f32 %v5399_v30, %v5337_v48 }
 0x4f9   : > { %v12613_v12 = vpop.f32.mrb[232].mxu1 }
 0x4fa   : > { %v5198_v5 = vmul.f32 %v15001_v57, %v12613_v12  ;;  %v5005_v41 = vpop.f32.mrb[233].mxu1  ;;  %v15008_v57 = vld [vmem:[#allocation93_spill] sm:$0xff] }
 0x4fb   : > { %v12617_v51 = vpop.f32.mrb[234].mxu1 }
 0x4fc   : > { %v5261_v62 = vadd.f32 %v5260_v8, %v5198_v5  ;;  %v5338_v1 = vmul.f32 %v5198_v5, %v12613_v12  ;;  %v5199_v54 = vmul.f32 %v15002_v10, %v12617_v51  ;;  %v5008_v22 = vpop.f32.mrb[235].mxu1  ;;  %v15004_v8 = vld [vmem:[#allocation81_spill] sm:$0xff] }
 0x4fd   : > { %v15005_v22 = vld [vmem:[#allocation80_spill] sm:$0xff] }
 0x4fe   : > { %v5401_v27 = vadd.f32 %v5400_v55, %v5338_v1  ;;  %v5262_v18 = vadd.f32 %v5261_v62, %v5199_v54  ;;  %v5339_v23 = vmul.f32 %v5199_v54, %v12617_v51 }
 0x500   : > { %v5402_v32 = vadd.f32 %v5401_v27, %v5339_v23 }
 0x501   : > { %v12623_v60 = vpop.f32.mrb[236].mxu1 }
 0x502   : > { %v5200_v20 = vmul.f32 %v15003_v50, %v12623_v60  ;;  %v5013_v11 = vpop.f32.mrb[237].mxu1  ;;  %v15006_v50 = vld [vmem:[#allocation73_spill] sm:$0xff] }
 0x503   : > { %v12627_v16 = vpop.f32.mrb[238].mxu1 }
 0x504   : > { %v5263_v42 = vadd.f32 %v5262_v18, %v5200_v20  ;;  %v5340_v30 = vmul.f32 %v5200_v20, %v12623_v60  ;;  %v5201_v48 = vmul.f32 %v15004_v8, %v12627_v16  ;;  %v5016_v5 = vpop.f32.mrb[239].mxu1 }
 0x506   : > { %v5403_v55 = vadd.f32 %v5402_v32, %v5340_v30  ;;  %v5264_v41 = vadd.f32 %v5263_v42, %v5201_v48  ;;  %v5341_v62 = vmul.f32 %v5201_v48, %v12627_v16 }
 0x508   : > { %v5404_v1 = vadd.f32 %v5403_v55, %v5341_v62  ;;  %v15007_v62 = vld [vmem:[#allocation97_spill] sm:$0xff] }
 0x509   : > { %v12633_v54 = vpop.f32.mrb[240].mxu1 }
 0x50a   : > { %v5202_v27 = vmul.f32 %v15005_v22, %v12633_v54  ;;  %v5021_v23 = vpop.f32.mrb[241].mxu1 }
 0x50b   : > { %v12637_v11 = vpop.f32.mrb[242].mxu1 }
 0x50c   : > { %v5265_v18 = vadd.f32 %v5264_v41, %v5202_v27  ;;  %v5342_v20 = vmul.f32 %v5202_v27, %v12633_v54  ;;  %v5203_v8 = vmul.f32 %v15006_v50, %v12637_v11  ;;  %v5024_v5 = vpop.f32.mrb[243].mxu1 }
 0x50e   : > { %v5405_v32 = vadd.f32 %v5404_v1, %v5342_v20  ;;  %v5266_v42 = vadd.f32 %v5265_v18, %v5203_v8  ;;  %v5343_v30 = vmul.f32 %v5203_v8, %v12637_v11 }
 0x510   : > { %v5406_v48 = vadd.f32 %v5405_v32, %v5343_v30  ;;  %v15009_v30 = vld [vmem:[#allocation92_spill] sm:$0xff] }
 0x511   : > { %v12643_v55 = vpop.f32.mrb[244].mxu1 }
 0x512   : > { %v5204_v22 = vmul.f32 %v15007_v62, %v12643_v55  ;;  %v5029_v23 = vpop.f32.mrb[245].mxu1 }
 0x513   : > { %v12647_v10 = vpop.f32.mrb[246].mxu1 }
 0x514   : > { %v5267_v41 = vadd.f32 %v5266_v42, %v5204_v22  ;;  %v5344_v27 = vmul.f32 %v5204_v22, %v12643_v55  ;;  %v5205_v50 = vmul.f32 %v15008_v57, %v12647_v10  ;;  %v5032_v5 = vpop.f32.mrb[247].mxu1 }
 0x516   : > { %v5407_v1 = vadd.f32 %v5406_v48, %v5344_v27  ;;  %v5268_v18 = vadd.f32 %v5267_v41, %v5205_v50  ;;  %v5345_v8 = vmul.f32 %v5205_v50, %v12647_v10 }
 0x518   : > { %v5408_v20 = vadd.f32 %v5407_v1, %v5345_v8  ;;  %v15011_v8 = vld [vmem:[#allocation105_spill] sm:$0xff] }
 0x51a   : > { %v12653_v32 = vpop.f32.mrb[248].mxu1 }
 0x51b   : > { %v5206_v62 = vmul.f32 %v15009_v30, %v12653_v32  ;;  %v5037_v23 = vpop.f32.mrb[249].mxu1 }
 0x51c   : > { %v12657_v46 = vpop.f32.mrb[250].mxu1 }
 0x51d   : > { %v5269_v42 = vadd.f32 %v5268_v18, %v5206_v62  ;;  %v5346_v22 = vmul.f32 %v5206_v62, %v12653_v32  ;;  %v5207_v57 = vmul.f32 %v15010_v33, %v12657_v46  ;;  %v5040_v5 = vpop.f32.mrb[251].mxu1 }
 0x51f   : > { %v5409_v48 = vadd.f32 %v5408_v20, %v5346_v22  ;;  %v5270_v41 = vadd.f32 %v5269_v42, %v5207_v57  ;;  %v5347_v50 = vmul.f32 %v5207_v57, %v12657_v46 }
 0x521   : > { %v5410_v27 = vadd.f32 %v5409_v48, %v5347_v50 }
 0x523   : > { %v12663_v1 = vpop.f32.mrb[252].mxu1 }
 0x524   : > { %v5208_v30 = vmul.f32 %v15011_v8, %v12663_v1  ;;  %v5045_v23 = vpop.f32.mrb[253].mxu1 }
 0x525   : > { %v12667_v15 = vpop.f32.mrb[254].mxu1 }
 0x526   : > { %v5271_v18 = vadd.f32 %v5270_v41, %v5208_v30  ;;  %v5348_v62 = vmul.f32 %v5208_v30, %v12663_v1  ;;  %v5209_v33 = vmul.f32 %v15012_v24, %v12667_v15  ;;  %v5048_v5 = vpop.f32.mrb[255].mxu1  ;;  %v15013_v30 = vld [vmem:[#allocation22_spill] sm:$0xff] }
 0x528   : > { %v5411_v20 = vadd.f32 %v5410_v27, %v5348_v62  ;;  %v5272_v42 = vadd.f32 %v5271_v18, %v5209_v33  ;;  %v5349_v57 = vmul.f32 %v5209_v33, %v12667_v15  ;;  %v15014_v33 = vld [vmem:[#allocation21_spill] sm:$0xff] }
 0x52a   : > { %v5273_v22 = vrot.slane %v5272_v42, 4  ;;  %v5412_v48 = vadd.f32 %v5411_v20, %v5349_v57 }
 0x52c   : > { %v5274_v50 = vadd.f32 %v5273_v22, %v5272_v42  ;;  %v5413_v19 = vrot.slane %v5412_v48, 4  ;;  %v15015_v22 = vld [vmem:[#allocation33_spill] sm:$0xff] }
 0x52e   : > { %v5275_v63 = vrot.slane %v5274_v50, 2  ;;  %v5414_v8 = vadd.f32 %v5413_v19, %v5412_v48 }
 0x530   : > { %v5276_v23 = vadd.f32 %v5275_v63, %v5274_v50  ;;  %v5415_v25 = vrot.slane %v5414_v8, 2  ;;  %v12673_v3 = vpop.f32.mrb[0].mxu1 }
 0x531   : > { %v5210_v41 = vmul.f32 %v15013_v30, %v12673_v3  ;;  %v5053_v17 = vpop.f32.mrb[1].mxu1 }
 0x532   : > { %v5277_v24 = vrot.slane %v5276_v23, 1  ;;  %v5416_v5 = vadd.f32 %v5415_v25, %v5414_v8  ;;  %v12677_v27 = vpop.f32.mrb[2].mxu1 }
 0x533   : > { %v5211_v18 = vmul.f32 %v15014_v33, %v12677_v27  ;;  %v5056_v62 = vpop.f32.mrb[3].mxu1  ;;  %v5350_v19 = vmul.f32 %v5210_v41, %v12673_v3 }
 0x534   : > { %v5278_v20 = vadd.f32 %v5277_v24, %v5276_v23  ;;  %v5417_v42 = vrot.slane %v5416_v5, 1 }
 0x535   : > { %v5279_v63 = vadd.f32 %v5211_v18, %v5210_v41  ;;  %v5351_v57 = vmul.f32 %v5211_v18, %v12677_v27  ;;  %v15017_v18 = vld [vmem:[#allocation25_spill] sm:$0xff] }
 0x536   : > { %v5316_v48 = vmul.f32 %v5278_v20, %v15015_v22  ;;  %v5418_v50 = vadd.f32 %v5417_v42, %v5416_v5 }
 0x537   : > { %v5419_v30 = vadd.f32 %v5351_v57, %v5350_v19 }
 0x538   : > { %v5456_v17 = vmul.f32 %v5418_v50, %v15015_v22  ;;  %v5458_v25 = vmul.f32 %v5316_v48, %v5316_v48  ;;  %v12685_v8 = vpop.f32.mrb[4].mxu1 }
 0x539   : > { %v5212_v33 = vmul.f32 %v15016_v13, %v12685_v8  ;;  %v5061_v62 = vpop.f32.mrb[5].mxu1 }
 0x53a   : > { %v5460_v24 = vsub.f32 %v5456_v17, %v5458_v25  ;;  %v12689_v23 = vpop.f32.mrb[6].mxu1  ;;  %v15018_v17 = vld [vmem:[#allocation36_spill] sm:$0xff] }
 0x53b   : > { %v5280_v59 = vadd.f32 %v5279_v63, %v5212_v33  ;;  %v5352_v41 = vmul.f32 %v5212_v33, %v12685_v8  ;;  %v5213_v20 = vmul.f32 %v15017_v18, %v12689_v23  ;;  %v5064_v5 = vpop.f32.mrb[7].mxu1 }
 0x53c   : > { %v5462_v42 = vmax.f32 %v5460_v24, 0.0  ;;  %v15019_v24 = vld [vmem:[#allocation35_spill] sm:$0xff] }
 0x53d   : > { %v5420_v19 = vadd.f32 %v5419_v30, %v5352_v41  ;;  %v5281_v57 = vadd.f32 %v5280_v59, %v5213_v20  ;;  %v5353_v50 = vmul.f32 %v5213_v20, %v12689_v23 }
 0x53e   : > { %v5465_v22 = vadd.f32 1e-05, %v5462_v42  ;;  %v12708_v42 = vld [vmem:[%s13874_s7] sm:$0x1] }
 0x53f   : > { %v5421_v21 = vadd.f32 %v5420_v19, %v5353_v50 }
 0x540   : > { %7753 = vrsqrt.f32 %v5465_v22  ;;  %v12695_v13 = vpop.f32.mrb[8].mxu1 }
 0x541   : > { %v5214_v25 = vmul.f32 %v15018_v17, %v12695_v13  ;;  %v5069_v63 = vpop.f32.mrb[9].mxu1 }
 0x542   : > { %v12699_v62 = vpop.f32.mrb[10].mxu1 }
 0x543   : > { %v5282_v33 = vadd.f32 %v5281_v57, %v5214_v25  ;;  %v5354_v18 = vmul.f32 %v5214_v25, %v12695_v13  ;;  %v5215_v30 = vmul.f32 %v15019_v24, %v12699_v62  ;;  %v5072_v59 = vpop.f32.mrb[11].mxu1  ;;  %v15020_v57 = vld [vmem:[#allocation42_spill] sm:$0xff] }
 0x545   : > { %v5422_v41 = vadd.f32 %v5421_v21, %v5354_v18  ;;  %v5283_v20 = vadd.f32 %v5282_v33, %v5215_v30  ;;  %v5355_v5 = vmul.f32 %v5215_v30, %v12699_v62  ;;  %v15021_v30 = vld [vmem:[#allocation41_spill] sm:$0xff] }
 0x547   : > { %v5423_v22 = vadd.f32 %v5422_v41, %v5355_v5  ;;  %v12723_v5 = vld [vmem:[%s13875_s8] sm:$0x1] }
 0x548   : > { %v12710_v19 = vpop.f32.mrb[12].mxu1 }
 0x549   : > { %v5216_v50 = vmul.f32 %v15020_v57, %v12710_v19  ;;  %v5077_v25 = vpop.f32.mrb[13].mxu1  ;;  %v15022_v57 = vld [vmem:[#allocation16_spill] sm:$0xff] }
 0x54a   : > { %v7754_v63 = vpop.eup %7753  ;;  %v12714_v17 = vpop.f32.mrb[14].mxu1 }
 0x54b   : > { %v5469_v21 = vmul.f32 %v7754_v63, %v12708_v42  ;;  %v5284_v18 = vadd.f32 %v5283_v20, %v5216_v50  ;;  %v5356_v33 = vmul.f32 %v5216_v50, %v12710_v19  ;;  %v5217_v59 = vmul.f32 %v15021_v30, %v12714_v17  ;;  %v5080_v41 = vpop.f32.mrb[15].mxu1 }
 0x54d   : > { %v5472_v24 = vmul.f32 %v5469_v21, %v5316_v48  ;;  %v5481_v25 = vrot.slane %v5469_v21, %v15022_v57  ;;  %v5424_v36 = vadd.f32 %v5423_v22, %v5356_v33  ;;  %v5285_v39 = vadd.f32 %v5284_v18, %v5217_v59 }
 0x54e   : > { %v5357_v40 = vmul.f32 %v5217_v59, %v12714_v17 }
 0x54f   : > { %v5474_v20 = vsub.f32 %v12723_v5, %v5472_v24  ;;  %v12729_v50 = vmul.f32 %v5481_v25, %v12667_v15  ;;  %v5488_v63 = vmul.f32 %v5481_v25, %v12505_v31  ;;  %v5489_v41 = vmul.f32 %v5481_v25, %v12510_v7 }
 0x550   : > { %v5490_v30 = vmul.f32 %v5481_v25, %v12516_v58  ;;  %v5491_v45 = vmul.f32 %v5481_v25, %v12521_v43  ;;  %v5492_v48 = vmul.f32 %v5481_v25, %v12527_v37  ;;  %v5493_v22 = vmul.f32 %v5481_v25, %v12532_v14  ;;  %v12737_v21 = vpop.f32.mrb[16].mxu1 }
 0x551   : > { %15023 = vst [vmem:[#allocation15_spill] sm:$0xff] %v12737_v21  ;;  %v12740_v18 = vrot.slane %v5474_v20, %v15022_v57  ;;  %v5494_v15 = vmul.f32 %v5481_v25, %v12538_v53  ;;  %v5495_v24 = vmul.f32 %v5481_v25, %v12543_v26  ;;  %v12745_v31 = vmul.f32 %v5481_v25, %v12550_v28  ;;  %v5085_v7 = vpop.f32.mrb[17].mxu1  ;;  %v15025_v20 = vld [vmem:[#allocation48_spill] sm:$0xff] }
 0x552   : > { %v12748_v58 = vmul.f32 %v5481_v25, %v12555_v29  ;;  %v12751_v43 = vmul.f32 %v5481_v25, %v12562_v6  ;;  %v12754_v37 = vmul.f32 %v5481_v25, %v12567_v47  ;;  %v12757_v14 = vmul.f32 %v5481_v25, %v12573_v2  ;;  %v12759_v33 = vpop.f32.mrb[18].mxu1  ;;  %v15026_v7 = vld [vmem:[#allocation47_spill] sm:$0xff] }
 0x553   : > { %15024 = vst [vmem:[#allocation124_spill] sm:$0xff] %v12759_v33  ;;  %v12762_v53 = vmul.f32 %v5481_v25, %v12577_v44  ;;  %v12765_v26 = vmul.f32 %v5481_v25, %v12583_v61  ;;  %v12768_v28 = vmul.f32 %v5481_v25, %v12587_v38  ;;  %v12771_v29 = vmul.f32 %v5481_v25, %v12593_v0  ;;  %v5088_v6 = vpop.f32.mrb[19].mxu1 }
 0x554   : > { %v12774_v47 = vmul.f32 %v5481_v25, %v12597_v9  ;;  %v12777_v2 = vmul.f32 %v5481_v25, %v12603_v35  ;;  %v12780_v59 = vmul.f32 %v5481_v25, %v12607_v56  ;;  %v12783_v44 = vmul.f32 %v5481_v25, %v12613_v12 }
 0x555   : > { %v12786_v61 = vmul.f32 %v5481_v25, %v12617_v51  ;;  %v12789_v38 = vmul.f32 %v5481_v25, %v12623_v60  ;;  %v12792_v0 = vmul.f32 %v5481_v25, %v12627_v16  ;;  %v12795_v9 = vmul.f32 %v5481_v25, %v12633_v54 }
 0x556   : > { %v12798_v35 = vmul.f32 %v5481_v25, %v12637_v11  ;;  %v12801_v56 = vmul.f32 %v5481_v25, %v12643_v55  ;;  %v12804_v12 = vmul.f32 %v5481_v25, %v12647_v10  ;;  %v12807_v51 = vmul.f32 %v5481_v25, %v12653_v32 }
 0x557   : > { %v12810_v60 = vmul.f32 %v5481_v25, %v12657_v46  ;;  %v12813_v16 = vmul.f32 %v5481_v25, %v12663_v1  ;;  %v5425_v54 = vadd.f32 %v5424_v36, %v5357_v40  ;;  %v5218_v11 = vmul.f32 %v15025_v20, %v12737_v21  ;;  %v15027_v1 = vld [vmem:[#allocation54_spill] sm:$0xff] }
 0x558   : > { %v5219_v55 = vmul.f32 %v15026_v7, %v12759_v33  ;;  %v12819_v6 = vpop.f32.mrb[20].mxu1  ;;  %v5565_v10 = vadd.f32 %v12740_v18, %v5489_v41  ;;  %v5564_v32 = vadd.f32 %v12740_v18, %v5488_v63  ;;  %v5566_v34 = vadd.f32 %v12740_v18, %v5490_v30  ;;  %v15029_v30 = vld [vmem:[#allocation53_spill] sm:$0xff] }
 0x559   : > { %v5286_v46 = vadd.f32 %v5285_v39, %v5218_v11  ;;  %v5358_v4 = vmul.f32 %v5218_v11, %v12737_v21  ;;  %v5220_v40 = vmul.f32 %v15027_v1, %v12819_v6  ;;  %v5093_v36 = vpop.f32.mrb[21].mxu1  ;;  %v5567_v25 = vadd.f32 %v12740_v18, %v5491_v45 }
 0x55a   : > { %v5359_v20 = vmul.f32 %v5219_v55, %v12759_v33  ;;  %v12829_v7 = vpop.f32.mrb[22].mxu1  ;;  %v12831_v49 = vmax.f32 %v5565_v10, 0.0  ;;  %v12833_v41 = vmax.f32 %v5564_v32, 0.0  ;;  %v12842_v1 = vmax.f32 %v5566_v34, 0.0 }
 0x55b   : > { %v5426_v63 = vadd.f32 %v5425_v54, %v5358_v4  ;;  %v5287_v52 = vadd.f32 %v5286_v46, %v5219_v55  ;;  %v5360_v39 = vmul.f32 %v5220_v40, %v12819_v6  ;;  %v5221_v11 = vmul.f32 %v15029_v30, %v12829_v7  ;;  %v5096_v21 = vpop.f32.mrb[23].mxu1 }
 0x55c   : > { %15028 = vst [vmem:[#allocation17_spill] sm:$0xff] %v12831_v49  ;;  %v5693_v36 = vmul.f32 %v12831_v49, %v12831_v49  ;;  %v5692_v45 = vmul.f32 %v12833_v41, %v12833_v41  ;;  %v5568_v4 = vadd.f32 %v12740_v18, %v5492_v48  ;;  %v5569_v54 = vadd.f32 %v12740_v18, %v5493_v22 }
 0x55d   : > { %v5427_v10 = vadd.f32 %v5426_v63, %v5359_v20  ;;  %v5288_v33 = vadd.f32 %v5287_v52, %v5220_v40  ;;  %v5361_v32 = vmul.f32 %v5221_v11, %v12829_v7  ;;  %v5570_v21 = vadd.f32 %v12740_v18, %v5494_v15 }
 0x55e   : > { %5758 = vadd.xlane.f32.xlu1 %v5693_v36  ;;  %5756 = vadd.xlane.f32.xlu0 %v5692_v45  ;;  %v5571_v30 = vadd.f32 %v12740_v18, %v5495_v24  ;;  %v5694_v34 = vmul.f32 %v12842_v1, %v12842_v1  ;;  %v12853_v52 = vmax.f32 %v5567_v25, 0.0  ;;  %v12857_v48 = vadd.f32 %v12740_v18, %v12745_v31 }
 0x55f   : > { %v5428_v55 = vadd.f32 %v5427_v10, %v5360_v39  ;;  %v5289_v46 = vadd.f32 %v5288_v33, %v5221_v11  ;;  %v12861_v22 = vadd.f32 %v12740_v18, %v12748_v58  ;;  %v15030_v33 = vld [vmem:[#allocation60_spill] sm:$0xff]  ;;  %v15031_v39 = vld [vmem:[#allocation59_spill] sm:$0xff]  ;;  %v12872_v58 = vmax.f32 %v5568_v4, 0.0 }
 0x560   : > { %v12849_v49 = vpop.f32.mrb[24].mxu1  ;;  %v5695_v36 = vmul.f32 %v12853_v52, %v12853_v52  ;;  %v12876_v45 = vadd.f32 %v12740_v18, %v12751_v43  ;;  %v12880_v10 = vadd.f32 %v12740_v18, %v12754_v37  ;;  %v12889_v4 = vadd.f32 %v12740_v18, %v12762_v53 }
 0x561   : > { %v5429_v15 = vadd.f32 %v5428_v55, %v5361_v32  ;;  %v5222_v20 = vmul.f32 %v15030_v33, %v12849_v49  ;;  %v5101_v24 = vpop.f32.mrb[25].mxu1  ;;  %v12893_v43 = vadd.f32 %v12740_v18, %v12765_v26  ;;  %v12897_v37 = vadd.f32 %v12740_v18, %v12768_v28 }
 0x562   : > { %5760 = vadd.xlane.f32.xlu1 %v5694_v34  ;;  %v12865_v40 = vpop.f32.mrb[26].mxu1  ;;  %v12885_v34 = vadd.f32 %v12740_v18, %v12757_v14  ;;  %v5696_v24 = vmul.f32 %v12872_v58, %v12872_v58  ;;  %v12907_v53 = vmax.f32 %v5569_v54, 0.0  ;;  %v12915_v28 = vadd.f32 %v12740_v18, %v12774_v47  ;;  %v15034_v54 = vld [vmem:[#allocation66_spill] sm:$0xff] }
 0x563   : > { %v5290_v63 = vadd.f32 %v5289_v46, %v5222_v20  ;;  %v5362_v25 = vmul.f32 %v5222_v20, %v12849_v49  ;;  %v5223_v11 = vmul.f32 %v15031_v39, %v12865_v40  ;;  %v5104_v31 = vpop.f32.mrb[27].mxu1  ;;  %v12930_v47 = vadd.f32 %v12740_v18, %v12780_v59 }
 0x564   : > { %15032 = vst [vmem:[#allocation110_spill] sm:$0xff] %v12907_v53  ;;  %v12947_v59 = vadd.f32 %v12740_v18, %v12792_v0 }
 0x565   : > { %v5430_v32 = vadd.f32 %v5429_v15, %v5362_v25  ;;  %v5291_v55 = vadd.f32 %v5290_v63, %v5223_v11  ;;  %v5363_v46 = vmul.f32 %v5223_v11, %v12865_v40  ;;  %v12901_v15 = vadd.f32 %v12740_v18, %v12771_v29  ;;  %v15033_v63 = vld [vmem:[#allocation67_spill] sm:$0xff] }
 0x566   : > { %5762 = vadd.xlane.f32.xlu1 %v5695_v36  ;;  %v12919_v29 = vadd.f32 %v12740_v18, %v12777_v2 }
 0x567   : > { %v5431_v20 = vadd.f32 %v5430_v32, %v5363_v46 }
 0x568   : > { %v12903_v14 = vpop.f32.mrb[28].mxu1 }
 0x569   : > { %v5224_v26 = vmul.f32 %v15033_v63, %v12903_v14  ;;  %v5109_v25 = vpop.f32.mrb[29].mxu1 }
 0x56a   : > { %5764 = vadd.xlane.f32.xlu1 %v5696_v24  ;;  %v12911_v11 = vpop.f32.mrb[30].mxu1  ;;  %v5697_v24 = vmul.f32 %v12907_v53, %v12907_v53  ;;  %v12926_v25 = vmax.f32 %v5570_v21, 0.0  ;;  %v12943_v21 = vadd.f32 %v12740_v18, %v12789_v38  ;;  %v15037_v38 = vld [vmem:[#allocation72_spill] sm:$0xff] }
 0x56b   : > { %v5292_v31 = vadd.f32 %v5291_v55, %v5224_v26  ;;  %v5364_v36 = vmul.f32 %v5224_v26, %v12903_v14  ;;  %v5225_v32 = vmul.f32 %v15034_v54, %v12911_v11  ;;  %v5112_v46 = vpop.f32.mrb[31].mxu1  ;;  %v12935_v55 = vadd.f32 %v12740_v18, %v12783_v44 }
 0x56c   : > { %15035 = vst [vmem:[#allocation30_spill] sm:$0xff] %v12926_v25  ;;  %v12939_v26 = vadd.f32 %v12740_v18, %v12786_v61  ;;  %v5698_v44 = vmul.f32 %v12926_v25, %v12926_v25  ;;  %v12957_v61 = vadd.f32 %v12740_v18, %v12795_v9  ;;  %v15038_v9 = vld [vmem:[#allocation71_spill] sm:$0xff] }
 0x56d   : > { %v5432_v63 = vadd.f32 %v5431_v20, %v5364_v36  ;;  %v5293_v39 = vadd.f32 %v5292_v31, %v5225_v32  ;;  %v5365_v2 = vmul.f32 %v5225_v32, %v12911_v11  ;;  %v12953_v31 = vmax.f32 %v5571_v30, 0.0 }
 0x56e   : > { %5766 = vadd.xlane.f32.xlu1 %v5697_v24  ;;  %v12969_v24 = vadd.f32 %v12740_v18, %v12801_v56  ;;  %v12982_v56 = vadd.f32 %v12740_v18, %v12804_v12 }
 0x56f   : > { %v5433_v46 = vadd.f32 %v5432_v63, %v5365_v2  ;;  %15036 = vst [vmem:[#allocation27_spill] sm:$0xff] %v12953_v31  ;;  %v12961_v63 = vadd.f32 %v12740_v18, %v12798_v35  ;;  %v5699_v35 = vmul.f32 %v12953_v31, %v12953_v31 }
 0x570   : > { %v12949_v20 = vpop.f32.mrb[32].mxu1 }
 0x571   : > { %v5226_v36 = vmul.f32 %v15037_v38, %v12949_v20  ;;  %v5117_v0 = vpop.f32.mrb[33].mxu1  ;;  %v12977_v38 = vmax.f32 %v12857_v48, 0.0  ;;  %v12994_v48 = vadd.f32 %v12740_v18, %v12813_v16 }
 0x572   : > { %5768 = vadd.xlane.f32.xlu1 %v5698_v44  ;;  %v12965_v32 = vpop.f32.mrb[34].mxu1 }
 0x573   : > { %v5294_v30 = vadd.f32 %v5293_v39, %v5226_v36  ;;  %v5366_v2 = vmul.f32 %v5226_v36, %v12949_v20  ;;  %v5227_v54 = vmul.f32 %v15038_v9, %v12965_v32  ;;  %v5120_v33 = vpop.f32.mrb[35].mxu1  ;;  %15039 = vst [vmem:[#allocation26_spill] sm:$0xff] %v12977_v38  ;;  %v12986_v39 = vadd.f32 %v12740_v18, %v12807_v51 }
 0x574   : > { %v12990_v33 = vadd.f32 %v12740_v18, %v12810_v60  ;;  %v5700_v36 = vmul.f32 %v12977_v38, %v12977_v38  ;;  %v13005_v51 = vmax.f32 %v12861_v22, 0.0  ;;  %v15041_v60 = vld [vmem:[#allocation79_spill] sm:$0xff]  ;;  %v13017_v22 = vmax.f32 %v12876_v45, 0.0 }
 0x575   : > { %v5434_v44 = vadd.f32 %v5433_v46, %v5366_v2  ;;  %v5295_v0 = vadd.f32 %v5294_v30, %v5227_v54  ;;  %v5367_v25 = vmul.f32 %v5227_v54, %v12965_v32  ;;  %v12998_v54 = vadd.f32 %v12740_v18, %v12729_v50  ;;  %v15042_v50 = vld [vmem:[#allocation78_spill] sm:$0xff] }
 0x576   : > { %5770 = vadd.xlane.f32.xlu1 %v5699_v35  ;;  %15040 = vst [vmem:[#allocation14_spill] sm:$0xff] %v13005_v51  ;;  %v5701_v9 = vmul.f32 %v13005_v51, %v13005_v51  ;;  %15043 = vst [vmem:[#allocation13_spill] sm:$0xff] %v13017_v22 }
 0x577   : > { %v5435_v46 = vadd.f32 %v5434_v44, %v5367_v25 }
 0x578   : > { %v13000_v12 = vpop.f32.mrb[36].mxu1 }
 0x579   : > { %v5228_v30 = vmul.f32 %v15041_v60, %v13000_v12  ;;  %v5125_v2 = vpop.f32.mrb[37].mxu1 }
 0x57a   : > { %5772 = vadd.xlane.f32.xlu1 %v5700_v36  ;;  %v13009_v16 = vpop.f32.mrb[38].mxu1 }
 0x57b   : > { %v5296_v25 = vadd.f32 %v5295_v0, %v5228_v30  ;;  %v5368_v35 = vmul.f32 %v5228_v30, %v13000_v12  ;;  %v5229_v18 = vmul.f32 %v15042_v50, %v13009_v16  ;;  %v5128_v44 = vpop.f32.mrb[39].mxu1  ;;  %v5702_v0 = vmul.f32 %v13017_v22, %v13017_v22 }
 0x57c   : > { %v13025_v30 = vmax.f32 %v12880_v10, 0.0  ;;  %v15045_v44 = vld [vmem:[#allocation84_spill] sm:$0xff]  ;;  %v13037_v10 = vmax.f32 %v12885_v34, 0.0 }
 0x57d   : > { %v5436_v38 = vadd.f32 %v5435_v46, %v5368_v35  ;;  %v5297_v31 = vadd.f32 %v5296_v25, %v5229_v18  ;;  %v5369_v2 = vmul.f32 %v5229_v18, %v13009_v16 }
 0x57e   : > { %5774 = vadd.xlane.f32.xlu1 %v5701_v9  ;;  %15044 = vst [vmem:[#allocation112_spill] sm:$0xff] %v13025_v30  ;;  %v5703_v18 = vmul.f32 %v13025_v30, %v13025_v30  ;;  %15047 = vst [vmem:[#allocation113_spill] sm:$0xff] %v13037_v10 }
 0x57f   : > { %v5437_v36 = vadd.f32 %v5436_v38, %v5369_v2  ;;  %v15046_v38 = vld [vmem:[#allocation83_spill] sm:$0xff] }
 0x580   : > { %v13020_v60 = vpop.f32.mrb[40].mxu1 }
 0x581   : > { %v5230_v50 = vmul.f32 %v15045_v44, %v13020_v60  ;;  %v5133_v51 = vpop.f32.mrb[41].mxu1 }
 0x582   : > { %5776 = vadd.xlane.f32.xlu1 %v5702_v0  ;;  %v13029_v45 = vpop.f32.mrb[42].mxu1 }
 0x583   : > { %v5298_v46 = vadd.f32 %v5297_v31, %v5230_v50  ;;  %v5370_v25 = vmul.f32 %v5230_v50, %v13020_v60  ;;  %v5231_v9 = vmul.f32 %v15046_v38, %v13029_v45  ;;  %v5136_v35 = vpop.f32.mrb[43].mxu1  ;;  %v5704_v31 = vmul.f32 %v13037_v10, %v13037_v10 }
 0x584   : > { %v13045_v50 = vmax.f32 %v12889_v4, 0.0  ;;  %v15049_v35 = vld [vmem:[#allocation91_spill] sm:$0xff]  ;;  %v13057_v4 = vmax.f32 %v12893_v43, 0.0 }
 0x585   : > { %v5438_v2 = vadd.f32 %v5437_v36, %v5370_v25  ;;  %v5299_v22 = vadd.f32 %v5298_v46, %v5231_v9  ;;  %v5371_v51 = vmul.f32 %v5231_v9, %v13029_v45  ;;  %v15050_v25 = vld [vmem:[#allocation90_spill] sm:$0xff] }
 0x586   : > { %5778 = vadd.xlane.f32.xlu1 %v5703_v18  ;;  %15048 = vst [vmem:[#allocation114_spill] sm:$0xff] %v13045_v50  ;;  %15051 = vst [vmem:[#allocation115_spill] sm:$0xff] %v13057_v4 }
 0x587   : > { %v5439_v0 = vadd.f32 %v5438_v2, %v5371_v51  ;;  %v5705_v2 = vmul.f32 %v13045_v50, %v13045_v50 }
 0x588   : > { %v13040_v44 = vpop.f32.mrb[44].mxu1 }
 0x589   : > { %v5232_v38 = vmul.f32 %v15049_v35, %v13040_v44  ;;  %v5141_v30 = vpop.f32.mrb[45].mxu1 }
 0x58a   : > { %5780 = vadd.xlane.f32.xlu1 %v5704_v31  ;;  %v13049_v34 = vpop.f32.mrb[46].mxu1 }
 0x58b   : > { %v5300_v36 = vadd.f32 %v5299_v22, %v5232_v38  ;;  %v5372_v46 = vmul.f32 %v5232_v38, %v13040_v44  ;;  %v5233_v9 = vmul.f32 %v15050_v25, %v13049_v34  ;;  %v5144_v18 = vpop.f32.mrb[47].mxu1  ;;  %v5706_v22 = vmul.f32 %v13057_v4, %v13057_v4 }
 0x58c   : > { %v13065_v38 = vmax.f32 %v12897_v37, 0.0  ;;  %v15053_v18 = vld [vmem:[#allocation96_spill] sm:$0xff]  ;;  %v13077_v37 = vmax.f32 %v12901_v15, 0.0 }
 0x58d   : > { %v5440_v51 = vadd.f32 %v5439_v0, %v5372_v46  ;;  %v5301_v10 = vadd.f32 %v5300_v36, %v5233_v9  ;;  %v5373_v30 = vmul.f32 %v5233_v9, %v13049_v34  ;;  %v15054_v46 = vld [vmem:[#allocation95_spill] sm:$0xff] }
 0x58e   : > { %5782 = vadd.xlane.f32.xlu1 %v5705_v2  ;;  %15052 = vst [vmem:[#allocation116_spill] sm:$0xff] %v13065_v38  ;;  %15055 = vst [vmem:[#allocation117_spill] sm:$0xff] %v13077_v37 }
 0x58f   : > { %v5441_v31 = vadd.f32 %v5440_v51, %v5373_v30  ;;  %v5707_v51 = vmul.f32 %v13065_v38, %v13065_v38 }
 0x590   : > { %v13060_v35 = vpop.f32.mrb[48].mxu1 }
 0x591   : > { %v5234_v25 = vmul.f32 %v15053_v18, %v13060_v35  ;;  %v5149_v50 = vpop.f32.mrb[49].mxu1 }
 0x592   : > { %5784 = vadd.xlane.f32.xlu1 %v5706_v22  ;;  %v13069_v43 = vpop.f32.mrb[50].mxu1 }
 0x593   : > { %v5302_v0 = vadd.f32 %v5301_v10, %v5234_v25  ;;  %v5374_v36 = vmul.f32 %v5234_v25, %v13060_v35  ;;  %v5235_v9 = vmul.f32 %v15054_v46, %v13069_v43  ;;  %v5152_v2 = vpop.f32.mrb[51].mxu1  ;;  %v5708_v10 = vmul.f32 %v13077_v37, %v13077_v37 }
 0x594   : > { %v13085_v25 = vmax.f32 %v12915_v28, 0.0  ;;  %v15057_v2 = vld [vmem:[#allocation104_spill] sm:$0xff]  ;;  %v13097_v28 = vmax.f32 %v12919_v29, 0.0 }
 0x595   : > { %v5442_v30 = vadd.f32 %v5441_v31, %v5374_v36  ;;  %v5303_v4 = vadd.f32 %v5302_v0, %v5235_v9  ;;  %v5375_v50 = vmul.f32 %v5235_v9, %v13069_v43  ;;  %v15058_v36 = vld [vmem:[#allocation103_spill] sm:$0xff] }
 0x596   : > { %5786 = vadd.xlane.f32.xlu1 %v5707_v51  ;;  %15056 = vst [vmem:[#allocation118_spill] sm:$0xff] %v13085_v25  ;;  %15059 = vst [vmem:[#allocation119_spill] sm:$0xff] %v13097_v28 }
 0x597   : > { %v5443_v22 = vadd.f32 %v5442_v30, %v5375_v50  ;;  %v5709_v30 = vmul.f32 %v13085_v25, %v13085_v25 }
 0x598   : > { %v13080_v18 = vpop.f32.mrb[52].mxu1 }
 0x599   : > { %v5236_v46 = vmul.f32 %v15057_v2, %v13080_v18  ;;  %v5157_v38 = vpop.f32.mrb[53].mxu1 }
 0x59a   : > { %5788 = vadd.xlane.f32.xlu1 %v5708_v10  ;;  %v13089_v15 = vpop.f32.mrb[54].mxu1 }
 0x59b   : > { %v5304_v31 = vadd.f32 %v5303_v4, %v5236_v46  ;;  %v5376_v0 = vmul.f32 %v5236_v46, %v13080_v18  ;;  %v5237_v9 = vmul.f32 %v15058_v36, %v13089_v15  ;;  %v5160_v51 = vpop.f32.mrb[55].mxu1  ;;  %v5710_v4 = vmul.f32 %v13097_v28, %v13097_v28 }
 0x59c   : > { %v13105_v46 = vmax.f32 %v12930_v47, 0.0  ;;  %v15061_v51 = vld [vmem:[#allocation108_spill] sm:$0xff]  ;;  %v13117_v47 = vmax.f32 %v12935_v55, 0.0 }
 0x59d   : > { %v5444_v50 = vadd.f32 %v5443_v22, %v5376_v0  ;;  %v5305_v37 = vadd.f32 %v5304_v31, %v5237_v9  ;;  %v5377_v38 = vmul.f32 %v5237_v9, %v13089_v15  ;;  %v15062_v0 = vld [vmem:[#allocation106_spill] sm:$0xff] }
 0x59e   : > { %5790 = vadd.xlane.f32.xlu1 %v5709_v30  ;;  %15060 = vst [vmem:[#allocation120_spill] sm:$0xff] %v13105_v46  ;;  %15063 = vst [vmem:[#allocation121_spill] sm:$0xff] %v13117_v47 }
 0x59f   : > { %v5445_v10 = vadd.f32 %v5444_v50, %v5377_v38  ;;  %v5711_v50 = vmul.f32 %v13105_v46, %v13105_v46 }
 0x5a0   : > { %v13100_v2 = vpop.f32.mrb[56].mxu1 }
 0x5a1   : > { %v5238_v36 = vmul.f32 %v15061_v51, %v13100_v2  ;;  %v5165_v25 = vpop.f32.mrb[57].mxu1 }
 0x5a2   : > { %5792 = vadd.xlane.f32.xlu1 %v5710_v4  ;;  %v13109_v29 = vpop.f32.mrb[58].mxu1 }
 0x5a3   : > { %v5306_v22 = vadd.f32 %v5305_v37, %v5238_v36  ;;  %v5378_v31 = vmul.f32 %v5238_v36, %v13100_v2  ;;  %v5239_v9 = vmul.f32 %v15062_v0, %v13109_v29  ;;  %v5168_v30 = vpop.f32.mrb[59].mxu1  ;;  %v5712_v37 = vmul.f32 %v13117_v47, %v13117_v47 }
 0x5a4   : > { %v13125_v36 = vmax.f32 %v12939_v26, 0.0  ;;  %v15065_v30 = vld [vmem:[#allocation111_spill] sm:$0xff]  ;;  %v13137_v26 = vmax.f32 %v12943_v21, 0.0 }
 0x5a5   : > { %v5446_v38 = vadd.f32 %v5445_v10, %v5378_v31  ;;  %v5307_v28 = vadd.f32 %v5306_v22, %v5239_v9  ;;  %v5379_v25 = vmul.f32 %v5239_v9, %v13109_v29  ;;  %v15066_v31 = vld [vmem:[#allocation109_spill] sm:$0xff] }
 0x5a6   : > { %5794 = vadd.xlane.f32.xlu1 %v5711_v50  ;;  %15064 = vst [vmem:[#allocation122_spill] sm:$0xff] %v13125_v36 }
 0x5a7   : > { %v5447_v4 = vadd.f32 %v5446_v38, %v5379_v25  ;;  %v5713_v38 = vmul.f32 %v13125_v36, %v13125_v36 }
 0x5a8   : > { %v13120_v51 = vpop.f32.mrb[60].mxu1 }
 0x5a9   : > { %v5240_v0 = vmul.f32 %v15065_v30, %v13120_v51  ;;  %v5173_v46 = vpop.f32.mrb[61].mxu1 }
 0x5aa   : > { %5796 = vadd.xlane.f32.xlu1 %v5712_v37  ;;  %v13129_v55 = vpop.f32.mrb[62].mxu1 }
 0x5ab   : > { %v5308_v10 = vadd.f32 %v5307_v28, %v5240_v0  ;;  %v5380_v22 = vmul.f32 %v5240_v0, %v13120_v51  ;;  %v5241_v9 = vmul.f32 %v15066_v31, %v13129_v55  ;;  %v5176_v50 = vpop.f32.mrb[63].mxu1  ;;  %v5714_v28 = vmul.f32 %v13137_v26, %v13137_v26 }
 0x5ac   : > { %v13143_v0 = vmax.f32 %v12947_v59, 0.0 }
 0x5ad   : > { %v5448_v25 = vadd.f32 %v5447_v4, %v5380_v22  ;;  %v5309_v47 = vadd.f32 %v5308_v10, %v5241_v9  ;;  %v5381_v46 = vmul.f32 %v5241_v9, %v13129_v55  ;;  %v13148_v4 = vmax.f32 %v12957_v61, 0.0 }
 0x5ae   : > { %5798 = vadd.xlane.f32.xlu1 %v5713_v38  ;;  %v5715_v21 = vmul.f32 %v13143_v0, %v13143_v0 }
 0x5af   : > { %v5310_v37 = vrot.slane %v5309_v47, 4  ;;  %v5449_v30 = vadd.f32 %v5448_v25, %v5381_v46  ;;  %v5716_v59 = vmul.f32 %v13148_v4, %v13148_v4 }
 0x5b1   : > { %v5311_v50 = vadd.f32 %v5310_v37, %v5309_v47  ;;  %v5450_v31 = vrot.slane %v5449_v30, 4  ;;  %v13153_v47 = vmax.f32 %v12961_v63, 0.0 }
 0x5b2   : > { %5800 = vadd.xlane.f32.xlu1 %v5714_v28 }
 0x5b3   : > { %v5312_v36 = vrot.slane %v5311_v50, 2  ;;  %v5451_v53 = vadd.f32 %v5450_v31, %v5449_v30  ;;  %v15067_v30 = vld [vmem:[#allocation107_spill] sm:$0xff]  ;;  %v5717_v61 = vmul.f32 %v13153_v47, %v13153_v47 }
 0x5b5   : > { %v5313_v10 = vadd.f32 %v5312_v36, %v5311_v50  ;;  %v5452_v22 = vrot.slane %v5451_v53, 2  ;;  %v13159_v36 = vmax.f32 %v12969_v24, 0.0  ;;  %v13170_v24 = vmax.f32 %v12986_v39, 0.0 }
 0x5b6   : > { %5802 = vadd.xlane.f32.xlu1 %v5715_v21  ;;  %v13165_v21 = vmax.f32 %v12982_v56, 0.0  ;;  %v13183_v39 = vmax.f32 %v12998_v54, 0.0 }
 0x5b7   : > { %v5314_v9 = vrot.slane %v5313_v10, 1  ;;  %v5453_v38 = vadd.f32 %v5452_v22, %v5451_v53  ;;  %v5718_v63 = vmul.f32 %v13159_v36, %v13159_v36 }
 0x5b9   : > { %v5315_v25 = vadd.f32 %v5314_v9, %v5313_v10  ;;  %v5454_v46 = vrot.slane %v5453_v38, 1  ;;  %v5719_v9 = vmul.f32 %v13165_v21, %v13165_v21 }
 0x5ba   : > { %5804 = vadd.xlane.f32.xlu1 %v5716_v59  ;;  %v13175_v59 = vmax.f32 %v12990_v33, 0.0 }
 0x5bb   : > { %v5317_v31 = vmul.f32 %v5315_v25, %v15067_v30  ;;  %v5455_v37 = vadd.f32 %v5454_v46, %v5453_v38  ;;  %v5720_v38 = vmul.f32 %v13170_v24, %v13170_v24  ;;  %v13180_v25 = vmax.f32 %v12994_v48, 0.0 }
 0x5bc   : > { %v5721_v56 = vmul.f32 %v13175_v59, %v13175_v59 }
 0x5bd   : > { %v5457_v53 = vmul.f32 %v5455_v37, %v15067_v30  ;;  %v5459_v28 = vmul.f32 %v5317_v31, %v5317_v31 }
 0x5be   : > { %5806 = vadd.xlane.f32.xlu1 %v5717_v61  ;;  %v5722_v61 = vmul.f32 %v13180_v25, %v13180_v25 }
 0x5bf   : > { %v5461_v50 = vsub.f32 %v5457_v53, %v5459_v28  ;;  %v5723_v28 = vmul.f32 %v13183_v39, %v13183_v39 }
 0x5c1   : > { %v5463_v10 = vmax.f32 %v5461_v50, 0.0 }
 0x5c2   : > { %5808 = vadd.xlane.f32.xlu1 %v5718_v63 }
 0x5c3   : > { %v5466_v22 = vadd.f32 1e-05, %v5463_v10 }
 0x5c5   : > { %7755 = vrsqrt.f32 %v5466_v22 }
 0x5c6   : > { %5810 = vadd.xlane.f32.xlu1 %v5719_v9 }
 0x5ca   : > { %5812 = vadd.xlane.f32.xlu1 %v5720_v38 }
 0x5ce   : > { %5814 = vadd.xlane.f32.xlu1 %v5721_v56 }
 0x5cf   : > { %v7756_v46 = vpop.eup %7755 }
 0x5d0   : > { %v5470_v37 = vmul.f32 %v7756_v46, %v12708_v42 }
 0x5d2   : > { %v5473_v53 = vmul.f32 %v5470_v37, %v5317_v31  ;;  %v5485_v33 = vrot.slane %v5470_v37, %v15022_v57  ;;  %5816 = vadd.xlane.f32.xlu1 %v5722_v61 }
 0x5d4   : > { %v5475_v48 = vsub.f32 %v12723_v5, %v5473_v53  ;;  %v5551_v50 = vmul.f32 %v5485_v33, %v13129_v55  ;;  %v5520_v63 = vmul.f32 %v5485_v33, %v12673_v3  ;;  %v5521_v54 = vmul.f32 %v5485_v33, %v12677_v27  ;;  %v15068_v55 = vld [vmem:[#allocation15_spill] sm:$0xff]  ;;  %v15069_v3 = vld [vmem:[#allocation124_spill] sm:$0xff] }
 0x5d5   : > { %v5522_v42 = vmul.f32 %v5485_v33, %v12685_v8  ;;  %v5523_v10 = vmul.f32 %v5485_v33, %v12689_v23  ;;  %v5524_v31 = vmul.f32 %v5485_v33, %v12695_v13  ;;  %v5525_v22 = vmul.f32 %v5485_v33, %v12699_v62 }
 0x5d6   : > { %v13200_v9 = vrot.slane %v5475_v48, %v15022_v57  ;;  %v5526_v38 = vmul.f32 %v5485_v33, %v12710_v19  ;;  %v5527_v5 = vmul.f32 %v5485_v33, %v12714_v17  ;;  %v5528_v56 = vmul.f32 %v5485_v33, %v15068_v55  ;;  %5818 = vadd.xlane.f32.xlu1 %v5723_v28 }
 0x5d7   : > { %v5529_v27 = vmul.f32 %v5485_v33, %v15069_v3  ;;  %v5530_v8 = vmul.f32 %v5485_v33, %v12819_v6  ;;  %v5531_v23 = vmul.f32 %v5485_v33, %v12829_v7  ;;  %v5532_v13 = vmul.f32 %v5485_v33, %v12849_v49 }
 0x5d8   : > { %v13210_v62 = vadd.f32 %v13200_v9, %v5551_v50  ;;  %v5533_v57 = vmul.f32 %v5485_v33, %v12865_v40  ;;  %v5534_v19 = vmul.f32 %v5485_v33, %v12903_v14  ;;  %v5535_v17 = vmul.f32 %v5485_v33, %v12911_v11 }
 0x5d9   : > { %v5536_v46 = vmul.f32 %v5485_v33, %v12949_v20  ;;  %v5537_v37 = vmul.f32 %v5485_v33, %v12965_v32  ;;  %v5538_v61 = vmul.f32 %v5485_v33, %v13000_v12  ;;  %v5539_v6 = vmul.f32 %v5485_v33, %v13009_v16 }
 0x5da   : > { %v5540_v7 = vmul.f32 %v5485_v33, %v13020_v60  ;;  %v5541_v49 = vmul.f32 %v5485_v33, %v13029_v45  ;;  %v5542_v53 = vmul.f32 %v5485_v33, %v13040_v44  ;;  %v5543_v40 = vmul.f32 %v5485_v33, %v13049_v34 }
 0x5db   : > { %v5544_v14 = vmul.f32 %v5485_v33, %v13060_v35  ;;  %v5545_v11 = vmul.f32 %v5485_v33, %v13069_v43  ;;  %v5546_v20 = vmul.f32 %v5485_v33, %v13080_v18  ;;  %v5547_v32 = vmul.f32 %v5485_v33, %v13089_v15 }
 0x5dc   : > { %v5548_v12 = vmul.f32 %v5485_v33, %v13100_v2  ;;  %v5549_v16 = vmul.f32 %v5485_v33, %v13109_v29  ;;  %v5550_v60 = vmul.f32 %v5485_v33, %v13120_v51  ;;  %v5596_v45 = vadd.f32 %v13200_v9, %v5520_v63 }
 0x5dd   : > { %v5597_v44 = vadd.f32 %v13200_v9, %v5521_v54  ;;  %v5598_v34 = vadd.f32 %v13200_v9, %v5522_v42  ;;  %v5599_v35 = vadd.f32 %v13200_v9, %v5523_v10  ;;  %v5600_v43 = vadd.f32 %v13200_v9, %v5524_v31 }
 0x5de   : > { %v13235_v28 = vmax.f32 %v5596_v45, 0.0  ;;  %v5601_v18 = vadd.f32 %v13200_v9, %v5525_v22  ;;  %v5602_v2 = vadd.f32 %v13200_v9, %v5526_v38  ;;  %v5603_v15 = vadd.f32 %v13200_v9, %v5527_v5 }
 0x5df   : > { %v13242_v29 = vmax.f32 %v5597_v44, 0.0  ;;  %v13244_v33 = vmax.f32 %v5598_v34, 0.0  ;;  %v13247_v48 = vadd.f32 %v13200_v9, %v5528_v56  ;;  %v13250_v50 = vadd.f32 %v13200_v9, %v5529_v27 }
 0x5e0   : > { %v5724_v51 = vmul.f32 %v13235_v28, %v13235_v28  ;;  %v13253_v63 = vadd.f32 %v13200_v9, %v5530_v8  ;;  %v13256_v54 = vadd.f32 %v13200_v9, %v5531_v23  ;;  %v13259_v42 = vadd.f32 %v13200_v9, %v5532_v13 }
 0x5e1   : > { %v5725_v10 = vmul.f32 %v13242_v29, %v13242_v29  ;;  %v13264_v31 = vadd.f32 %v13200_v9, %v5533_v57  ;;  %v13267_v22 = vadd.f32 %v13200_v9, %v5534_v19  ;;  %v13270_v38 = vadd.f32 %v13200_v9, %v5535_v17 }
 0x5e2   : > { %5820 = vadd.xlane.f32.xlu0 %v5724_v51  ;;  %v5726_v5 = vmul.f32 %v13244_v33, %v13244_v33  ;;  %v13274_v55 = vmax.f32 %v5599_v35, 0.0  ;;  %v13277_v56 = vadd.f32 %v13200_v9, %v5536_v46  ;;  %v13280_v3 = vadd.f32 %v13200_v9, %v5537_v37 }
 0x5e3   : > { %v13283_v27 = vadd.f32 %v13200_v9, %v5538_v61  ;;  %v13286_v8 = vadd.f32 %v13200_v9, %v5539_v6  ;;  %v13289_v23 = vadd.f32 %v13200_v9, %v5540_v7  ;;  %v13292_v13 = vadd.f32 %v13200_v9, %v5541_v49 }
 0x5e4   : > { %v13295_v57 = vadd.f32 %v13200_v9, %v5542_v53  ;;  %v13298_v19 = vadd.f32 %v13200_v9, %v5543_v40  ;;  %v5727_v37 = vmul.f32 %v13274_v55, %v13274_v55  ;;  %v13302_v45 = vmax.f32 %v5600_v43, 0.0 }
 0x5e5   : > { %v13305_v49 = vadd.f32 %v13200_v9, %v5544_v14  ;;  %v13308_v53 = vadd.f32 %v13200_v9, %v5545_v11  ;;  %v13311_v40 = vadd.f32 %v13200_v9, %v5546_v20  ;;  %v13315_v35 = vmax.f32 %v5601_v18, 0.0 }
 0x5e6   : > { %5822 = vadd.xlane.f32.xlu0 %v5725_v10  ;;  %v5728_v44 = vmul.f32 %v13302_v45, %v13302_v45  ;;  %v13318_v43 = vadd.f32 %v13200_v9, %v5547_v32  ;;  %v13321_v51 = vadd.f32 %v13200_v9, %v5548_v12  ;;  %v13324_v14 = vadd.f32 %v13200_v9, %v5549_v16 }
 0x5e7   : > { %v13327_v11 = vadd.f32 %v13200_v9, %v5550_v60  ;;  %v5729_v10 = vmul.f32 %v13315_v35, %v13315_v35  ;;  %v13338_v9 = vmax.f32 %v5603_v15, 0.0 }
 0x5e9   : > { %v5731_v15 = vmul.f32 %v13338_v9, %v13338_v9 }
 0x5ea   : > { %5824 = vadd.xlane.f32.xlu0 %v5726_v5  ;;  %v13331_v5 = vmax.f32 %v5602_v2, 0.0 }
 0x5eb   : > { %v5759_v17 = vpop.xlane.xlu1 %5758  ;;  %v5757_v46 = vpop.xlane.xlu0 %5756 }
 0x5ec   : > { %v5885_v61 = vmax.f32 %v5759_v17, 1e-24  ;;  %v5884_v6 = vmax.f32 %v5757_v46, 1e-24  ;;  %v5730_v16 = vmul.f32 %v13331_v5, %v13331_v5  ;;  %v15070_v46 = vld [vmem:[#allocation17_spill] sm:$0xff] }
 0x5ee   : > { %5826 = vadd.xlane.f32.xlu0 %v5727_v37  ;;  %7757 = vrsqrt.f32 %v5885_v61  ;;  %v15071_v61 = vld [vmem:[#allocation18_spill] sm:$0xff] }
 0x5ef   : > { %7759 = vrsqrt.f32 %v5884_v6  ;;  %v5761_v7 = vpop.xlane.xlu1 %5760 }
 0x5f0   : > { %v5886_v34 = vmax.f32 %v5761_v7, 1e-24 }
 0x5f2   : > { %5828 = vadd.xlane.f32.xlu0 %v5728_v44  ;;  %7761 = vrsqrt.f32 %v5886_v34  ;;  %v15072_v34 = vld [vmem:[#allocation19_spill] sm:$0xff] }
 0x5f3   : > { %v5763_v20 = vpop.xlane.xlu1 %5762 }
 0x5f4   : > { %v5887_v18 = vmax.f32 %v5763_v20, 1e-24 }
 0x5f6   : > { %5830 = vadd.xlane.f32.xlu0 %v5729_v10  ;;  %7763 = vrsqrt.f32 %v5887_v18  ;;  %v13352_v18 = vmax.f32 %v13247_v48, 0.0  ;;  %v13363_v48 = vmax.f32 %v13250_v50, 0.0 }
 0x5f7   : > { %v5765_v32 = vpop.xlane.xlu1 %5764 }
 0x5f8   : > { %v7758_v12 = vpop.eup %7757  ;;  %v5888_v17 = vmax.f32 %v5765_v32, 1e-24 }
 0x5f9   : > { %v7760_v60 = vpop.eup %7759  ;;  %v6013_v37 = vmul.f32 %v7758_v12, %v15070_v46 }
 0x5fa   : > { %v6012_v2 = vmul.f32 %v7760_v60, %v12833_v41  ;;  %5832 = vadd.xlane.f32.xlu0 %v5730_v16  ;;  %7765 = vrsqrt.f32 %v5888_v17  ;;  %v5732_v17 = vmul.f32 %v13352_v18, %v13352_v18 }
 0x5fb   : > { %v13344_v6 = vmul.f32 %v15071_v61, %v6013_v37  ;;  %v5767_v7 = vpop.xlane.xlu1 %5766  ;;  %v15073_v37 = vld [vmem:[#allocation23_spill] sm:$0xff] }
 0x5fc   : > { %v7762_v44 = vpop.eup %7761  ;;  %v13347_v20 = vmul.f32 %v15072_v34, %v6012_v2  ;;  %v5889_v10 = vmax.f32 %v5767_v7, 1e-24  ;;  %v15074_v2 = vld [vmem:[#allocation20_spill] sm:$0xff]  ;;  %v5733_v34 = vmul.f32 %v13363_v48, %v13363_v48 }
 0x5fd   : > { %v6014_v32 = vmul.f32 %v7762_v44, %v12842_v1 }
 0x5fe   : > { %v7017_v41 = vpack.c.bf16 %v13344_v6, %v13347_v20  ;;  %5834 = vadd.xlane.f32.xlu0 %v5731_v15  ;;  %7767 = vrsqrt.f32 %v5889_v10  ;;  %v13375_v10 = vmax.f32 %v13253_v63, 0.0  ;;  %v15075_v63 = vld [vmem:[#allocation110_spill] sm:$0xff] }
 0x5ff   : > { %v5769_v12 = vpop.xlane.xlu1 %5768  ;;  %v13367_v1 = vmul.f32 %v15073_v37, %v6014_v32 }
 0x600   : > { %v7764_v16 = vpop.eup %7763  ;;  %7018 = vst [vmem:[%s13357_s11] sm:$0xff] %v7017_v41   ;;  %v5890_v60 = vmax.f32 %v5769_v12, 1e-24  ;;  %v5734_v12 = vmul.f32 %v13375_v10, %v13375_v10 }
 0x601   : > { %v6015_v46 = vmul.f32 %v7764_v16, %v12853_v52 }
 0x602   : > { %5836 = vadd.xlane.f32.xlu0 %v5732_v17  ;;  %7769 = vrsqrt.f32 %v5890_v60  ;;  %v13384_v17 = vmax.f32 %v13256_v54, 0.0 }
 0x603   : > { %v13370_v61 = vmul.f32 %v15074_v2, %v6015_v46  ;;  %v5771_v7 = vpop.xlane.xlu1 %5770  ;;  %v15076_v46 = vld [vmem:[#allocation29_spill] sm:$0xff]  ;;  %v15077_v2 = vld [vmem:[#allocation24_spill] sm:$0xff] }
 0x604   : > { %v7766_v44 = vpop.eup %7765  ;;  %v5891_v15 = vmax.f32 %v5771_v7, 1e-24 }
 0x605   : > { %v7022_v52 = vpack.c.bf16 %v13370_v61, %v13367_v1  ;;  %v6016_v50 = vmul.f32 %v7766_v44, %v12872_v58 }
 0x606   : > { %5838 = vadd.xlane.f32.xlu0 %v5733_v34  ;;  %7771 = vrsqrt.f32 %v5891_v15  ;;  %v5735_v34 = vmul.f32 %v13384_v17, %v13384_v17 }
 0x607   : > { %7174 = vst [vmem:[%s13357_s11 + $0x8] sm:$0xff] %v7022_v52   ;;  %v5773_v41 = vpop.xlane.xlu1 %5772  ;;  %v13388_v37 = vmul.f32 %v15076_v46, %v6016_v50  ;;  %v13396_v52 = vmax.f32 %v13259_v42, 0.0  ;;  %v15078_v50 = vld [vmem:[#allocation30_spill] sm:$0xff]  ;;  %v15080_v42 = vld [vmem:[#allocation27_spill] sm:$0xff] }
 0x608   : > { %v7768_v32 = vpop.eup %7767  ;;  %v5892_v16 = vmax.f32 %v5773_v41, 1e-24 }
 0x609   : > { %v6017_v60 = vmul.f32 %v7768_v32, %v15075_v63 }
 0x60a   : > { %5840 = vadd.xlane.f32.xlu0 %v5734_v12  ;;  %7773 = vrsqrt.f32 %v5892_v16  ;;  %v5736_v16 = vmul.f32 %v13396_v52, %v13396_v52 }
 0x60b   : > { %v13391_v7 = vmul.f32 %v15077_v2, %v6017_v60  ;;  %v5775_v58 = vpop.xlane.xlu1 %5774  ;;  %v13405_v60 = vmax.f32 %v13264_v31, 0.0  ;;  %v15081_v2 = vld [vmem:[#allocation38_spill] sm:$0xff] }
 0x60c   : > { %v7770_v44 = vpop.eup %7769  ;;  %v5893_v15 = vmax.f32 %v5775_v58, 1e-24 }
 0x60d   : > { %v7027_v54 = vpack.c.bf16 %v13391_v7, %v13388_v37  ;;  %v6018_v41 = vmul.f32 %v7770_v44, %v15078_v50  ;;  %15079 = vst [vmem:[#allocation123_spill] sm:$0xff] %v13405_v60  ;;  %v5737_v50 = vmul.f32 %v13405_v60, %v13405_v60 }
 0x60e   : > { %5842 = vadd.xlane.f32.xlu0 %v5735_v34  ;;  %7775 = vrsqrt.f32 %v5893_v15  ;;  %v15082_v34 = vld [vmem:[#allocation34_spill] sm:$0xff] }
 0x60f   : > { %7175 = vst [vmem:[%s13357_s11 + $0x10] sm:$0xff] %v7027_v54   ;;  %v5777_v32 = vpop.xlane.xlu1 %5776  ;;  %v13409_v58 = vmul.f32 %v15081_v2, %v6018_v41  ;;  %v15084_v41 = vld [vmem:[#allocation26_spill] sm:$0xff]  ;;  %v13426_v2 = vmax.f32 %v13270_v38, 0.0 }
 0x610   : > { %v7772_v12 = vpop.eup %7771  ;;  %v5894_v63 = vmax.f32 %v5777_v32, 1e-24  ;;  %v13417_v32 = vmax.f32 %v13267_v22, 0.0  ;;  %v15086_v22 = vld [vmem:[#allocation14_spill] sm:$0xff] }
 0x611   : > { %v6019_v46 = vmul.f32 %v7772_v12, %v15080_v42  ;;  %15085 = vst [vmem:[#allocation127_spill] sm:$0xff] %v13426_v2 }
 0x612   : > { %5844 = vadd.xlane.f32.xlu0 %v5736_v16  ;;  %7777 = vrsqrt.f32 %v5894_v63  ;;  %15083 = vst [vmem:[#allocation125_spill] sm:$0xff] %v13417_v32  ;;  %v5738_v42 = vmul.f32 %v13417_v32, %v13417_v32  ;;  %v5739_v32 = vmul.f32 %v13426_v2, %v13426_v2 }
 0x613   : > { %v13412_v15 = vmul.f32 %v15082_v34, %v6019_v46  ;;  %v5779_v44 = vpop.xlane.xlu1 %5778 }
 0x614   : > { %v7774_v54 = vpop.eup %7773  ;;  %v5895_v30 = vmax.f32 %v5779_v44, 1e-24  ;;  %v15087_v44 = vld [vmem:[#allocation32_spill] sm:$0xff] }
 0x615   : > { %v7032_v31 = vpack.c.bf16 %v13412_v15, %v13409_v58  ;;  %v6020_v12 = vmul.f32 %v7774_v54, %v15084_v41 }
 0x616   : > { %5846 = vadd.xlane.f32.xlu0 %v5737_v50  ;;  %7779 = vrsqrt.f32 %v5895_v30  ;;  %v15088_v30 = vld [vmem:[#allocation31_spill] sm:$0xff] }
 0x617   : > { %7176 = vst [vmem:[%s13357_s11 + $0x18] sm:$0xff] %v7032_v31   ;;  %v5781_v16 = vpop.xlane.xlu1 %5780  ;;  %v13430_v50 = vmul.f32 %v15087_v44, %v6020_v12  ;;  %v15090_v12 = vld [vmem:[#allocation13_spill] sm:$0xff]  ;;  %v13447_v44 = vmax.f32 %v13280_v3, 0.0 }
 0x618   : > { %v7776_v63 = vpop.eup %7775  ;;  %v5896_v46 = vmax.f32 %v5781_v16, 1e-24  ;;  %v13438_v16 = vmax.f32 %v13277_v56, 0.0  ;;  %v15092_v56 = vld [vmem:[#allocation112_spill] sm:$0xff] }
 0x619   : > { %v6021_v34 = vmul.f32 %v7776_v63, %v15086_v22  ;;  %15091 = vst [vmem:[#allocation132_spill] sm:$0xff] %v13447_v44 }
 0x61a   : > { %5848 = vadd.xlane.f32.xlu0 %v5738_v42  ;;  %7781 = vrsqrt.f32 %v5896_v46  ;;  %15089 = vst [vmem:[#allocation131_spill] sm:$0xff] %v13438_v16  ;;  %v5740_v22 = vmul.f32 %v13438_v16, %v13438_v16  ;;  %v5741_v16 = vmul.f32 %v13447_v44, %v13447_v44 }
 0x61b   : > { %v13433_v31 = vmul.f32 %v15088_v30, %v6021_v34  ;;  %v5783_v54 = vpop.xlane.xlu1 %5782 }
 0x61c   : > { %v7778_v41 = vpop.eup %7777  ;;  %v5897_v60 = vmax.f32 %v5783_v54, 1e-24  ;;  %v15093_v54 = vld [vmem:[#allocation50_spill] sm:$0xff] }
 0x61d   : > { %v7037_v38 = vpack.c.bf16 %v13433_v31, %v13430_v50  ;;  %v6022_v63 = vmul.f32 %v7778_v41, %v15090_v12 }
 0x61e   : > { %5850 = vadd.xlane.f32.xlu0 %v5739_v32  ;;  %7783 = vrsqrt.f32 %v5897_v60  ;;  %v15094_v60 = vld [vmem:[#allocation44_spill] sm:$0xff] }
 0x61f   : > { %7177 = vst [vmem:[%s13357_s11 + $0x20] sm:$0xff] %v7037_v38   ;;  %v5785_v42 = vpop.xlane.xlu1 %5784  ;;  %v13451_v32 = vmul.f32 %v15093_v54, %v6022_v63  ;;  %v15096_v63 = vld [vmem:[#allocation113_spill] sm:$0xff]  ;;  %v13468_v54 = vmax.f32 %v13286_v8, 0.0 }
 0x620   : > { %v7780_v46 = vpop.eup %7779  ;;  %v5898_v34 = vmax.f32 %v5785_v42, 1e-24  ;;  %v13459_v42 = vmax.f32 %v13283_v27, 0.0  ;;  %v15098_v27 = vld [vmem:[#allocation114_spill] sm:$0xff] }
 0x621   : > { %v6023_v30 = vmul.f32 %v7780_v46, %v15092_v56  ;;  %15097 = vst [vmem:[#allocation134_spill] sm:$0xff] %v13468_v54 }
 0x622   : > { %5852 = vadd.xlane.f32.xlu0 %v5740_v22  ;;  %7785 = vrsqrt.f32 %v5898_v34  ;;  %15095 = vst [vmem:[#allocation133_spill] sm:$0xff] %v13459_v42  ;;  %v5742_v56 = vmul.f32 %v13459_v42, %v13459_v42  ;;  %v5743_v42 = vmul.f32 %v13468_v54, %v13468_v54 }
 0x623   : > { %v13454_v38 = vmul.f32 %v15094_v60, %v6023_v30  ;;  %v5787_v41 = vpop.xlane.xlu1 %5786 }
 0x624   : > { %v7782_v12 = vpop.eup %7781  ;;  %v5899_v2 = vmax.f32 %v5787_v41, 1e-24  ;;  %v15099_v41 = vld [vmem:[#allocation43_spill] sm:$0xff] }
 0x625   : > { %v7042_v3 = vpack.c.bf16 %v13454_v38, %v13451_v32  ;;  %v6024_v46 = vmul.f32 %v7782_v12, %v15096_v63 }
 0x626   : > { %5854 = vadd.xlane.f32.xlu0 %v5741_v16  ;;  %7787 = vrsqrt.f32 %v5899_v2  ;;  %v15100_v2 = vld [vmem:[#allocation37_spill] sm:$0xff] }
 0x627   : > { %7178 = vst [vmem:[%s13357_s11 + $0x28] sm:$0xff] %v7042_v3   ;;  %v5789_v22 = vpop.xlane.xlu1 %5788  ;;  %v13472_v16 = vmul.f32 %v15099_v41, %v6024_v46  ;;  %v15102_v46 = vld [vmem:[#allocation115_spill] sm:$0xff]  ;;  %v13489_v41 = vmax.f32 %v13292_v13, 0.0 }
 0x628   : > { %v7784_v34 = vpop.eup %7783  ;;  %v5900_v30 = vmax.f32 %v5789_v22, 1e-24  ;;  %v13480_v22 = vmax.f32 %v13289_v23, 0.0  ;;  %v15104_v23 = vld [vmem:[#allocation116_spill] sm:$0xff] }
 0x629   : > { %v6025_v60 = vmul.f32 %v7784_v34, %v15098_v27  ;;  %15103 = vst [vmem:[#allocation137_spill] sm:$0xff] %v13489_v41 }
 0x62a   : > { %5856 = vadd.xlane.f32.xlu0 %v5742_v56  ;;  %7789 = vrsqrt.f32 %v5900_v30  ;;  %15101 = vst [vmem:[#allocation136_spill] sm:$0xff] %v13480_v22  ;;  %v5744_v27 = vmul.f32 %v13480_v22, %v13480_v22  ;;  %v5745_v22 = vmul.f32 %v13489_v41, %v13489_v41 }
 0x62b   : > { %v13475_v3 = vmul.f32 %v15100_v2, %v6025_v60  ;;  %v5791_v12 = vpop.xlane.xlu1 %5790 }
 0x62c   : > { %v7786_v63 = vpop.eup %7785  ;;  %v5901_v44 = vmax.f32 %v5791_v12, 1e-24  ;;  %v15105_v12 = vld [vmem:[#allocation62_spill] sm:$0xff] }
 0x62d   : > { %v7047_v8 = vpack.c.bf16 %v13475_v3, %v13472_v16  ;;  %v6026_v34 = vmul.f32 %v7786_v63, %v15102_v46 }
 0x62e   : > { %5858 = vadd.xlane.f32.xlu0 %v5743_v42  ;;  %7791 = vrsqrt.f32 %v5901_v44  ;;  %v15106_v44 = vld [vmem:[#allocation56_spill] sm:$0xff] }
 0x62f   : > { %7179 = vst [vmem:[%s13357_s11 + $0x30] sm:$0xff] %v7047_v8   ;;  %v5793_v56 = vpop.xlane.xlu1 %5792  ;;  %v13493_v42 = vmul.f32 %v15105_v12, %v6026_v34  ;;  %v15108_v34 = vld [vmem:[#allocation117_spill] sm:$0xff]  ;;  %v13510_v12 = vmax.f32 %v13298_v19, 0.0 }
 0x630   : > { %v7788_v30 = vpop.eup %7787  ;;  %v5902_v60 = vmax.f32 %v5793_v56, 1e-24  ;;  %v13501_v56 = vmax.f32 %v13295_v57, 0.0  ;;  %v6460_v57 = vadd.f32 %v13344_v6, %v13347_v20  ;;  %v13525_v6 = vmax.f32 %v13305_v49, 0.0 }
 0x631   : > { %v6027_v2 = vmul.f32 %v7788_v30, %v15104_v23  ;;  %v5747_v19 = vmul.f32 %v13510_v12, %v13510_v12  ;;  %v13536_v49 = vmax.f32 %v13308_v53, 0.0 }
 0x632   : > { %5860 = vadd.xlane.f32.xlu0 %v5744_v27  ;;  %7793 = vrsqrt.f32 %v5902_v60  ;;  %15107 = vst [vmem:[#allocation135_spill] sm:$0xff] %v13501_v56  ;;  %v5746_v23 = vmul.f32 %v13501_v56, %v13501_v56 }
 0x633   : > { %v13496_v8 = vmul.f32 %v15106_v44, %v6027_v2  ;;  %v5795_v63 = vpop.xlane.xlu1 %5794  ;;  %v15109_v44 = vld [vmem:[#allocation118_spill] sm:$0xff]  ;;  %v5749_v53 = vmul.f32 %v13536_v49, %v13536_v49 }
 0x634   : > { %v7790_v46 = vpop.eup %7789  ;;  %v5903_v54 = vmax.f32 %v5795_v63, 1e-24 }
 0x635   : > { %v7052_v13 = vpack.c.bf16 %v13496_v8, %v13493_v42  ;;  %v6028_v30 = vmul.f32 %v7790_v46, %v15108_v34 }
 0x636   : > { %5862 = vadd.xlane.f32.xlu0 %v5745_v22  ;;  %7795 = vrsqrt.f32 %v5903_v54  ;;  %v6461_v54 = vadd.f32 %v6460_v57, %v13367_v1  ;;  %v15110_v22 = vld [vmem:[#allocation55_spill] sm:$0xff] }
 0x637   : > { %7180 = vst [vmem:[%s13357_s11 + $0x38] sm:$0xff] %v7052_v13   ;;  %v5797_v27 = vpop.xlane.xlu1 %5796  ;;  %v13517_v46 = vmul.f32 %v15110_v22, %v6028_v30  ;;  %v15111_v13 = vld [vmem:[#allocation49_spill] sm:$0xff] }
 0x638   : > { %v7792_v60 = vpop.eup %7791  ;;  %v5904_v2 = vmax.f32 %v5797_v27, 1e-24  ;;  %v6462_v20 = vadd.f32 %v6461_v54, %v13370_v61  ;;  %v15113_v54 = vld [vmem:[#allocation120_spill] sm:$0xff] }
 0x639   : > { %v6029_v63 = vmul.f32 %v7792_v60, %v15109_v44  ;;  %v15112_v60 = vld [vmem:[#allocation119_spill] sm:$0xff]  ;;  %v5748_v44 = vmul.f32 %v13525_v6, %v13525_v6 }
 0x63a   : > { %5864 = vadd.xlane.f32.xlu0 %v5746_v23  ;;  %7797 = vrsqrt.f32 %v5904_v2  ;;  %v6463_v30 = vadd.f32 %v6462_v20, %v13388_v37 }
 0x63b   : > { %v13520_v34 = vmul.f32 %v15111_v13, %v6029_v63  ;;  %v5799_v27 = vpop.xlane.xlu1 %5798  ;;  %v15115_v13 = vld [vmem:[#allocation69_spill] sm:$0xff] }
 0x63c   : > { %v7794_v56 = vpop.eup %7793  ;;  %v5905_v41 = vmax.f32 %v5799_v27, 1e-24  ;;  %v6464_v61 = vadd.f32 %v6463_v30, %v13391_v7  ;;  %v13550_v7 = vmax.f32 %v13311_v40, 0.0  ;;  %v13561_v40 = vmax.f32 %v13318_v43, 0.0 }
 0x63d   : > { %v7057_v1 = vpack.c.bf16 %v13520_v34, %v13517_v46  ;;  %v6030_v23 = vmul.f32 %v7794_v56, %v15112_v60 }
 0x63e   : > { %5866 = vadd.xlane.f32.xlu0 %v5747_v19  ;;  %7799 = vrsqrt.f32 %v5905_v41  ;;  %v6465_v37 = vadd.f32 %v6464_v61, %v13409_v58  ;;  %v15114_v41 = vld [vmem:[#allocation74_spill] sm:$0xff]  ;;  %v5751_v43 = vmul.f32 %v13561_v40, %v13561_v40 }
 0x63f   : > { %7181 = vst [vmem:[%s13357_s11 + $0x40] sm:$0xff] %v7057_v1   ;;  %v5801_v2 = vpop.xlane.xlu1 %5800  ;;  %v13542_v56 = vmul.f32 %v15114_v41, %v6030_v23  ;;  %v15116_v23 = vld [vmem:[#allocation121_spill] sm:$0xff] }
 0x640   : > { %v7796_v57 = vpop.eup %7795  ;;  %v5906_v63 = vmax.f32 %v5801_v2, 1e-24  ;;  %v6466_v30 = vadd.f32 %v6465_v37, %v13412_v15  ;;  %v15118_v37 = vld [vmem:[#allocation68_spill] sm:$0xff] }
 0x641   : > { %v6031_v22 = vmul.f32 %v7796_v57, %v15113_v54  ;;  %v15117_v54 = vld [vmem:[#allocation122_spill] sm:$0xff] }
 0x642   : > { %5868 = vadd.xlane.f32.xlu0 %v5748_v44  ;;  %7801 = vrsqrt.f32 %v5906_v63  ;;  %v6467_v60 = vadd.f32 %v6466_v30, %v13430_v50  ;;  %v5750_v63 = vmul.f32 %v13550_v7, %v13550_v7 }
 0x643   : > { %v13545_v27 = vmul.f32 %v15115_v13, %v6031_v22  ;;  %v5803_v19 = vpop.xlane.xlu1 %5802  ;;  %v15119_v13 = vld [vmem:[#allocation61_spill] sm:$0xff] }
 0x644   : > { %v7798_v20 = vpop.eup %7797  ;;  %v5907_v1 = vmax.f32 %v5803_v19, 1e-24  ;;  %v6468_v15 = vadd.f32 %v6467_v60, %v13433_v31  ;;  %v13573_v31 = vmax.f32 %v13321_v51, 0.0  ;;  %v13583_v51 = vmax.f32 %v13324_v14, 0.0 }
 0x645   : > { %v7062_v58 = vpack.c.bf16 %v13545_v27, %v13542_v56  ;;  %v6032_v2 = vmul.f32 %v7798_v20, %v15116_v23 }
 0x646   : > { %5870 = vadd.xlane.f32.xlu0 %v5749_v53  ;;  %7803 = vrsqrt.f32 %v5907_v1  ;;  %v6469_v50 = vadd.f32 %v6468_v15, %v13451_v32  ;;  %v15121_v15 = vld [vmem:[#allocation81_spill] sm:$0xff] }
 0x647   : > { %7182 = vst [vmem:[%s13357_s11 + $0x48] sm:$0xff] %v7062_v58   ;;  %v5805_v57 = vpop.xlane.xlu1 %5804  ;;  %v6096_v41 = vmul.f32 %v15118_v37, %v6032_v2  ;;  %v5753_v37 = vmul.f32 %v13583_v51, %v13583_v51 }
 0x648   : > { %v7800_v44 = vpop.eup %7799  ;;  %v5908_v61 = vmax.f32 %v5805_v57, 1e-24  ;;  %v6470_v30 = vadd.f32 %v6469_v50, %v13454_v38  ;;  %v5752_v57 = vmul.f32 %v13573_v31, %v13573_v31 }
 0x649   : > { %v6033_v22 = vmul.f32 %v7800_v44, %v15117_v54 }
 0x64a   : > { %5872 = vadd.xlane.f32.xlu0 %v5750_v63  ;;  %7805 = vrsqrt.f32 %v5908_v61  ;;  %v6471_v32 = vadd.f32 %v6470_v30, %v13472_v16  ;;  %v15120_v61 = vld [vmem:[#allocation86_spill] sm:$0xff] }
 0x64b   : > { %v13568_v19 = vmul.f32 %v15119_v13, %v6033_v22  ;;  %v5807_v20 = vpop.xlane.xlu1 %5806  ;;  %v13593_v13 = vmax.f32 %v13327_v11, 0.0 }
 0x64c   : > { %v7802_v53 = vpop.eup %7801  ;;  %v5909_v1 = vmax.f32 %v5807_v20, 1e-24  ;;  %v6472_v38 = vadd.f32 %v6471_v32, %v13475_v3  ;;  %v15122_v32 = vld [vmem:[#allocation80_spill] sm:$0xff] }
 0x64d   : > { %v7067_v58 = vpack.c.bf16 %v13568_v19, %v6096_v41  ;;  %v6034_v60 = vmul.f32 %v7802_v53, %v13137_v26 }
 0x64e   : > { %5874 = vadd.xlane.f32.xlu0 %v5751_v43  ;;  %7807 = vrsqrt.f32 %v5909_v1  ;;  %v6473_v16 = vadd.f32 %v6472_v38, %v13493_v42  ;;  %v5754_v1 = vmul.f32 %v13593_v13, %v13593_v13 }
 0x64f   : > { %7183 = vst [vmem:[%s13357_s11 + $0x50] sm:$0xff] %v7067_v58   ;;  %v5809_v23 = vpop.xlane.xlu1 %5808  ;;  %v6098_v26 = vmul.f32 %v15120_v61, %v6034_v60  ;;  %v13602_v58 = vmax.f32 %v13210_v62, 0.0  ;;  %v15123_v60 = vld [vmem:[#allocation73_spill] sm:$0xff] }
 0x650   : > { %v7804_v2 = vpop.eup %7803  ;;  %v5910_v44 = vmax.f32 %v5809_v23, 1e-24 }
 0x651   : > { %v6035_v63 = vmul.f32 %v7804_v2, %v13143_v0  ;;  %v6474_v0 = vadd.f32 %v6473_v16, %v13496_v8 }
 0x652   : > { %5876 = vadd.xlane.f32.xlu0 %v5752_v57  ;;  %7809 = vrsqrt.f32 %v5910_v44  ;;  %v5755_v44 = vmul.f32 %v13602_v58, %v13602_v58 }
 0x653   : > { %v6099_v54 = vmul.f32 %v15121_v15, %v6035_v63  ;;  %v5811_v22 = vpop.xlane.xlu1 %5810  ;;  %v6475_v42 = vadd.f32 %v6474_v0, %v13517_v46 }
 0x654   : > { %v7806_v50 = vpop.eup %7805  ;;  %v5911_v14 = vmax.f32 %v5811_v22, 1e-24 }
 0x655   : > { %v7072_v3 = vpack.c.bf16 %v6099_v54, %v6098_v26  ;;  %v6036_v20 = vmul.f32 %v7806_v50, %v13148_v4  ;;  %v6476_v11 = vadd.f32 %v6475_v42, %v13520_v34 }
 0x656   : > { %5878 = vadd.xlane.f32.xlu0 %v5753_v37  ;;  %7811 = vrsqrt.f32 %v5911_v14  ;;  %v15124_v37 = vld [vmem:[#allocation97_spill] sm:$0xff] }
 0x657   : > { %7184 = vst [vmem:[%s13357_s11 + $0x58] sm:$0xff] %v7072_v3   ;;  %v5813_v53 = vpop.xlane.xlu1 %5812  ;;  %v6477_v46 = vadd.f32 %v6476_v11, %v13542_v56  ;;  %v6100_v4 = vmul.f32 %v15122_v32, %v6036_v20 }
 0x658   : > { %v7808_v43 = vpop.eup %7807  ;;  %v5912_v30 = vmax.f32 %v5813_v53, 1e-24 }
 0x659   : > { %v6037_v8 = vmul.f32 %v7808_v43, %v13153_v47  ;;  %v6478_v38 = vadd.f32 %v6477_v46, %v13545_v27  ;;  %v15125_v27 = vld [vmem:[#allocation93_spill] sm:$0xff] }
 0x65a   : > { %5880 = vadd.xlane.f32.xlu0 %v5754_v1  ;;  %7813 = vrsqrt.f32 %v5912_v30  ;;  %v15126_v30 = vld [vmem:[#allocation92_spill] sm:$0xff] }
 0x65b   : > { %v6101_v23 = vmul.f32 %v15123_v60, %v6037_v8  ;;  %v5815_v2 = vpop.xlane.xlu1 %5814  ;;  %v6479_v47 = vadd.f32 %v6478_v38, %v6096_v41  ;;  %v15127_v8 = vld [vmem:[#allocation85_spill] sm:$0xff] }
 0x65c   : > { %v7810_v57 = vpop.eup %7809  ;;  %v5913_v62 = vmax.f32 %v5815_v2, 1e-24 }
 0x65d   : > { %v7077_v34 = vpack.c.bf16 %v6101_v23, %v6100_v4  ;;  %v6038_v63 = vmul.f32 %v7810_v57, %v13159_v36  ;;  %v6480_v15 = vadd.f32 %v6479_v47, %v13568_v19  ;;  %v15129_v47 = vld [vmem:[#allocation98_spill] sm:$0xff] }
 0x65e   : > { %5882 = vadd.xlane.f32.xlu0 %v5755_v44  ;;  %7815 = vrsqrt.f32 %v5913_v62 }
 0x65f   : > { %7185 = vst [vmem:[%s13357_s11 + $0x60] sm:$0xff] %v7077_v34   ;;  %v5817_v56 = vpop.xlane.xlu1 %5816  ;;  %v6481_v50 = vadd.f32 %v6480_v15, %v6098_v26  ;;  %v6102_v14 = vmul.f32 %v15124_v37, %v6038_v63 }
 0x660   : > { %v7812_v16 = vpop.eup %7811  ;;  %v5914_v61 = vmax.f32 %v5817_v56, 1e-24 }
 0x661   : > { %v6039_v22 = vmul.f32 %v7812_v16, %v13165_v21  ;;  %v6482_v20 = vadd.f32 %v6481_v50, %v6099_v54 }
 0x662   : > { %7817 = vrsqrt.f32 %v5914_v61 }
 0x663   : > { %v6103_v0 = vmul.f32 %v15125_v27, %v6039_v22  ;;  %v5819_v3 = vpop.xlane.xlu1 %5818  ;;  %v6483_v36 = vadd.f32 %v6482_v20, %v6100_v4  ;;  %v15128_v4 = vld [vmem:[#allocation105_spill] sm:$0xff] }
 0x664   : > { %v7814_v42 = vpop.eup %7813  ;;  %v5915_v41 = vmax.f32 %v5819_v3, 1e-24 }
 0x665   : > { %v7082_v53 = vpack.c.bf16 %v6103_v0, %v6102_v14  ;;  %v6040_v43 = vmul.f32 %v7814_v42, %v13170_v24  ;;  %v6484_v1 = vadd.f32 %v6483_v36, %v6101_v23 }
 0x666   : > { %7819 = vrsqrt.f32 %v5915_v41 }
 0x667   : > { %7186 = vst [vmem:[%s13357_s11 + $0x68] sm:$0xff] %v7082_v53   ;;  %v6485_v26 = vadd.f32 %v6484_v1, %v6102_v14  ;;  %v6104_v11 = vmul.f32 %v15126_v30, %v6040_v43  ;;  %v15130_v1 = vld [vmem:[#allocation22_spill] sm:$0xff] }
 0x668   : > { %v7816_v19 = vpop.eup %7815 }
 0x669   : > { %v6041_v21 = vmul.f32 %v7816_v19, %v13175_v59  ;;  %v6486_v60 = vadd.f32 %v6485_v26, %v6103_v0  ;;  %v15131_v26 = vld [vmem:[#allocation21_spill] sm:$0xff] }
 0x66b   : > { %v6105_v46 = vmul.f32 %v15127_v8, %v6041_v21  ;;  %v6487_v57 = vadd.f32 %v6486_v60, %v6104_v11  ;;  %v15132_v8 = vld [vmem:[#allocation33_spill] sm:$0xff] }
 0x66c   : > { %v7818_v32 = vpop.eup %7817 }
 0x66d   : > { %v7087_v2 = vpack.c.bf16 %v6105_v46, %v6104_v11  ;;  %v6042_v54 = vmul.f32 %v7818_v32, %v13180_v25  ;;  %v6488_v38 = vadd.f32 %v6487_v57, %v6105_v46 }
 0x66f   : > { %7187 = vst [vmem:[%s13357_s11 + $0x70] sm:$0xff] %v7087_v2   ;;  %v6106_v44 = vmul.f32 %v15128_v4, %v6042_v54  ;;  %v5821_v24 = vpop.xlane.xlu0 %5820 }
 0x670   : > { %v7820_v62 = vpop.eup %7819  ;;  %v5916_v23 = vmax.f32 %v5821_v24, 1e-24 }
 0x671   : > { %v6043_v59 = vmul.f32 %v7820_v62, %v13183_v39  ;;  %v6489_v34 = vadd.f32 %v6488_v38, %v6106_v44  ;;  %v15134_v62 = vld [vmem:[#allocation25_spill] sm:$0xff] }
 0x672   : > { %7821 = vrsqrt.f32 %v5916_v23 }
 0x673   : > { %v6107_v63 = vmul.f32 %v15129_v47, %v6043_v59  ;;  %v5823_v56 = vpop.xlane.xlu0 %5822 }
 0x674   : > { %v5917_v16 = vmax.f32 %v5823_v56, 1e-24 }
 0x675   : > { %v7092_v61 = vpack.c.bf16 %v6107_v63, %v6106_v44  ;;  %v6490_v15 = vadd.f32 %v6489_v34, %v6107_v63  ;;  %v15133_v44 = vld [vmem:[#allocation28_spill] sm:$0xff] }
 0x676   : > { %7823 = vrsqrt.f32 %v5917_v16 }
 0x677   : > { %7188 = vst [vmem:[%s13357_s11 + $0x78] sm:$0xff] %v7092_v61   ;;  %v6491_v25 = vrot.slane %v6490_v15, 4  ;;  %v5825_v22 = vpop.xlane.xlu0 %5824  ;;  %v15135_v61 = vld [vmem:[#allocation36_spill] sm:$0xff] }
 0x678   : > { %v5918_v50 = vmax.f32 %v5825_v22, 1e-24 }
 0x679   : > { %v6492_v37 = vadd.f32 %v6491_v25, %v6490_v15  ;;  %v15136_v25 = vld [vmem:[#allocation35_spill] sm:$0xff] }
 0x67a   : > { %7825 = vrsqrt.f32 %v5918_v50 }
 0x67b   : > { %v6493_v14 = vrot.slane %v6492_v37, 2  ;;  %v5827_v27 = vpop.xlane.xlu0 %5826 }
 0x67c   : > { %v7822_v0 = vpop.eup %7821  ;;  %v5919_v39 = vmax.f32 %v5827_v27, 1e-24 }
 0x67d   : > { %v6494_v3 = vadd.f32 %v6493_v14, %v6492_v37  ;;  %v6044_v41 = vmul.f32 %v7822_v0, %v13235_v28 }
 0x67e   : > { %7827 = vrsqrt.f32 %v5919_v39 }
 0x67f   : > { %v6495_v42 = vrot.slane %v6494_v3, 1  ;;  %v5829_v20 = vpop.xlane.xlu0 %5828  ;;  %v13633_v21 = vmul.f32 %v15130_v1, %v6044_v41 }
 0x680   : > { %v7824_v53 = vpop.eup %7823  ;;  %v5920_v36 = vmax.f32 %v5829_v20, 1e-24  ;;  %v15138_v20 = vld [vmem:[#allocation41_spill] sm:$0xff] }
 0x681   : > { %v6496_v43 = vadd.f32 %v6495_v42, %v6494_v3  ;;  %v6045_v19 = vmul.f32 %v7824_v53, %v13242_v29  ;;  %v15137_v42 = vld [vmem:[#allocation42_spill] sm:$0xff] }
 0x682   : > { %7829 = vrsqrt.f32 %v5920_v36 }
 0x683   : > { %v13636_v30 = vmul.f32 %v15131_v26, %v6045_v19  ;;  %v5831_v11 = vpop.xlane.xlu0 %5830  ;;  %v6534_v46 = vmul.f32 %v6496_v43, %v15132_v8 }
 0x684   : > { %v7826_v32 = vpop.eup %7825  ;;  %v5921_v28 = vmax.f32 %v5831_v11, 1e-24 }
 0x685   : > { %v7097_v60 = vpack.c.bf16 %v13636_v30, %v13633_v21  ;;  %6536 = vst [vmem:[%s13641_s27] sm:$0x1] %v6534_v46  ;;  %v6046_v29 = vmul.f32 %v7826_v32, %v13244_v33  ;;  %v15139_v46 = vld [vmem:[#allocation48_spill] sm:$0xff] }
 0x686   : > { %7831 = vrsqrt.f32 %v5921_v28  ;;  %v15140_v28 = vld [vmem:[#allocation47_spill] sm:$0xff] }
 0x687   : > { %7189 = vst [vmem:[%s13357_s11 + $0x80] sm:$0xff] %v7097_v60   ;;  %v5833_v2 = vpop.xlane.xlu0 %5832  ;;  %v13648_v24 = vmul.f32 %v15133_v44, %v6046_v29 }
 0x688   : > { %v7828_v54 = vpop.eup %7827  ;;  %v5922_v57 = vmax.f32 %v5833_v2, 1e-24 }
 0x689   : > { %v6047_v4 = vmul.f32 %v7828_v54, %v13274_v55 }
 0x68a   : > { %7833 = vrsqrt.f32 %v5922_v57 }
 0x68b   : > { %v13651_v23 = vmul.f32 %v15134_v62, %v6047_v4  ;;  %v5835_v38 = vpop.xlane.xlu0 %5834 }
 0x68c   : > { %v7830_v59 = vpop.eup %7829  ;;  %v5923_v34 = vmax.f32 %v5835_v38, 1e-24  ;;  %v15141_v38 = vld [vmem:[#allocation54_spill] sm:$0xff] }
 0x68d   : > { %v7102_v47 = vpack.c.bf16 %v13651_v23, %v13648_v24  ;;  %v6048_v33 = vmul.f32 %v7830_v59, %v13302_v45 }
 0x68e   : > { %7835 = vrsqrt.f32 %v5923_v34  ;;  %v15142_v34 = vld [vmem:[#allocation53_spill] sm:$0xff] }
 0x68f   : > { %7190 = vst [vmem:[%s13357_s11 + $0x88] sm:$0xff] %v7102_v47   ;;  %v5837_v63 = vpop.xlane.xlu0 %5836  ;;  %v13659_v15 = vmul.f32 %v15135_v61, %v6048_v33 }
 0x690   : > { %v7832_v55 = vpop.eup %7831  ;;  %v5924_v56 = vmax.f32 %v5837_v63, 1e-24 }
 0x691   : > { %v6049_v16 = vmul.f32 %v7832_v55, %v13315_v35 }
 0x692   : > { %7837 = vrsqrt.f32 %v5924_v56 }
 0x693   : > { %v13662_v22 = vmul.f32 %v15136_v25, %v6049_v16  ;;  %v5839_v50 = vpop.xlane.xlu0 %5838  ;;  %v15143_v25 = vld [vmem:[#allocation123_spill] sm:$0xff] }
 0x694   : > { %v7834_v37 = vpop.eup %7833  ;;  %v5925_v14 = vmax.f32 %v5839_v50, 1e-24 }
 0x695   : > { %v7107_v27 = vpack.c.bf16 %v13662_v22, %v13659_v15  ;;  %v6050_v45 = vmul.f32 %v7834_v37, %v13331_v5  ;;  %v15144_v37 = vld [vmem:[#allocation60_spill] sm:$0xff] }
 0x696   : > { %7839 = vrsqrt.f32 %v5925_v14 }
 0x697   : > { %7191 = vst [vmem:[%s13357_s11 + $0x90] sm:$0xff] %v7107_v27   ;;  %v5841_v0 = vpop.xlane.xlu0 %5840  ;;  %v13670_v41 = vmul.f32 %v15137_v42, %v6050_v45  ;;  %v15145_v27 = vld [vmem:[#allocation59_spill] sm:$0xff] }
 0x698   : > { %v7836_v35 = vpop.eup %7835  ;;  %v5926_v39 = vmax.f32 %v5841_v0, 1e-24 }
 0x699   : > { %v6051_v3 = vmul.f32 %v7836_v35, %v13338_v9 }
 0x69a   : > { %7841 = vrsqrt.f32 %v5926_v39 }
 0x69b   : > { %v13673_v53 = vmul.f32 %v15138_v20, %v6051_v3  ;;  %v5843_v36 = vpop.xlane.xlu0 %5842 }
 0x69c   : > { %v7838_v43 = vpop.eup %7837  ;;  %v5927_v19 = vmax.f32 %v5843_v36, 1e-24 }
 0x69d   : > { %v7112_v1 = vpack.c.bf16 %v13673_v53, %v13670_v41  ;;  %v6052_v5 = vmul.f32 %v7838_v43, %v13352_v18 }
 0x69e   : > { %7843 = vrsqrt.f32 %v5927_v19  ;;  %v15147_v19 = vld [vmem:[#allocation127_spill] sm:$0xff] }
 0x69f   : > { %7192 = vst [vmem:[%s13357_s11 + $0x98] sm:$0xff] %v7112_v1   ;;  %v5845_v26 = vpop.xlane.xlu0 %5844  ;;  %v13681_v32 = vmul.f32 %v15139_v46, %v6052_v5  ;;  %v15148_v5 = vld [vmem:[#allocation67_spill] sm:$0xff] }
 0x6a0   : > { %v7840_v9 = vpop.eup %7839  ;;  %v5928_v11 = vmax.f32 %v5845_v26, 1e-24 }
 0x6a1   : > { %v6053_v8 = vmul.f32 %v7840_v9, %v13363_v48  ;;  %v15149_v9 = vld [vmem:[#allocation66_spill] sm:$0xff] }
 0x6a2   : > { %7845 = vrsqrt.f32 %v5928_v11 }
 0x6a3   : > { %v13684_v60 = vmul.f32 %v15140_v28, %v6053_v8  ;;  %v5847_v29 = vpop.xlane.xlu0 %5846 }
 0x6a4   : > { %v7842_v2 = vpop.eup %7841  ;;  %v5929_v54 = vmax.f32 %v5847_v29, 1e-24 }
 0x6a5   : > { %v7117_v57 = vpack.c.bf16 %v13684_v60, %v13681_v32  ;;  %v6054_v18 = vmul.f32 %v7842_v2, %v13375_v10  ;;  %v15150_v2 = vld [vmem:[#allocation131_spill] sm:$0xff] }
 0x6a6   : > { %7847 = vrsqrt.f32 %v5929_v54 }
 0x6a7   : > { %7193 = vst [vmem:[%s13357_s11 + $0xa0] sm:$0xff] %v7117_v57   ;;  %v5849_v4 = vpop.xlane.xlu0 %5848  ;;  %v13692_v59 = vmul.f32 %v15141_v38, %v6054_v18 }
 0x6a8   : > { %v7844_v48 = vpop.eup %7843  ;;  %v5930_v44 = vmax.f32 %v5849_v4, 1e-24 }
 0x6a9   : > { %v6055_v62 = vmul.f32 %v7844_v48, %v13384_v17  ;;  %v6497_v48 = vadd.f32 %v13636_v30, %v13633_v21  ;;  %v15154_v30 = vld [vmem:[#allocation133_spill] sm:$0xff] }
 0x6aa   : > { %7849 = vrsqrt.f32 %v5930_v44  ;;  %v15151_v44 = vld [vmem:[#allocation132_spill] sm:$0xff] }
 0x6ab   : > { %v13695_v47 = vmul.f32 %v15142_v34, %v6055_v62  ;;  %v5851_v33 = vpop.xlane.xlu0 %5850  ;;  %v6498_v38 = vadd.f32 %v6497_v48, %v13648_v24  ;;  %v15152_v34 = vld [vmem:[#allocation72_spill] sm:$0xff] }
 0x6ac   : > { %v7846_v63 = vpop.eup %7845  ;;  %v5931_v55 = vmax.f32 %v5851_v33, 1e-24 }
 0x6ad   : > { %v7122_v56 = vpack.c.bf16 %v13695_v47, %v13692_v59  ;;  %v6056_v10 = vmul.f32 %v7846_v63, %v13396_v52  ;;  %v15146_v52 = vld [vmem:[#allocation125_spill] sm:$0xff]  ;;  %v15153_v63 = vld [vmem:[#allocation71_spill] sm:$0xff] }
 0x6ae   : > { %7851 = vrsqrt.f32 %v5931_v55 }
 0x6af   : > { %7194 = vst [vmem:[%s13357_s11 + $0xa8] sm:$0xff] %v7122_v56   ;;  %v5853_v16 = vpop.xlane.xlu0 %5852  ;;  %v13703_v14 = vmul.f32 %v15144_v37, %v6056_v10 }
 0x6b0   : > { %v7848_v17 = vpop.eup %7847  ;;  %v5932_v61 = vmax.f32 %v5853_v16, 1e-24 }
 0x6b1   : > { %v6057_v50 = vmul.f32 %v7848_v17, %v15143_v25  ;;  %v6499_v17 = vadd.f32 %v6498_v38, %v13651_v23  ;;  %v15156_v23 = vld [vmem:[#allocation79_spill] sm:$0xff] }
 0x6b2   : > { %7853 = vrsqrt.f32 %v5932_v61 }
 0x6b3   : > { %v13706_v45 = vmul.f32 %v15145_v27, %v6057_v50  ;;  %v5855_v0 = vpop.xlane.xlu0 %5854  ;;  %v6500_v21 = vadd.f32 %v6499_v17, %v13659_v15 }
 0x6b4   : > { %v7850_v35 = vpop.eup %7849  ;;  %v5933_v39 = vmax.f32 %v5855_v0, 1e-24  ;;  %v15155_v0 = vld [vmem:[#allocation134_spill] sm:$0xff] }
 0x6b5   : > { %v7127_v3 = vpack.c.bf16 %v13706_v45, %v13703_v14  ;;  %v6058_v42 = vmul.f32 %v7850_v35, %v15146_v52  ;;  %v6501_v27 = vadd.f32 %v6500_v21, %v13662_v22  ;;  %v15157_v52 = vld [vmem:[#allocation78_spill] sm:$0xff]  ;;  %v15158_v22 = vld [vmem:[#allocation136_spill] sm:$0xff] }
 0x6b6   : > { %7855 = vrsqrt.f32 %v5933_v39  ;;  %v15164_v21 = vld [vmem:[#allocation90_spill] sm:$0xff] }
 0x6b7   : > { %7195 = vst [vmem:[%s13357_s11 + $0xb0] sm:$0xff] %v7127_v3   ;;  %v5857_v20 = vpop.xlane.xlu0 %5856  ;;  %v13714_v26 = vmul.f32 %v15148_v5, %v6058_v42  ;;  %v6502_v39 = vadd.f32 %v6501_v27, %v13670_v41 }
 0x6b8   : > { %v7852_v36 = vpop.eup %7851  ;;  %v5934_v43 = vmax.f32 %v5857_v20, 1e-24 }
 0x6b9   : > { %v6059_v1 = vmul.f32 %v7852_v36, %v15147_v19 }
 0x6ba   : > { %7857 = vrsqrt.f32 %v5934_v43  ;;  %v6503_v43 = vadd.f32 %v6502_v39, %v13673_v53 }
 0x6bb   : > { %v13717_v11 = vmul.f32 %v15149_v9, %v6059_v1  ;;  %v5859_v8 = vpop.xlane.xlu0 %5858 }
 0x6bc   : > { %v7854_v46 = vpop.eup %7853  ;;  %v5935_v28 = vmax.f32 %v5859_v8, 1e-24  ;;  %v6504_v1 = vadd.f32 %v6503_v43, %v13681_v32 }
 0x6bd   : > { %v7132_v29 = vpack.c.bf16 %v13717_v11, %v13714_v26  ;;  %v6060_v54 = vmul.f32 %v7854_v46, %v15150_v2 }
 0x6be   : > { %7859 = vrsqrt.f32 %v5935_v28  ;;  %v6505_v46 = vadd.f32 %v6504_v1, %v13684_v60  ;;  %v15159_v28 = vld [vmem:[#allocation137_spill] sm:$0xff]  ;;  %v15162_v60 = vld [vmem:[#allocation135_spill] sm:$0xff] }
 0x6bf   : > { %7196 = vst [vmem:[%s13357_s11 + $0xb8] sm:$0xff] %v7132_v29   ;;  %v5861_v57 = vpop.xlane.xlu0 %5860  ;;  %v6124_v33 = vmul.f32 %v15152_v34, %v6060_v54  ;;  %v15160_v54 = vld [vmem:[#allocation84_spill] sm:$0xff] }
 0x6c0   : > { %v7856_v18 = vpop.eup %7855  ;;  %v5936_v4 = vmax.f32 %v5861_v57, 1e-24  ;;  %v6506_v2 = vadd.f32 %v6505_v46, %v13692_v59  ;;  %v15161_v57 = vld [vmem:[#allocation83_spill] sm:$0xff] }
 0x6c1   : > { %v6061_v62 = vmul.f32 %v7856_v18, %v15151_v44 }
 0x6c2   : > { %7861 = vrsqrt.f32 %v5936_v4  ;;  %v6507_v44 = vadd.f32 %v6506_v2, %v13695_v47 }
 0x6c3   : > { %v13729_v55 = vmul.f32 %v15153_v63, %v6061_v62  ;;  %v5863_v56 = vpop.xlane.xlu0 %5862 }
 0x6c4   : > { %v7858_v10 = vpop.eup %7857  ;;  %v5937_v16 = vmax.f32 %v5863_v56, 1e-24  ;;  %v6508_v38 = vadd.f32 %v6507_v44, %v13703_v14  ;;  %v15169_v44 = vld [vmem:[#allocation108_spill] sm:$0xff] }
 0x6c5   : > { %v7137_v61 = vpack.c.bf16 %v13729_v55, %v6124_v33  ;;  %v6062_v25 = vmul.f32 %v7858_v10, %v15154_v30 }
 0x6c6   : > { %7863 = vrsqrt.f32 %v5937_v16  ;;  %v6509_v10 = vadd.f32 %v6508_v38, %v13706_v45  ;;  %v15170_v38 = vld [vmem:[#allocation106_spill] sm:$0xff] }
 0x6c7   : > { %7197 = vst [vmem:[%s13357_s11 + $0xc0] sm:$0xff] %v7137_v61   ;;  %v5865_v50 = vpop.xlane.xlu0 %5864  ;;  %v6126_v3 = vmul.f32 %v15156_v23, %v6062_v25  ;;  %v15163_v61 = vld [vmem:[#allocation91_spill] sm:$0xff] }
 0x6c8   : > { %v7860_v24 = vpop.eup %7859  ;;  %v5938_v37 = vmax.f32 %v5865_v50, 1e-24  ;;  %v6510_v17 = vadd.f32 %v6509_v10, %v13714_v26 }
 0x6c9   : > { %v6063_v35 = vmul.f32 %v7860_v24, %v15155_v0 }
 0x6ca   : > { %7865 = vrsqrt.f32 %v5938_v37  ;;  %v6511_v24 = vadd.f32 %v6510_v17, %v13717_v11 }
 0x6cb   : > { %v6127_v42 = vmul.f32 %v15157_v52, %v6063_v35  ;;  %v5867_v20 = vpop.xlane.xlu0 %5866  ;;  %v15165_v52 = vld [vmem:[#allocation96_spill] sm:$0xff] }
 0x6cc   : > { %v7862_v15 = vpop.eup %7861  ;;  %v5939_v36 = vmax.f32 %v5867_v20, 1e-24  ;;  %v6512_v27 = vadd.f32 %v6511_v24, %v6124_v33 }
 0x6cd   : > { %v7142_v19 = vpack.c.bf16 %v6127_v42, %v6126_v3  ;;  %v6064_v5 = vmul.f32 %v7862_v15, %v15158_v22  ;;  %v15166_v15 = vld [vmem:[#allocation95_spill] sm:$0xff] }
 0x6ce   : > { %7867 = vrsqrt.f32 %v5939_v36  ;;  %v6513_v26 = vadd.f32 %v6512_v27, %v13729_v55 }
 0x6cf   : > { %7198 = vst [vmem:[%s13357_s11 + $0xc8] sm:$0xff] %v7142_v19   ;;  %v5869_v9 = vpop.xlane.xlu0 %5868  ;;  %v6128_v53 = vmul.f32 %v15160_v54, %v6064_v5 }
 0x6d0   : > { %v7864_v8 = vpop.eup %7863  ;;  %v5940_v41 = vmax.f32 %v5869_v9, 1e-24  ;;  %v6514_v23 = vadd.f32 %v6513_v26, %v6126_v3 }
 0x6d1   : > { %v6065_v29 = vmul.f32 %v7864_v8, %v15159_v28  ;;  %v15168_v28 = vld [vmem:[#allocation103_spill] sm:$0xff] }
 0x6d2   : > { %7869 = vrsqrt.f32 %v5940_v41  ;;  %v6515_v19 = vadd.f32 %v6514_v23, %v6127_v42  ;;  %v15167_v41 = vld [vmem:[#allocation104_spill] sm:$0xff] }
 0x6d3   : > { %v6129_v18 = vmul.f32 %v15161_v57, %v6065_v29  ;;  %v5871_v4 = vpop.xlane.xlu0 %5870 }
 0x6d4   : > { %v7866_v32 = vpop.eup %7865  ;;  %v5941_v48 = vmax.f32 %v5871_v4, 1e-24 }
 0x6d5   : > { %v7147_v62 = vpack.c.bf16 %v6129_v18, %v6128_v53  ;;  %v6066_v34 = vmul.f32 %v7866_v32, %v15162_v60 }
 0x6d6   : > { %7871 = vrsqrt.f32 %v5941_v48 }
 0x6d7   : > { %7199 = vst [vmem:[%s13357_s11 + $0xd0] sm:$0xff] %v7147_v62   ;;  %v5873_v63 = vpop.xlane.xlu0 %5872  ;;  %v6130_v47 = vmul.f32 %v15163_v61, %v6066_v34 }
 0x6d8   : > { %v7868_v56 = vpop.eup %7867  ;;  %v5942_v59 = vmax.f32 %v5873_v63, 1e-24 }
 0x6d9   : > { %v6067_v16 = vmul.f32 %v7868_v56, %v13510_v12 }
 0x6da   : > { %7873 = vrsqrt.f32 %v5942_v59 }
 0x6db   : > { %v6131_v30 = vmul.f32 %v15164_v21, %v6067_v16  ;;  %v5875_v25 = vpop.xlane.xlu0 %5874  ;;  %v15172_v21 = vld [vmem:[#allocation109_spill] sm:$0xff] }
 0x6dc   : > { %v7870_v14 = vpop.eup %7869  ;;  %v5943_v50 = vmax.f32 %v5875_v25, 1e-24 }
 0x6dd   : > { %v7152_v37 = vpack.c.bf16 %v6131_v30, %v6130_v47  ;;  %v6068_v45 = vmul.f32 %v7870_v14, %v13525_v6  ;;  %v6516_v6 = vadd.f32 %v6515_v19, %v6128_v53 }
 0x6de   : > { %7875 = vrsqrt.f32 %v5943_v50 }
 0x6df   : > { %7200 = vst [vmem:[%s13357_s11 + $0xd8] sm:$0xff] %v7152_v37   ;;  %v5877_v0 = vpop.xlane.xlu0 %5876  ;;  %v6132_v20 = vmul.f32 %v15165_v52, %v6068_v45  ;;  %v6517_v9 = vadd.f32 %v6516_v6, %v6129_v18 }
 0x6e0   : > { %v7872_v12 = vpop.eup %7871  ;;  %v5944_v35 = vmax.f32 %v5877_v0, 1e-24 }
 0x6e1   : > { %v6069_v39 = vmul.f32 %v7872_v12, %v13536_v49  ;;  %v6518_v8 = vadd.f32 %v6517_v9, %v6130_v47 }
 0x6e2   : > { %7877 = vrsqrt.f32 %v5944_v35 }
 0x6e3   : > { %v6133_v11 = vmul.f32 %v15166_v15, %v6069_v39  ;;  %v5879_v36 = vpop.xlane.xlu0 %5878  ;;  %v6519_v53 = vadd.f32 %v6518_v8, %v6131_v30 }
 0x6e4   : > { %v7874_v43 = vpop.eup %7873  ;;  %v5945_v33 = vmax.f32 %v5879_v36, 1e-24 }
 0x6e5   : > { %v7157_v1 = vpack.c.bf16 %v6133_v11, %v6132_v20  ;;  %v6070_v22 = vmul.f32 %v7874_v43, %v13550_v7  ;;  %v6520_v7 = vadd.f32 %v6519_v53, %v6132_v20 }
 0x6e6   : > { %7879 = vrsqrt.f32 %v5945_v33 }
 0x6e7   : > { %7201 = vst [vmem:[%s13357_s11 + $0xe0] sm:$0xff] %v7157_v1   ;;  %v5881_v5 = vpop.xlane.xlu0 %5880  ;;  %v6134_v46 = vmul.f32 %v15167_v41, %v6070_v22 }
 0x6e8   : > { %v7876_v55 = vpop.eup %7875  ;;  %v5946_v49 = vmax.f32 %v5881_v5, 1e-24 }
 0x6e9   : > { %v6071_v3 = vmul.f32 %v7876_v55, %v13561_v40  ;;  %v6521_v40 = vadd.f32 %v6520_v7, %v6133_v11 }
 0x6ea   : > { %7881 = vrsqrt.f32 %v5946_v49 }
 0x6eb   : > { %v6135_v29 = vmul.f32 %v15168_v28, %v6071_v3  ;;  %v5883_v42 = vpop.xlane.xlu0 %5882  ;;  %v6522_v48 = vadd.f32 %v6521_v40, %v6134_v46 }
 0x6ec   : > { %v7878_v2 = vpop.eup %7877  ;;  %v5947_v54 = vmax.f32 %v5883_v42, 1e-24 }
 0x6ed   : > { %v7162_v57 = vpack.c.bf16 %v6135_v29, %v6134_v46  ;;  %v6072_v4 = vmul.f32 %v7878_v2, %v13573_v31  ;;  %v6523_v63 = vadd.f32 %v6522_v48, %v6135_v29  ;;  %v15171_v31 = vld [vmem:[#allocation111_spill] sm:$0xff] }
 0x6ee   : > { %7883 = vrsqrt.f32 %v5947_v54 }
 0x6ef   : > { %7202 = vst [vmem:[%s13357_s11 + $0xe8] sm:$0xff] %v7162_v57   ;;  %v6136_v62 = vmul.f32 %v15169_v44, %v6072_v4 }
 0x6f0   : > { %v7880_v18 = vpop.eup %7879 }
 0x6f1   : > { %v6073_v32 = vmul.f32 %v7880_v18, %v13583_v51  ;;  %v6524_v10 = vadd.f32 %v6523_v63, %v6136_v62 }
 0x6f3   : > { %v6137_v60 = vmul.f32 %v15170_v38, %v6073_v32 }
 0x6f4   : > { %v7882_v34 = vpop.eup %7881 }
 0x6f5   : > { %v7167_v56 = vpack.c.bf16 %v6137_v60, %v6136_v62  ;;  %v6074_v59 = vmul.f32 %v7882_v34, %v13593_v13  ;;  %v6525_v61 = vadd.f32 %v6524_v10, %v6137_v60 }
 0x6f7   : > { %7203 = vst [vmem:[%s13357_s11 + $0xf0] sm:$0xff] %v7167_v56   ;;  %v6138_v16 = vmul.f32 %v15171_v31, %v6074_v59 }
 0x6f8   : > { %v7884_v17 = vpop.eup %7883 }
 0x6f9   : > { %v6075_v51 = vmul.f32 %v7884_v17, %v13602_v58  ;;  %v6526_v47 = vadd.f32 %v6525_v61, %v6138_v16 }
 0x6fb   : > { %v6139_v30 = vmul.f32 %v15172_v21, %v6075_v51 }
 0x6fd   : > { %v7172_v13 = vpack.c.bf16 %v6139_v30, %v6138_v16  ;;  %v6527_v25 = vadd.f32 %v6526_v47, %v6139_v30 }
 0x6ff   : > { %7204 = vst [vmem:[%s13357_s11 + $0xf8] sm:$0xff] %v7172_v13   ;;  %v6528_v14 = vrot.slane %v6527_v25, 4 }
 0x700   : > { %7927 = shalt.err (!%p7924_p7)
}
 0x701   : > { %s7928_s11 = scalar_lea.hbm %s13786_s29, 4096  ;;  %s7932_s25 = scalar_lea.hbm %s13876_s9, 8192 }
 0x702   : > { %p7929_p8 = scmp.ne.s32.totalorder %s13786_s29, %s7928_s11  ;;  %p7933_p1 = scmp.lt.u32.totalorder %s13786_s29, %s13876_s9 }
 0x703   : > { %p7934_p0 = scmp.lt.u32.totalorder %s7932_s25, %s7928_s11  ;;  %p7936_p6 = scmp.lt.u32.totalorder %s7928_s11, %s13786_s29 }
 0x704   : > { %p7930_p11 = pnand %p7929_p8, %p15173_p9 }
 0x705   : > { %p7935_p5 = por %p7934_p0, %p7933_p1 }
 0x706   : > { %p7931_p13 = pneg %p7930_p11 }
 0x707   : > { %p7937_p10 = por %p7936_p6, %p7935_p5 }
 0x709   : > { %p7938_p12 = pnand %p7937_p10, %p7931_p13 }
 0x70b   : > { %7941 = shalt.err (!%p7938_p12)
}
 0x70c   : > { %s8021_s18 = smov 64   ;;  %s8022_s28 = smov 4   ;;  %v6529_v58 = vadd.f32 %v6528_v14, %v6527_v25  ;;  %v15175_v45 = vld [vmem:[#allocation107_spill] sm:$0xff] }
 0x70d   : > { %s15174_s26 = scalar_lea.sflag [#allocation4], %s13334_s12  ;;  %s7013_s30 = sshll.u32 %s8102_s17, 5 }
 0x70e   : > { %7339 = dma.vmem_to_hbm [thread:$0]  (%p15173_p9), %s13788_s21, 4096, %s13786_s29, %s15174_s26, %s8021_s18, %s8021_s18, %s8022_s28   ;;  %v6530_v50 = vrot.slane %v6529_v58, 2 }
 0x70f   : > { %s6574_s11 = sshll.u32 %s13641_s27, 4  ;;  %s13820_s0 = scalar_lea.hbm %s13877_s10, %s7013_s30  ;;  %s13822_s11 = int_to_ptr.vmem [resolvable:$true] %s6574_s11 }
 0x710   : > { %v6531_v24 = vadd.f32 %v6530_v50, %v6529_v58  ;;  %s6544_s21 = scalar_lea.sflag [#allocation7], %s13334_s12  ;;  %s7942_s29 = scalar_lea.vmem %s13822_s11, 32 }
 0x711   : > { %p7943_p2 = scmp.ne.s32.totalorder %s13822_s11, %s7942_s29  ;;  %s8023_s17 = smov [#allocation6]  }
 0x712   : > { %v6532_v37 = vrot.slane %v6531_v24, 1  ;;  %s7946_s18 = sshll.u32 %s8023_s17, 4  ;;  %s7947_s18 = int_to_ptr.vmem [resolvable:$false] %s7946_s18 }
 0x713   : > { %p7944_p3 = pnand %p7943_p2, %p15173_p9  ;;  %s7948_s28 = scalar_lea.vmem %s7947_s18, 64 }
 0x714   : > { %v6533_v27 = vadd.f32 %v6532_v37, %v6531_v24  ;;  %p7949_p7 = scmp.lt.s32.totalorder %s13822_s11, %s7947_s18  ;;  %p7950_p8 = scmp.lt.s32.totalorder %s7948_s28, %s7942_s29 }
 0x715   : > { %p7945_p4 = pneg %p7944_p3 }
 0x716   : > { %v6535_v0 = vmul.f32 %v6533_v27, %v15175_v45  ;;  %p7951_p11 = por %p7950_p8, %p7949_p7 }
 0x718   : > { %6537 = vst [vmem:[%s13641_s27 + $0x1] sm:$0x1] %v6535_v0  ;;  %p7952_p13 = pnand %p7951_p11, %p7945_p4 }
 0x71a   : > { %7955 = shalt.err (!%p7952_p13)
}
 0x71b   : > { %s7956_s27 = scalar_lea.hbm %s13820_s0, 32  ;;  %s7960_s20 = scalar_lea.hbm %s13877_s10, 64 }
 0x71c   : > { %p7957_p1 = scmp.ne.s32.totalorder %s13820_s0, %s7956_s27  ;;  %p7961_p6 = scmp.lt.u32.totalorder %s13820_s0, %s13877_s10 }
 0x71d   : > { %p7962_p10 = scmp.lt.u32.totalorder %s7960_s20, %s7956_s27  ;;  %p7964_p2 = scmp.lt.u32.totalorder %s7956_s27, %s13820_s0 }
 0x71e   : > { %p7958_p0 = pnand %p7957_p1, %p15173_p9 }
 0x71f   : > { %p7963_p12 = por %p7962_p10, %p7961_p6 }
 0x720   : > { %p7959_p5 = pneg %p7958_p0 }
 0x721   : > { %p7965_p3 = por %p7964_p2, %p7963_p12 }
 0x723   : > { %p7966_p4 = pnand %p7965_p3, %p7959_p5 }
 0x725   : > { %7969 = shalt.err (!%p7966_p4)
}
 0x726   : > { %s8024_s29 = smov 16   ;;  %s8025_s18 = smov 1  }
 0x727   : > { %7340 = dma.vmem_to_hbm [thread:$0]  (%p15173_p9), %s13822_s11, 32, %s13820_s0, %s6544_s21, %s8024_s29, %s8024_s29, %s8025_s18  }
 0x728 PF: > { %p7356_p7 = scmp.ge.s32.totalorder %s8012_s16, 2  ;;  %s6589_s28 = sand.u32 1, %s8000_s13  }
 0x729   : > { %p15176_p8 = scmp.ne.s32.totalorder %s14280_s24, 0  ;;  %s6590_s27 = scalar_lea.sflag [#allocation4], %s6589_s28 }
 0x72b   : > { %p7348_p11 = pnand %p7356_p7, %p15176_p8 }
 0x72d   : > { %7991 = dma.done.wait (!%p7348_p11), %s6590_s27, 4096  }
 0x72e   : > { %7993 = vsyncadd (!%p7348_p11), %s6590_s27, 4294963200  ;;  %s6599_s26 = scalar_lea.sflag [#allocation7], %s6589_s28 }
 0x72f   : > { %7995 = dma.done.wait (!%p7348_p11), %s6599_s26, 32  }
 0x730   : > { %7997 = vsyncadd (!%p7348_p11), %s6599_s26, 4294967264  ;;  %p25_p9 = scmp.ge.s32.totalorder %s8106_s19, 4   ;;  %s15177_s13 = smov %s8004_s14 }
 0x731   : > { %s15178_s14 = smov %s8008_s15  ;;  %s15179_s15 = smov %s8117_s22 }
 0x732   : > { %s15180_s16 = smov %s8106_s19  ;;  %27 = sbr.rel (!%p25_p9) target bundleno = 8 (0x8), region = 113 }
 0x739   :  { %6604 = vsyncpa [#allocation3], 1 }
 0x73a   :  { %6606 = vsyncpa [#allocation3 + $0x1], 1 }
 0x73b   :  { %6607 = vsyncpa [#allocation4], 1 }
 0x73c   :  { %6609 = vsyncpa [#allocation4 + $0x1], 1 }
 0x73d   :  { %6610 = vsyncpa [#allocation7], 1 }
 0x73e   :  { %6612 = vsyncpa [#allocation7 + $0x1], 1 }

</bundles_post_ra>
